<compile_context>
chip_gen: v7x
topology: tpu7x:2x2x1
jax: 0.10.0
libtpu: 0.0.40
codegen_flags: <defaults>
</compile_context>

<pallas_src>
import jax
import jax.numpy as jnp
from jax import lax
from jax.experimental import pallas as pl
from jax.experimental.pallas import tpu as pltpu


# ------------------------------ Pallas kernel -------------------------------


def _fused_forward_kernel(xp_ref, g_ref, b1_ref, w2_ref, b2_ref,
                          fc1_ref, bf1_ref, fc2_ref, bf2_ref, fc3_ref, bf3_ref,
                          o_ref,
                          hp_ref, n_ref, p1_ref, mw_ref):
    f32 = jnp.float32

    # ---- conv1 (3x3, 1->10) fused with the H-direction 5-max-pool --------
    # xp_ref[0, s] holds input rows {s, s+5, s+10, ...}  -> shape (97, 37).
    # g_ref[i] is the banded weight matrix folding the kw taps: (37, 350),
    # columns ordered w*10 + co.  hp[p, w*10+co] = max_{d<5} conv1[co,5p+d,w].
    hp = None
    for d in range(5):
        a_d = jnp.dot(xp_ref[0, d], g_ref[0], preferred_element_type=f32)
        for i in range(1, 3):
            a_d = a_d + jnp.dot(xp_ref[0, d + i], g_ref[i],
                                preferred_element_type=f32)
        hp = a_d if hp is None else jnp.maximum(hp, a_d)
    hp_ref[...] = hp                                           # (97, 350)

    # ---- W-direction 5-max-pool, conv1 bias + ReLU ------------------------
    # Running max over lane offsets {0,10,...,40}, then contiguous 10-wide
    # blocks per pooled-w position.  p1[h, 10*pw + ci] = pool1[ci, h, pw].
    n = hp_ref[:, 0:310]
    for e in range(1, 5):
        n = jnp.maximum(n, hp_ref[:, 10 * e:10 * e + 310])
    n_ref[...] = n                                             # (97, 310)
    for pw in range(7):
        p1_ref[:, 10 * pw:10 * pw + 10] = jnp.maximum(
            n_ref[:, 50 * pw:50 * pw + 10] + b1_ref[...], 0.0)  # (97, 70)

    # ---- conv2 (3x3, 10->30) + max over the 5 output-w columns -----------
    # w2_ref[i] folds (kw, cin) into K=30: (30, 30).
    mw = None
    for w in range(5):
        accw = jnp.dot(p1_ref[0:95, 10 * w:10 * w + 30], w2_ref[0],
                       preferred_element_type=f32)
        for i in range(1, 3):
            accw = accw + jnp.dot(p1_ref[i:i + 95, 10 * w:10 * w + 30],
                                  w2_ref[i], preferred_element_type=f32)
        mw = accw if mw is None else jnp.maximum(mw, accw)
    mw_ref[...] = mw                                           # (95, 30)

    # ---- pool2 over H (19 groups of 5) + conv2 bias + ReLU, fused with fc1
    h1 = bf1_ref[...]                                          # (1, 50)
    for p in range(19):
        row = jnp.max(mw_ref[5 * p:5 * p + 5, :], axis=0, keepdims=True)
        row = jnp.maximum(row + b2_ref[...], 0.0)              # (1, 30)
        h1 = h1 + jnp.dot(row, fc1_ref[p], preferred_element_type=f32)
    h1 = jnp.maximum(h1, 0.0)                                  # (1, 50)

    # ---- fc2 + ReLU, fc3 ---------------------------------------------------
    h2 = jnp.maximum(
        jnp.dot(h1, fc2_ref[...], preferred_element_type=f32) + bf2_ref[...],
        0.0)                                                   # (1, 20)
    o_ref[0] = (jnp.dot(h2, fc3_ref[...], preferred_element_type=f32)
                + bf3_ref[...])                                # (1, 3)


# ------------------------------- JAX wrapper --------------------------------


def model_forward(params, x):
    """x: (N, 1, 487, 37) NCHW, same as the PyTorch module."""
    B, C, H, W = x.shape
    assert (C, H, W) == (1, 487, 37), "shape fixed by Linear(570, 50)"
    f32 = jnp.float32

    x2d = x[:, 0].astype(f32)                                  # (B, 487, 37)
    # Pre-split rows by (h mod 5) so conv1 + pool1 need no strided access.
    xp = jnp.stack([x2d[:, s::5, :][:, :97, :] for s in range(7)], axis=1)

    # conv1 weights folded into banded matrices: G[i, v, w*10+co] = w1[co,i,v-w]
    w1 = params["conv1_w"].astype(f32).reshape(10, 3, 3)       # [co, i, j]
    shift_eye = (jnp.arange(37)[None, :, None]
                 == (jnp.arange(35)[None, None, :]
                     + jnp.arange(3)[:, None, None])).astype(f32)  # [j, v, w]
    gmat = jnp.einsum('cij,jvw->ivwc', w1, shift_eye).reshape(3, 37, 350)

    b1r = params["conv1_b"].astype(f32).reshape(1, 10)
    # conv2 weights: fold (kw, cin) into K=30:  [i, j*10+ci, co]
    w2f = params["conv2_w"].astype(f32).transpose(2, 3, 1, 0).reshape(3, 30, 30)
    b2r = params["conv2_b"].astype(f32).reshape(1, 30)
    # fc1 weights regrouped per pooled-H position: [p, ci, out]
    fc1r = params["fc1_w"].astype(f32).reshape(30, 19, 50).transpose(1, 0, 2)
    bf1 = params["fc1_b"].astype(f32).reshape(1, 50)
    fc2 = params["fc2_w"].astype(f32)
    bf2 = params["fc2_b"].astype(f32).reshape(1, 20)
    fc3 = params["fc3_w"].astype(f32)
    bf3 = params["fc3_b"].astype(f32).reshape(1, 3)

    out = pl.pallas_call(
        _fused_forward_kernel,
        out_shape=jax.ShapeDtypeStruct((B, 1, 3), f32),
        grid_spec=pltpu.PrefetchScalarGridSpec(
            num_scalar_prefetch=0,
            grid=(B,),
            in_specs=[
                pl.BlockSpec((1, 7, 97, 37), lambda b: (b, 0, 0, 0)),
                pl.BlockSpec((3, 37, 350), lambda b: (0, 0, 0)),
                pl.BlockSpec((1, 10), lambda b: (0, 0)),
                pl.BlockSpec((3, 30, 30), lambda b: (0, 0, 0)),
                pl.BlockSpec((1, 30), lambda b: (0, 0)),
                pl.BlockSpec((19, 30, 50), lambda b: (0, 0, 0)),
                pl.BlockSpec((1, 50), lambda b: (0, 0)),
                pl.BlockSpec((50, 20), lambda b: (0, 0)),
                pl.BlockSpec((1, 20), lambda b: (0, 0)),
                pl.BlockSpec((20, 3), lambda b: (0, 0)),
                pl.BlockSpec((1, 3), lambda b: (0, 0)),
            ],
            out_specs=pl.BlockSpec((1, 1, 3), lambda b: (b, 0, 0)),
            scratch_shapes=[
                pltpu.VMEM((97, 350), f32),   # conv1 + H-pool
                pltpu.VMEM((97, 310), f32),   # W-direction running max
                pltpu.VMEM((97, 70), f32),    # pool1 output (h, 10*pw+ci)
                pltpu.VMEM((95, 30), f32),    # conv2 max over output w
            ],
        ),
        compiler_params=pltpu.CompilerParams(
            dimension_semantics=("parallel",)),
    )(xp, gmat, b1r, w2f, b2r, fc1r, bf1, fc2, bf2, fc3, bf3)
    return out.reshape(B, 3)


# --------------------------- deterministic params ---------------------------


def init_params(key):
    ks = jax.random.split(key, 10)

    def u(k, shape, fan_in):
        bound = 1.0 / float(fan_in) ** 0.5
        return jax.random.uniform(k, shape, jnp.float32, -bound, bound)

    return {
        "conv1_w": u(ks[0], (10, 1, 3, 3), 9),
        "conv1_b": u(ks[1], (10,), 9),
        "conv2_w": u(ks[2], (30, 10, 3, 3), 90),
        "conv2_b": u(ks[3], (30,), 90),
        "fc1_w": u(ks[4], (570, 50), 570),
        "fc1_b": u(ks[5], (50,), 570),
        "fc2_w": u(ks[6], (50, 20), 50),
        "fc2_b": u(ks[7], (20,), 50),
        "fc3_w": u(ks[8], (20, 3), 20),
        "fc3_b": u(ks[9], (3,), 20),
    }


# -------------------------------- reference ---------------------------------


def ref_forward(params, x):
    def conv(x, w, b):
        y = lax.conv_general_dilated(
            x, w, (1, 1), "VALID",
            dimension_numbers=("NCHW", "OIHW", "NCHW"))
        return jnp.maximum(y + b[None, :, None, None], 0.0)

    def pool(x):
        return lax.reduce_window(x, -jnp.inf, lax.max,
                                 (1, 1, 5, 5), (1, 1, 5, 5), "VALID")

    h = pool(conv(x, params["conv1_w"], params["conv1_b"]))
    h = pool(conv(h, params["conv2_w"], params["conv2_b"]))
    h = h.reshape(h.shape[0], -1)
    h = jnp.maximum(h @ params["fc1_w"] + params["fc1_b"], 0.0)
    h = jnp.maximum(h @ params["fc2_w"] + params["fc2_b"], 0.0)
    return h @ params["fc3_w"] + params["fc3_b"]


if __name__ == "__main__":
    key = jax.random.PRNGKey(0)
    pkey, xkey = jax.random.split(key)
    params = init_params(pkey)

    # Smallest NCHW input consistent with Linear(570, 50):
    # (2,1,487,37) -conv3-> (2,10,485,35) -pool5-> (2,10,97,7)
    #              -conv3-> (2,30,95,5)  -pool5-> (2,30,19,1) -flatten-> (2,570)
    x = jax.random.normal(xkey, (2, 1, 487, 37), jnp.float32)

    fwd = jax.jit(model_forward)
    logits = jax.block_until_ready(fwd(params, x))
    assert logits.shape == (2, 3), logits.shape

    ref = jax.block_until_ready(ref_forward(params, x))
    # Tolerance leaves headroom for MXU pass / accumulation-order differences
    # between the Pallas and XLA conv paths; real layout bugs are O(0.1-1).
    assert jnp.allclose(logits, ref, rtol=5e-4, atol=5e-4), (
        "mismatch", logits, ref)

    print("KERNEL_OK")
</pallas_src>

<mosaic_0001>
module attributes {stable_mosaic.version = 11 : i64} {
  func.func @_fused_forward_kernel(%arg0: i32, %arg1: memref<1x7x97x37xf32, #tpu.memory_space<vmem>>, %arg2: memref<3x37x350xf32, #tpu.memory_space<vmem>>, %arg3: memref<1x10xf32, #tpu.memory_space<vmem>>, %arg4: memref<3x30x30xf32, #tpu.memory_space<vmem>>, %arg5: memref<1x30xf32, #tpu.memory_space<vmem>>, %arg6: memref<19x30x50xf32, #tpu.memory_space<vmem>>, %arg7: memref<1x50xf32, #tpu.memory_space<vmem>>, %arg8: memref<50x20xf32, #tpu.memory_space<vmem>>, %arg9: memref<1x20xf32, #tpu.memory_space<vmem>>, %arg10: memref<20x3xf32, #tpu.memory_space<vmem>>, %arg11: memref<1x3xf32, #tpu.memory_space<vmem>>, %arg12: memref<1x1x3xf32, #tpu.memory_space<vmem>>, %arg13: memref<97x350xf32, #tpu.memory_space<vmem>>, %arg14: memref<97x310xf32, #tpu.memory_space<vmem>>, %arg15: memref<97x70xf32, #tpu.memory_space<vmem>>, %arg16: memref<95x30xf32, #tpu.memory_space<vmem>>) attributes {dimension_semantics = [#tpu.dimension_semantics<parallel>], iteration_bounds = array<i64: 2>, scalar_prefetch = 0 : i64, scratch_operands = 4 : i64, tpu.core_type = #tpu.core_type<tc>, window_params = [{transform_indices = @transform_0, window_bounds = array<i64: 1, 7, 97, 37>}, {pipeline_mode = #tpu.pipeline_mode<synchronous>, transform_indices = @transform_1, window_bounds = array<i64: 3, 37, 350>}, {pipeline_mode = #tpu.pipeline_mode<synchronous>, transform_indices = @transform_2, window_bounds = array<i64: 1, 10>}, {pipeline_mode = #tpu.pipeline_mode<synchronous>, transform_indices = @transform_3, window_bounds = array<i64: 3, 30, 30>}, {pipeline_mode = #tpu.pipeline_mode<synchronous>, transform_indices = @transform_4, window_bounds = array<i64: 1, 30>}, {pipeline_mode = #tpu.pipeline_mode<synchronous>, transform_indices = @transform_5, window_bounds = array<i64: 19, 30, 50>}, {pipeline_mode = #tpu.pipeline_mode<synchronous>, transform_indices = @transform_6, window_bounds = array<i64: 1, 50>}, {pipeline_mode = #tpu.pipeline_mode<synchronous>, transform_indices = @transform_7, window_bounds = array<i64: 50, 20>}, {pipeline_mode = #tpu.pipeline_mode<synchronous>, transform_indices = @transform_8, window_bounds = array<i64: 1, 20>}, {pipeline_mode = #tpu.pipeline_mode<synchronous>, transform_indices = @transform_9, window_bounds = array<i64: 20, 3>}, {pipeline_mode = #tpu.pipeline_mode<synchronous>, transform_indices = @transform_10, window_bounds = array<i64: 1, 3>}, {transform_indices = @transform_11, window_bounds = array<i64: 1, 1, 3>}]} {
    %c0 = arith.constant 0 : index
    %c0_0 = arith.constant 0 : index
    %c0_1 = arith.constant 0 : index
    %c0_2 = arith.constant 0 : index
    %0 = vector.load %arg1[%c0, %c0_0, %c0_1, %c0_2] : memref<1x7x97x37xf32, #tpu.memory_space<vmem>>, vector<1x1x97x37xf32>
    %1 = vector.shape_cast %0 : vector<1x1x97x37xf32> to vector<97x37xf32>
    %c0_3 = arith.constant 0 : index
    %c0_4 = arith.constant 0 : index
    %c0_5 = arith.constant 0 : index
    %2 = vector.load %arg2[%c0_3, %c0_4, %c0_5] : memref<3x37x350xf32, #tpu.memory_space<vmem>>, vector<1x37x350xf32>
    %3 = vector.shape_cast %2 : vector<1x37x350xf32> to vector<37x350xf32>
    %cst = arith.constant dense<0.000000e+00> : vector<97x350xf32>
    %4 = tpu.matmul %1, %3, %cst {dimension_numbers = #tpu.dot_dimension_numbers<[1], [0], [0], [1], [0, 0, 1, 1], [], []>} : vector<97x37xf32>, vector<37x350xf32>, vector<97x350xf32> -> vector<97x350xf32>
    %c0_6 = arith.constant 0 : index
    %c1 = arith.constant 1 : index
    %c0_7 = arith.constant 0 : index
    %c0_8 = arith.constant 0 : index
    %5 = vector.load %arg1[%c0_6, %c1, %c0_7, %c0_8] : memref<1x7x97x37xf32, #tpu.memory_space<vmem>>, vector<1x1x97x37xf32>
    %6 = vector.shape_cast %5 : vector<1x1x97x37xf32> to vector<97x37xf32>
    %c1_9 = arith.constant 1 : index
    %c0_10 = arith.constant 0 : index
    %c0_11 = arith.constant 0 : index
    %7 = vector.load %arg2[%c1_9, %c0_10, %c0_11] : memref<3x37x350xf32, #tpu.memory_space<vmem>>, vector<1x37x350xf32>
    %8 = vector.shape_cast %7 : vector<1x37x350xf32> to vector<37x350xf32>
    %cst_12 = arith.constant dense<0.000000e+00> : vector<97x350xf32>
    %9 = tpu.matmul %6, %8, %cst_12 {dimension_numbers = #tpu.dot_dimension_numbers<[1], [0], [0], [1], [0, 0, 1, 1], [], []>} : vector<97x37xf32>, vector<37x350xf32>, vector<97x350xf32> -> vector<97x350xf32>
    %10 = arith.addf %4, %9 : vector<97x350xf32>
    %c0_13 = arith.constant 0 : index
    %c2 = arith.constant 2 : index
    %c0_14 = arith.constant 0 : index
    %c0_15 = arith.constant 0 : index
    %11 = vector.load %arg1[%c0_13, %c2, %c0_14, %c0_15] : memref<1x7x97x37xf32, #tpu.memory_space<vmem>>, vector<1x1x97x37xf32>
    %12 = vector.shape_cast %11 : vector<1x1x97x37xf32> to vector<97x37xf32>
    %c2_16 = arith.constant 2 : index
    %c0_17 = arith.constant 0 : index
    %c0_18 = arith.constant 0 : index
    %13 = vector.load %arg2[%c2_16, %c0_17, %c0_18] : memref<3x37x350xf32, #tpu.memory_space<vmem>>, vector<1x37x350xf32>
    %14 = vector.shape_cast %13 : vector<1x37x350xf32> to vector<37x350xf32>
    %cst_19 = arith.constant dense<0.000000e+00> : vector<97x350xf32>
    %15 = tpu.matmul %12, %14, %cst_19 {dimension_numbers = #tpu.dot_dimension_numbers<[1], [0], [0], [1], [0, 0, 1, 1], [], []>} : vector<97x37xf32>, vector<37x350xf32>, vector<97x350xf32> -> vector<97x350xf32>
    %16 = arith.addf %10, %15 : vector<97x350xf32>
    %c0_20 = arith.constant 0 : index
    %c1_21 = arith.constant 1 : index
    %c0_22 = arith.constant 0 : index
    %c0_23 = arith.constant 0 : index
    %17 = vector.load %arg1[%c0_20, %c1_21, %c0_22, %c0_23] : memref<1x7x97x37xf32, #tpu.memory_space<vmem>>, vector<1x1x97x37xf32>
    %18 = vector.shape_cast %17 : vector<1x1x97x37xf32> to vector<97x37xf32>
    %c0_24 = arith.constant 0 : index
    %c0_25 = arith.constant 0 : index
    %c0_26 = arith.constant 0 : index
    %19 = vector.load %arg2[%c0_24, %c0_25, %c0_26] : memref<3x37x350xf32, #tpu.memory_space<vmem>>, vector<1x37x350xf32>
    %20 = vector.shape_cast %19 : vector<1x37x350xf32> to vector<37x350xf32>
    %cst_27 = arith.constant dense<0.000000e+00> : vector<97x350xf32>
    %21 = tpu.matmul %18, %20, %cst_27 {dimension_numbers = #tpu.dot_dimension_numbers<[1], [0], [0], [1], [0, 0, 1, 1], [], []>} : vector<97x37xf32>, vector<37x350xf32>, vector<97x350xf32> -> vector<97x350xf32>
    %c0_28 = arith.constant 0 : index
    %c2_29 = arith.constant 2 : index
    %c0_30 = arith.constant 0 : index
    %c0_31 = arith.constant 0 : index
    %22 = vector.load %arg1[%c0_28, %c2_29, %c0_30, %c0_31] : memref<1x7x97x37xf32, #tpu.memory_space<vmem>>, vector<1x1x97x37xf32>
    %23 = vector.shape_cast %22 : vector<1x1x97x37xf32> to vector<97x37xf32>
    %c1_32 = arith.constant 1 : index
    %c0_33 = arith.constant 0 : index
    %c0_34 = arith.constant 0 : index
    %24 = vector.load %arg2[%c1_32, %c0_33, %c0_34] : memref<3x37x350xf32, #tpu.memory_space<vmem>>, vector<1x37x350xf32>
    %25 = vector.shape_cast %24 : vector<1x37x350xf32> to vector<37x350xf32>
    %cst_35 = arith.constant dense<0.000000e+00> : vector<97x350xf32>
    %26 = tpu.matmul %23, %25, %cst_35 {dimension_numbers = #tpu.dot_dimension_numbers<[1], [0], [0], [1], [0, 0, 1, 1], [], []>} : vector<97x37xf32>, vector<37x350xf32>, vector<97x350xf32> -> vector<97x350xf32>
    %27 = arith.addf %21, %26 : vector<97x350xf32>
    %c0_36 = arith.constant 0 : index
    %c3 = arith.constant 3 : index
    %c0_37 = arith.constant 0 : index
    %c0_38 = arith.constant 0 : index
    %28 = vector.load %arg1[%c0_36, %c3, %c0_37, %c0_38] : memref<1x7x97x37xf32, #tpu.memory_space<vmem>>, vector<1x1x97x37xf32>
    %29 = vector.shape_cast %28 : vector<1x1x97x37xf32> to vector<97x37xf32>
    %c2_39 = arith.constant 2 : index
    %c0_40 = arith.constant 0 : index
    %c0_41 = arith.constant 0 : index
    %30 = vector.load %arg2[%c2_39, %c0_40, %c0_41] : memref<3x37x350xf32, #tpu.memory_space<vmem>>, vector<1x37x350xf32>
    %31 = vector.shape_cast %30 : vector<1x37x350xf32> to vector<37x350xf32>
    %cst_42 = arith.constant dense<0.000000e+00> : vector<97x350xf32>
    %32 = tpu.matmul %29, %31, %cst_42 {dimension_numbers = #tpu.dot_dimension_numbers<[1], [0], [0], [1], [0, 0, 1, 1], [], []>} : vector<97x37xf32>, vector<37x350xf32>, vector<97x350xf32> -> vector<97x350xf32>
    %33 = arith.addf %27, %32 : vector<97x350xf32>
    %34 = arith.maximumf %16, %33 : vector<97x350xf32>
    %c0_43 = arith.constant 0 : index
    %c2_44 = arith.constant 2 : index
    %c0_45 = arith.constant 0 : index
    %c0_46 = arith.constant 0 : index
    %35 = vector.load %arg1[%c0_43, %c2_44, %c0_45, %c0_46] : memref<1x7x97x37xf32, #tpu.memory_space<vmem>>, vector<1x1x97x37xf32>
    %36 = vector.shape_cast %35 : vector<1x1x97x37xf32> to vector<97x37xf32>
    %c0_47 = arith.constant 0 : index
    %c0_48 = arith.constant 0 : index
    %c0_49 = arith.constant 0 : index
    %37 = vector.load %arg2[%c0_47, %c0_48, %c0_49] : memref<3x37x350xf32, #tpu.memory_space<vmem>>, vector<1x37x350xf32>
    %38 = vector.shape_cast %37 : vector<1x37x350xf32> to vector<37x350xf32>
    %cst_50 = arith.constant dense<0.000000e+00> : vector<97x350xf32>
    %39 = tpu.matmul %36, %38, %cst_50 {dimension_numbers = #tpu.dot_dimension_numbers<[1], [0], [0], [1], [0, 0, 1, 1], [], []>} : vector<97x37xf32>, vector<37x350xf32>, vector<97x350xf32> -> vector<97x350xf32>
    %c0_51 = arith.constant 0 : index
    %c3_52 = arith.constant 3 : index
    %c0_53 = arith.constant 0 : index
    %c0_54 = arith.constant 0 : index
    %40 = vector.load %arg1[%c0_51, %c3_52, %c0_53, %c0_54] : memref<1x7x97x37xf32, #tpu.memory_space<vmem>>, vector<1x1x97x37xf32>
    %41 = vector.shape_cast %40 : vector<1x1x97x37xf32> to vector<97x37xf32>
    %c1_55 = arith.constant 1 : index
    %c0_56 = arith.constant 0 : index
    %c0_57 = arith.constant 0 : index
    %42 = vector.load %arg2[%c1_55, %c0_56, %c0_57] : memref<3x37x350xf32, #tpu.memory_space<vmem>>, vector<1x37x350xf32>
    %43 = vector.shape_cast %42 : vector<1x37x350xf32> to vector<37x350xf32>
    %cst_58 = arith.constant dense<0.000000e+00> : vector<97x350xf32>
    %44 = tpu.matmul %41, %43, %cst_58 {dimension_numbers = #tpu.dot_dimension_numbers<[1], [0], [0], [1], [0, 0, 1, 1], [], []>} : vector<97x37xf32>, vector<37x350xf32>, vector<97x350xf32> -> vector<97x350xf32>
    %45 = arith.addf %39, %44 : vector<97x350xf32>
    %c0_59 = arith.constant 0 : index
    %c4 = arith.constant 4 : index
    %c0_60 = arith.constant 0 : index
    %c0_61 = arith.constant 0 : index
    %46 = vector.load %arg1[%c0_59, %c4, %c0_60, %c0_61] : memref<1x7x97x37xf32, #tpu.memory_space<vmem>>, vector<1x1x97x37xf32>
    %47 = vector.shape_cast %46 : vector<1x1x97x37xf32> to vector<97x37xf32>
    %c2_62 = arith.constant 2 : index
    %c0_63 = arith.constant 0 : index
    %c0_64 = arith.constant 0 : index
    %48 = vector.load %arg2[%c2_62, %c0_63, %c0_64] : memref<3x37x350xf32, #tpu.memory_space<vmem>>, vector<1x37x350xf32>
    %49 = vector.shape_cast %48 : vector<1x37x350xf32> to vector<37x350xf32>
    %cst_65 = arith.constant dense<0.000000e+00> : vector<97x350xf32>
    %50 = tpu.matmul %47, %49, %cst_65 {dimension_numbers = #tpu.dot_dimension_numbers<[1], [0], [0], [1], [0, 0, 1, 1], [], []>} : vector<97x37xf32>, vector<37x350xf32>, vector<97x350xf32> -> vector<97x350xf32>
    %51 = arith.addf %45, %50 : vector<97x350xf32>
    %52 = arith.maximumf %34, %51 : vector<97x350xf32>
    %c0_66 = arith.constant 0 : index
    %c3_67 = arith.constant 3 : index
    %c0_68 = arith.constant 0 : index
    %c0_69 = arith.constant 0 : index
    %53 = vector.load %arg1[%c0_66, %c3_67, %c0_68, %c0_69] : memref<1x7x97x37xf32, #tpu.memory_space<vmem>>, vector<1x1x97x37xf32>
    %54 = vector.shape_cast %53 : vector<1x1x97x37xf32> to vector<97x37xf32>
    %c0_70 = arith.constant 0 : index
    %c0_71 = arith.constant 0 : index
    %c0_72 = arith.constant 0 : index
    %55 = vector.load %arg2[%c0_70, %c0_71, %c0_72] : memref<3x37x350xf32, #tpu.memory_space<vmem>>, vector<1x37x350xf32>
    %56 = vector.shape_cast %55 : vector<1x37x350xf32> to vector<37x350xf32>
    %cst_73 = arith.constant dense<0.000000e+00> : vector<97x350xf32>
    %57 = tpu.matmul %54, %56, %cst_73 {dimension_numbers = #tpu.dot_dimension_numbers<[1], [0], [0], [1], [0, 0, 1, 1], [], []>} : vector<97x37xf32>, vector<37x350xf32>, vector<97x350xf32> -> vector<97x350xf32>
    %c0_74 = arith.constant 0 : index
    %c4_75 = arith.constant 4 : index
    %c0_76 = arith.constant 0 : index
    %c0_77 = arith.constant 0 : index
    %58 = vector.load %arg1[%c0_74, %c4_75, %c0_76, %c0_77] : memref<1x7x97x37xf32, #tpu.memory_space<vmem>>, vector<1x1x97x37xf32>
    %59 = vector.shape_cast %58 : vector<1x1x97x37xf32> to vector<97x37xf32>
    %c1_78 = arith.constant 1 : index
    %c0_79 = arith.constant 0 : index
    %c0_80 = arith.constant 0 : index
    %60 = vector.load %arg2[%c1_78, %c0_79, %c0_80] : memref<3x37x350xf32, #tpu.memory_space<vmem>>, vector<1x37x350xf32>
    %61 = vector.shape_cast %60 : vector<1x37x350xf32> to vector<37x350xf32>
    %cst_81 = arith.constant dense<0.000000e+00> : vector<97x350xf32>
    %62 = tpu.matmul %59, %61, %cst_81 {dimension_numbers = #tpu.dot_dimension_numbers<[1], [0], [0], [1], [0, 0, 1, 1], [], []>} : vector<97x37xf32>, vector<37x350xf32>, vector<97x350xf32> -> vector<97x350xf32>
    %63 = arith.addf %57, %62 : vector<97x350xf32>
    %c0_82 = arith.constant 0 : index
    %c5 = arith.constant 5 : index
    %c0_83 = arith.constant 0 : index
    %c0_84 = arith.constant 0 : index
    %64 = vector.load %arg1[%c0_82, %c5, %c0_83, %c0_84] : memref<1x7x97x37xf32, #tpu.memory_space<vmem>>, vector<1x1x97x37xf32>
    %65 = vector.shape_cast %64 : vector<1x1x97x37xf32> to vector<97x37xf32>
    %c2_85 = arith.constant 2 : index
    %c0_86 = arith.constant 0 : index
    %c0_87 = arith.constant 0 : index
    %66 = vector.load %arg2[%c2_85, %c0_86, %c0_87] : memref<3x37x350xf32, #tpu.memory_space<vmem>>, vector<1x37x350xf32>
    %67 = vector.shape_cast %66 : vector<1x37x350xf32> to vector<37x350xf32>
    %cst_88 = arith.constant dense<0.000000e+00> : vector<97x350xf32>
    %68 = tpu.matmul %65, %67, %cst_88 {dimension_numbers = #tpu.dot_dimension_numbers<[1], [0], [0], [1], [0, 0, 1, 1], [], []>} : vector<97x37xf32>, vector<37x350xf32>, vector<97x350xf32> -> vector<97x350xf32>
    %69 = arith.addf %63, %68 : vector<97x350xf32>
    %70 = arith.maximumf %52, %69 : vector<97x350xf32>
    %c0_89 = arith.constant 0 : index
    %c4_90 = arith.constant 4 : index
    %c0_91 = arith.constant 0 : index
    %c0_92 = arith.constant 0 : index
    %71 = vector.load %arg1[%c0_89, %c4_90, %c0_91, %c0_92] : memref<1x7x97x37xf32, #tpu.memory_space<vmem>>, vector<1x1x97x37xf32>
    %72 = vector.shape_cast %71 : vector<1x1x97x37xf32> to vector<97x37xf32>
    %c0_93 = arith.constant 0 : index
    %c0_94 = arith.constant 0 : index
    %c0_95 = arith.constant 0 : index
    %73 = vector.load %arg2[%c0_93, %c0_94, %c0_95] : memref<3x37x350xf32, #tpu.memory_space<vmem>>, vector<1x37x350xf32>
    %74 = vector.shape_cast %73 : vector<1x37x350xf32> to vector<37x350xf32>
    %cst_96 = arith.constant dense<0.000000e+00> : vector<97x350xf32>
    %75 = tpu.matmul %72, %74, %cst_96 {dimension_numbers = #tpu.dot_dimension_numbers<[1], [0], [0], [1], [0, 0, 1, 1], [], []>} : vector<97x37xf32>, vector<37x350xf32>, vector<97x350xf32> -> vector<97x350xf32>
    %c0_97 = arith.constant 0 : index
    %c5_98 = arith.constant 5 : index
    %c0_99 = arith.constant 0 : index
    %c0_100 = arith.constant 0 : index
    %76 = vector.load %arg1[%c0_97, %c5_98, %c0_99, %c0_100] : memref<1x7x97x37xf32, #tpu.memory_space<vmem>>, vector<1x1x97x37xf32>
    %77 = vector.shape_cast %76 : vector<1x1x97x37xf32> to vector<97x37xf32>
    %c1_101 = arith.constant 1 : index
    %c0_102 = arith.constant 0 : index
    %c0_103 = arith.constant 0 : index
    %78 = vector.load %arg2[%c1_101, %c0_102, %c0_103] : memref<3x37x350xf32, #tpu.memory_space<vmem>>, vector<1x37x350xf32>
    %79 = vector.shape_cast %78 : vector<1x37x350xf32> to vector<37x350xf32>
    %cst_104 = arith.constant dense<0.000000e+00> : vector<97x350xf32>
    %80 = tpu.matmul %77, %79, %cst_104 {dimension_numbers = #tpu.dot_dimension_numbers<[1], [0], [0], [1], [0, 0, 1, 1], [], []>} : vector<97x37xf32>, vector<37x350xf32>, vector<97x350xf32> -> vector<97x350xf32>
    %81 = arith.addf %75, %80 : vector<97x350xf32>
    %c0_105 = arith.constant 0 : index
    %c6 = arith.constant 6 : index
    %c0_106 = arith.constant 0 : index
    %c0_107 = arith.constant 0 : index
    %82 = vector.load %arg1[%c0_105, %c6, %c0_106, %c0_107] : memref<1x7x97x37xf32, #tpu.memory_space<vmem>>, vector<1x1x97x37xf32>
    %83 = vector.shape_cast %82 : vector<1x1x97x37xf32> to vector<97x37xf32>
    %c2_108 = arith.constant 2 : index
    %c0_109 = arith.constant 0 : index
    %c0_110 = arith.constant 0 : index
    %84 = vector.load %arg2[%c2_108, %c0_109, %c0_110] : memref<3x37x350xf32, #tpu.memory_space<vmem>>, vector<1x37x350xf32>
    %85 = vector.shape_cast %84 : vector<1x37x350xf32> to vector<37x350xf32>
    %cst_111 = arith.constant dense<0.000000e+00> : vector<97x350xf32>
    %86 = tpu.matmul %83, %85, %cst_111 {dimension_numbers = #tpu.dot_dimension_numbers<[1], [0], [0], [1], [0, 0, 1, 1], [], []>} : vector<97x37xf32>, vector<37x350xf32>, vector<97x350xf32> -> vector<97x350xf32>
    %87 = arith.addf %81, %86 : vector<97x350xf32>
    %88 = arith.maximumf %70, %87 : vector<97x350xf32>
    %c0_112 = arith.constant 0 : index
    %c0_113 = arith.constant 0 : index
    %89 = vector.load %arg13[%c0_112, %c0_113] : memref<97x350xf32, #tpu.memory_space<vmem>>, vector<97x350xf32>
    tpu.vector_store %arg13[%c0_112, %c0_113], %88 {strides = array<i32>} : memref<97x350xf32, #tpu.memory_space<vmem>>, vector<97x350xf32>,
    %c0_114 = arith.constant 0 : index
    %c0_115 = arith.constant 0 : index
    %90 = vector.load %arg13[%c0_114, %c0_115] : memref<97x350xf32, #tpu.memory_space<vmem>>, vector<97x310xf32>
    %c0_116 = arith.constant 0 : index
    %c10 = arith.constant 10 : index
    %91 = vector.load %arg13[%c0_116, %c10] : memref<97x350xf32, #tpu.memory_space<vmem>>, vector<97x310xf32>
    %92 = arith.maximumf %90, %91 : vector<97x310xf32>
    %c0_117 = arith.constant 0 : index
    %c20 = arith.constant 20 : index
    %93 = vector.load %arg13[%c0_117, %c20] : memref<97x350xf32, #tpu.memory_space<vmem>>, vector<97x310xf32>
    %94 = arith.maximumf %92, %93 : vector<97x310xf32>
    %c0_118 = arith.constant 0 : index
    %c30 = arith.constant 30 : index
    %95 = vector.load %arg13[%c0_118, %c30] : memref<97x350xf32, #tpu.memory_space<vmem>>, vector<97x310xf32>
    %96 = arith.maximumf %94, %95 : vector<97x310xf32>
    %c0_119 = arith.constant 0 : index
    %c40 = arith.constant 40 : index
    %97 = vector.load %arg13[%c0_119, %c40] : memref<97x350xf32, #tpu.memory_space<vmem>>, vector<97x310xf32>
    %98 = arith.maximumf %96, %97 : vector<97x310xf32>
    %c0_120 = arith.constant 0 : index
    %c0_121 = arith.constant 0 : index
    %99 = vector.load %arg14[%c0_120, %c0_121] : memref<97x310xf32, #tpu.memory_space<vmem>>, vector<97x310xf32>
    tpu.vector_store %arg14[%c0_120, %c0_121], %98 {strides = array<i32>} : memref<97x310xf32, #tpu.memory_space<vmem>>, vector<97x310xf32>,
    %c0_122 = arith.constant 0 : index
    %c0_123 = arith.constant 0 : index
    %100 = vector.load %arg14[%c0_122, %c0_123] : memref<97x310xf32, #tpu.memory_space<vmem>>, vector<97x10xf32>
    %c0_124 = arith.constant 0 : index
    %c0_125 = arith.constant 0 : index
    %101 = vector.load %arg3[%c0_124, %c0_125] : memref<1x10xf32, #tpu.memory_space<vmem>>, vector<1x10xf32>
    %102 = vector.broadcast %101 : vector<1x10xf32> to vector<97x10xf32>
    %103 = arith.addf %100, %102 : vector<97x10xf32>
    %cst_126 = arith.constant 0.000000e+00 : f32
    %104 = vector.broadcast %cst_126 : f32 to vector<97x10xf32>
    %105 = arith.maximumf %103, %104 : vector<97x10xf32>
    %c0_127 = arith.constant 0 : index
    %c0_128 = arith.constant 0 : index
    %106 = vector.load %arg15[%c0_127, %c0_128] : memref<97x70xf32, #tpu.memory_space<vmem>>, vector<97x10xf32>
    tpu.vector_store %arg15[%c0_127, %c0_128], %105 {strides = array<i32>} : memref<97x70xf32, #tpu.memory_space<vmem>>, vector<97x10xf32>,
    %c0_129 = arith.constant 0 : index
    %c50 = arith.constant 50 : index
    %107 = vector.load %arg14[%c0_129, %c50] : memref<97x310xf32, #tpu.memory_space<vmem>>, vector<97x10xf32>
    %c0_130 = arith.constant 0 : index
    %c0_131 = arith.constant 0 : index
    %108 = vector.load %arg3[%c0_130, %c0_131] : memref<1x10xf32, #tpu.memory_space<vmem>>, vector<1x10xf32>
    %109 = vector.broadcast %108 : vector<1x10xf32> to vector<97x10xf32>
    %110 = arith.addf %107, %109 : vector<97x10xf32>
    %cst_132 = arith.constant 0.000000e+00 : f32
    %111 = vector.broadcast %cst_132 : f32 to vector<97x10xf32>
    %112 = arith.maximumf %110, %111 : vector<97x10xf32>
    %c0_133 = arith.constant 0 : index
    %c10_134 = arith.constant 10 : index
    %113 = vector.load %arg15[%c0_133, %c10_134] : memref<97x70xf32, #tpu.memory_space<vmem>>, vector<97x10xf32>
    tpu.vector_store %arg15[%c0_133, %c10_134], %112 {strides = array<i32>} : memref<97x70xf32, #tpu.memory_space<vmem>>, vector<97x10xf32>,
    %c0_135 = arith.constant 0 : index
    %c100 = arith.constant 100 : index
    %114 = vector.load %arg14[%c0_135, %c100] : memref<97x310xf32, #tpu.memory_space<vmem>>, vector<97x10xf32>
    %c0_136 = arith.constant 0 : index
    %c0_137 = arith.constant 0 : index
    %115 = vector.load %arg3[%c0_136, %c0_137] : memref<1x10xf32, #tpu.memory_space<vmem>>, vector<1x10xf32>
    %116 = vector.broadcast %115 : vector<1x10xf32> to vector<97x10xf32>
    %117 = arith.addf %114, %116 : vector<97x10xf32>
    %cst_138 = arith.constant 0.000000e+00 : f32
    %118 = vector.broadcast %cst_138 : f32 to vector<97x10xf32>
    %119 = arith.maximumf %117, %118 : vector<97x10xf32>
    %c0_139 = arith.constant 0 : index
    %c20_140 = arith.constant 20 : index
    %120 = vector.load %arg15[%c0_139, %c20_140] : memref<97x70xf32, #tpu.memory_space<vmem>>, vector<97x10xf32>
    tpu.vector_store %arg15[%c0_139, %c20_140], %119 {strides = array<i32>} : memref<97x70xf32, #tpu.memory_space<vmem>>, vector<97x10xf32>,
    %c0_141 = arith.constant 0 : index
    %c150 = arith.constant 150 : index
    %121 = vector.load %arg14[%c0_141, %c150] : memref<97x310xf32, #tpu.memory_space<vmem>>, vector<97x10xf32>
    %c0_142 = arith.constant 0 : index
    %c0_143 = arith.constant 0 : index
    %122 = vector.load %arg3[%c0_142, %c0_143] : memref<1x10xf32, #tpu.memory_space<vmem>>, vector<1x10xf32>
    %123 = vector.broadcast %122 : vector<1x10xf32> to vector<97x10xf32>
    %124 = arith.addf %121, %123 : vector<97x10xf32>
    %cst_144 = arith.constant 0.000000e+00 : f32
    %125 = vector.broadcast %cst_144 : f32 to vector<97x10xf32>
    %126 = arith.maximumf %124, %125 : vector<97x10xf32>
    %c0_145 = arith.constant 0 : index
    %c30_146 = arith.constant 30 : index
    %127 = vector.load %arg15[%c0_145, %c30_146] : memref<97x70xf32, #tpu.memory_space<vmem>>, vector<97x10xf32>
    tpu.vector_store %arg15[%c0_145, %c30_146], %126 {strides = array<i32>} : memref<97x70xf32, #tpu.memory_space<vmem>>, vector<97x10xf32>,
    %c0_147 = arith.constant 0 : index
    %c200 = arith.constant 200 : index
    %128 = vector.load %arg14[%c0_147, %c200] : memref<97x310xf32, #tpu.memory_space<vmem>>, vector<97x10xf32>
    %c0_148 = arith.constant 0 : index
    %c0_149 = arith.constant 0 : index
    %129 = vector.load %arg3[%c0_148, %c0_149] : memref<1x10xf32, #tpu.memory_space<vmem>>, vector<1x10xf32>
    %130 = vector.broadcast %129 : vector<1x10xf32> to vector<97x10xf32>
    %131 = arith.addf %128, %130 : vector<97x10xf32>
    %cst_150 = arith.constant 0.000000e+00 : f32
    %132 = vector.broadcast %cst_150 : f32 to vector<97x10xf32>
    %133 = arith.maximumf %131, %132 : vector<97x10xf32>
    %c0_151 = arith.constant 0 : index
    %c40_152 = arith.constant 40 : index
    %134 = vector.load %arg15[%c0_151, %c40_152] : memref<97x70xf32, #tpu.memory_space<vmem>>, vector<97x10xf32>
    tpu.vector_store %arg15[%c0_151, %c40_152], %133 {strides = array<i32>} : memref<97x70xf32, #tpu.memory_space<vmem>>, vector<97x10xf32>,
    %c0_153 = arith.constant 0 : index
    %c250 = arith.constant 250 : index
    %135 = vector.load %arg14[%c0_153, %c250] : memref<97x310xf32, #tpu.memory_space<vmem>>, vector<97x10xf32>
    %c0_154 = arith.constant 0 : index
    %c0_155 = arith.constant 0 : index
    %136 = vector.load %arg3[%c0_154, %c0_155] : memref<1x10xf32, #tpu.memory_space<vmem>>, vector<1x10xf32>
    %137 = vector.broadcast %136 : vector<1x10xf32> to vector<97x10xf32>
    %138 = arith.addf %135, %137 : vector<97x10xf32>
    %cst_156 = arith.constant 0.000000e+00 : f32
    %139 = vector.broadcast %cst_156 : f32 to vector<97x10xf32>
    %140 = arith.maximumf %138, %139 : vector<97x10xf32>
    %c0_157 = arith.constant 0 : index
    %c50_158 = arith.constant 50 : index
    %141 = vector.load %arg15[%c0_157, %c50_158] : memref<97x70xf32, #tpu.memory_space<vmem>>, vector<97x10xf32>
    tpu.vector_store %arg15[%c0_157, %c50_158], %140 {strides = array<i32>} : memref<97x70xf32, #tpu.memory_space<vmem>>, vector<97x10xf32>,
    %c0_159 = arith.constant 0 : index
    %c300 = arith.constant 300 : index
    %142 = vector.load %arg14[%c0_159, %c300] : memref<97x310xf32, #tpu.memory_space<vmem>>, vector<97x10xf32>
    %c0_160 = arith.constant 0 : index
    %c0_161 = arith.constant 0 : index
    %143 = vector.load %arg3[%c0_160, %c0_161] : memref<1x10xf32, #tpu.memory_space<vmem>>, vector<1x10xf32>
    %144 = vector.broadcast %143 : vector<1x10xf32> to vector<97x10xf32>
    %145 = arith.addf %142, %144 : vector<97x10xf32>
    %cst_162 = arith.constant 0.000000e+00 : f32
    %146 = vector.broadcast %cst_162 : f32 to vector<97x10xf32>
    %147 = arith.maximumf %145, %146 : vector<97x10xf32>
    %c0_163 = arith.constant 0 : index
    %c60 = arith.constant 60 : index
    %148 = vector.load %arg15[%c0_163, %c60] : memref<97x70xf32, #tpu.memory_space<vmem>>, vector<97x10xf32>
    tpu.vector_store %arg15[%c0_163, %c60], %147 {strides = array<i32>} : memref<97x70xf32, #tpu.memory_space<vmem>>, vector<97x10xf32>,
    %c0_164 = arith.constant 0 : index
    %c0_165 = arith.constant 0 : index
    %149 = vector.load %arg15[%c0_164, %c0_165] : memref<97x70xf32, #tpu.memory_space<vmem>>, vector<95x30xf32>
    %c0_166 = arith.constant 0 : index
    %c0_167 = arith.constant 0 : index
    %c0_168 = arith.constant 0 : index
    %150 = vector.load %arg4[%c0_166, %c0_167, %c0_168] : memref<3x30x30xf32, #tpu.memory_space<vmem>>, vector<1x30x30xf32>
    %151 = vector.shape_cast %150 : vector<1x30x30xf32> to vector<30x30xf32>
    %cst_169 = arith.constant dense<0.000000e+00> : vector<95x30xf32>
    %152 = tpu.matmul %149, %151, %cst_169 {dimension_numbers = #tpu.dot_dimension_numbers<[1], [0], [0], [1], [0, 0, 1, 1], [], []>} : vector<95x30xf32>, vector<30x30xf32>, vector<95x30xf32> -> vector<95x30xf32>
    %c1_170 = arith.constant 1 : index
    %c0_171 = arith.constant 0 : index
    %153 = vector.load %arg15[%c1_170, %c0_171] : memref<97x70xf32, #tpu.memory_space<vmem>>, vector<95x30xf32>
    %c1_172 = arith.constant 1 : index
    %c0_173 = arith.constant 0 : index
    %c0_174 = arith.constant 0 : index
    %154 = vector.load %arg4[%c1_172, %c0_173, %c0_174] : memref<3x30x30xf32, #tpu.memory_space<vmem>>, vector<1x30x30xf32>
    %155 = vector.shape_cast %154 : vector<1x30x30xf32> to vector<30x30xf32>
    %cst_175 = arith.constant dense<0.000000e+00> : vector<95x30xf32>
    %156 = tpu.matmul %153, %155, %cst_175 {dimension_numbers = #tpu.dot_dimension_numbers<[1], [0], [0], [1], [0, 0, 1, 1], [], []>} : vector<95x30xf32>, vector<30x30xf32>, vector<95x30xf32> -> vector<95x30xf32>
    %157 = arith.addf %152, %156 : vector<95x30xf32>
    %c2_176 = arith.constant 2 : index
    %c0_177 = arith.constant 0 : index
    %158 = vector.load %arg15[%c2_176, %c0_177] : memref<97x70xf32, #tpu.memory_space<vmem>>, vector<95x30xf32>
    %c2_178 = arith.constant 2 : index
    %c0_179 = arith.constant 0 : index
    %c0_180 = arith.constant 0 : index
    %159 = vector.load %arg4[%c2_178, %c0_179, %c0_180] : memref<3x30x30xf32, #tpu.memory_space<vmem>>, vector<1x30x30xf32>
    %160 = vector.shape_cast %159 : vector<1x30x30xf32> to vector<30x30xf32>
    %cst_181 = arith.constant dense<0.000000e+00> : vector<95x30xf32>
    %161 = tpu.matmul %158, %160, %cst_181 {dimension_numbers = #tpu.dot_dimension_numbers<[1], [0], [0], [1], [0, 0, 1, 1], [], []>} : vector<95x30xf32>, vector<30x30xf32>, vector<95x30xf32> -> vector<95x30xf32>
    %162 = arith.addf %157, %161 : vector<95x30xf32>
    %c0_182 = arith.constant 0 : index
    %c10_183 = arith.constant 10 : index
    %163 = vector.load %arg15[%c0_182, %c10_183] : memref<97x70xf32, #tpu.memory_space<vmem>>, vector<95x30xf32>
    %c0_184 = arith.constant 0 : index
    %c0_185 = arith.constant 0 : index
    %c0_186 = arith.constant 0 : index
    %164 = vector.load %arg4[%c0_184, %c0_185, %c0_186] : memref<3x30x30xf32, #tpu.memory_space<vmem>>, vector<1x30x30xf32>
    %165 = vector.shape_cast %164 : vector<1x30x30xf32> to vector<30x30xf32>
    %cst_187 = arith.constant dense<0.000000e+00> : vector<95x30xf32>
    %166 = tpu.matmul %163, %165, %cst_187 {dimension_numbers = #tpu.dot_dimension_numbers<[1], [0], [0], [1], [0, 0, 1, 1], [], []>} : vector<95x30xf32>, vector<30x30xf32>, vector<95x30xf32> -> vector<95x30xf32>
    %c1_188 = arith.constant 1 : index
    %c10_189 = arith.constant 10 : index
    %167 = vector.load %arg15[%c1_188, %c10_189] : memref<97x70xf32, #tpu.memory_space<vmem>>, vector<95x30xf32>
    %c1_190 = arith.constant 1 : index
    %c0_191 = arith.constant 0 : index
    %c0_192 = arith.constant 0 : index
    %168 = vector.load %arg4[%c1_190, %c0_191, %c0_192] : memref<3x30x30xf32, #tpu.memory_space<vmem>>, vector<1x30x30xf32>
    %169 = vector.shape_cast %168 : vector<1x30x30xf32> to vector<30x30xf32>
    %cst_193 = arith.constant dense<0.000000e+00> : vector<95x30xf32>
    %170 = tpu.matmul %167, %169, %cst_193 {dimension_numbers = #tpu.dot_dimension_numbers<[1], [0], [0], [1], [0, 0, 1, 1], [], []>} : vector<95x30xf32>, vector<30x30xf32>, vector<95x30xf32> -> vector<95x30xf32>
    %171 = arith.addf %166, %170 : vector<95x30xf32>
    %c2_194 = arith.constant 2 : index
    %c10_195 = arith.constant 10 : index
    %172 = vector.load %arg15[%c2_194, %c10_195] : memref<97x70xf32, #tpu.memory_space<vmem>>, vector<95x30xf32>
    %c2_196 = arith.constant 2 : index
    %c0_197 = arith.constant 0 : index
    %c0_198 = arith.constant 0 : index
    %173 = vector.load %arg4[%c2_196, %c0_197, %c0_198] : memref<3x30x30xf32, #tpu.memory_space<vmem>>, vector<1x30x30xf32>
    %174 = vector.shape_cast %173 : vector<1x30x30xf32> to vector<30x30xf32>
    %cst_199 = arith.constant dense<0.000000e+00> : vector<95x30xf32>
    %175 = tpu.matmul %172, %174, %cst_199 {dimension_numbers = #tpu.dot_dimension_numbers<[1], [0], [0], [1], [0, 0, 1, 1], [], []>} : vector<95x30xf32>, vector<30x30xf32>, vector<95x30xf32> -> vector<95x30xf32>
    %176 = arith.addf %171, %175 : vector<95x30xf32>
    %177 = arith.maximumf %162, %176 : vector<95x30xf32>
    %c0_200 = arith.constant 0 : index
    %c20_201 = arith.constant 20 : index
    %178 = vector.load %arg15[%c0_200, %c20_201] : memref<97x70xf32, #tpu.memory_space<vmem>>, vector<95x30xf32>
    %c0_202 = arith.constant 0 : index
    %c0_203 = arith.constant 0 : index
    %c0_204 = arith.constant 0 : index
    %179 = vector.load %arg4[%c0_202, %c0_203, %c0_204] : memref<3x30x30xf32, #tpu.memory_space<vmem>>, vector<1x30x30xf32>
    %180 = vector.shape_cast %179 : vector<1x30x30xf32> to vector<30x30xf32>
    %cst_205 = arith.constant dense<0.000000e+00> : vector<95x30xf32>
    %181 = tpu.matmul %178, %180, %cst_205 {dimension_numbers = #tpu.dot_dimension_numbers<[1], [0], [0], [1], [0, 0, 1, 1], [], []>} : vector<95x30xf32>, vector<30x30xf32>, vector<95x30xf32> -> vector<95x30xf32>
    %c1_206 = arith.constant 1 : index
    %c20_207 = arith.constant 20 : index
    %182 = vector.load %arg15[%c1_206, %c20_207] : memref<97x70xf32, #tpu.memory_space<vmem>>, vector<95x30xf32>
    %c1_208 = arith.constant 1 : index
    %c0_209 = arith.constant 0 : index
    %c0_210 = arith.constant 0 : index
    %183 = vector.load %arg4[%c1_208, %c0_209, %c0_210] : memref<3x30x30xf32, #tpu.memory_space<vmem>>, vector<1x30x30xf32>
    %184 = vector.shape_cast %183 : vector<1x30x30xf32> to vector<30x30xf32>
    %cst_211 = arith.constant dense<0.000000e+00> : vector<95x30xf32>
    %185 = tpu.matmul %182, %184, %cst_211 {dimension_numbers = #tpu.dot_dimension_numbers<[1], [0], [0], [1], [0, 0, 1, 1], [], []>} : vector<95x30xf32>, vector<30x30xf32>, vector<95x30xf32> -> vector<95x30xf32>
    %186 = arith.addf %181, %185 : vector<95x30xf32>
    %c2_212 = arith.constant 2 : index
    %c20_213 = arith.constant 20 : index
    %187 = vector.load %arg15[%c2_212, %c20_213] : memref<97x70xf32, #tpu.memory_space<vmem>>, vector<95x30xf32>
    %c2_214 = arith.constant 2 : index
    %c0_215 = arith.constant 0 : index
    %c0_216 = arith.constant 0 : index
    %188 = vector.load %arg4[%c2_214, %c0_215, %c0_216] : memref<3x30x30xf32, #tpu.memory_space<vmem>>, vector<1x30x30xf32>
    %189 = vector.shape_cast %188 : vector<1x30x30xf32> to vector<30x30xf32>
    %cst_217 = arith.constant dense<0.000000e+00> : vector<95x30xf32>
    %190 = tpu.matmul %187, %189, %cst_217 {dimension_numbers = #tpu.dot_dimension_numbers<[1], [0], [0], [1], [0, 0, 1, 1], [], []>} : vector<95x30xf32>, vector<30x30xf32>, vector<95x30xf32> -> vector<95x30xf32>
    %191 = arith.addf %186, %190 : vector<95x30xf32>
    %192 = arith.maximumf %177, %191 : vector<95x30xf32>
    %c0_218 = arith.constant 0 : index
    %c30_219 = arith.constant 30 : index
    %193 = vector.load %arg15[%c0_218, %c30_219] : memref<97x70xf32, #tpu.memory_space<vmem>>, vector<95x30xf32>
    %c0_220 = arith.constant 0 : index
    %c0_221 = arith.constant 0 : index
    %c0_222 = arith.constant 0 : index
    %194 = vector.load %arg4[%c0_220, %c0_221, %c0_222] : memref<3x30x30xf32, #tpu.memory_space<vmem>>, vector<1x30x30xf32>
    %195 = vector.shape_cast %194 : vector<1x30x30xf32> to vector<30x30xf32>
    %cst_223 = arith.constant dense<0.000000e+00> : vector<95x30xf32>
    %196 = tpu.matmul %193, %195, %cst_223 {dimension_numbers = #tpu.dot_dimension_numbers<[1], [0], [0], [1], [0, 0, 1, 1], [], []>} : vector<95x30xf32>, vector<30x30xf32>, vector<95x30xf32> -> vector<95x30xf32>
    %c1_224 = arith.constant 1 : index
    %c30_225 = arith.constant 30 : index
    %197 = vector.load %arg15[%c1_224, %c30_225] : memref<97x70xf32, #tpu.memory_space<vmem>>, vector<95x30xf32>
    %c1_226 = arith.constant 1 : index
    %c0_227 = arith.constant 0 : index
    %c0_228 = arith.constant 0 : index
    %198 = vector.load %arg4[%c1_226, %c0_227, %c0_228] : memref<3x30x30xf32, #tpu.memory_space<vmem>>, vector<1x30x30xf32>
    %199 = vector.shape_cast %198 : vector<1x30x30xf32> to vector<30x30xf32>
    %cst_229 = arith.constant dense<0.000000e+00> : vector<95x30xf32>
    %200 = tpu.matmul %197, %199, %cst_229 {dimension_numbers = #tpu.dot_dimension_numbers<[1], [0], [0], [1], [0, 0, 1, 1], [], []>} : vector<95x30xf32>, vector<30x30xf32>, vector<95x30xf32> -> vector<95x30xf32>
    %201 = arith.addf %196, %200 : vector<95x30xf32>
    %c2_230 = arith.constant 2 : index
    %c30_231 = arith.constant 30 : index
    %202 = vector.load %arg15[%c2_230, %c30_231] : memref<97x70xf32, #tpu.memory_space<vmem>>, vector<95x30xf32>
    %c2_232 = arith.constant 2 : index
    %c0_233 = arith.constant 0 : index
    %c0_234 = arith.constant 0 : index
    %203 = vector.load %arg4[%c2_232, %c0_233, %c0_234] : memref<3x30x30xf32, #tpu.memory_space<vmem>>, vector<1x30x30xf32>
    %204 = vector.shape_cast %203 : vector<1x30x30xf32> to vector<30x30xf32>
    %cst_235 = arith.constant dense<0.000000e+00> : vector<95x30xf32>
    %205 = tpu.matmul %202, %204, %cst_235 {dimension_numbers = #tpu.dot_dimension_numbers<[1], [0], [0], [1], [0, 0, 1, 1], [], []>} : vector<95x30xf32>, vector<30x30xf32>, vector<95x30xf32> -> vector<95x30xf32>
    %206 = arith.addf %201, %205 : vector<95x30xf32>
    %207 = arith.maximumf %192, %206 : vector<95x30xf32>
    %c0_236 = arith.constant 0 : index
    %c40_237 = arith.constant 40 : index
    %208 = vector.load %arg15[%c0_236, %c40_237] : memref<97x70xf32, #tpu.memory_space<vmem>>, vector<95x30xf32>
    %c0_238 = arith.constant 0 : index
    %c0_239 = arith.constant 0 : index
    %c0_240 = arith.constant 0 : index
    %209 = vector.load %arg4[%c0_238, %c0_239, %c0_240] : memref<3x30x30xf32, #tpu.memory_space<vmem>>, vector<1x30x30xf32>
    %210 = vector.shape_cast %209 : vector<1x30x30xf32> to vector<30x30xf32>
    %cst_241 = arith.constant dense<0.000000e+00> : vector<95x30xf32>
    %211 = tpu.matmul %208, %210, %cst_241 {dimension_numbers = #tpu.dot_dimension_numbers<[1], [0], [0], [1], [0, 0, 1, 1], [], []>} : vector<95x30xf32>, vector<30x30xf32>, vector<95x30xf32> -> vector<95x30xf32>
    %c1_242 = arith.constant 1 : index
    %c40_243 = arith.constant 40 : index
    %212 = vector.load %arg15[%c1_242, %c40_243] : memref<97x70xf32, #tpu.memory_space<vmem>>, vector<95x30xf32>
    %c1_244 = arith.constant 1 : index
    %c0_245 = arith.constant 0 : index
    %c0_246 = arith.constant 0 : index
    %213 = vector.load %arg4[%c1_244, %c0_245, %c0_246] : memref<3x30x30xf32, #tpu.memory_space<vmem>>, vector<1x30x30xf32>
    %214 = vector.shape_cast %213 : vector<1x30x30xf32> to vector<30x30xf32>
    %cst_247 = arith.constant dense<0.000000e+00> : vector<95x30xf32>
    %215 = tpu.matmul %212, %214, %cst_247 {dimension_numbers = #tpu.dot_dimension_numbers<[1], [0], [0], [1], [0, 0, 1, 1], [], []>} : vector<95x30xf32>, vector<30x30xf32>, vector<95x30xf32> -> vector<95x30xf32>
    %216 = arith.addf %211, %215 : vector<95x30xf32>
    %c2_248 = arith.constant 2 : index
    %c40_249 = arith.constant 40 : index
    %217 = vector.load %arg15[%c2_248, %c40_249] : memref<97x70xf32, #tpu.memory_space<vmem>>, vector<95x30xf32>
    %c2_250 = arith.constant 2 : index
    %c0_251 = arith.constant 0 : index
    %c0_252 = arith.constant 0 : index
    %218 = vector.load %arg4[%c2_250, %c0_251, %c0_252] : memref<3x30x30xf32, #tpu.memory_space<vmem>>, vector<1x30x30xf32>
    %219 = vector.shape_cast %218 : vector<1x30x30xf32> to vector<30x30xf32>
    %cst_253 = arith.constant dense<0.000000e+00> : vector<95x30xf32>
    %220 = tpu.matmul %217, %219, %cst_253 {dimension_numbers = #tpu.dot_dimension_numbers<[1], [0], [0], [1], [0, 0, 1, 1], [], []>} : vector<95x30xf32>, vector<30x30xf32>, vector<95x30xf32> -> vector<95x30xf32>
    %221 = arith.addf %216, %220 : vector<95x30xf32>
    %222 = arith.maximumf %207, %221 : vector<95x30xf32>
    %c0_254 = arith.constant 0 : index
    %c0_255 = arith.constant 0 : index
    %223 = vector.load %arg16[%c0_254, %c0_255] : memref<95x30xf32, #tpu.memory_space<vmem>>, vector<95x30xf32>
    tpu.vector_store %arg16[%c0_254, %c0_255], %222 {strides = array<i32>} : memref<95x30xf32, #tpu.memory_space<vmem>>, vector<95x30xf32>,
    %c0_256 = arith.constant 0 : index
    %c0_257 = arith.constant 0 : index
    %224 = vector.load %arg7[%c0_256, %c0_257] : memref<1x50xf32, #tpu.memory_space<vmem>>, vector<1x50xf32>
    %c0_258 = arith.constant 0 : index
    %c0_259 = arith.constant 0 : index
    %225 = vector.load %arg16[%c0_258, %c0_259] : memref<95x30xf32, #tpu.memory_space<vmem>>, vector<5x30xf32>
    %cst_260 = arith.constant dense<0xFF800000> : vector<30xf32>
    %226 = vector.multi_reduction <maximumf>, %225, %cst_260 [0] : vector<5x30xf32> to vector<30xf32>
    %227 = vector.shape_cast %226 : vector<30xf32> to vector<1x30xf32>
    %c0_261 = arith.constant 0 : index
    %c0_262 = arith.constant 0 : index
    %228 = vector.load %arg5[%c0_261, %c0_262] : memref<1x30xf32, #tpu.memory_space<vmem>>, vector<1x30xf32>
    %229 = arith.addf %227, %228 : vector<1x30xf32>
    %cst_263 = arith.constant 0.000000e+00 : f32
    %230 = vector.broadcast %cst_263 : f32 to vector<1x30xf32>
    %231 = arith.maximumf %229, %230 : vector<1x30xf32>
    %c0_264 = arith.constant 0 : index
    %c0_265 = arith.constant 0 : index
    %c0_266 = arith.constant 0 : index
    %232 = vector.load %arg6[%c0_264, %c0_265, %c0_266] : memref<19x30x50xf32, #tpu.memory_space<vmem>>, vector<1x30x50xf32>
    %233 = vector.shape_cast %232 : vector<1x30x50xf32> to vector<30x50xf32>
    %cst_267 = arith.constant dense<0.000000e+00> : vector<1x50xf32>
    %234 = tpu.matmul %231, %233, %cst_267 {dimension_numbers = #tpu.dot_dimension_numbers<[1], [0], [0], [1], [0, 0, 1, 1], [], []>} : vector<1x30xf32>, vector<30x50xf32>, vector<1x50xf32> -> vector<1x50xf32>
    %235 = arith.addf %224, %234 : vector<1x50xf32>
    %c5_268 = arith.constant 5 : index
    %c0_269 = arith.constant 0 : index
    %236 = vector.load %arg16[%c5_268, %c0_269] : memref<95x30xf32, #tpu.memory_space<vmem>>, vector<5x30xf32>
    %cst_270 = arith.constant dense<0xFF800000> : vector<30xf32>
    %237 = vector.multi_reduction <maximumf>, %236, %cst_270 [0] : vector<5x30xf32> to vector<30xf32>
    %238 = vector.shape_cast %237 : vector<30xf32> to vector<1x30xf32>
    %c0_271 = arith.constant 0 : index
    %c0_272 = arith.constant 0 : index
    %239 = vector.load %arg5[%c0_271, %c0_272] : memref<1x30xf32, #tpu.memory_space<vmem>>, vector<1x30xf32>
    %240 = arith.addf %238, %239 : vector<1x30xf32>
    %cst_273 = arith.constant 0.000000e+00 : f32
    %241 = vector.broadcast %cst_273 : f32 to vector<1x30xf32>
    %242 = arith.maximumf %240, %241 : vector<1x30xf32>
    %c1_274 = arith.constant 1 : index
    %c0_275 = arith.constant 0 : index
    %c0_276 = arith.constant 0 : index
    %243 = vector.load %arg6[%c1_274, %c0_275, %c0_276] : memref<19x30x50xf32, #tpu.memory_space<vmem>>, vector<1x30x50xf32>
    %244 = vector.shape_cast %243 : vector<1x30x50xf32> to vector<30x50xf32>
    %cst_277 = arith.constant dense<0.000000e+00> : vector<1x50xf32>
    %245 = tpu.matmul %242, %244, %cst_277 {dimension_numbers = #tpu.dot_dimension_numbers<[1], [0], [0], [1], [0, 0, 1, 1], [], []>} : vector<1x30xf32>, vector<30x50xf32>, vector<1x50xf32> -> vector<1x50xf32>
    %246 = arith.addf %235, %245 : vector<1x50xf32>
    %c10_278 = arith.constant 10 : index
    %c0_279 = arith.constant 0 : index
    %247 = vector.load %arg16[%c10_278, %c0_279] : memref<95x30xf32, #tpu.memory_space<vmem>>, vector<5x30xf32>
    %cst_280 = arith.constant dense<0xFF800000> : vector<30xf32>
    %248 = vector.multi_reduction <maximumf>, %247, %cst_280 [0] : vector<5x30xf32> to vector<30xf32>
    %249 = vector.shape_cast %248 : vector<30xf32> to vector<1x30xf32>
    %c0_281 = arith.constant 0 : index
    %c0_282 = arith.constant 0 : index
    %250 = vector.load %arg5[%c0_281, %c0_282] : memref<1x30xf32, #tpu.memory_space<vmem>>, vector<1x30xf32>
    %251 = arith.addf %249, %250 : vector<1x30xf32>
    %cst_283 = arith.constant 0.000000e+00 : f32
    %252 = vector.broadcast %cst_283 : f32 to vector<1x30xf32>
    %253 = arith.maximumf %251, %252 : vector<1x30xf32>
    %c2_284 = arith.constant 2 : index
    %c0_285 = arith.constant 0 : index
    %c0_286 = arith.constant 0 : index
    %254 = vector.load %arg6[%c2_284, %c0_285, %c0_286] : memref<19x30x50xf32, #tpu.memory_space<vmem>>, vector<1x30x50xf32>
    %255 = vector.shape_cast %254 : vector<1x30x50xf32> to vector<30x50xf32>
    %cst_287 = arith.constant dense<0.000000e+00> : vector<1x50xf32>
    %256 = tpu.matmul %253, %255, %cst_287 {dimension_numbers = #tpu.dot_dimension_numbers<[1], [0], [0], [1], [0, 0, 1, 1], [], []>} : vector<1x30xf32>, vector<30x50xf32>, vector<1x50xf32> -> vector<1x50xf32>
    %257 = arith.addf %246, %256 : vector<1x50xf32>
    %c15 = arith.constant 15 : index
    %c0_288 = arith.constant 0 : index
    %258 = vector.load %arg16[%c15, %c0_288] : memref<95x30xf32, #tpu.memory_space<vmem>>, vector<5x30xf32>
    %cst_289 = arith.constant dense<0xFF800000> : vector<30xf32>
    %259 = vector.multi_reduction <maximumf>, %258, %cst_289 [0] : vector<5x30xf32> to vector<30xf32>
    %260 = vector.shape_cast %259 : vector<30xf32> to vector<1x30xf32>
    %c0_290 = arith.constant 0 : index
    %c0_291 = arith.constant 0 : index
    %261 = vector.load %arg5[%c0_290, %c0_291] : memref<1x30xf32, #tpu.memory_space<vmem>>, vector<1x30xf32>
    %262 = arith.addf %260, %261 : vector<1x30xf32>
    %cst_292 = arith.constant 0.000000e+00 : f32
    %263 = vector.broadcast %cst_292 : f32 to vector<1x30xf32>
    %264 = arith.maximumf %262, %263 : vector<1x30xf32>
    %c3_293 = arith.constant 3 : index
    %c0_294 = arith.constant 0 : index
    %c0_295 = arith.constant 0 : index
    %265 = vector.load %arg6[%c3_293, %c0_294, %c0_295] : memref<19x30x50xf32, #tpu.memory_space<vmem>>, vector<1x30x50xf32>
    %266 = vector.shape_cast %265 : vector<1x30x50xf32> to vector<30x50xf32>
    %cst_296 = arith.constant dense<0.000000e+00> : vector<1x50xf32>
    %267 = tpu.matmul %264, %266, %cst_296 {dimension_numbers = #tpu.dot_dimension_numbers<[1], [0], [0], [1], [0, 0, 1, 1], [], []>} : vector<1x30xf32>, vector<30x50xf32>, vector<1x50xf32> -> vector<1x50xf32>
    %268 = arith.addf %257, %267 : vector<1x50xf32>
    %c20_297 = arith.constant 20 : index
    %c0_298 = arith.constant 0 : index
    %269 = vector.load %arg16[%c20_297, %c0_298] : memref<95x30xf32, #tpu.memory_space<vmem>>, vector<5x30xf32>
    %cst_299 = arith.constant dense<0xFF800000> : vector<30xf32>
    %270 = vector.multi_reduction <maximumf>, %269, %cst_299 [0] : vector<5x30xf32> to vector<30xf32>
    %271 = vector.shape_cast %270 : vector<30xf32> to vector<1x30xf32>
    %c0_300 = arith.constant 0 : index
    %c0_301 = arith.constant 0 : index
    %272 = vector.load %arg5[%c0_300, %c0_301] : memref<1x30xf32, #tpu.memory_space<vmem>>, vector<1x30xf32>
    %273 = arith.addf %271, %272 : vector<1x30xf32>
    %cst_302 = arith.constant 0.000000e+00 : f32
    %274 = vector.broadcast %cst_302 : f32 to vector<1x30xf32>
    %275 = arith.maximumf %273, %274 : vector<1x30xf32>
    %c4_303 = arith.constant 4 : index
    %c0_304 = arith.constant 0 : index
    %c0_305 = arith.constant 0 : index
    %276 = vector.load %arg6[%c4_303, %c0_304, %c0_305] : memref<19x30x50xf32, #tpu.memory_space<vmem>>, vector<1x30x50xf32>
    %277 = vector.shape_cast %276 : vector<1x30x50xf32> to vector<30x50xf32>
    %cst_306 = arith.constant dense<0.000000e+00> : vector<1x50xf32>
    %278 = tpu.matmul %275, %277, %cst_306 {dimension_numbers = #tpu.dot_dimension_numbers<[1], [0], [0], [1], [0, 0, 1, 1], [], []>} : vector<1x30xf32>, vector<30x50xf32>, vector<1x50xf32> -> vector<1x50xf32>
    %279 = arith.addf %268, %278 : vector<1x50xf32>
    %c25 = arith.constant 25 : index
    %c0_307 = arith.constant 0 : index
    %280 = vector.load %arg16[%c25, %c0_307] : memref<95x30xf32, #tpu.memory_space<vmem>>, vector<5x30xf32>
    %cst_308 = arith.constant dense<0xFF800000> : vector<30xf32>
    %281 = vector.multi_reduction <maximumf>, %280, %cst_308 [0] : vector<5x30xf32> to vector<30xf32>
    %282 = vector.shape_cast %281 : vector<30xf32> to vector<1x30xf32>
    %c0_309 = arith.constant 0 : index
    %c0_310 = arith.constant 0 : index
    %283 = vector.load %arg5[%c0_309, %c0_310] : memref<1x30xf32, #tpu.memory_space<vmem>>, vector<1x30xf32>
    %284 = arith.addf %282, %283 : vector<1x30xf32>
    %cst_311 = arith.constant 0.000000e+00 : f32
    %285 = vector.broadcast %cst_311 : f32 to vector<1x30xf32>
    %286 = arith.maximumf %284, %285 : vector<1x30xf32>
    %c5_312 = arith.constant 5 : index
    %c0_313 = arith.constant 0 : index
    %c0_314 = arith.constant 0 : index
    %287 = vector.load %arg6[%c5_312, %c0_313, %c0_314] : memref<19x30x50xf32, #tpu.memory_space<vmem>>, vector<1x30x50xf32>
    %288 = vector.shape_cast %287 : vector<1x30x50xf32> to vector<30x50xf32>
    %cst_315 = arith.constant dense<0.000000e+00> : vector<1x50xf32>
    %289 = tpu.matmul %286, %288, %cst_315 {dimension_numbers = #tpu.dot_dimension_numbers<[1], [0], [0], [1], [0, 0, 1, 1], [], []>} : vector<1x30xf32>, vector<30x50xf32>, vector<1x50xf32> -> vector<1x50xf32>
    %290 = arith.addf %279, %289 : vector<1x50xf32>
    %c30_316 = arith.constant 30 : index
    %c0_317 = arith.constant 0 : index
    %291 = vector.load %arg16[%c30_316, %c0_317] : memref<95x30xf32, #tpu.memory_space<vmem>>, vector<5x30xf32>
    %cst_318 = arith.constant dense<0xFF800000> : vector<30xf32>
    %292 = vector.multi_reduction <maximumf>, %291, %cst_318 [0] : vector<5x30xf32> to vector<30xf32>
    %293 = vector.shape_cast %292 : vector<30xf32> to vector<1x30xf32>
    %c0_319 = arith.constant 0 : index
    %c0_320 = arith.constant 0 : index
    %294 = vector.load %arg5[%c0_319, %c0_320] : memref<1x30xf32, #tpu.memory_space<vmem>>, vector<1x30xf32>
    %295 = arith.addf %293, %294 : vector<1x30xf32>
    %cst_321 = arith.constant 0.000000e+00 : f32
    %296 = vector.broadcast %cst_321 : f32 to vector<1x30xf32>
    %297 = arith.maximumf %295, %296 : vector<1x30xf32>
    %c6_322 = arith.constant 6 : index
    %c0_323 = arith.constant 0 : index
    %c0_324 = arith.constant 0 : index
    %298 = vector.load %arg6[%c6_322, %c0_323, %c0_324] : memref<19x30x50xf32, #tpu.memory_space<vmem>>, vector<1x30x50xf32>
    %299 = vector.shape_cast %298 : vector<1x30x50xf32> to vector<30x50xf32>
    %cst_325 = arith.constant dense<0.000000e+00> : vector<1x50xf32>
    %300 = tpu.matmul %297, %299, %cst_325 {dimension_numbers = #tpu.dot_dimension_numbers<[1], [0], [0], [1], [0, 0, 1, 1], [], []>} : vector<1x30xf32>, vector<30x50xf32>, vector<1x50xf32> -> vector<1x50xf32>
    %301 = arith.addf %290, %300 : vector<1x50xf32>
    %c35 = arith.constant 35 : index
    %c0_326 = arith.constant 0 : index
    %302 = vector.load %arg16[%c35, %c0_326] : memref<95x30xf32, #tpu.memory_space<vmem>>, vector<5x30xf32>
    %cst_327 = arith.constant dense<0xFF800000> : vector<30xf32>
    %303 = vector.multi_reduction <maximumf>, %302, %cst_327 [0] : vector<5x30xf32> to vector<30xf32>
    %304 = vector.shape_cast %303 : vector<30xf32> to vector<1x30xf32>
    %c0_328 = arith.constant 0 : index
    %c0_329 = arith.constant 0 : index
    %305 = vector.load %arg5[%c0_328, %c0_329] : memref<1x30xf32, #tpu.memory_space<vmem>>, vector<1x30xf32>
    %306 = arith.addf %304, %305 : vector<1x30xf32>
    %cst_330 = arith.constant 0.000000e+00 : f32
    %307 = vector.broadcast %cst_330 : f32 to vector<1x30xf32>
    %308 = arith.maximumf %306, %307 : vector<1x30xf32>
    %c7 = arith.constant 7 : index
    %c0_331 = arith.constant 0 : index
    %c0_332 = arith.constant 0 : index
    %309 = vector.load %arg6[%c7, %c0_331, %c0_332] : memref<19x30x50xf32, #tpu.memory_space<vmem>>, vector<1x30x50xf32>
    %310 = vector.shape_cast %309 : vector<1x30x50xf32> to vector<30x50xf32>
    %cst_333 = arith.constant dense<0.000000e+00> : vector<1x50xf32>
    %311 = tpu.matmul %308, %310, %cst_333 {dimension_numbers = #tpu.dot_dimension_numbers<[1], [0], [0], [1], [0, 0, 1, 1], [], []>} : vector<1x30xf32>, vector<30x50xf32>, vector<1x50xf32> -> vector<1x50xf32>
    %312 = arith.addf %301, %311 : vector<1x50xf32>
    %c40_334 = arith.constant 40 : index
    %c0_335 = arith.constant 0 : index
    %313 = vector.load %arg16[%c40_334, %c0_335] : memref<95x30xf32, #tpu.memory_space<vmem>>, vector<5x30xf32>
    %cst_336 = arith.constant dense<0xFF800000> : vector<30xf32>
    %314 = vector.multi_reduction <maximumf>, %313, %cst_336 [0] : vector<5x30xf32> to vector<30xf32>
    %315 = vector.shape_cast %314 : vector<30xf32> to vector<1x30xf32>
    %c0_337 = arith.constant 0 : index
    %c0_338 = arith.constant 0 : index
    %316 = vector.load %arg5[%c0_337, %c0_338] : memref<1x30xf32, #tpu.memory_space<vmem>>, vector<1x30xf32>
    %317 = arith.addf %315, %316 : vector<1x30xf32>
    %cst_339 = arith.constant 0.000000e+00 : f32
    %318 = vector.broadcast %cst_339 : f32 to vector<1x30xf32>
    %319 = arith.maximumf %317, %318 : vector<1x30xf32>
    %c8 = arith.constant 8 : index
    %c0_340 = arith.constant 0 : index
    %c0_341 = arith.constant 0 : index
    %320 = vector.load %arg6[%c8, %c0_340, %c0_341] : memref<19x30x50xf32, #tpu.memory_space<vmem>>, vector<1x30x50xf32>
    %321 = vector.shape_cast %320 : vector<1x30x50xf32> to vector<30x50xf32>
    %cst_342 = arith.constant dense<0.000000e+00> : vector<1x50xf32>
    %322 = tpu.matmul %319, %321, %cst_342 {dimension_numbers = #tpu.dot_dimension_numbers<[1], [0], [0], [1], [0, 0, 1, 1], [], []>} : vector<1x30xf32>, vector<30x50xf32>, vector<1x50xf32> -> vector<1x50xf32>
    %323 = arith.addf %312, %322 : vector<1x50xf32>
    %c45 = arith.constant 45 : index
    %c0_343 = arith.constant 0 : index
    %324 = vector.load %arg16[%c45, %c0_343] : memref<95x30xf32, #tpu.memory_space<vmem>>, vector<5x30xf32>
    %cst_344 = arith.constant dense<0xFF800000> : vector<30xf32>
    %325 = vector.multi_reduction <maximumf>, %324, %cst_344 [0] : vector<5x30xf32> to vector<30xf32>
    %326 = vector.shape_cast %325 : vector<30xf32> to vector<1x30xf32>
    %c0_345 = arith.constant 0 : index
    %c0_346 = arith.constant 0 : index
    %327 = vector.load %arg5[%c0_345, %c0_346] : memref<1x30xf32, #tpu.memory_space<vmem>>, vector<1x30xf32>
    %328 = arith.addf %326, %327 : vector<1x30xf32>
    %cst_347 = arith.constant 0.000000e+00 : f32
    %329 = vector.broadcast %cst_347 : f32 to vector<1x30xf32>
    %330 = arith.maximumf %328, %329 : vector<1x30xf32>
    %c9 = arith.constant 9 : index
    %c0_348 = arith.constant 0 : index
    %c0_349 = arith.constant 0 : index
    %331 = vector.load %arg6[%c9, %c0_348, %c0_349] : memref<19x30x50xf32, #tpu.memory_space<vmem>>, vector<1x30x50xf32>
    %332 = vector.shape_cast %331 : vector<1x30x50xf32> to vector<30x50xf32>
    %cst_350 = arith.constant dense<0.000000e+00> : vector<1x50xf32>
    %333 = tpu.matmul %330, %332, %cst_350 {dimension_numbers = #tpu.dot_dimension_numbers<[1], [0], [0], [1], [0, 0, 1, 1], [], []>} : vector<1x30xf32>, vector<30x50xf32>, vector<1x50xf32> -> vector<1x50xf32>
    %334 = arith.addf %323, %333 : vector<1x50xf32>
    %c50_351 = arith.constant 50 : index
    %c0_352 = arith.constant 0 : index
    %335 = vector.load %arg16[%c50_351, %c0_352] : memref<95x30xf32, #tpu.memory_space<vmem>>, vector<5x30xf32>
    %cst_353 = arith.constant dense<0xFF800000> : vector<30xf32>
    %336 = vector.multi_reduction <maximumf>, %335, %cst_353 [0] : vector<5x30xf32> to vector<30xf32>
    %337 = vector.shape_cast %336 : vector<30xf32> to vector<1x30xf32>
    %c0_354 = arith.constant 0 : index
    %c0_355 = arith.constant 0 : index
    %338 = vector.load %arg5[%c0_354, %c0_355] : memref<1x30xf32, #tpu.memory_space<vmem>>, vector<1x30xf32>
    %339 = arith.addf %337, %338 : vector<1x30xf32>
    %cst_356 = arith.constant 0.000000e+00 : f32
    %340 = vector.broadcast %cst_356 : f32 to vector<1x30xf32>
    %341 = arith.maximumf %339, %340 : vector<1x30xf32>
    %c10_357 = arith.constant 10 : index
    %c0_358 = arith.constant 0 : index
    %c0_359 = arith.constant 0 : index
    %342 = vector.load %arg6[%c10_357, %c0_358, %c0_359] : memref<19x30x50xf32, #tpu.memory_space<vmem>>, vector<1x30x50xf32>
    %343 = vector.shape_cast %342 : vector<1x30x50xf32> to vector<30x50xf32>
    %cst_360 = arith.constant dense<0.000000e+00> : vector<1x50xf32>
    %344 = tpu.matmul %341, %343, %cst_360 {dimension_numbers = #tpu.dot_dimension_numbers<[1], [0], [0], [1], [0, 0, 1, 1], [], []>} : vector<1x30xf32>, vector<30x50xf32>, vector<1x50xf32> -> vector<1x50xf32>
    %345 = arith.addf %334, %344 : vector<1x50xf32>
    %c55 = arith.constant 55 : index
    %c0_361 = arith.constant 0 : index
    %346 = vector.load %arg16[%c55, %c0_361] : memref<95x30xf32, #tpu.memory_space<vmem>>, vector<5x30xf32>
    %cst_362 = arith.constant dense<0xFF800000> : vector<30xf32>
    %347 = vector.multi_reduction <maximumf>, %346, %cst_362 [0] : vector<5x30xf32> to vector<30xf32>
    %348 = vector.shape_cast %347 : vector<30xf32> to vector<1x30xf32>
    %c0_363 = arith.constant 0 : index
    %c0_364 = arith.constant 0 : index
    %349 = vector.load %arg5[%c0_363, %c0_364] : memref<1x30xf32, #tpu.memory_space<vmem>>, vector<1x30xf32>
    %350 = arith.addf %348, %349 : vector<1x30xf32>
    %cst_365 = arith.constant 0.000000e+00 : f32
    %351 = vector.broadcast %cst_365 : f32 to vector<1x30xf32>
    %352 = arith.maximumf %350, %351 : vector<1x30xf32>
    %c11 = arith.constant 11 : index
    %c0_366 = arith.constant 0 : index
    %c0_367 = arith.constant 0 : index
    %353 = vector.load %arg6[%c11, %c0_366, %c0_367] : memref<19x30x50xf32, #tpu.memory_space<vmem>>, vector<1x30x50xf32>
    %354 = vector.shape_cast %353 : vector<1x30x50xf32> to vector<30x50xf32>
    %cst_368 = arith.constant dense<0.000000e+00> : vector<1x50xf32>
    %355 = tpu.matmul %352, %354, %cst_368 {dimension_numbers = #tpu.dot_dimension_numbers<[1], [0], [0], [1], [0, 0, 1, 1], [], []>} : vector<1x30xf32>, vector<30x50xf32>, vector<1x50xf32> -> vector<1x50xf32>
    %356 = arith.addf %345, %355 : vector<1x50xf32>
    %c60_369 = arith.constant 60 : index
    %c0_370 = arith.constant 0 : index
    %357 = vector.load %arg16[%c60_369, %c0_370] : memref<95x30xf32, #tpu.memory_space<vmem>>, vector<5x30xf32>
    %cst_371 = arith.constant dense<0xFF800000> : vector<30xf32>
    %358 = vector.multi_reduction <maximumf>, %357, %cst_371 [0] : vector<5x30xf32> to vector<30xf32>
    %359 = vector.shape_cast %358 : vector<30xf32> to vector<1x30xf32>
    %c0_372 = arith.constant 0 : index
    %c0_373 = arith.constant 0 : index
    %360 = vector.load %arg5[%c0_372, %c0_373] : memref<1x30xf32, #tpu.memory_space<vmem>>, vector<1x30xf32>
    %361 = arith.addf %359, %360 : vector<1x30xf32>
    %cst_374 = arith.constant 0.000000e+00 : f32
    %362 = vector.broadcast %cst_374 : f32 to vector<1x30xf32>
    %363 = arith.maximumf %361, %362 : vector<1x30xf32>
    %c12 = arith.constant 12 : index
    %c0_375 = arith.constant 0 : index
    %c0_376 = arith.constant 0 : index
    %364 = vector.load %arg6[%c12, %c0_375, %c0_376] : memref<19x30x50xf32, #tpu.memory_space<vmem>>, vector<1x30x50xf32>
    %365 = vector.shape_cast %364 : vector<1x30x50xf32> to vector<30x50xf32>
    %cst_377 = arith.constant dense<0.000000e+00> : vector<1x50xf32>
    %366 = tpu.matmul %363, %365, %cst_377 {dimension_numbers = #tpu.dot_dimension_numbers<[1], [0], [0], [1], [0, 0, 1, 1], [], []>} : vector<1x30xf32>, vector<30x50xf32>, vector<1x50xf32> -> vector<1x50xf32>
    %367 = arith.addf %356, %366 : vector<1x50xf32>
    %c65 = arith.constant 65 : index
    %c0_378 = arith.constant 0 : index
    %368 = vector.load %arg16[%c65, %c0_378] : memref<95x30xf32, #tpu.memory_space<vmem>>, vector<5x30xf32>
    %cst_379 = arith.constant dense<0xFF800000> : vector<30xf32>
    %369 = vector.multi_reduction <maximumf>, %368, %cst_379 [0] : vector<5x30xf32> to vector<30xf32>
    %370 = vector.shape_cast %369 : vector<30xf32> to vector<1x30xf32>
    %c0_380 = arith.constant 0 : index
    %c0_381 = arith.constant 0 : index
    %371 = vector.load %arg5[%c0_380, %c0_381] : memref<1x30xf32, #tpu.memory_space<vmem>>, vector<1x30xf32>
    %372 = arith.addf %370, %371 : vector<1x30xf32>
    %cst_382 = arith.constant 0.000000e+00 : f32
    %373 = vector.broadcast %cst_382 : f32 to vector<1x30xf32>
    %374 = arith.maximumf %372, %373 : vector<1x30xf32>
    %c13 = arith.constant 13 : index
    %c0_383 = arith.constant 0 : index
    %c0_384 = arith.constant 0 : index
    %375 = vector.load %arg6[%c13, %c0_383, %c0_384] : memref<19x30x50xf32, #tpu.memory_space<vmem>>, vector<1x30x50xf32>
    %376 = vector.shape_cast %375 : vector<1x30x50xf32> to vector<30x50xf32>
    %cst_385 = arith.constant dense<0.000000e+00> : vector<1x50xf32>
    %377 = tpu.matmul %374, %376, %cst_385 {dimension_numbers = #tpu.dot_dimension_numbers<[1], [0], [0], [1], [0, 0, 1, 1], [], []>} : vector<1x30xf32>, vector<30x50xf32>, vector<1x50xf32> -> vector<1x50xf32>
    %378 = arith.addf %367, %377 : vector<1x50xf32>
    %c70 = arith.constant 70 : index
    %c0_386 = arith.constant 0 : index
    %379 = vector.load %arg16[%c70, %c0_386] : memref<95x30xf32, #tpu.memory_space<vmem>>, vector<5x30xf32>
    %cst_387 = arith.constant dense<0xFF800000> : vector<30xf32>
    %380 = vector.multi_reduction <maximumf>, %379, %cst_387 [0] : vector<5x30xf32> to vector<30xf32>
    %381 = vector.shape_cast %380 : vector<30xf32> to vector<1x30xf32>
    %c0_388 = arith.constant 0 : index
    %c0_389 = arith.constant 0 : index
    %382 = vector.load %arg5[%c0_388, %c0_389] : memref<1x30xf32, #tpu.memory_space<vmem>>, vector<1x30xf32>
    %383 = arith.addf %381, %382 : vector<1x30xf32>
    %cst_390 = arith.constant 0.000000e+00 : f32
    %384 = vector.broadcast %cst_390 : f32 to vector<1x30xf32>
    %385 = arith.maximumf %383, %384 : vector<1x30xf32>
    %c14 = arith.constant 14 : index
    %c0_391 = arith.constant 0 : index
    %c0_392 = arith.constant 0 : index
    %386 = vector.load %arg6[%c14, %c0_391, %c0_392] : memref<19x30x50xf32, #tpu.memory_space<vmem>>, vector<1x30x50xf32>
    %387 = vector.shape_cast %386 : vector<1x30x50xf32> to vector<30x50xf32>
    %cst_393 = arith.constant dense<0.000000e+00> : vector<1x50xf32>
    %388 = tpu.matmul %385, %387, %cst_393 {dimension_numbers = #tpu.dot_dimension_numbers<[1], [0], [0], [1], [0, 0, 1, 1], [], []>} : vector<1x30xf32>, vector<30x50xf32>, vector<1x50xf32> -> vector<1x50xf32>
    %389 = arith.addf %378, %388 : vector<1x50xf32>
    %c75 = arith.constant 75 : index
    %c0_394 = arith.constant 0 : index
    %390 = vector.load %arg16[%c75, %c0_394] : memref<95x30xf32, #tpu.memory_space<vmem>>, vector<5x30xf32>
    %cst_395 = arith.constant dense<0xFF800000> : vector<30xf32>
    %391 = vector.multi_reduction <maximumf>, %390, %cst_395 [0] : vector<5x30xf32> to vector<30xf32>
    %392 = vector.shape_cast %391 : vector<30xf32> to vector<1x30xf32>
    %c0_396 = arith.constant 0 : index
    %c0_397 = arith.constant 0 : index
    %393 = vector.load %arg5[%c0_396, %c0_397] : memref<1x30xf32, #tpu.memory_space<vmem>>, vector<1x30xf32>
    %394 = arith.addf %392, %393 : vector<1x30xf32>
    %cst_398 = arith.constant 0.000000e+00 : f32
    %395 = vector.broadcast %cst_398 : f32 to vector<1x30xf32>
    %396 = arith.maximumf %394, %395 : vector<1x30xf32>
    %c15_399 = arith.constant 15 : index
    %c0_400 = arith.constant 0 : index
    %c0_401 = arith.constant 0 : index
    %397 = vector.load %arg6[%c15_399, %c0_400, %c0_401] : memref<19x30x50xf32, #tpu.memory_space<vmem>>, vector<1x30x50xf32>
    %398 = vector.shape_cast %397 : vector<1x30x50xf32> to vector<30x50xf32>
    %cst_402 = arith.constant dense<0.000000e+00> : vector<1x50xf32>
    %399 = tpu.matmul %396, %398, %cst_402 {dimension_numbers = #tpu.dot_dimension_numbers<[1], [0], [0], [1], [0, 0, 1, 1], [], []>} : vector<1x30xf32>, vector<30x50xf32>, vector<1x50xf32> -> vector<1x50xf32>
    %400 = arith.addf %389, %399 : vector<1x50xf32>
    %c80 = arith.constant 80 : index
    %c0_403 = arith.constant 0 : index
    %401 = vector.load %arg16[%c80, %c0_403] : memref<95x30xf32, #tpu.memory_space<vmem>>, vector<5x30xf32>
    %cst_404 = arith.constant dense<0xFF800000> : vector<30xf32>
    %402 = vector.multi_reduction <maximumf>, %401, %cst_404 [0] : vector<5x30xf32> to vector<30xf32>
    %403 = vector.shape_cast %402 : vector<30xf32> to vector<1x30xf32>
    %c0_405 = arith.constant 0 : index
    %c0_406 = arith.constant 0 : index
    %404 = vector.load %arg5[%c0_405, %c0_406] : memref<1x30xf32, #tpu.memory_space<vmem>>, vector<1x30xf32>
    %405 = arith.addf %403, %404 : vector<1x30xf32>
    %cst_407 = arith.constant 0.000000e+00 : f32
    %406 = vector.broadcast %cst_407 : f32 to vector<1x30xf32>
    %407 = arith.maximumf %405, %406 : vector<1x30xf32>
    %c16 = arith.constant 16 : index
    %c0_408 = arith.constant 0 : index
    %c0_409 = arith.constant 0 : index
    %408 = vector.load %arg6[%c16, %c0_408, %c0_409] : memref<19x30x50xf32, #tpu.memory_space<vmem>>, vector<1x30x50xf32>
    %409 = vector.shape_cast %408 : vector<1x30x50xf32> to vector<30x50xf32>
    %cst_410 = arith.constant dense<0.000000e+00> : vector<1x50xf32>
    %410 = tpu.matmul %407, %409, %cst_410 {dimension_numbers = #tpu.dot_dimension_numbers<[1], [0], [0], [1], [0, 0, 1, 1], [], []>} : vector<1x30xf32>, vector<30x50xf32>, vector<1x50xf32> -> vector<1x50xf32>
    %411 = arith.addf %400, %410 : vector<1x50xf32>
    %c85 = arith.constant 85 : index
    %c0_411 = arith.constant 0 : index
    %412 = vector.load %arg16[%c85, %c0_411] : memref<95x30xf32, #tpu.memory_space<vmem>>, vector<5x30xf32>
    %cst_412 = arith.constant dense<0xFF800000> : vector<30xf32>
    %413 = vector.multi_reduction <maximumf>, %412, %cst_412 [0] : vector<5x30xf32> to vector<30xf32>
    %414 = vector.shape_cast %413 : vector<30xf32> to vector<1x30xf32>
    %c0_413 = arith.constant 0 : index
    %c0_414 = arith.constant 0 : index
    %415 = vector.load %arg5[%c0_413, %c0_414] : memref<1x30xf32, #tpu.memory_space<vmem>>, vector<1x30xf32>
    %416 = arith.addf %414, %415 : vector<1x30xf32>
    %cst_415 = arith.constant 0.000000e+00 : f32
    %417 = vector.broadcast %cst_415 : f32 to vector<1x30xf32>
    %418 = arith.maximumf %416, %417 : vector<1x30xf32>
    %c17 = arith.constant 17 : index
    %c0_416 = arith.constant 0 : index
    %c0_417 = arith.constant 0 : index
    %419 = vector.load %arg6[%c17, %c0_416, %c0_417] : memref<19x30x50xf32, #tpu.memory_space<vmem>>, vector<1x30x50xf32>
    %420 = vector.shape_cast %419 : vector<1x30x50xf32> to vector<30x50xf32>
    %cst_418 = arith.constant dense<0.000000e+00> : vector<1x50xf32>
    %421 = tpu.matmul %418, %420, %cst_418 {dimension_numbers = #tpu.dot_dimension_numbers<[1], [0], [0], [1], [0, 0, 1, 1], [], []>} : vector<1x30xf32>, vector<30x50xf32>, vector<1x50xf32> -> vector<1x50xf32>
    %422 = arith.addf %411, %421 : vector<1x50xf32>
    %c90 = arith.constant 90 : index
    %c0_419 = arith.constant 0 : index
    %423 = vector.load %arg16[%c90, %c0_419] : memref<95x30xf32, #tpu.memory_space<vmem>>, vector<5x30xf32>
    %cst_420 = arith.constant dense<0xFF800000> : vector<30xf32>
    %424 = vector.multi_reduction <maximumf>, %423, %cst_420 [0] : vector<5x30xf32> to vector<30xf32>
    %425 = vector.shape_cast %424 : vector<30xf32> to vector<1x30xf32>
    %c0_421 = arith.constant 0 : index
    %c0_422 = arith.constant 0 : index
    %426 = vector.load %arg5[%c0_421, %c0_422] : memref<1x30xf32, #tpu.memory_space<vmem>>, vector<1x30xf32>
    %427 = arith.addf %425, %426 : vector<1x30xf32>
    %cst_423 = arith.constant 0.000000e+00 : f32
    %428 = vector.broadcast %cst_423 : f32 to vector<1x30xf32>
    %429 = arith.maximumf %427, %428 : vector<1x30xf32>
    %c18 = arith.constant 18 : index
    %c0_424 = arith.constant 0 : index
    %c0_425 = arith.constant 0 : index
    %430 = vector.load %arg6[%c18, %c0_424, %c0_425] : memref<19x30x50xf32, #tpu.memory_space<vmem>>, vector<1x30x50xf32>
    %431 = vector.shape_cast %430 : vector<1x30x50xf32> to vector<30x50xf32>
    %cst_426 = arith.constant dense<0.000000e+00> : vector<1x50xf32>
    %432 = tpu.matmul %429, %431, %cst_426 {dimension_numbers = #tpu.dot_dimension_numbers<[1], [0], [0], [1], [0, 0, 1, 1], [], []>} : vector<1x30xf32>, vector<30x50xf32>, vector<1x50xf32> -> vector<1x50xf32>
    %433 = arith.addf %422, %432 : vector<1x50xf32>
    %cst_427 = arith.constant 0.000000e+00 : f32
    %434 = vector.broadcast %cst_427 : f32 to vector<1x50xf32>
    %435 = arith.maximumf %433, %434 : vector<1x50xf32>
    %c0_428 = arith.constant 0 : index
    %c0_429 = arith.constant 0 : index
    %436 = vector.load %arg8[%c0_428, %c0_429] : memref<50x20xf32, #tpu.memory_space<vmem>>, vector<50x20xf32>
    %cst_430 = arith.constant dense<0.000000e+00> : vector<1x20xf32>
    %437 = tpu.matmul %435, %436, %cst_430 {dimension_numbers = #tpu.dot_dimension_numbers<[1], [0], [0], [1], [0, 0, 1, 1], [], []>} : vector<1x50xf32>, vector<50x20xf32>, vector<1x20xf32> -> vector<1x20xf32>
    %c0_431 = arith.constant 0 : index
    %c0_432 = arith.constant 0 : index
    %438 = vector.load %arg9[%c0_431, %c0_432] : memref<1x20xf32, #tpu.memory_space<vmem>>, vector<1x20xf32>
    %439 = arith.addf %437, %438 : vector<1x20xf32>
    %cst_433 = arith.constant 0.000000e+00 : f32
    %440 = vector.broadcast %cst_433 : f32 to vector<1x20xf32>
    %441 = arith.maximumf %439, %440 : vector<1x20xf32>
    %c0_434 = arith.constant 0 : index
    %c0_435 = arith.constant 0 : index
    %442 = vector.load %arg10[%c0_434, %c0_435] : memref<20x3xf32, #tpu.memory_space<vmem>>, vector<20x3xf32>
    %cst_436 = arith.constant dense<0.000000e+00> : vector<1x3xf32>
    %443 = tpu.matmul %441, %442, %cst_436 {dimension_numbers = #tpu.dot_dimension_numbers<[1], [0], [0], [1], [0, 0, 1, 1], [], []>} : vector<1x20xf32>, vector<20x3xf32>, vector<1x3xf32> -> vector<1x3xf32>
    %c0_437 = arith.constant 0 : index
    %c0_438 = arith.constant 0 : index
    %444 = vector.load %arg11[%c0_437, %c0_438] : memref<1x3xf32, #tpu.memory_space<vmem>>, vector<1x3xf32>
    %445 = arith.addf %443, %444 : vector<1x3xf32>
    %c0_439 = arith.constant 0 : index
    %c0_440 = arith.constant 0 : index
    %c0_441 = arith.constant 0 : index
    %446 = vector.load %arg12[%c0_439, %c0_440, %c0_441] : memref<1x1x3xf32, #tpu.memory_space<vmem>>, vector<1x1x3xf32>
    %447 = vector.shape_cast %446 : vector<1x1x3xf32> to vector<1x3xf32>
    %448 = vector.shape_cast %445 : vector<1x3xf32> to vector<1x1x3xf32>
    tpu.vector_store %arg12[%c0_439, %c0_440, %c0_441], %448 {strides = array<i32>} : memref<1x1x3xf32, #tpu.memory_space<vmem>>, vector<1x1x3xf32>,
    return
  }
  func.func @transform_0(%arg0: i32) -> (i32, i32, i32, i32) {
    %c0_i32 = arith.constant 0 : i32
    %c0_i32_0 = arith.constant 0 : i32
    %c0_i32_1 = arith.constant 0 : i32
    %c0_i32_2 = arith.constant 0 : i32
    return %arg0, %c0_i32, %c0_i32_0, %c0_i32_1 : i32, i32, i32, i32
  }
  func.func @transform_1(%arg0: i32) -> (i32, i32, i32) {
    %c0_i32 = arith.constant 0 : i32
    %c0_i32_0 = arith.constant 0 : i32
    %c0_i32_1 = arith.constant 0 : i32
    %c0_i32_2 = arith.constant 0 : i32
    return %c0_i32, %c0_i32_0, %c0_i32_1 : i32, i32, i32
  }
  func.func @transform_2(%arg0: i32) -> (i32, i32) {
    %c0_i32 = arith.constant 0 : i32
    %c0_i32_0 = arith.constant 0 : i32
    %c0_i32_1 = arith.constant 0 : i32
    return %c0_i32, %c0_i32_0 : i32, i32
  }
  func.func @transform_3(%arg0: i32) -> (i32, i32, i32) {
    %c0_i32 = arith.constant 0 : i32
    %c0_i32_0 = arith.constant 0 : i32
    %c0_i32_1 = arith.constant 0 : i32
    %c0_i32_2 = arith.constant 0 : i32
    return %c0_i32, %c0_i32_0, %c0_i32_1 : i32, i32, i32
  }
  func.func @transform_4(%arg0: i32) -> (i32, i32) {
    %c0_i32 = arith.constant 0 : i32
    %c0_i32_0 = arith.constant 0 : i32
    %c0_i32_1 = arith.constant 0 : i32
    return %c0_i32, %c0_i32_0 : i32, i32
  }
  func.func @transform_5(%arg0: i32) -> (i32, i32, i32) {
    %c0_i32 = arith.constant 0 : i32
    %c0_i32_0 = arith.constant 0 : i32
    %c0_i32_1 = arith.constant 0 : i32
    %c0_i32_2 = arith.constant 0 : i32
    return %c0_i32, %c0_i32_0, %c0_i32_1 : i32, i32, i32
  }
  func.func @transform_6(%arg0: i32) -> (i32, i32) {
    %c0_i32 = arith.constant 0 : i32
    %c0_i32_0 = arith.constant 0 : i32
    %c0_i32_1 = arith.constant 0 : i32
    return %c0_i32, %c0_i32_0 : i32, i32
  }
  func.func @transform_7(%arg0: i32) -> (i32, i32) {
    %c0_i32 = arith.constant 0 : i32
    %c0_i32_0 = arith.constant 0 : i32
    %c0_i32_1 = arith.constant 0 : i32
    return %c0_i32, %c0_i32_0 : i32, i32
  }
  func.func @transform_8(%arg0: i32) -> (i32, i32) {
    %c0_i32 = arith.constant 0 : i32
    %c0_i32_0 = arith.constant 0 : i32
    %c0_i32_1 = arith.constant 0 : i32
    return %c0_i32, %c0_i32_0 : i32, i32
  }
  func.func @transform_9(%arg0: i32) -> (i32, i32) {
    %c0_i32 = arith.constant 0 : i32
    %c0_i32_0 = arith.constant 0 : i32
    %c0_i32_1 = arith.constant 0 : i32
    return %c0_i32, %c0_i32_0 : i32, i32
  }
  func.func @transform_10(%arg0: i32) -> (i32, i32) {
    %c0_i32 = arith.constant 0 : i32
    %c0_i32_0 = arith.constant 0 : i32
    %c0_i32_1 = arith.constant 0 : i32
    return %c0_i32, %c0_i32_0 : i32, i32
  }
  func.func @transform_11(%arg0: i32) -> (i32, i32, i32) {
    %c0_i32 = arith.constant 0 : i32
    %c0_i32_0 = arith.constant 0 : i32
    %c0_i32_1 = arith.constant 0 : i32
    return %arg0, %c0_i32, %c0_i32_0 : i32, i32, i32
  }
}

</mosaic_0001>

<bundles_post_ra>
// kernel: model_forward.1
= control target key start
LH: loop header
LB: loop body
LE: loop exit
PB: predicated region body
PF: predicated region fallthrough
CT: control target
= control target key end

     0   :  { %16 = vsyncpa [#allocation7], 0  ;;  %s21819_s0 = inlined_call_operand.vmem [shape: f32[2,7,97,37], index: 0, kind: input, shape index: {}]   ;;  %s21820_s1 = inlined_call_operand.vmem [shape: f32[3,37,350], index: 1, kind: input, shape index: {}]   ;;  %s21821_s2 = inlined_call_operand.vmem [shape: f32[1,10], index: 2, kind: input, shape index: {}]   ;;  %s21822_s3 = inlined_call_operand.vmem [shape: f32[3,30,30], index: 3, kind: input, shape index: {}]   ;;  %s21823_s4 = inlined_call_operand.vmem [shape: f32[1,30], index: 4, kind: input, shape index: {}]   ;;  %s21824_s5 = inlined_call_operand.vmem [shape: f32[19,30,50], index: 5, kind: input, shape index: {}]   ;;  %s21825_s6 = inlined_call_operand.vmem [shape: f32[1,50], index: 6, kind: input, shape index: {}]   ;;  %s21826_s7 = inlined_call_operand.vmem [shape: f32[50,20], index: 7, kind: input, shape index: {}]   ;;  %s21827_s8 = inlined_call_operand.vmem [shape: f32[1,20], index: 8, kind: input, shape index: {}]   ;;  %s21828_s9 = inlined_call_operand.vmem [shape: f32[20,3], index: 9, kind: input, shape index: {}]   ;;  %s21829_s10 = inlined_call_operand.vmem [shape: f32[1,3], index: 10, kind: input, shape index: {}]   ;;  %s21830_s11 = inlined_call_operand.hbm [shape: f32[2,1,3], index: 11, kind: output, shape index: {}]  }
   0x1   :  { %18 = vsyncpa [#allocation7 + $0x1], 0  ;;  %s16030_s17 = smov 0   ;;  %s16032_s18 = smov 0  }
   0x2   :  { %s16034_s19 = smov 0   ;;  %s16036_s20 = smov 0  }
   0x3 LB: > { %s16051_s21 = sadd.s32 4294967295, %s15948_s20   ;;  %s11742_s22 = sadd.s32 4294967294, %s15948_s20   ;;  %s15948_s20 = sphi %s16036_s20, %s22371_s20   ;;  %s15944_s19 = sphi %s16034_s19, %s22370_s19   ;;  %s15940_s18 = sphi %s16032_s18, %s22369_s18   ;;  %s15936_s17 = sphi %s16030_s17, %s22368_s17  }
   0x4   : > { %s16055_s23 = sadd.s32 1, %s15948_s20   ;;  %s267_s24 = sadd.s32 1, %s15944_s19 }
   0x5   : > { %s264_s25 = ssub.s32 %s15948_s20, %s16055_s23  ;;  %p277_p0 = scmp.ne.s32.totalorder %s15944_s19, %s15940_s18 }
   0x6   : > { %p265_p1 = scmp.eq.s32.totalorder %s264_s25, 0  ;;  %p278_p2 = scmp.eq.s32.totalorder %s16051_s21, 1 }
   0x7   : > { %p283_p3 = scmp.ne.s32.totalorder %s15940_s18, %s15936_s17  ;;  %p284_p4 = scmp.eq.s32.totalorder %s11742_s22, 1 }
   0x8   : > { %s16066_s26 = scalar_select %p265_p1, %s15944_s19, %s267_s24  }
   0x9   : > { %p16068_p5 = por %p278_p2, %p277_p0  ;;  %p16072_p6 = por %p284_p4, %p283_p3 }
   0xa   : > { %21978 = sst [smem:[#allocation9_spill]] %s16066_s26  ;;  %p11745_p7 = scmp.ge.s32.totalorder %s15948_s20, 1 }
   0xb   : > { %p340_p8 = scmp.lt.s32.totalorder %s15948_s20, 3 }
   0xd   : > { %p341_p9 = pnand %p11745_p7, %p340_p8 }
   0xf   : > { %344 = sbr.rel (%p341_p9) target bundleno = 2882 (0xb42), region = 64 }
  0x16   : > { %v11761_v0 = vld [vmem:[%s21820_s1 + $0x80] sm:$0xff]  ;;  %v11764_v1 = vld [vmem:[%s21820_s1 + $0x98] sm:$0xff]  ;;  %v11762_v2 = vld [vmem:[%s21820_s1 + $0x88] sm:$0xff]  ;;  %v21833_v3 = vmov 0.0|0.0   ;;  %v21895_v8 = vmov 0.0   ;;  %p379_p10 = scmp.lt.s32.totalorder %s16051_s21, 1 }
  0x17   : > { %15099 = vmatprep.subr.bf16.mxu1 %v21833_v3  ;;  %v16088_v4 = vpack.c.bf16 %v11764_v1, %v11761_v0  ;;  %v11765_v5 = vld [vmem:[%s21820_s1 + $0xa0] sm:$0xff]  ;;  %v11760_v6 = vld [vmem:[%s21820_s1 + $0x78] sm:$0xff]  ;;  %v11763_v7 = vld [vmem:[%s21820_s1 + $0x90] sm:$0xff]  ;;  %556 = vmatprep.mubr.f32.mxu0 %v21895_v8  ;;  %vm15952_vm0 = vmmov 0   ;;  %vm482_vm1 = vcmask 1044480   ;;  %vm442_vm2 = vcmask 302080  }
  0x18   : > { %v16101_v9 = vpack.c.bf16 %v11765_v5, %v11762_v2  ;;  %v16103_v10 = vpack.c.bf16 %v11763_v7, %v11760_v6  ;;  %v11767_v11 = vld [vmem:[%s21820_s1 + $0xb0] sm:$0xff]  ;;  %v11770_v12 = vld [vmem:[%s21820_s1 + $0xc8] sm:$0xff]  ;;  %v11768_v13 = vld [vmem:[%s21820_s1 + $0xb8] sm:$0xff]  ;;  %13268 = vmatprep.mubr.msk.f32.mxu1 %vm15952_vm0, %v21895_v8  ;;  %s380_s14 = scalar_select %p379_p10, %s16051_s21, 1  ;;  %vm5278_vm3 = vcmask 769024   ;;  %vm5315_vm4 = vcmask 761856  }
  0x19   : > { %21981 = vst [vmem:[#allocation10_spill] sm:$0xff] %v16088_v4  ;;  %14595 = vmatprep.subr.bf16.mxu0 %v16088_v4  ;;  %v16117_v14 = vpack.c.bf16 %v11770_v12, %v11767_v11  ;;  %v11771_v15 = vld [vmem:[%s21820_s1 + $0xd0] sm:$0xff]  ;;  %v11766_v16 = vld [vmem:[%s21820_s1 + $0xa8] sm:$0xff]  ;;  %v11769_v17 = vld [vmem:[%s21820_s1 + $0xc0] sm:$0xff]  ;;  %s15953_s26 = smov 100   ;;  %s15954_s24 = smov 50  }
  0x1a   : > { %21982 = vst [vmem:[#allocation11_spill] sm:$0xff] %v16101_v9  ;;  %21983 = vst [vmem:[#allocation12_spill] sm:$0xff] %v16103_v10  ;;  %15102 = vmatpush3.bf16.msra.mxu1 %v16101_v9  ;;  %14597 = vmatpush1.bf16.msra.mxu0 %v16103_v10  ;;  %v16131_v18 = vpack.c.bf16 %v11771_v15, %v11768_v13  ;;  %v16133_v19 = vpack.c.bf16 %v11769_v17, %v11766_v16  ;;  %s15774_s15 = smul.u32 728, %s380_s14  ;;  %v16140_v20 = vld [vmem:[%s21820_s1 + $0xe0] sm:$0x1f]  ;;  %v399_v21 = vld [vmem:[%s21820_s1 + $0x10] sm:$0xff] }
  0x1b   : > { %15100 = vmatprep.subr.bf16.mxu1 %v21833_v3  ;;  %14599 = vmatprep.subr.bf16.mxu0 %v16117_v14  ;;  %v402_v22 = vld [vmem:[%s21820_s1 + $0x28] sm:$0xff]  ;;  %v16166_v24 = vld [vmem:[%s21820_s1 + $0xd8] sm:$0x1f]  ;;  %v405_v28 = vld [vmem:[%s21820_s1 + $0x40] sm:$0xff]  ;;  %s15956_s25 = smov 22   ;;  %s15957_s30 = smov 44  }
  0x1c   : > { %21984 = vst [vmem:[#allocation13_spill] sm:$0xff] %v16131_v18  ;;  %21985 = vst [vmem:[#allocation14_spill] sm:$0xff] %v16133_v19  ;;  %s16145_s29 = scalar_lea.vmem %s21819_s0, %s15774_s15  ;;  %v16161_v23 = vld [vmem:[%s21820_s1 + $0xe8] sm:$0x1f]  ;;  %v16171_v26 = vpack.c.bf16 %v402_v22, %v399_v21  ;;  %v408_v29 = vld [vmem:[%s21820_s1 + $0x58] sm:$0xff]  ;;  %s15958_s12 = smov 122  }
  0x1d   : > { %v16169_v25 = vld [vmem:[%s16145_s29 + $0xa8] sm:$0xff]  ;;  %v16193_v30 = vld [vmem:[%s16145_s29 + $0xb0] sm:$0xff]  ;;  %v16201_v32 = vpack.c.bf16 %v408_v29, %v405_v28  ;;  %v16213_v33 = vld [vmem:[%s16145_s29 + $0xb8] sm:$0xff]  ;;  %s15959_s13 = smov 108   ;;  %s15960_s14 = smov 118   ;;  %vm6129_vm5 = vcmask 441344  }
  0x1e   : > { %15103 = vmatpush3.bf16.msra.mxu1 %v16131_v18  ;;  %14601 = vmatpush1.bf16.msra.mxu0 %v16133_v19  ;;  %v16174_v27 = vld [vmem:[%s16145_s29 + $0x68] sm:$0xff]  ;;  %v16199_v31 = vld [vmem:[%s16145_s29 + $0x70] sm:$0xff]  ;;  %v16218_v34 = vld [vmem:[%s16145_s29 + $0x78] sm:$0xff]  ;;  %s21974_s15 = smov 98   ;;  %s15962_s16 = smov 88   ;;  %vm6166_vm6 = vcmask 434176  }
  0x1f   : > { %15101 = vmatprep.subr.mxu1 %v21895_v8  ;;  %11775 = vmatprep.subr.msk.mxu0 %vm482_vm1, %v16140_v20  ;;  %v16224_v35 = vld [vmem:[%s21820_s1 + $0x70] sm:$0x1f]  ;;  %v398_v36 = vld [vmem:[%s21820_s1 + $0x8] sm:$0xff]  ;;  %v401_v37 = vld [vmem:[%s21820_s1 + $0x20] sm:$0xff]  ;;  %vm5473_vm7 = vcmask 965632   ;;  %vm5656_vm8 = vcmask 883712  }
  0x20   : > { %v16241_v38 = vld [vmem:[%s16145_s29 + $0xc0] sm:$0xff]  ;;  %v16249_v40 = vpack.c.bf16 %v401_v37, %v398_v36  ;;  %v16262_v41 = vld [vmem:[%s16145_s29 + $0xc8] sm:$0x1]  ;;  %v11851_v44 = vld [vmem:[%s21820_s1 + $0x118] sm:$0xff]  ;;  %vm5839_vm9 = vcmask 801792   ;;  %vm6022_vm10 = vcmask 719872  }
  0x21   : > { %v16245_v39 = vld [vmem:[%s16145_s29 + $0x80] sm:$0xff]  ;;  %v16266_v42 = vld [vmem:[%s16145_s29 + $0x88] sm:$0xff]  ;;  %v16288_v47 = vld [vmem:[%s16145_s29 + $0x90] sm:$0xff]  ;;  %vm6214_vm11 = vcmask 80896   ;;  %vm7081_vm12 = vcmask 1045504   ;;  %vm15968_vm13 = vmmov 1  }
  0x22   : > { %15104 = vmatpush3.msk.msra.mxu1 %vm482_vm1, %v16161_v23  ;;  %11776 = vmatpush1.msk.msra.mxu0 %vm482_vm1, %v16166_v24  ;;  %21986 = vst [vmem:[#allocation15_spill] sm:$0xff] %v16249_v40  ;;  %v11848_v43 = vld [vmem:[%s21820_s1 + $0x100] sm:$0xff]  ;;  %v11854_v48 = vld [vmem:[%s21820_s1 + $0x130] sm:$0xff]  ;;  %v11857_v49 = vld [vmem:[%s21820_s1 + $0x148] sm:$0xff]  ;;  %vm6227_vm15 = vcmask 73728   ;;  %s12614_s22 = sshll.u32 %s16051_s21, 4 }
  0x23   : > { %13269 = vmatmul.mubr.msk.f32.vlgmr.msra.gmra.mrb[0].mxu1 %vm442_vm2, %v16169_v25  ;;  %14616 = vmatprep.subr.bf16.mxu1 %v21833_v3  ;;  %v16282_v45 = vld [vmem:[%s16145_s29] sm:$0xff]  ;;  %v16284_v46 = vpack.c.bf16 %v11851_v44, %v11848_v43  ;;  %v16302_v50 = vld [vmem:[%s16145_s29 + $0x8] sm:$0xff]  ;;  %v16308_v51 = vld [vmem:[%s16145_s29 + $0x98] sm:$0xff]  ;;  %v16310_v52 = vpack.c.bf16 %v11857_v49, %v11854_v48  ;;  %s15969_s21 = smov [#allocation6]  }
  0x24   : > { %11777 = vmatmul.mubr.msk.f32.vlgmr.msra.gmra.mrb[0].mxu0 %vm442_vm2, %v16174_v27  ;;  %14618 = vmatpush3.bf16.msra.mxu1 %v16171_v26  ;;  %v16320_v53 = vld [vmem:[%s16145_s29 + $0x10] sm:$0xff]  ;;  %v16324_v54 = vld [vmem:[%s16145_s29 + $0xa0] sm:$0xff]  ;;  %v16340_v56 = vld [vmem:[%s16145_s29 + $0x18] sm:$0xff] }
  0x25   : > { %13271 = vmatprep.mubr.msk.f32.mxu1 %vm15952_vm0, %v21895_v8  ;;  %562 = vmatprep.mubr.f32.mxu0 %v21895_v8  ;;  %v16331_v55 = vld [vmem:[%s21820_s1 + $0x160] sm:$0x1f]  ;;  %v16363_v58 = vld [vmem:[%s16145_s29 + $0x28] sm:$0xff]  ;;  %v16373_v59 = vld [vmem:[%s16145_s29 + $0x30] sm:$0xff] }
  0x26   : > { %14619 = vmatprep.subr.bf16.mxu1 %v21833_v3  ;;  %14602 = vmatprep.subr.bf16.mxu0 %v21833_v3  ;;  %v16353_v57 = vld [vmem:[%s16145_s29 + $0x20] sm:$0xff]  ;;  %v16383_v60 = vld [vmem:[%s16145_s29 + $0x38] sm:$0xff]  ;;  %v407_v0 = vld [vmem:[%s21820_s1 + $0x50] sm:$0xff] }
  0x27   : > { %13272 = vmatmul.mubr.msk.f32.gmra.mrb[2].mxu1 %vm442_vm2, %v16193_v30  ;;  %14604 = vmatpush3.bf16.msra.mxu0 %v16101_v9  ;;  %v397_v61 = vld [vmem:[%s21820_s1] sm:$0xff]  ;;  %v400_v62 = vld [vmem:[%s21820_s1 + $0x18] sm:$0xff]  ;;  %v403_v6 = vld [vmem:[%s21820_s1 + $0x30] sm:$0xff] }
  0x28   : > { %11778 = vmatmul.mubr.msk.f32.gmra.mrb[2].mxu0 %vm442_vm2, %v16199_v31  ;;  %13274 = vmatprep.mubr.msk.f32.mxu1 %vm15952_vm0, %v21895_v8  ;;  %v404_v63 = vld [vmem:[%s21820_s1 + $0x38] sm:$0xff]  ;;  %v16405_v1 = vld [vmem:[%s16145_s29 + $0x40] sm:$0xff]  ;;  %v16409_v2 = vpack.c.bf16 %v400_v62, %v397_v61  ;;  %v406_v7 = vld [vmem:[%s21820_s1 + $0x48] sm:$0xff] }
  0x29   : > { %568 = vmatprep.mubr.f32.mxu0 %v21895_v8  ;;  %14621 = vmatpush3.bf16.msra.mxu1 %v16201_v32  ;;  %v16411_v5 = vpack.c.bf16 %v407_v0, %v404_v63  ;;  %v16426_v11 = vld [vmem:[%s16145_s29 + $0x48] sm:$0xff]  ;;  %v16431_v12 = vpack.c.bf16 %v406_v7, %v403_v6  ;;  %v11847_v15 = vld [vmem:[%s21820_s1 + $0xf8] sm:$0xff]  ;;  %v11850_v16 = vld [vmem:[%s21820_s1 + $0x110] sm:$0xff] }
  0x2a   : > { %13291 = vmatprep.subr.mxu1 %v21895_v8  ;;  %14605 = vmatprep.subr.bf16.mxu0 %v21833_v3  ;;  %v16439_v13 = vld [vmem:[%s21820_s1 + $0x68] sm:$0x1f]  ;;  %v16452_v17 = vld [vmem:[%s16145_s29 + $0x50] sm:$0xff]  ;;  %v16462_v21 = vld [vmem:[%s21820_s1 + $0x60] sm:$0x1f]  ;;  %v16464_v22 = vpack.c.bf16 %v11850_v16, %v11847_v15 }
  0x2b   : > { %13275 = vmatmul.mubr.msk.f32.gmra.mrb[4].mxu1 %vm442_vm2, %v16213_v33  ;;  %14607 = vmatpush3.bf16.msra.mxu0 %v16131_v18  ;;  %v16473_v28 = vld [vmem:[%s16145_s29 + $0x58] sm:$0xff]  ;;  %v16487_v29 = vld [vmem:[%s16145_s29 + $0x60] sm:$0x1]  ;;  %v16498_v36 = vld [vmem:[%s16145_s29 + $0xd0] sm:$0xff] }
  0x2c   : > { %11779 = vmatmul.mubr.msk.f32.gmra.mrb[4].mxu0 %vm442_vm2, %v16218_v34  ;;  %13277 = vmatprep.mubr.msk.f32.mxu1 %vm15952_vm0, %v21895_v8  ;;  %21987 = vst [vmem:[#allocation16_spill] sm:$0xff] %v16464_v22  ;;  %v16508_v37 = vld [vmem:[%s16145_s29 + $0xd8] sm:$0xff]  ;;  %v16522_v43 = vld [vmem:[%s16145_s29 + $0xe0] sm:$0xff]  ;;  %v11846_v44 = vld [vmem:[%s21820_s1 + $0xf0] sm:$0xff] }
  0x2d   : > { %574 = vmatprep.mubr.f32.mxu0 %v21895_v8  ;;  %13292 = vmatpush3.msk.msra.mxu1 %vm482_vm1, %v16224_v35  ;;  %v11849_v48 = vld [vmem:[%s21820_s1 + $0x108] sm:$0xff]  ;;  %v11856_v61 = vld [vmem:[%s21820_s1 + $0x140] sm:$0xff]  ;;  %v11855_v7 = vld [vmem:[%s21820_s1 + $0x138] sm:$0xff] }
  0x2e   : > { %14630 = vmatprep.subr.bf16.mxu1 %v21833_v3  ;;  %13242 = vmatprep.subr.mxu0 %v21895_v8  ;;  %v11853_v49 = vld [vmem:[%s21820_s1 + $0x128] sm:$0xff]  ;;  %v16552_v63 = vpack.c.bf16 %v11849_v48, %v11846_v44  ;;  %v11852_v6 = vld [vmem:[%s21820_s1 + $0x120] sm:$0xff]  ;;  %v16570_v15 = vld [vmem:[%s16145_s29 + $0xf0] sm:$0xff] }
  0x2f   : > { %13278 = vmatmul.mubr.msk.f32.gmra.mrb[6].mxu1 %vm442_vm2, %v16241_v38  ;;  %13243 = vmatpush3.msk.msra.mxu0 %vm482_vm1, %v16161_v23  ;;  %v16547_v62 = vld [vmem:[%s16145_s29 + $0xe8] sm:$0xff]  ;;  %v16555_v0 = vpack.c.bf16 %v11856_v61, %v11853_v49  ;;  %v16574_v16 = vpack.c.bf16 %v11855_v7, %v11852_v6  ;;  %v16589_v44 = vld [vmem:[%s16145_s29 + $0xf8] sm:$0xff]  ;;  %v16598_v48 = vld [vmem:[%s21820_s1 + $0x150] sm:$0x1f] }
  0x30   : > { %11780 = vmatmul.mubr.msk.f32.gmra.mrb[6].mxu0 %vm442_vm2, %v16245_v39  ;;  %13280 = vmatprep.mubr.msk.f32.mxu1 %vm15952_vm0, %v21895_v8  ;;  %21988 = vst [vmem:[#allocation17_spill] sm:$0xff] %v16552_v63  ;;  %v16630_v49 = vld [vmem:[%s16145_s29 + $0x110] sm:$0xff]  ;;  %v17027_v6 = vld [vmem:[%s16145_s29 + $0x198] sm:$0x1]  ;;  %vm19882_vm14 = vmpackc.low %vm7081_vm12, %vm15968_vm13  ;;  %vm6687_vm12 = vcmask 401728   ;;  %vm6894_vm13 = vcmask 483728  }
  0x31   : > { %580 = vmatprep.mubr.f32.mxu0 %v21895_v8  ;;  %14609 = vmatprep.subr.bf16.mxu0 %v16249_v40  ;;  %21989 = vst [vmem:[#allocation18_spill] sm:$0xff] %v16555_v0  ;;  %21990 = vst [vmem:[#allocation19_spill] sm:$0xff] %v16574_v16 }
  0x32   : > { %21993 = vst [vmem:[#allocation22_spill] sm:$0xff] %v17027_v6 }
  0x33   : > { %13281 = vmatmul.mubr.msk.f32.gmra.mrb[8].mxu1 %vm442_vm2, %v16262_v41 }
  0x34   : > { %11781 = vmatmul.mubr.msk.f32.gmra.mrb[8].mxu0 %vm442_vm2, %v16266_v42  ;;  %13293 = vmatprep.mubr.msk.f32.mxu1 %vm15952_vm0, %v21895_v8 }
  0x35   : > { %586 = vmatprep.mubr.f32.mxu0 %v21895_v8 }
  0x37   : > { %13294 = vmatmul.mubr.msk.f32.vlgmr.msra.gmra.mrb[10].mxu1 %vm442_vm2, %v16282_v45 }
  0x38   : > { %11782 = vmatmul.mubr.msk.f32.gmra.mrb[10].mxu0 %vm442_vm2, %v16288_v47  ;;  %14632 = vmatpush3.bf16.msra.mxu1 %v16284_v46 }
  0x39   : > { %13296 = vmatprep.mubr.msk.f32.mxu1 %vm15952_vm0, %v21895_v8  ;;  %592 = vmatprep.mubr.f32.mxu0 %v21895_v8 }
  0x3a   : > { %14633 = vmatprep.subr.bf16.mxu1 %v21833_v3 }
  0x3b   : > { %13297 = vmatmul.mubr.msk.f32.gmra.mrb[12].mxu1 %vm442_vm2, %v16302_v50 }
  0x3c   : > { %11783 = vmatmul.mubr.msk.f32.gmra.mrb[12].mxu0 %vm442_vm2, %v16308_v51  ;;  %13299 = vmatprep.mubr.msk.f32.mxu1 %vm15952_vm0, %v21895_v8 }
  0x3d   : > { %598 = vmatprep.mubr.f32.mxu0 %v21895_v8  ;;  %14635 = vmatpush3.bf16.msra.mxu1 %v16310_v52 }
  0x3e   : > { %13340 = vmatprep.subr.mxu1 %v21895_v8 }
  0x3f   : > { %13300 = vmatmul.mubr.msk.f32.gmra.mrb[14].mxu1 %vm442_vm2, %v16320_v53 }
  0x40   : > { %11784 = vmatmul.mubr.msk.f32.gmra.mrb[14].mxu0 %vm442_vm2, %v16324_v54  ;;  %13302 = vmatprep.mubr.msk.f32.mxu1 %vm15952_vm0, %v21895_v8 }
  0x41   : > { %604 = vmatprep.mubr.f32.mxu0 %v21895_v8  ;;  %13341 = vmatpush3.msk.msra.mxu1 %vm482_vm1, %v16331_v55 }
  0x42   : > { %14644 = vmatprep.subr.bf16.mxu1 %v21833_v3 }
  0x43   : > { %13303 = vmatmul.mubr.msk.f32.gmra.mrb[16].mxu1 %vm442_vm2, %v16340_v56 }
  0x44   : > { %11785 = vmatmul.mubr.msk.f32.gmra.mrb[16].mxu0 %vm442_vm2, %v16169_v25  ;;  %13305 = vmatprep.mubr.msk.f32.mxu1 %vm15952_vm0, %v21895_v8 }
  0x45   : > { %610 = vmatprep.mubr.f32.mxu0 %v21895_v8 }
  0x47   : > { %13306 = vmatmul.mubr.msk.f32.gmra.mrb[18].mxu1 %vm442_vm2, %v16353_v57 }
  0x48   : > { %11786 = vmatmul.mubr.msk.f32.gmra.mrb[18].mxu0 %vm442_vm2, %v16193_v30  ;;  %13308 = vmatprep.mubr.msk.f32.mxu1 %vm15952_vm0, %v21895_v8 }
  0x49   : > { %616 = vmatprep.mubr.f32.mxu0 %v21895_v8 }
  0x4b   : > { %13309 = vmatmul.mubr.msk.f32.gmra.mrb[20].mxu1 %vm442_vm2, %v16363_v58 }
  0x4c   : > { %11787 = vmatmul.mubr.msk.f32.gmra.mrb[20].mxu0 %vm442_vm2, %v16213_v33  ;;  %13311 = vmatprep.mubr.msk.f32.mxu1 %vm15952_vm0, %v21895_v8 }
  0x4d   : > { %622 = vmatprep.mubr.f32.mxu0 %v21895_v8 }
  0x4f   : > { %13312 = vmatmul.mubr.msk.f32.gmra.mrb[22].mxu1 %vm442_vm2, %v16373_v59 }
  0x50   : > { %11788 = vmatmul.mubr.msk.f32.gmra.mrb[22].mxu0 %vm442_vm2, %v16241_v38  ;;  %13314 = vmatprep.mubr.msk.f32.mxu1 %vm15952_vm0, %v21895_v8 }
  0x51   : > { %628 = vmatprep.mubr.f32.mxu0 %v21895_v8 }
  0x53   : > { %13315 = vmatmul.mubr.msk.f32.gmra.mrb[24].mxu1 %vm442_vm2, %v16383_v60 }
  0x54   : > { %11789 = vmatmul.mubr.msk.f32.gmra.mrb[24].mxu0 %vm442_vm2, %v16262_v41  ;;  %13317 = vmatprep.mubr.msk.f32.mxu1 %vm15952_vm0, %v21895_v8 }
  0x55   : > { %13244 = vmatprep.mubr.msk.f32.mxu0 %vm15952_vm0, %v21895_v8 }
  0x57   : > { %13318 = vmatmul.mubr.msk.f32.gmra.mrb[0].mxu1 %vm442_vm2, %v16405_v1 }
  0x58   : > { %13245 = vmatmul.mubr.msk.f32.vlgmr.msra.gmra.mrb[26].mxu0 %vm442_vm2, %v16174_v27  ;;  %13320 = vmatprep.mubr.msk.f32.mxu1 %vm15952_vm0, %v21895_v8 }
  0x59   : > { %13247 = vmatprep.mubr.msk.f32.mxu0 %vm15952_vm0, %v21895_v8  ;;  %14611 = vmatpush1.bf16.msra.mxu0 %v16409_v2 }
  0x5a   : > { %14613 = vmatprep.subr.bf16.mxu0 %v16411_v5 }
  0x5b   : > { %13321 = vmatmul.mubr.msk.f32.gmra.mrb[2].mxu1 %vm442_vm2, %v16426_v11 }
  0x5c   : > { %13248 = vmatmul.mubr.msk.f32.gmra.mrb[28].mxu0 %vm442_vm2, %v16199_v31  ;;  %13323 = vmatprep.mubr.msk.f32.mxu1 %vm15952_vm0, %v21895_v8 }
  0x5d   : > { %13250 = vmatprep.mubr.msk.f32.mxu0 %vm15952_vm0, %v21895_v8  ;;  %14615 = vmatpush1.bf16.msra.mxu0 %v16431_v12 }
  0x5e   : > { %11804 = vmatprep.subr.msk.mxu0 %vm482_vm1, %v16439_v13 }
  0x5f   : > { %13324 = vmatmul.mubr.msk.f32.gmra.mrb[4].mxu1 %vm442_vm2, %v16452_v17 }
  0x60   : > { %13251 = vmatmul.mubr.msk.f32.gmra.mrb[30].mxu0 %vm442_vm2, %v16218_v34  ;;  %13326 = vmatprep.mubr.msk.f32.mxu1 %vm15952_vm0, %v21895_v8 }
  0x61   : > { %13253 = vmatprep.mubr.msk.f32.mxu0 %vm15952_vm0, %v21895_v8  ;;  %11805 = vmatpush1.msk.msra.mxu0 %vm482_vm1, %v16462_v21 }
  0x62   : > { %14623 = vmatprep.subr.bf16.mxu0 %v16464_v22 }
  0x63   : > { %13327 = vmatmul.mubr.msk.f32.gmra.mrb[6].mxu1 %vm442_vm2, %v16473_v28 }
  0x64   : > { %13254 = vmatmul.mubr.msk.f32.gmra.mrb[32].mxu0 %vm442_vm2, %v16245_v39  ;;  %13329 = vmatprep.mubr.msk.f32.mxu1 %vm15952_vm0, %v21895_v8 }
  0x65   : > { %13256 = vmatprep.mubr.msk.f32.mxu0 %vm15952_vm0, %v21895_v8 }
  0x67   : > { %13330 = vmatmul.mubr.msk.f32.gmra.mrb[8].mxu1 %vm442_vm2, %v16487_v29 }
  0x68   : > { %13257 = vmatmul.mubr.msk.f32.gmra.mrb[34].mxu0 %vm442_vm2, %v16266_v42  ;;  %13342 = vmatprep.mubr.msk.f32.mxu1 %vm15952_vm0, %v21895_v8 }
  0x69   : > { %13259 = vmatprep.mubr.msk.f32.mxu0 %vm15952_vm0, %v21895_v8 }
  0x6b   : > { %13343 = vmatmul.mubr.msk.f32.vlgmr.msra.gmra.mrb[10].mxu1 %vm442_vm2, %v16498_v36 }
  0x6c   : > { %13260 = vmatmul.mubr.msk.f32.gmra.mrb[36].mxu0 %vm442_vm2, %v16288_v47  ;;  %14646 = vmatpush3.bf16.msra.mxu1 %v16101_v9 }
  0x6d   : > { %13345 = vmatprep.mubr.msk.f32.mxu1 %vm15952_vm0, %v21895_v8  ;;  %13262 = vmatprep.mubr.msk.f32.mxu0 %vm15952_vm0, %v21895_v8 }
  0x6e   : > { %14647 = vmatprep.subr.bf16.mxu1 %v21833_v3 }
  0x6f   : > { %13346 = vmatmul.mubr.msk.f32.gmra.mrb[12].mxu1 %vm442_vm2, %v16508_v37 }
  0x70   : > { %13263 = vmatmul.mubr.msk.f32.gmra.mrb[38].mxu0 %vm442_vm2, %v16308_v51  ;;  %13348 = vmatprep.mubr.msk.f32.mxu1 %vm15952_vm0, %v21895_v8 }
  0x71   : > { %13265 = vmatprep.mubr.msk.f32.mxu0 %vm15952_vm0, %v21895_v8  ;;  %14649 = vmatpush3.bf16.msra.mxu1 %v16131_v18 }
  0x72   : > { %13389 = vmatprep.subr.mxu1 %v21895_v8 }
  0x73   : > { %13349 = vmatmul.mubr.msk.f32.gmra.mrb[14].mxu1 %vm442_vm2, %v16522_v43 }
  0x74   : > { %13266 = vmatmul.mubr.msk.f32.gmra.mrb[40].mxu0 %vm442_vm2, %v16324_v54  ;;  %13351 = vmatprep.mubr.msk.f32.mxu1 %vm15952_vm0, %v21895_v8 }
  0x75   : > { %877 = vmatprep.mubr.f32.mxu0 %v21895_v8  ;;  %13390 = vmatpush3.msk.msra.mxu1 %vm482_vm1, %v16161_v23 }
  0x76   : > { %14658 = vmatprep.subr.bf16.mxu1 %v21833_v3 }
  0x77   : > { %13352 = vmatmul.mubr.msk.f32.gmra.mrb[16].mxu1 %vm442_vm2, %v16547_v62 }
  0x78   : > { %11806 = vmatmul.mubr.msk.f32.vlgmr.msra.gmra.mrb[0].mxu0 %vm442_vm2, %v16282_v45  ;;  %13354 = vmatprep.mubr.msk.f32.mxu1 %vm15952_vm0, %v21895_v8  ;;  %v16582_v45 = vld [vmem:[%s21820_s1 + $0x158] sm:$0x1f] }
  0x79   : > { %883 = vmatprep.mubr.f32.mxu0 %v21895_v8  ;;  %14625 = vmatpush1.bf16.msra.mxu0 %v16552_v63 }
  0x7a   : > { %14627 = vmatprep.subr.bf16.mxu0 %v16555_v0 }
  0x7b   : > { %13355 = vmatmul.mubr.msk.f32.gmra.mrb[18].mxu1 %vm442_vm2, %v16570_v15 }
  0x7c   : > { %11807 = vmatmul.mubr.msk.f32.gmra.mrb[2].mxu0 %vm442_vm2, %v16302_v50  ;;  %13357 = vmatprep.mubr.msk.f32.mxu1 %vm15952_vm0, %v21895_v8  ;;  %v16607_v50 = vld [vmem:[%s16145_s29 + $0x100] sm:$0xff] }
  0x7d   : > { %889 = vmatprep.mubr.f32.mxu0 %v21895_v8  ;;  %14629 = vmatpush1.bf16.msra.mxu0 %v16574_v16 }
  0x7e   : > { %11861 = vmatprep.subr.msk.mxu0 %vm482_vm1, %v16582_v45 }
  0x7f   : > { %13358 = vmatmul.mubr.msk.f32.gmra.mrb[20].mxu1 %vm442_vm2, %v16589_v44 }
  0x80   : > { %11808 = vmatmul.mubr.msk.f32.gmra.mrb[4].mxu0 %vm442_vm2, %v16320_v53  ;;  %13360 = vmatprep.mubr.msk.f32.mxu1 %vm15952_vm0, %v21895_v8  ;;  %v16620_v53 = vld [vmem:[%s16145_s29 + $0x108] sm:$0xff] }
  0x81   : > { %895 = vmatprep.mubr.f32.mxu0 %v21895_v8  ;;  %11862 = vmatpush1.msk.msra.mxu0 %vm482_vm1, %v16598_v48 }
  0x82   : > { %14637 = vmatprep.subr.bf16.mxu0 %v16088_v4 }
  0x83   : > { %13361 = vmatmul.mubr.msk.f32.gmra.mrb[22].mxu1 %vm442_vm2, %v16607_v50 }
  0x84   : > { %11809 = vmatmul.mubr.msk.f32.gmra.mrb[6].mxu0 %vm442_vm2, %v16340_v56  ;;  %13363 = vmatprep.mubr.msk.f32.mxu1 %vm15952_vm0, %v21895_v8  ;;  %v16640_v56 = vld [vmem:[%s16145_s29 + $0x118] sm:$0xff] }
  0x85   : > { %901 = vmatprep.mubr.f32.mxu0 %v21895_v8 }
  0x87   : > { %13364 = vmatmul.mubr.msk.f32.gmra.mrb[24].mxu1 %vm442_vm2, %v16620_v53 }
  0x88   : > { %11810 = vmatmul.mubr.msk.f32.gmra.mrb[8].mxu0 %vm442_vm2, %v16353_v57  ;;  %13366 = vmatprep.mubr.msk.f32.mxu1 %vm15952_vm0, %v21895_v8  ;;  %v16650_v57 = vld [vmem:[%s16145_s29 + $0x120] sm:$0xff] }
  0x89   : > { %907 = vmatprep.mubr.f32.mxu0 %v21895_v8 }
  0x8b   : > { %13367 = vmatmul.mubr.msk.f32.gmra.mrb[0].mxu1 %vm442_vm2, %v16630_v49 }
  0x8c   : > { %11811 = vmatmul.mubr.msk.f32.gmra.mrb[10].mxu0 %vm442_vm2, %v16363_v58  ;;  %13369 = vmatprep.mubr.msk.f32.mxu1 %vm15952_vm0, %v21895_v8  ;;  %v16660_v58 = vld [vmem:[%s16145_s29 + $0x128] sm:$0xff] }
  0x8d   : > { %913 = vmatprep.mubr.f32.mxu0 %v21895_v8 }
  0x8f   : > { %13370 = vmatmul.mubr.msk.f32.gmra.mrb[2].mxu1 %vm442_vm2, %v16640_v56 }
  0x90   : > { %11812 = vmatmul.mubr.msk.f32.gmra.mrb[12].mxu0 %vm442_vm2, %v16373_v59  ;;  %13372 = vmatprep.mubr.msk.f32.mxu1 %vm15952_vm0, %v21895_v8  ;;  %v16670_v59 = vld [vmem:[%s16145_s29 + $0x130] sm:$0x1] }
  0x91   : > { %919 = vmatprep.mubr.f32.mxu0 %v21895_v8 }
  0x93   : > { %13373 = vmatmul.mubr.msk.f32.gmra.mrb[4].mxu1 %vm442_vm2, %v16650_v57 }
  0x94   : > { %11813 = vmatmul.mubr.msk.f32.gmra.mrb[14].mxu0 %vm442_vm2, %v16383_v60  ;;  %13375 = vmatprep.mubr.msk.f32.mxu1 %vm15952_vm0, %v21895_v8  ;;  %v16914_v60 = vld [vmem:[%s16145_s29 + $0x148] sm:$0xff] }
  0x95   : > { %925 = vmatprep.mubr.f32.mxu0 %v21895_v8 }
  0x97   : > { %13376 = vmatmul.mubr.msk.f32.gmra.mrb[6].mxu1 %vm442_vm2, %v16660_v58 }
  0x98   : > { %11814 = vmatmul.mubr.msk.f32.gmra.mrb[16].mxu0 %vm442_vm2, %v16405_v1  ;;  %13378 = vmatprep.mubr.msk.f32.mxu1 %vm15952_vm0, %v21895_v8  ;;  %v16926_v1 = vld [vmem:[%s16145_s29 + $0x150] sm:$0xff] }
  0x99   : > { %931 = vmatprep.mubr.f32.mxu0 %v21895_v8 }
  0x9b   : > { %13379 = vmatmul.mubr.msk.f32.gmra.mrb[8].mxu1 %vm442_vm2, %v16670_v59 }
  0x9c   : > { %11815 = vmatmul.mubr.msk.f32.gmra.mrb[18].mxu0 %vm442_vm2, %v16426_v11  ;;  %13391 = vmatprep.mubr.msk.f32.mxu1 %vm15952_vm0, %v21895_v8  ;;  %v16939_v11 = vld [vmem:[%s16145_s29 + $0x158] sm:$0xff] }
  0x9d   : > { %937 = vmatprep.mubr.f32.mxu0 %v21895_v8 }
  0x9f   : > { %13392 = vmatmul.mubr.msk.f32.vlgmr.msra.gmra.mrb[26].mxu1 %vm442_vm2, %v16498_v36 }
  0xa0   : > { %11816 = vmatmul.mubr.msk.f32.gmra.mrb[20].mxu0 %vm442_vm2, %v16452_v17  ;;  %14660 = vmatpush3.bf16.msra.mxu1 %v16171_v26  ;;  %v17007_v17 = vld [vmem:[%s16145_s29 + $0x188] sm:$0xff] }
  0xa1   : > { %13394 = vmatprep.mubr.msk.f32.mxu1 %vm15952_vm0, %v21895_v8  ;;  %943 = vmatprep.mubr.f32.mxu0 %v21895_v8  ;;  %21991 = vst [vmem:[#allocation20_spill] sm:$0xff] %v17007_v17 }
  0xa2   : > { %14661 = vmatprep.subr.bf16.mxu1 %v21833_v3 }
  0xa3   : > { %13395 = vmatmul.mubr.msk.f32.gmra.mrb[28].mxu1 %vm442_vm2, %v16508_v37 }
  0xa4   : > { %11817 = vmatmul.mubr.msk.f32.gmra.mrb[22].mxu0 %vm442_vm2, %v16473_v28  ;;  %13397 = vmatprep.mubr.msk.f32.mxu1 %vm15952_vm0, %v21895_v8 }
  0xa5   : > { %949 = vmatprep.mubr.f32.mxu0 %v21895_v8  ;;  %14663 = vmatpush3.bf16.msra.mxu1 %v16201_v32 }
  0xa6   : > { %13438 = vmatprep.subr.mxu1 %v21895_v8 }
  0xa7   : > { %13398 = vmatmul.mubr.msk.f32.gmra.mrb[30].mxu1 %vm442_vm2, %v16522_v43 }
  0xa8   : > { %11818 = vmatmul.mubr.msk.f32.gmra.mrb[24].mxu0 %vm442_vm2, %v16487_v29  ;;  %13400 = vmatprep.mubr.msk.f32.mxu1 %vm15952_vm0, %v21895_v8 }
  0xa9   : > { %1228 = vmatprep.mubr.f32.mxu0 %v21895_v8  ;;  %13439 = vmatpush3.msk.msra.mxu1 %vm482_vm1, %v16224_v35 }
  0xaa   : > { %14672 = vmatprep.subr.bf16.mxu1 %v21833_v3 }
  0xab   : > { %13401 = vmatmul.mubr.msk.f32.gmra.mrb[32].mxu1 %vm442_vm2, %v16547_v62 }
  0xac   : > { %11863 = vmatmul.mubr.msk.f32.vlgmr.msra.gmra.mrb[0].mxu0 %vm442_vm2, %v16498_v36  ;;  %13403 = vmatprep.mubr.msk.f32.mxu1 %vm15952_vm0, %v21895_v8 }
  0xad   : > { %1234 = vmatprep.mubr.f32.mxu0 %v21895_v8  ;;  %14639 = vmatpush1.bf16.msra.mxu0 %v16103_v10 }
  0xae   : > { %14641 = vmatprep.subr.bf16.mxu0 %v16117_v14 }
  0xaf   : > { %13404 = vmatmul.mubr.msk.f32.gmra.mrb[34].mxu1 %vm442_vm2, %v16570_v15 }
  0xb0   : > { %11864 = vmatmul.mubr.msk.f32.gmra.mrb[2].mxu0 %vm442_vm2, %v16508_v37  ;;  %13406 = vmatprep.mubr.msk.f32.mxu1 %vm15952_vm0, %v21895_v8 }
  0xb1   : > { %1240 = vmatprep.mubr.f32.mxu0 %v21895_v8  ;;  %14643 = vmatpush1.bf16.msra.mxu0 %v16133_v19 }
  0xb2   : > { %11890 = vmatprep.subr.msk.mxu0 %vm482_vm1, %v16140_v20  ;;  %v16892_v20 = vld [vmem:[%s16145_s29 + $0x138] sm:$0xff] }
  0xb3   : > { %13407 = vmatmul.mubr.msk.f32.gmra.mrb[36].mxu1 %vm442_vm2, %v16589_v44 }
  0xb4   : > { %11865 = vmatmul.mubr.msk.f32.gmra.mrb[4].mxu0 %vm442_vm2, %v16522_v43  ;;  %13409 = vmatprep.mubr.msk.f32.mxu1 %vm15952_vm0, %v21895_v8 }
  0xb5   : > { %1246 = vmatprep.mubr.f32.mxu0 %v21895_v8  ;;  %11891 = vmatpush1.msk.msra.mxu0 %vm482_vm1, %v16166_v24  ;;  %v16901_v24 = vld [vmem:[%s16145_s29 + $0x140] sm:$0xff] }
  0xb6   : > { %14651 = vmatprep.subr.bf16.mxu0 %v16249_v40 }
  0xb7   : > { %13410 = vmatmul.mubr.msk.f32.gmra.mrb[38].mxu1 %vm442_vm2, %v16607_v50 }
  0xb8   : > { %11866 = vmatmul.mubr.msk.f32.gmra.mrb[6].mxu0 %vm442_vm2, %v16547_v62  ;;  %13412 = vmatprep.mubr.msk.f32.mxu1 %vm15952_vm0, %v21895_v8 }
  0xb9   : > { %1252 = vmatprep.mubr.f32.mxu0 %v21895_v8 }
  0xbb   : > { %13413 = vmatmul.mubr.msk.f32.gmra.mrb[40].mxu1 %vm442_vm2, %v16620_v53 }
  0xbc   : > { %11867 = vmatmul.mubr.msk.f32.gmra.mrb[8].mxu0 %vm442_vm2, %v16570_v15  ;;  %13415 = vmatprep.mubr.msk.f32.mxu1 %vm15952_vm0, %v21895_v8 }
  0xbd   : > { %1258 = vmatprep.mubr.f32.mxu0 %v21895_v8 }
  0xbf   : > { %13416 = vmatmul.mubr.msk.f32.gmra.mrb[42].mxu1 %vm442_vm2, %v16630_v49 }
  0xc0   : > { %11868 = vmatmul.mubr.msk.f32.gmra.mrb[10].mxu0 %vm442_vm2, %v16589_v44  ;;  %13418 = vmatprep.mubr.msk.f32.mxu1 %vm15952_vm0, %v21895_v8 }
  0xc1   : > { %1264 = vmatprep.mubr.f32.mxu0 %v21895_v8 }
  0xc3   : > { %13419 = vmatmul.mubr.msk.f32.gmra.mrb[44].mxu1 %vm442_vm2, %v16640_v56 }
  0xc4   : > { %11869 = vmatmul.mubr.msk.f32.gmra.mrb[12].mxu0 %vm442_vm2, %v16607_v50  ;;  %13421 = vmatprep.mubr.msk.f32.mxu1 %vm15952_vm0, %v21895_v8 }
  0xc5   : > { %1270 = vmatprep.mubr.f32.mxu0 %v21895_v8 }
  0xc7   : > { %13422 = vmatmul.mubr.msk.f32.gmra.mrb[46].mxu1 %vm442_vm2, %v16650_v57 }
  0xc8   : > { %11870 = vmatmul.mubr.msk.f32.gmra.mrb[14].mxu0 %vm442_vm2, %v16620_v53  ;;  %13424 = vmatprep.mubr.msk.f32.mxu1 %vm15952_vm0, %v21895_v8 }
  0xc9   : > { %1276 = vmatprep.mubr.f32.mxu0 %v21895_v8 }
  0xcb   : > { %13425 = vmatmul.mubr.msk.f32.gmra.mrb[48].mxu1 %vm442_vm2, %v16660_v58 }
  0xcc   : > { %11871 = vmatmul.mubr.msk.f32.gmra.mrb[16].mxu0 %vm442_vm2, %v16630_v49  ;;  %13427 = vmatprep.mubr.msk.f32.mxu1 %vm15952_vm0, %v21895_v8 }
  0xcd   : > { %1282 = vmatprep.mubr.f32.mxu0 %v21895_v8 }
  0xcf   : > { %13428 = vmatmul.mubr.msk.f32.gmra.mrb[50].mxu1 %vm442_vm2, %v16670_v59 }
  0xd0   : > { %11872 = vmatmul.mubr.msk.f32.gmra.mrb[18].mxu0 %vm442_vm2, %v16640_v56  ;;  %13440 = vmatprep.mubr.msk.f32.mxu1 %vm15952_vm0, %v21895_v8 }
  0xd1   : > { %1288 = vmatprep.mubr.f32.mxu0 %v21895_v8 }
  0xd3   : > { %13441 = vmatmul.mubr.msk.f32.vlgmr.msra.gmra.mrb[26].mxu1 %vm442_vm2, %v16174_v27 }
  0xd4   : > { %11873 = vmatmul.mubr.msk.f32.gmra.mrb[20].mxu0 %vm442_vm2, %v16650_v57  ;;  %14674 = vmatpush3.bf16.msra.mxu1 %v16284_v46 }
  0xd5   : > { %13443 = vmatprep.mubr.msk.f32.mxu1 %vm15952_vm0, %v21895_v8  ;;  %1294 = vmatprep.mubr.f32.mxu0 %v21895_v8 }
  0xd6   : > { %14675 = vmatprep.subr.bf16.mxu1 %v21833_v3 }
  0xd7   : > { %13444 = vmatmul.mubr.msk.f32.gmra.mrb[28].mxu1 %vm442_vm2, %v16199_v31 }
  0xd8   : > { %11874 = vmatmul.mubr.msk.f32.gmra.mrb[22].mxu0 %vm442_vm2, %v16660_v58  ;;  %13446 = vmatprep.mubr.msk.f32.mxu1 %vm15952_vm0, %v21895_v8 }
  0xd9   : > { %1300 = vmatprep.mubr.f32.mxu0 %v21895_v8  ;;  %14677 = vmatpush3.bf16.msra.mxu1 %v16310_v52 }
  0xda   : > { %13487 = vmatprep.subr.mxu1 %v21895_v8 }
  0xdb   : > { %13447 = vmatmul.mubr.msk.f32.gmra.mrb[30].mxu1 %vm442_vm2, %v16218_v34 }
  0xdc   : > { %11875 = vmatmul.mubr.msk.f32.gmra.mrb[24].mxu0 %vm442_vm2, %v16670_v59  ;;  %13449 = vmatprep.mubr.msk.f32.mxu1 %vm15952_vm0, %v21895_v8 }
  0xdd   : > { %1540 = vmatprep.mubr.f32.mxu0 %v21895_v8  ;;  %13488 = vmatpush3.msk.msra.mxu1 %vm482_vm1, %v16331_v55 }
  0xde   : > { %14686 = vmatprep.subr.bf16.mxu1 %v21833_v3 }
  0xdf   : > { %13450 = vmatmul.mubr.msk.f32.gmra.mrb[32].mxu1 %vm442_vm2, %v16245_v39 }
  0xe0   : > { %11892 = vmatmul.mubr.msk.f32.vlgmr.msra.gmra.mrb[42].mxu0 %vm442_vm2, %v16498_v36  ;;  %13452 = vmatprep.mubr.msk.f32.mxu1 %vm15952_vm0, %v21895_v8 }
  0xe1   : > { %1546 = vmatprep.mubr.f32.mxu0 %v21895_v8  ;;  %14653 = vmatpush1.bf16.msra.mxu0 %v16409_v2 }
  0xe2   : > { %14655 = vmatprep.subr.bf16.mxu0 %v16411_v5 }
  0xe3   : > { %13453 = vmatmul.mubr.msk.f32.gmra.mrb[34].mxu1 %vm442_vm2, %v16266_v42 }
  0xe4   : > { %11893 = vmatmul.mubr.msk.f32.gmra.mrb[44].mxu0 %vm442_vm2, %v16508_v37  ;;  %13455 = vmatprep.mubr.msk.f32.mxu1 %vm15952_vm0, %v21895_v8 }
  0xe5   : > { %1552 = vmatprep.mubr.f32.mxu0 %v21895_v8  ;;  %14657 = vmatpush1.bf16.msra.mxu0 %v16431_v12 }
  0xe6   : > { %11919 = vmatprep.subr.msk.mxu0 %vm482_vm1, %v16439_v13 }
  0xe7   : > { %13456 = vmatmul.mubr.msk.f32.gmra.mrb[36].mxu1 %vm442_vm2, %v16288_v47 }
  0xe8   : > { %11894 = vmatmul.mubr.msk.f32.gmra.mrb[46].mxu0 %vm442_vm2, %v16522_v43  ;;  %13458 = vmatprep.mubr.msk.f32.mxu1 %vm15952_vm0, %v21895_v8 }
  0xe9   : > { %1558 = vmatprep.mubr.f32.mxu0 %v21895_v8  ;;  %11920 = vmatpush1.msk.msra.mxu0 %vm482_vm1, %v16462_v21 }
  0xea   : > { %14665 = vmatprep.subr.bf16.mxu0 %v16464_v22 }
  0xeb   : > { %13459 = vmatmul.mubr.msk.f32.gmra.mrb[38].mxu1 %vm442_vm2, %v16308_v51 }
  0xec   : > { %11895 = vmatmul.mubr.msk.f32.gmra.mrb[48].mxu0 %vm442_vm2, %v16547_v62  ;;  %13461 = vmatprep.mubr.msk.f32.mxu1 %vm15952_vm0, %v21895_v8 }
  0xed   : > { %1564 = vmatprep.mubr.f32.mxu0 %v21895_v8 }
  0xef   : > { %13462 = vmatmul.mubr.msk.f32.gmra.mrb[40].mxu1 %vm442_vm2, %v16324_v54 }
  0xf0   : > { %11896 = vmatmul.mubr.msk.f32.gmra.mrb[50].mxu0 %vm442_vm2, %v16570_v15  ;;  %13464 = vmatprep.mubr.msk.f32.mxu1 %vm15952_vm0, %v21895_v8 }
  0xf1   : > { %1570 = vmatprep.mubr.f32.mxu0 %v21895_v8 }
  0xf3   : > { %13465 = vmatmul.mubr.msk.f32.gmra.mrb[42].mxu1 %vm442_vm2, %v16169_v25 }
  0xf4   : > { %11897 = vmatmul.mubr.msk.f32.gmra.mrb[52].mxu0 %vm442_vm2, %v16589_v44  ;;  %13467 = vmatprep.mubr.msk.f32.mxu1 %vm15952_vm0, %v21895_v8 }
  0xf5   : > { %1576 = vmatprep.mubr.f32.mxu0 %v21895_v8 }
  0xf7   : > { %13468 = vmatmul.mubr.msk.f32.gmra.mrb[44].mxu1 %vm442_vm2, %v16193_v30 }
  0xf8   : > { %11898 = vmatmul.mubr.msk.f32.gmra.mrb[54].mxu0 %vm442_vm2, %v16607_v50  ;;  %13470 = vmatprep.mubr.msk.f32.mxu1 %vm15952_vm0, %v21895_v8 }
  0xf9   : > { %1582 = vmatprep.mubr.f32.mxu0 %v21895_v8 }
  0xfb   : > { %13471 = vmatmul.mubr.msk.f32.gmra.mrb[46].mxu1 %vm442_vm2, %v16213_v33 }
  0xfc   : > { %11899 = vmatmul.mubr.msk.f32.gmra.mrb[56].mxu0 %vm442_vm2, %v16620_v53  ;;  %13473 = vmatprep.mubr.msk.f32.mxu1 %vm15952_vm0, %v21895_v8 }
  0xfd   : > { %1588 = vmatprep.mubr.f32.mxu0 %v21895_v8 }
  0xff   : > { %13474 = vmatmul.mubr.msk.f32.gmra.mrb[48].mxu1 %vm442_vm2, %v16241_v38 }
 0x100   : > { %11900 = vmatmul.mubr.msk.f32.gmra.mrb[58].mxu0 %vm442_vm2, %v16630_v49  ;;  %13476 = vmatprep.mubr.msk.f32.mxu1 %vm15952_vm0, %v21895_v8 }
 0x101   : > { %1594 = vmatprep.mubr.f32.mxu0 %v21895_v8 }
 0x103   : > { %13477 = vmatmul.mubr.msk.f32.gmra.mrb[50].mxu1 %vm442_vm2, %v16262_v41 }
 0x104   : > { %11901 = vmatmul.mubr.msk.f32.gmra.mrb[60].mxu0 %vm442_vm2, %v16640_v56  ;;  %13489 = vmatprep.mubr.msk.f32.mxu1 %vm15952_vm0, %v21895_v8 }
 0x105   : > { %1600 = vmatprep.mubr.f32.mxu0 %v21895_v8 }
 0x107   : > { %13490 = vmatmul.mubr.msk.f32.vlgmr.msra.gmra.mrb[26].mxu1 %vm442_vm2, %v16892_v20 }
 0x108   : > { %11902 = vmatmul.mubr.msk.f32.gmra.mrb[62].mxu0 %vm442_vm2, %v16650_v57  ;;  %14688 = vmatpush3.bf16.msra.mxu1 %v16101_v9 }
 0x109   : > { %13492 = vmatprep.mubr.msk.f32.mxu1 %vm15952_vm0, %v21895_v8  ;;  %1606 = vmatprep.mubr.f32.mxu0 %v21895_v8 }
 0x10a   : > { %14689 = vmatprep.subr.bf16.mxu1 %v21833_v3 }
 0x10b   : > { %13493 = vmatmul.mubr.msk.f32.gmra.mrb[28].mxu1 %vm442_vm2, %v16901_v24 }
 0x10c   : > { %11903 = vmatmul.mubr.msk.f32.gmra.mrb[64].mxu0 %vm442_vm2, %v16660_v58  ;;  %13495 = vmatprep.mubr.msk.f32.mxu1 %vm15952_vm0, %v21895_v8 }
 0x10d   : > { %1612 = vmatprep.mubr.f32.mxu0 %v21895_v8  ;;  %14691 = vmatpush3.bf16.msra.mxu1 %v16131_v18 }
 0x10e   : > { %13536 = vmatprep.subr.mxu1 %v21895_v8 }
 0x10f   : > { %13496 = vmatmul.mubr.msk.f32.gmra.mrb[30].mxu1 %vm442_vm2, %v16914_v60 }
 0x110   : > { %11904 = vmatmul.mubr.msk.f32.gmra.mrb[66].mxu0 %vm442_vm2, %v16670_v59  ;;  %13498 = vmatprep.mubr.msk.f32.mxu1 %vm15952_vm0, %v21895_v8 }
 0x111   : > { %1813 = vmatprep.mubr.f32.mxu0 %v21895_v8  ;;  %13537 = vmatpush3.msk.msra.mxu1 %vm482_vm1, %v16161_v23  ;;  %v16951_v23 = vld [vmem:[%s16145_s29 + $0x160] sm:$0xff] }
 0x112   : > { %14700 = vmatprep.subr.bf16.mxu1 %v21833_v3 }
 0x113   : > { %13499 = vmatmul.mubr.msk.f32.gmra.mrb[32].mxu1 %vm442_vm2, %v16926_v1 }
 0x114   : > { %11921 = vmatmul.mubr.msk.f32.vlgmr.msra.gmra.mrb[42].mxu0 %vm442_vm2, %v16174_v27  ;;  %13501 = vmatprep.mubr.msk.f32.mxu1 %vm15952_vm0, %v21895_v8  ;;  %v16964_v27 = vld [vmem:[%s16145_s29 + $0x168] sm:$0xff] }
 0x115   : > { %1819 = vmatprep.mubr.f32.mxu0 %v21895_v8  ;;  %14667 = vmatpush1.bf16.msra.mxu0 %v16552_v63 }
 0x116   : > { %14669 = vmatprep.subr.bf16.mxu0 %v16555_v0 }
 0x117   : > { %13502 = vmatmul.mubr.msk.f32.gmra.mrb[34].mxu1 %vm442_vm2, %v16939_v11 }
 0x118   : > { %11922 = vmatmul.mubr.msk.f32.gmra.mrb[44].mxu0 %vm442_vm2, %v16199_v31  ;;  %13504 = vmatprep.mubr.msk.f32.mxu1 %vm15952_vm0, %v21895_v8  ;;  %v16977_v31 = vld [vmem:[%s16145_s29 + $0x170] sm:$0xff] }
 0x119   : > { %1825 = vmatprep.mubr.f32.mxu0 %v21895_v8  ;;  %14671 = vmatpush1.bf16.msra.mxu0 %v16574_v16 }
 0x11a   : > { %11961 = vmatprep.subr.msk.mxu0 %vm482_vm1, %v16582_v45 }
 0x11b   : > { %13505 = vmatmul.mubr.msk.f32.gmra.mrb[36].mxu1 %vm442_vm2, %v16951_v23 }
 0x11c   : > { %11923 = vmatmul.mubr.msk.f32.gmra.mrb[46].mxu0 %vm442_vm2, %v16218_v34  ;;  %13507 = vmatprep.mubr.msk.f32.mxu1 %vm15952_vm0, %v21895_v8  ;;  %v16987_v34 = vld [vmem:[%s16145_s29 + $0x178] sm:$0xff] }
 0x11d   : > { %1831 = vmatprep.mubr.f32.mxu0 %v21895_v8  ;;  %11962 = vmatpush1.msk.msra.mxu0 %vm482_vm1, %v16598_v48 }
 0x11e   : > { %14679 = vmatprep.subr.bf16.mxu0 %v16088_v4 }
 0x11f   : > { %13508 = vmatmul.mubr.msk.f32.gmra.mrb[38].mxu1 %vm442_vm2, %v16964_v27 }
 0x120   : > { %11924 = vmatmul.mubr.msk.f32.gmra.mrb[48].mxu0 %vm442_vm2, %v16245_v39  ;;  %13510 = vmatprep.mubr.msk.f32.mxu1 %vm15952_vm0, %v21895_v8  ;;  %v16997_v39 = vld [vmem:[%s16145_s29 + $0x180] sm:$0xff] }
 0x121   : > { %1837 = vmatprep.mubr.f32.mxu0 %v21895_v8 }
 0x123   : > { %13511 = vmatmul.mubr.msk.f32.gmra.mrb[40].mxu1 %vm442_vm2, %v16977_v31 }
 0x124   : > { %11925 = vmatmul.mubr.msk.f32.gmra.mrb[50].mxu0 %vm442_vm2, %v16266_v42  ;;  %13513 = vmatprep.mubr.msk.f32.mxu1 %vm15952_vm0, %v21895_v8 }
 0x125   : > { %1843 = vmatprep.mubr.f32.mxu0 %v21895_v8 }
 0x127   : > { %13514 = vmatmul.mubr.msk.f32.gmra.mrb[42].mxu1 %vm442_vm2, %v16987_v34 }
 0x128   : > { %11926 = vmatmul.mubr.msk.f32.gmra.mrb[52].mxu0 %vm442_vm2, %v16288_v47  ;;  %13516 = vmatprep.mubr.msk.f32.mxu1 %vm15952_vm0, %v21895_v8 }
 0x129   : > { %1849 = vmatprep.mubr.f32.mxu0 %v21895_v8 }
 0x12b   : > { %13517 = vmatmul.mubr.msk.f32.gmra.mrb[44].mxu1 %vm442_vm2, %v16997_v39  ;;  %v701_v42 = vpop.f32.mrb[26].mxu0 }
 0x12c   : > { %11927 = vmatmul.mubr.msk.f32.gmra.mrb[54].mxu0 %vm442_vm2, %v16308_v51  ;;  %13519 = vmatprep.mubr.msk.f32.mxu1 %vm15952_vm0, %v21895_v8  ;;  %v13246_v47 = vpop.f32.mrb[27].mxu0  ;;  %v17017_v51 = vld [vmem:[%s16145_s29 + $0x190] sm:$0xff] }
 0x12d   : > { %1855 = vmatprep.mubr.f32.mxu0 %v21895_v8  ;;  %21992 = vst [vmem:[#allocation21_spill] sm:$0xff] %v17017_v51 }
 0x12f   : > { %13520 = vmatmul.mubr.msk.f32.gmra.mrb[46].mxu1 %vm442_vm2, %v17007_v17  ;;  %v706_v28 = vpop.f32.mrb[28].mxu0 }
 0x130   : > { %11928 = vmatmul.mubr.msk.f32.gmra.mrb[56].mxu0 %vm442_vm2, %v16324_v54  ;;  %13522 = vmatprep.mubr.msk.f32.mxu1 %vm15952_vm0, %v21895_v8  ;;  %v13249_v29 = vpop.f32.mrb[29].mxu0 }
 0x131   : > { %1861 = vmatprep.mubr.f32.mxu0 %v21895_v8 }
 0x133   : > { %13523 = vmatmul.mubr.msk.f32.gmra.mrb[48].mxu1 %vm442_vm2, %v17017_v51  ;;  %v711_v61 = vpop.f32.mrb[30].mxu0 }
 0x134   : > { %11929 = vmatmul.mubr.msk.f32.gmra.mrb[58].mxu0 %vm442_vm2, %v16169_v25  ;;  %13525 = vmatprep.mubr.msk.f32.mxu1 %vm15952_vm0, %v21895_v8  ;;  %v13252_v54 = vpop.f32.mrb[31].mxu0 }
 0x135   : > { %1867 = vmatprep.mubr.f32.mxu0 %v21895_v8 }
 0x137   : > { %13526 = vmatmul.mubr.msk.f32.gmra.mrb[50].mxu1 %vm442_vm2, %v17027_v6  ;;  %v716_v7 = vpop.f32.mrb[32].mxu0 }
 0x138   : > { %11930 = vmatmul.mubr.msk.f32.gmra.mrb[60].mxu0 %vm442_vm2, %v16193_v30  ;;  %13538 = vmatprep.mubr.msk.f32.mxu1 %vm15952_vm0, %v21895_v8  ;;  %v13255_v47 = vpop.f32.mrb[33].mxu0 }
 0x139   : > { %1873 = vmatprep.mubr.f32.mxu0 %v21895_v8 }
 0x13b   : > { %13539 = vmatmul.mubr.msk.f32.vlgmr.msra.gmra.mrb[52].mxu1 %vm442_vm2, %v16892_v20  ;;  %v721_v25 = vpop.f32.mrb[34].mxu0 }
 0x13c   : > { %11931 = vmatmul.mubr.msk.f32.gmra.mrb[62].mxu0 %vm442_vm2, %v16213_v33  ;;  %14702 = vmatpush3.bf16.msra.mxu1 %v16171_v26  ;;  %v13258_v29 = vpop.f32.mrb[35].mxu0 }
 0x13d   : > { %13541 = vmatprep.mubr.msk.f32.mxu1 %vm15952_vm0, %v21895_v8  ;;  %1879 = vmatprep.mubr.f32.mxu0 %v21895_v8 }
 0x13e   : > { %v1373_v30 = vpop.f32.mrb[10].mxu1  ;;  %14703 = vmatprep.subr.bf16.mxu1 %v21833_v3 }
 0x13f   : > { %v17046_v54 = vadd.f32 %v1373_v30, %v701_v42  ;;  %v13344_v47 = vpop.f32.mrb[11].mxu1  ;;  %13542 = vmatmul.mubr.msk.f32.gmra.mrb[54].mxu1 %vm442_vm2, %v16901_v24  ;;  %v726_v4 = vpop.f32.mrb[36].mxu0 }
 0x140   : > { %11932 = vmatmul.mubr.msk.f32.gmra.mrb[64].mxu0 %vm442_vm2, %v16241_v38  ;;  %13544 = vmatprep.mubr.msk.f32.mxu1 %vm15952_vm0, %v21895_v8  ;;  %v13261_v33 = vpop.f32.mrb[37].mxu0 }
 0x141   : > { %1885 = vmatprep.mubr.f32.mxu0 %v21895_v8  ;;  %14705 = vmatpush3.bf16.msra.mxu1 %v16201_v32 }
 0x142   : > { %v1378_v29 = vpop.f32.mrb[12].mxu1  ;;  %13585 = vmatprep.subr.mxu1 %v21895_v8 }
 0x143   : > { %v17057_v42 = vadd.f32 %v1378_v29, %v706_v28  ;;  %v13347_v30 = vpop.f32.mrb[13].mxu1  ;;  %13545 = vmatmul.mubr.msk.f32.gmra.mrb[56].mxu1 %vm442_vm2, %v16914_v60  ;;  %v731_v47 = vpop.f32.mrb[38].mxu0 }
 0x144   : > { %11933 = vmatmul.mubr.msk.f32.gmra.mrb[66].mxu0 %vm442_vm2, %v16262_v41  ;;  %13547 = vmatprep.mubr.msk.f32.mxu1 %vm15952_vm0, %v21895_v8  ;;  %v13264_v38 = vpop.f32.mrb[39].mxu0 }
 0x145   : > { %2139 = vmatprep.mubr.f32.mxu0 %v21895_v8  ;;  %13586 = vmatpush3.msk.msra.mxu1 %vm482_vm1, %v16224_v35 }
 0x146   : > { %v1383_v33 = vpop.f32.mrb[14].mxu1  ;;  %14714 = vmatprep.subr.bf16.mxu1 %v21833_v3 }
 0x147   : > { %v17069_v28 = vadd.f32 %v1383_v33, %v711_v61  ;;  %v13350_v29 = vpop.f32.mrb[15].mxu1  ;;  %13548 = vmatmul.mubr.msk.f32.gmra.mrb[58].mxu1 %vm442_vm2, %v16926_v1  ;;  %v736_v30 = vpop.f32.mrb[40].mxu0 }
 0x148   : > { %11963 = vmatmul.mubr.msk.f32.vlgmr.msra.gmra.mrb[42].mxu0 %vm442_vm2, %v16892_v20  ;;  %13550 = vmatprep.mubr.msk.f32.mxu1 %vm15952_vm0, %v21895_v8  ;;  %v13267_v41 = vpop.f32.mrb[41].mxu0 }
 0x149   : > { %2145 = vmatprep.mubr.f32.mxu0 %v21895_v8  ;;  %14681 = vmatpush1.bf16.msra.mxu0 %v16103_v10 }
 0x14a   : > { %v1388_v35 = vpop.f32.mrb[16].mxu1  ;;  %14683 = vmatprep.subr.bf16.mxu0 %v16117_v14 }
 0x14b   : > { %v17080_v61 = vadd.f32 %v1388_v35, %v716_v7  ;;  %v13353_v38 = vpop.f32.mrb[17].mxu1  ;;  %13551 = vmatmul.mubr.msk.f32.gmra.mrb[60].mxu1 %vm442_vm2, %v16939_v11  ;;  %v17093_v7 = vld [vmem:[%s21820_s1 + $0xe0] sm:$0x1f]  ;;  %v17109_v35 = vld [vmem:[%s21820_s1 + $0xd8] sm:$0x1f] }
 0x14c   : > { %11964 = vmatmul.mubr.msk.f32.gmra.mrb[44].mxu0 %vm442_vm2, %v16901_v24  ;;  %13553 = vmatprep.mubr.msk.f32.mxu1 %vm15952_vm0, %v21895_v8  ;;  %21994 = vst [vmem:[#allocation23_spill] sm:$0xff] %v17109_v35 }
 0x14d   : > { %2151 = vmatprep.mubr.f32.mxu0 %v21895_v8  ;;  %14685 = vmatpush1.bf16.msra.mxu0 %v16133_v19 }
 0x14e   : > { %v1393_v33 = vpop.f32.mrb[18].mxu1  ;;  %11990 = vmatprep.subr.msk.mxu0 %vm482_vm1, %v17093_v7 }
 0x14f   : > { %v17097_v29 = vadd.f32 %v1393_v33, %v721_v25  ;;  %v13356_v41 = vpop.f32.mrb[19].mxu1  ;;  %13554 = vmatmul.mubr.msk.f32.gmra.mrb[62].mxu1 %vm442_vm2, %v16951_v23 }
 0x150   : > { %11965 = vmatmul.mubr.msk.f32.gmra.mrb[46].mxu0 %vm442_vm2, %v16914_v60  ;;  %13556 = vmatprep.mubr.msk.f32.mxu1 %vm15952_vm0, %v21895_v8 }
 0x151   : > { %2157 = vmatprep.mubr.f32.mxu0 %v21895_v8  ;;  %11991 = vmatpush1.msk.msra.mxu0 %vm482_vm1, %v17109_v35 }
 0x152   : > { %v1398_v25 = vpop.f32.mrb[20].mxu1  ;;  %14693 = vmatprep.subr.bf16.mxu0 %v16249_v40 }
 0x153   : > { %v17114_v38 = vadd.f32 %v1398_v25, %v726_v4  ;;  %v13359_v33 = vpop.f32.mrb[21].mxu1  ;;  %13557 = vmatmul.mubr.msk.f32.gmra.mrb[64].mxu1 %vm442_vm2, %v16964_v27 }
 0x154   : > { %11966 = vmatmul.mubr.msk.f32.gmra.mrb[48].mxu0 %vm442_vm2, %v16926_v1  ;;  %13559 = vmatprep.mubr.msk.f32.mxu1 %vm15952_vm0, %v21895_v8 }
 0x155   : > { %2163 = vmatprep.mubr.f32.mxu0 %v21895_v8 }
 0x156   : > { %v1403_v41 = vpop.f32.mrb[22].mxu1 }
 0x157   : > { %v17123_v3 = vadd.f32 %v1403_v41, %v731_v47  ;;  %v13362_v35 = vpop.f32.mrb[23].mxu1  ;;  %13560 = vmatmul.mubr.msk.f32.gmra.mrb[66].mxu1 %vm442_vm2, %v16977_v31 }
 0x158   : > { %11967 = vmatmul.mubr.msk.f32.gmra.mrb[50].mxu0 %vm442_vm2, %v16939_v11  ;;  %13562 = vmatprep.mubr.msk.f32.mxu1 %vm15952_vm0, %v21895_v8 }
 0x159   : > { %2169 = vmatprep.mubr.f32.mxu0 %v21895_v8 }
 0x15a   : > { %v1408_v4 = vpop.f32.mrb[24].mxu1 }
 0x15b   : > { %v17132_v25 = vadd.f32 %v1408_v4, %v736_v30  ;;  %v13365_v33 = vpop.f32.mrb[25].mxu1  ;;  %13563 = vmatmul.mubr.msk.f32.gmra.mrb[68].mxu1 %vm442_vm2, %v16987_v34 }
 0x15c   : > { %11968 = vmatmul.mubr.msk.f32.gmra.mrb[52].mxu0 %vm442_vm2, %v16951_v23  ;;  %13565 = vmatprep.mubr.msk.f32.mxu1 %vm15952_vm0, %v21895_v8 }
 0x15d   : > { %2175 = vmatprep.mubr.f32.mxu0 %v21895_v8 }
 0x15e   : > { %v17141_v47 = vpop.f32.mrb[0].mxu1 }
 0x15f   : > { %21995 = vst [vmem:[#allocation24_spill] sm:$0xff] %v17141_v47  ;;  %v13368_v35 = vpop.f32.mrb[1].mxu1  ;;  %13566 = vmatmul.mubr.msk.f32.gmra.mrb[70].mxu1 %vm442_vm2, %v16997_v39 }
 0x160   : > { %11969 = vmatmul.mubr.msk.f32.gmra.mrb[54].mxu0 %vm442_vm2, %v16964_v27  ;;  %13568 = vmatprep.mubr.msk.f32.mxu1 %vm15952_vm0, %v21895_v8 }
 0x161   : > { %2181 = vmatprep.mubr.f32.mxu0 %v21895_v8 }
 0x162   : > { %v17150_v30 = vpop.f32.mrb[2].mxu1 }
 0x163   : > { %v13371_v41 = vpop.f32.mrb[3].mxu1  ;;  %13569 = vmatmul.mubr.msk.f32.gmra.mrb[72].mxu1 %vm442_vm2, %v17007_v17 }
 0x164   : > { %11970 = vmatmul.mubr.msk.f32.gmra.mrb[56].mxu0 %vm442_vm2, %v16977_v31  ;;  %13571 = vmatprep.mubr.msk.f32.mxu1 %vm15952_vm0, %v21895_v8 }
 0x165   : > { %2187 = vmatprep.mubr.f32.mxu0 %v21895_v8 }
 0x166   : > { %v17159_v4 = vpop.f32.mrb[4].mxu1 }
 0x167   : > { %21996 = vst [vmem:[#allocation25_spill] sm:$0xff] %v17159_v4  ;;  %v13374_v33 = vpop.f32.mrb[5].mxu1  ;;  %13572 = vmatmul.mubr.msk.f32.gmra.mrb[74].mxu1 %vm442_vm2, %v17017_v51 }
 0x168   : > { %11971 = vmatmul.mubr.msk.f32.gmra.mrb[58].mxu0 %vm442_vm2, %v16987_v34  ;;  %13574 = vmatprep.mubr.msk.f32.mxu1 %vm15952_vm0, %v21895_v8 }
 0x169   : > { %2193 = vmatprep.mubr.f32.mxu0 %v21895_v8 }
 0x16a   : > { %v17168_v35 = vpop.f32.mrb[6].mxu1 }
 0x16b   : > { %v13377_v41 = vpop.f32.mrb[7].mxu1  ;;  %13575 = vmatmul.mubr.msk.f32.gmra.mrb[76].mxu1 %vm442_vm2, %v17027_v6 }
 0x16c   : > { %11972 = vmatmul.mubr.msk.f32.gmra.mrb[60].mxu0 %vm442_vm2, %v16997_v39  ;;  %13587 = vmatprep.mubr.msk.f32.mxu1 %vm15952_vm0, %v21895_v8  ;;  %v21997_v41 = vmov 0.0|0.0  }
 0x16d   : > { %2199 = vmatprep.mubr.f32.mxu0 %v21895_v8 }
 0x16e   : > { %v17177_v33 = vpop.f32.mrb[8].mxu1 }
 0x16f   : > { %v13380_v4 = vpop.f32.mrb[9].mxu1  ;;  %13588 = vmatmul.mubr.msk.f32.vlgmr.msra.gmra.mrb[52].mxu1 %vm442_vm2, %v16498_v36 }
 0x170   : > { %11973 = vmatmul.mubr.msk.f32.gmra.mrb[62].mxu0 %vm442_vm2, %v17007_v17  ;;  %14716 = vmatpush3.bf16.msra.mxu1 %v16284_v46 }
 0x171   : > { %13590 = vmatprep.mubr.msk.f32.mxu1 %vm15952_vm0, %v21895_v8  ;;  %2205 = vmatprep.mubr.f32.mxu0 %v21895_v8 }
 0x172   : > { %14717 = vmatprep.subr.bf16.mxu1 %v21997_v41 }
 0x173   : > { %13591 = vmatmul.mubr.msk.f32.gmra.mrb[54].mxu1 %vm442_vm2, %v16508_v37 }
 0x174   : > { %11974 = vmatmul.mubr.msk.f32.gmra.mrb[64].mxu0 %vm442_vm2, %v17017_v51  ;;  %13593 = vmatprep.mubr.msk.f32.mxu1 %vm15952_vm0, %v21895_v8 }
 0x175   : > { %2211 = vmatprep.mubr.f32.mxu0 %v21895_v8  ;;  %14719 = vmatpush3.bf16.msra.mxu1 %v16310_v52 }
 0x176   : > { %13634 = vmatprep.subr.mxu1 %v21895_v8 }
 0x177   : > { %13594 = vmatmul.mubr.msk.f32.gmra.mrb[56].mxu1 %vm442_vm2, %v16522_v43 }
 0x178   : > { %11975 = vmatmul.mubr.msk.f32.gmra.mrb[66].mxu0 %vm442_vm2, %v17027_v6  ;;  %13596 = vmatprep.mubr.msk.f32.mxu1 %vm15952_vm0, %v21895_v8 }
 0x179   : > { %2490 = vmatprep.mubr.f32.mxu0 %v21895_v8  ;;  %13635 = vmatpush3.msk.msra.mxu1 %vm482_vm1, %v16331_v55 }
 0x17a   : > { %14728 = vmatprep.subr.bf16.mxu1 %v21997_v41 }
 0x17b   : > { %13597 = vmatmul.mubr.msk.f32.gmra.mrb[58].mxu1 %vm442_vm2, %v16547_v62 }
 0x17c   : > { %11992 = vmatmul.mubr.msk.f32.vlgmr.msra.gmra.mrb[68].mxu0 %vm442_vm2, %v16892_v20  ;;  %13599 = vmatprep.mubr.msk.f32.mxu1 %vm15952_vm0, %v21895_v8 }
 0x17d   : > { %2496 = vmatprep.mubr.f32.mxu0 %v21895_v8  ;;  %14695 = vmatpush1.bf16.msra.mxu0 %v16409_v2 }
 0x17e   : > { %14697 = vmatprep.subr.bf16.mxu0 %v16411_v5 }
 0x17f   : > { %v17216_v36 = vpop.f32.mrb[0].mxu0  ;;  %13600 = vmatmul.mubr.msk.f32.gmra.mrb[60].mxu1 %vm442_vm2, %v16570_v15 }
 0x180   : > { %v17220_v55 = vpop.f32.mrb[1].mxu0  ;;  %11993 = vmatmul.mubr.msk.f32.gmra.mrb[70].mxu0 %vm442_vm2, %v16901_v24  ;;  %13602 = vmatprep.mubr.msk.f32.mxu1 %vm15952_vm0, %v21895_v8 }
 0x181   : > { %2502 = vmatprep.mubr.f32.mxu0 %v21895_v8  ;;  %14699 = vmatpush1.bf16.msra.mxu0 %v16431_v12 }
 0x182   : > { %12019 = vmatprep.subr.msk.mxu0 %vm482_vm1, %v16439_v13 }
 0x183   : > { %v17230_v37 = vpop.f32.mrb[2].mxu0  ;;  %13603 = vmatmul.mubr.msk.f32.gmra.mrb[62].mxu1 %vm442_vm2, %v16589_v44 }
 0x184   : > { %v17234_v43 = vpop.f32.mrb[3].mxu0  ;;  %11994 = vmatmul.mubr.msk.f32.gmra.mrb[72].mxu0 %vm442_vm2, %v16914_v60  ;;  %13605 = vmatprep.mubr.msk.f32.mxu1 %vm15952_vm0, %v21895_v8 }
 0x185   : > { %2508 = vmatprep.mubr.f32.mxu0 %v21895_v8  ;;  %12020 = vmatpush1.msk.msra.mxu0 %vm482_vm1, %v16462_v21 }
 0x186   : > { %14707 = vmatprep.subr.bf16.mxu0 %v16464_v22 }
 0x187   : > { %v17244_v13 = vpop.f32.mrb[4].mxu0  ;;  %13606 = vmatmul.mubr.msk.f32.gmra.mrb[64].mxu1 %vm442_vm2, %v16607_v50 }
 0x188   : > { %v17248_v62 = vpop.f32.mrb[5].mxu0  ;;  %11995 = vmatmul.mubr.msk.f32.gmra.mrb[74].mxu0 %vm442_vm2, %v16926_v1  ;;  %13608 = vmatprep.mubr.msk.f32.mxu1 %vm15952_vm0, %v21895_v8 }
 0x189   : > { %21998 = vst [vmem:[#allocation26_spill] sm:$0xff] %v17248_v62  ;;  %2514 = vmatprep.mubr.f32.mxu0 %v21895_v8 }
 0x18b   : > { %v17255_v15 = vpop.f32.mrb[6].mxu0  ;;  %13609 = vmatmul.mubr.msk.f32.gmra.mrb[66].mxu1 %vm442_vm2, %v16620_v53 }
 0x18c   : > { %21999 = vst [vmem:[#allocation27_spill] sm:$0xff] %v17255_v15  ;;  %v17259_v21 = vpop.f32.mrb[7].mxu0  ;;  %11996 = vmatmul.mubr.msk.f32.gmra.mrb[76].mxu0 %vm442_vm2, %v16939_v11  ;;  %13611 = vmatprep.mubr.msk.f32.mxu1 %vm15952_vm0, %v21895_v8 }
 0x18d   : > { %22000 = vst [vmem:[#allocation28_spill] sm:$0xff] %v17259_v21  ;;  %2520 = vmatprep.mubr.f32.mxu0 %v21895_v8 }
 0x18f   : > { %v17266_v4 = vpop.f32.mrb[8].mxu0  ;;  %13612 = vmatmul.mubr.msk.f32.gmra.mrb[68].mxu1 %vm442_vm2, %v16630_v49 }
 0x190   : > { %22001 = vst [vmem:[#allocation29_spill] sm:$0xff] %v17266_v4  ;;  %v17270_v62 = vpop.f32.mrb[9].mxu0  ;;  %11997 = vmatmul.mubr.msk.f32.gmra.mrb[78].mxu0 %vm442_vm2, %v16951_v23  ;;  %13614 = vmatprep.mubr.msk.f32.mxu1 %vm15952_vm0, %v21895_v8 }
 0x191   : > { %22002 = vst [vmem:[#allocation30_spill] sm:$0xff] %v17270_v62  ;;  %2526 = vmatprep.mubr.f32.mxu0 %v21895_v8 }
 0x193   : > { %v17277_v21 = vpop.f32.mrb[10].mxu0  ;;  %13615 = vmatmul.mubr.msk.f32.gmra.mrb[70].mxu1 %vm442_vm2, %v16640_v56 }
 0x194   : > { %22003 = vst [vmem:[#allocation31_spill] sm:$0xff] %v17277_v21  ;;  %v17281_v15 = vpop.f32.mrb[11].mxu0  ;;  %11998 = vmatmul.mubr.msk.f32.gmra.mrb[80].mxu0 %vm442_vm2, %v16964_v27  ;;  %13617 = vmatprep.mubr.msk.f32.mxu1 %vm15952_vm0, %v21895_v8 }
 0x195   : > { %22004 = vst [vmem:[#allocation32_spill] sm:$0xff] %v17281_v15  ;;  %2532 = vmatprep.mubr.f32.mxu0 %v21895_v8 }
 0x197   : > { %v17288_v62 = vpop.f32.mrb[12].mxu0  ;;  %13618 = vmatmul.mubr.msk.f32.gmra.mrb[72].mxu1 %vm442_vm2, %v16650_v57 }
 0x198   : > { %22005 = vst [vmem:[#allocation33_spill] sm:$0xff] %v17288_v62  ;;  %v17292_v21 = vpop.f32.mrb[13].mxu0  ;;  %11999 = vmatmul.mubr.msk.f32.gmra.mrb[82].mxu0 %vm442_vm2, %v16977_v31  ;;  %13620 = vmatprep.mubr.msk.f32.mxu1 %vm15952_vm0, %v21895_v8 }
 0x199   : > { %22006 = vst [vmem:[#allocation34_spill] sm:$0xff] %v17292_v21  ;;  %2538 = vmatprep.mubr.f32.mxu0 %v21895_v8 }
 0x19b   : > { %v17299_v15 = vpop.f32.mrb[14].mxu0  ;;  %13621 = vmatmul.mubr.msk.f32.gmra.mrb[74].mxu1 %vm442_vm2, %v16660_v58 }
 0x19c   : > { %22007 = vst [vmem:[#allocation35_spill] sm:$0xff] %v17299_v15  ;;  %v17303_v62 = vpop.f32.mrb[15].mxu0  ;;  %12000 = vmatmul.mubr.msk.f32.gmra.mrb[84].mxu0 %vm442_vm2, %v16987_v34  ;;  %13623 = vmatprep.mubr.msk.f32.mxu1 %vm15952_vm0, %v21895_v8 }
 0x19d   : > { %22008 = vst [vmem:[#allocation36_spill] sm:$0xff] %v17303_v62  ;;  %2544 = vmatprep.mubr.f32.mxu0 %v21895_v8  ;;  %v17321_v62 = vld [vmem:[%s16145_s29 + $0x1a0] sm:$0xff] }
 0x19f   : > { %v17310_v21 = vpop.f32.mrb[16].mxu0  ;;  %13624 = vmatmul.mubr.msk.f32.gmra.mrb[76].mxu1 %vm442_vm2, %v16670_v59 }
 0x1a0   : > { %22009 = vst [vmem:[#allocation37_spill] sm:$0xff] %v17310_v21  ;;  %v17314_v15 = vpop.f32.mrb[17].mxu0  ;;  %12001 = vmatmul.mubr.msk.f32.gmra.mrb[86].mxu0 %vm442_vm2, %v16997_v39  ;;  %13636 = vmatprep.mubr.msk.f32.mxu1 %vm15952_vm0, %v21895_v8 }
 0x1a1   : > { %22010 = vst [vmem:[#allocation38_spill] sm:$0xff] %v17314_v15  ;;  %2550 = vmatprep.mubr.f32.mxu0 %v21895_v8  ;;  %v17334_v15 = vld [vmem:[%s16145_s29 + $0x1a8] sm:$0xff] }
 0x1a3   : > { %v17324_v4 = vpop.f32.mrb[18].mxu0  ;;  %13637 = vmatmul.mubr.msk.f32.vlgmr.msra.gmra.mrb[52].mxu1 %vm442_vm2, %v17321_v62 }
 0x1a4   : > { %22011 = vst [vmem:[#allocation39_spill] sm:$0xff] %v17324_v4  ;;  %v17328_v21 = vpop.f32.mrb[19].mxu0  ;;  %12002 = vmatmul.mubr.msk.f32.gmra.mrb[88].mxu0 %vm442_vm2, %v17007_v17  ;;  %14730 = vmatpush3.bf16.msra.mxu1 %v16101_v9  ;;  %v17351_v9 = vld [vmem:[%s16145_s29 + $0x1b0] sm:$0xff]  ;;  %v17389_v17 = vld [vmem:[%s16145_s29 + $0x1c0] sm:$0xff] }
 0x1a5   : > { %22012 = vst [vmem:[#allocation40_spill] sm:$0xff] %v17328_v21  ;;  %13639 = vmatprep.mubr.msk.f32.mxu1 %vm15952_vm0, %v21895_v8  ;;  %2556 = vmatprep.mubr.f32.mxu0 %v21895_v8 }
 0x1a6   : > { %14731 = vmatprep.subr.bf16.mxu1 %v21997_v41 }
 0x1a7   : > { %v17340_v4 = vpop.f32.mrb[20].mxu0  ;;  %13640 = vmatmul.mubr.msk.f32.gmra.mrb[54].mxu1 %vm442_vm2, %v17334_v15 }
 0x1a8   : > { %22013 = vst [vmem:[#allocation41_spill] sm:$0xff] %v17340_v4  ;;  %v17344_v21 = vpop.f32.mrb[21].mxu0  ;;  %12003 = vmatmul.mubr.msk.f32.gmra.mrb[90].mxu0 %vm442_vm2, %v17017_v51  ;;  %13642 = vmatprep.mubr.msk.f32.mxu1 %vm15952_vm0, %v21895_v8  ;;  %v17367_v51 = vld [vmem:[%s16145_s29 + $0x1b8] sm:$0xff] }
 0x1a9   : > { %22014 = vst [vmem:[#allocation42_spill] sm:$0xff] %v17344_v21  ;;  %2562 = vmatprep.mubr.f32.mxu0 %v21895_v8  ;;  %14733 = vmatpush3.bf16.msra.mxu1 %v16131_v18 }
 0x1aa   : > { %13683 = vmatprep.subr.mxu1 %v21895_v8 }
 0x1ab   : > { %v17356_v4 = vpop.f32.mrb[22].mxu0  ;;  %13643 = vmatmul.mubr.msk.f32.gmra.mrb[56].mxu1 %vm442_vm2, %v17351_v9 }
 0x1ac   : > { %22015 = vst [vmem:[#allocation43_spill] sm:$0xff] %v17356_v4  ;;  %v17360_v21 = vpop.f32.mrb[23].mxu0  ;;  %12004 = vmatmul.mubr.msk.f32.gmra.mrb[92].mxu0 %vm442_vm2, %v17027_v6  ;;  %13645 = vmatprep.mubr.msk.f32.mxu1 %vm15952_vm0, %v21895_v8  ;;  %v17373_v4 = vld [vmem:[%s21820_s1 + $0xe8] sm:$0x1f]  ;;  %v15836_v6 = vld [vmem:[%s16145_s29 + $0xd0] sm:$0xff] }
 0x1ad   : > { %22016 = vst [vmem:[#allocation44_spill] sm:$0xff] %v17360_v21  ;;  %2763 = vmatprep.mubr.f32.mxu0 %v21895_v8  ;;  %13684 = vmatpush3.msk.msra.mxu1 %vm482_vm1, %v17373_v4 }
 0x1ae   : > { %14742 = vmatprep.subr.bf16.mxu1 %v21997_v41 }
 0x1af   : > { %v17378_v21 = vpop.f32.mrb[24].mxu0  ;;  %13646 = vmatmul.mubr.msk.f32.gmra.mrb[58].mxu1 %vm442_vm2, %v17367_v51 }
 0x1b0   : > { %22017 = vst [vmem:[#allocation45_spill] sm:$0xff] %v17378_v21  ;;  %v17382_v18 = vpop.f32.mrb[25].mxu0  ;;  %12021 = vmatmul.mubr.msk.f32.vlgmr.msra.gmra.mrb[68].mxu0 %vm442_vm2, %v15836_v6  ;;  %13648 = vmatprep.mubr.msk.f32.mxu1 %vm15952_vm0, %v21895_v8  ;;  %v17401_v6 = vld [vmem:[%s16145_s29 + $0x1c8] sm:$0xff]  ;;  %v15854_v21 = vld [vmem:[%s16145_s29 + $0x170] sm:$0xff] }
 0x1b1   : > { %22018 = vst [vmem:[#allocation46_spill] sm:$0xff] %v17382_v18  ;;  %2769 = vmatprep.mubr.f32.mxu0 %v21895_v8  ;;  %14709 = vmatpush1.bf16.msra.mxu0 %v16552_v63  ;;  %v15837_v18 = vld [vmem:[%s16145_s29 + $0xd8] sm:$0xff] }
 0x1b2   : > { %14711 = vmatprep.subr.bf16.mxu0 %v16555_v0  ;;  %v15838_v0 = vld [vmem:[%s16145_s29 + $0xe0] sm:$0xff] }
 0x1b3   : > { %13649 = vmatmul.mubr.msk.f32.gmra.mrb[60].mxu1 %vm442_vm2, %v17389_v17 }
 0x1b4   : > { %12022 = vmatmul.mubr.msk.f32.gmra.mrb[70].mxu0 %vm442_vm2, %v15837_v18  ;;  %13651 = vmatprep.mubr.msk.f32.mxu1 %vm15952_vm0, %v21895_v8  ;;  %v17414_v18 = vld [vmem:[%s16145_s29 + $0x1d0] sm:$0xff] }
 0x1b5   : > { %2775 = vmatprep.mubr.f32.mxu0 %v21895_v8  ;;  %14713 = vmatpush1.bf16.msra.mxu0 %v16574_v16  ;;  %v22019_v16 = vld [vmem:[#allocation10_spill] sm:$0xff] }
 0x1b6   : > { %12061 = vmatprep.subr.msk.mxu0 %vm482_vm1, %v16582_v45  ;;  %v15839_v45 = vld [vmem:[%s16145_s29 + $0xe8] sm:$0xff] }
 0x1b7   : > { %13652 = vmatmul.mubr.msk.f32.gmra.mrb[62].mxu1 %vm442_vm2, %v17401_v6 }
 0x1b8   : > { %12023 = vmatmul.mubr.msk.f32.gmra.mrb[72].mxu0 %vm442_vm2, %v15838_v0  ;;  %13654 = vmatprep.mubr.msk.f32.mxu1 %vm15952_vm0, %v21895_v8  ;;  %v17427_v0 = vld [vmem:[%s16145_s29 + $0x1d8] sm:$0xff] }
 0x1b9   : > { %2781 = vmatprep.mubr.f32.mxu0 %v21895_v8  ;;  %12062 = vmatpush1.msk.msra.mxu0 %vm482_vm1, %v16598_v48  ;;  %v15840_v48 = vld [vmem:[%s16145_s29 + $0xf0] sm:$0xff] }
 0x1ba   : > { %14721 = vmatprep.subr.bf16.mxu0 %v22019_v16  ;;  %v17437_v16 = vld [vmem:[%s16145_s29 + $0x1e0] sm:$0xff] }
 0x1bb   : > { %13655 = vmatmul.mubr.msk.f32.gmra.mrb[64].mxu1 %vm442_vm2, %v17414_v18  ;;  %22020 = vst [vmem:[#allocation47_spill] sm:$0xff] %v17437_v16 }
 0x1bc   : > { %12024 = vmatmul.mubr.msk.f32.gmra.mrb[74].mxu0 %vm442_vm2, %v15839_v45  ;;  %13657 = vmatprep.mubr.msk.f32.mxu1 %vm15952_vm0, %v21895_v8  ;;  %v17447_v45 = vld [vmem:[%s16145_s29 + $0x1e8] sm:$0xff] }
 0x1bd   : > { %2787 = vmatprep.mubr.f32.mxu0 %v21895_v8  ;;  %22021 = vst [vmem:[#allocation48_spill] sm:$0xff] %v17447_v45 }
 0x1bf   : > { %13658 = vmatmul.mubr.msk.f32.gmra.mrb[66].mxu1 %vm442_vm2, %v17427_v0 }
 0x1c0   : > { %12025 = vmatmul.mubr.msk.f32.gmra.mrb[76].mxu0 %vm442_vm2, %v15840_v48  ;;  %13660 = vmatprep.mubr.msk.f32.mxu1 %vm15952_vm0, %v21895_v8  ;;  %v17457_v48 = vld [vmem:[%s16145_s29 + $0x1f0] sm:$0xff] }
 0x1c1   : > { %2793 = vmatprep.mubr.f32.mxu0 %v21895_v8  ;;  %22022 = vst [vmem:[#allocation49_spill] sm:$0xff] %v17457_v48 }
 0x1c3   : > { %13661 = vmatmul.mubr.msk.f32.gmra.mrb[68].mxu1 %vm442_vm2, %v17437_v16 }
 0x1c4   : > { %12026 = vmatmul.mubr.msk.f32.gmra.mrb[78].mxu0 %vm442_vm2, %v16589_v44  ;;  %13663 = vmatprep.mubr.msk.f32.mxu1 %vm15952_vm0, %v21895_v8  ;;  %v17467_v44 = vld [vmem:[%s16145_s29 + $0x1f8] sm:$0xff] }
 0x1c5   : > { %2799 = vmatprep.mubr.f32.mxu0 %v21895_v8  ;;  %22023 = vst [vmem:[#allocation50_spill] sm:$0xff] %v17467_v44 }
 0x1c7   : > { %13664 = vmatmul.mubr.msk.f32.gmra.mrb[70].mxu1 %vm442_vm2, %v17447_v45 }
 0x1c8   : > { %12027 = vmatmul.mubr.msk.f32.gmra.mrb[80].mxu0 %vm442_vm2, %v16607_v50  ;;  %13666 = vmatprep.mubr.msk.f32.mxu1 %vm15952_vm0, %v21895_v8  ;;  %v17477_v50 = vld [vmem:[%s16145_s29 + $0x200] sm:$0x1] }
 0x1c9   : > { %2805 = vmatprep.mubr.f32.mxu0 %v21895_v8  ;;  %22024 = vst [vmem:[#allocation51_spill] sm:$0xff] %v17477_v50 }
 0x1cb   : > { %13667 = vmatmul.mubr.msk.f32.gmra.mrb[72].mxu1 %vm442_vm2, %v17457_v48 }
 0x1cc   : > { %12028 = vmatmul.mubr.msk.f32.gmra.mrb[82].mxu0 %vm442_vm2, %v16620_v53  ;;  %13669 = vmatprep.mubr.msk.f32.mxu1 %vm15952_vm0, %v21895_v8 }
 0x1cd   : > { %2811 = vmatprep.mubr.f32.mxu0 %v21895_v8 }
 0x1cf   : > { %13670 = vmatmul.mubr.msk.f32.gmra.mrb[74].mxu1 %vm442_vm2, %v17467_v44 }
 0x1d0   : > { %12029 = vmatmul.mubr.msk.f32.gmra.mrb[84].mxu0 %vm442_vm2, %v16630_v49  ;;  %13672 = vmatprep.mubr.msk.f32.mxu1 %vm15952_vm0, %v21895_v8 }
 0x1d1   : > { %2817 = vmatprep.mubr.f32.mxu0 %v21895_v8 }
 0x1d3   : > { %13673 = vmatmul.mubr.msk.f32.gmra.mrb[76].mxu1 %vm442_vm2, %v17477_v50 }
 0x1d4   : > { %12030 = vmatmul.mubr.msk.f32.gmra.mrb[86].mxu0 %vm442_vm2, %v16640_v56  ;;  %13685 = vmatprep.mubr.msk.f32.mxu1 %vm15952_vm0, %v21895_v8 }
 0x1d5   : > { %2823 = vmatprep.mubr.f32.mxu0 %v21895_v8 }
 0x1d7   : > { %13686 = vmatmul.mubr.msk.f32.vlgmr.msra.gmra.mrb[78].mxu1 %vm442_vm2, %v17321_v62 }
 0x1d8   : > { %12031 = vmatmul.mubr.msk.f32.gmra.mrb[88].mxu0 %vm442_vm2, %v16650_v57  ;;  %14744 = vmatpush3.bf16.msra.mxu1 %v16171_v26 }
 0x1d9   : > { %13688 = vmatprep.mubr.msk.f32.mxu1 %vm15952_vm0, %v21895_v8  ;;  %2829 = vmatprep.mubr.f32.mxu0 %v21895_v8 }
 0x1da   : > { %v17495_v53 = vpop.f32.mrb[26].mxu1  ;;  %14745 = vmatprep.subr.bf16.mxu1 %v21997_v41 }
 0x1db   : > { %v13491_v56 = vpop.f32.mrb[27].mxu1  ;;  %13689 = vmatmul.mubr.msk.f32.gmra.mrb[80].mxu1 %vm442_vm2, %v17334_v15 }
 0x1dc   : > { %12032 = vmatmul.mubr.msk.f32.gmra.mrb[90].mxu0 %vm442_vm2, %v16660_v58  ;;  %13691 = vmatprep.mubr.msk.f32.mxu1 %vm15952_vm0, %v21895_v8  ;;  %v17523_v58 = vld [vmem:[%s21820_s1 + $0x70] sm:$0x1f] }
 0x1dd   : > { %2835 = vmatprep.mubr.f32.mxu0 %v21895_v8  ;;  %14747 = vmatpush3.bf16.msra.mxu1 %v16201_v32  ;;  %22025 = vst [vmem:[#allocation52_spill] sm:$0xff] %v17523_v58 }
 0x1de   : > { %v17508_v57 = vpop.f32.mrb[28].mxu1  ;;  %13732 = vmatprep.subr.mxu1 %v21895_v8 }
 0x1df   : > { %v13494_v49 = vpop.f32.mrb[29].mxu1  ;;  %13692 = vmatmul.mubr.msk.f32.gmra.mrb[82].mxu1 %vm442_vm2, %v17351_v9 }
 0x1e0   : > { %12033 = vmatmul.mubr.msk.f32.gmra.mrb[92].mxu0 %vm442_vm2, %v16670_v59  ;;  %13694 = vmatprep.mubr.msk.f32.mxu1 %vm15952_vm0, %v21895_v8 }
 0x1e1   : > { %3089 = vmatprep.mubr.f32.mxu0 %v21895_v8  ;;  %13733 = vmatpush3.msk.msra.mxu1 %vm482_vm1, %v17523_v58 }
 0x1e2   : > { %v17527_v49 = vpop.f32.mrb[30].mxu1  ;;  %14756 = vmatprep.subr.bf16.mxu1 %v21997_v41 }
 0x1e3   : > { %v13497_v56 = vpop.f32.mrb[31].mxu1  ;;  %13695 = vmatmul.mubr.msk.f32.gmra.mrb[84].mxu1 %vm442_vm2, %v17367_v51 }
 0x1e4   : > { %12063 = vmatmul.mubr.msk.f32.vlgmr.msra.gmra.mrb[68].mxu0 %vm442_vm2, %v17321_v62  ;;  %13697 = vmatprep.mubr.msk.f32.mxu1 %vm15952_vm0, %v21895_v8 }
 0x1e5   : > { %3095 = vmatprep.mubr.f32.mxu0 %v21895_v8  ;;  %14723 = vmatpush1.bf16.msra.mxu0 %v16103_v10 }
 0x1e6   : > { %v17540_v58 = vpop.f32.mrb[32].mxu1  ;;  %14725 = vmatprep.subr.bf16.mxu0 %v16117_v14 }
 0x1e7   : > { %22026 = vst [vmem:[#allocation53_spill] sm:$0xff] %v17540_v58  ;;  %v13500_v59 = vpop.f32.mrb[33].mxu1  ;;  %13698 = vmatmul.mubr.msk.f32.gmra.mrb[86].mxu1 %vm442_vm2, %v17389_v17 }
 0x1e8   : > { %12064 = vmatmul.mubr.msk.f32.gmra.mrb[70].mxu0 %vm442_vm2, %v17334_v15  ;;  %13700 = vmatprep.mubr.msk.f32.mxu1 %vm15952_vm0, %v21895_v8  ;;  %v22034_v59 = vld [vmem:[#allocation25_spill] sm:$0xff] }
 0x1e9   : > { %3101 = vmatprep.mubr.f32.mxu0 %v21895_v8  ;;  %14727 = vmatpush1.bf16.msra.mxu0 %v16133_v19  ;;  %v22027_v19 = vld [vmem:[#allocation23_spill] sm:$0xff] }
 0x1ea   : > { %v17553_v10 = vpop.f32.mrb[34].mxu1  ;;  %12090 = vmatprep.subr.msk.mxu0 %vm482_vm1, %v17093_v7 }
 0x1eb   : > { %v13503_v56 = vpop.f32.mrb[35].mxu1  ;;  %13701 = vmatmul.mubr.msk.f32.gmra.mrb[88].mxu1 %vm442_vm2, %v17401_v6 }
 0x1ec   : > { %12065 = vmatmul.mubr.msk.f32.gmra.mrb[72].mxu0 %vm442_vm2, %v17351_v9  ;;  %13703 = vmatprep.mubr.msk.f32.mxu1 %vm15952_vm0, %v21895_v8 }
 0x1ed   : > { %3107 = vmatprep.mubr.f32.mxu0 %v21895_v8  ;;  %12091 = vmatpush1.msk.msra.mxu0 %vm482_vm1, %v22027_v19 }
 0x1ee   : > { %v17568_v58 = vpop.f32.mrb[36].mxu1  ;;  %14735 = vmatprep.subr.bf16.mxu0 %v16249_v40 }
 0x1ef   : > { %22028 = vst [vmem:[#allocation23_spill] sm:$0xff] %v17568_v58  ;;  %v13506_v56 = vpop.f32.mrb[37].mxu1  ;;  %13704 = vmatmul.mubr.msk.f32.gmra.mrb[90].mxu1 %vm442_vm2, %v17414_v18 }
 0x1f0   : > { %12066 = vmatmul.mubr.msk.f32.gmra.mrb[74].mxu0 %vm442_vm2, %v17367_v51  ;;  %13706 = vmatprep.mubr.msk.f32.mxu1 %vm15952_vm0, %v21895_v8 }
 0x1f1   : > { %3113 = vmatprep.mubr.f32.mxu0 %v21895_v8 }
 0x1f2   : > { %v17580_v19 = vpop.f32.mrb[38].mxu1 }
 0x1f3   : > { %22029 = vst [vmem:[#allocation54_spill] sm:$0xff] %v17580_v19  ;;  %v13509_v40 = vpop.f32.mrb[39].mxu1  ;;  %13707 = vmatmul.mubr.msk.f32.gmra.mrb[92].mxu1 %vm442_vm2, %v17427_v0 }
 0x1f4   : > { %12067 = vmatmul.mubr.msk.f32.gmra.mrb[76].mxu0 %vm442_vm2, %v17389_v17  ;;  %13709 = vmatprep.mubr.msk.f32.mxu1 %vm15952_vm0, %v21895_v8 }
 0x1f5   : > { %3119 = vmatprep.mubr.f32.mxu0 %v21895_v8 }
 0x1f6   : > { %v17591_v56 = vpop.f32.mrb[40].mxu1 }
 0x1f7   : > { %22030 = vst [vmem:[#allocation55_spill] sm:$0xff] %v17591_v56  ;;  %v13512_v58 = vpop.f32.mrb[41].mxu1  ;;  %13710 = vmatmul.mubr.msk.f32.gmra.mrb[94].mxu1 %vm442_vm2, %v17437_v16 }
 0x1f8   : > { %12068 = vmatmul.mubr.msk.f32.gmra.mrb[78].mxu0 %vm442_vm2, %v17401_v6  ;;  %13712 = vmatprep.mubr.msk.f32.mxu1 %vm15952_vm0, %v21895_v8 }
 0x1f9   : > { %3125 = vmatprep.mubr.f32.mxu0 %v21895_v8 }
 0x1fa   : > { %v17602_v40 = vpop.f32.mrb[42].mxu1 }
 0x1fb   : > { %22031 = vst [vmem:[#allocation56_spill] sm:$0xff] %v17602_v40  ;;  %v13515_v19 = vpop.f32.mrb[43].mxu1  ;;  %13713 = vmatmul.mubr.msk.f32.gmra.mrb[96].mxu1 %vm442_vm2, %v17447_v45 }
 0x1fc   : > { %12069 = vmatmul.mubr.msk.f32.gmra.mrb[80].mxu0 %vm442_vm2, %v17414_v18  ;;  %13715 = vmatprep.mubr.msk.f32.mxu1 %vm15952_vm0, %v21895_v8 }
 0x1fd   : > { %3131 = vmatprep.mubr.f32.mxu0 %v21895_v8 }
 0x1fe   : > { %v17613_v58 = vpop.f32.mrb[44].mxu1 }
 0x1ff   : > { %22032 = vst [vmem:[#allocation57_spill] sm:$0xff] %v17613_v58  ;;  %v13518_v56 = vpop.f32.mrb[45].mxu1  ;;  %13716 = vmatmul.mubr.msk.f32.gmra.mrb[98].mxu1 %vm442_vm2, %v17457_v48 }
 0x200   : > { %12070 = vmatmul.mubr.msk.f32.gmra.mrb[82].mxu0 %vm442_vm2, %v17427_v0  ;;  %13718 = vmatprep.mubr.msk.f32.mxu1 %vm15952_vm0, %v21895_v8 }
 0x201   : > { %3137 = vmatprep.mubr.f32.mxu0 %v21895_v8 }
 0x202   : > { %v17624_v19 = vpop.f32.mrb[46].mxu1 }
 0x203   : > { %22033 = vst [vmem:[#allocation58_spill] sm:$0xff] %v17624_v19  ;;  %v13521_v47 = vpop.f32.mrb[47].mxu1  ;;  %13719 = vmatmul.mubr.msk.f32.gmra.mrb[100].mxu1 %vm442_vm2, %v17467_v44 }
 0x204   : > { %12071 = vmatmul.mubr.msk.f32.gmra.mrb[84].mxu0 %vm442_vm2, %v17437_v16  ;;  %13721 = vmatprep.mubr.msk.f32.mxu1 %vm15952_vm0, %v21895_v8 }
 0x205   : > { %3143 = vmatprep.mubr.f32.mxu0 %v21895_v8 }
 0x206   : > { %v17635_v56 = vpop.f32.mrb[48].mxu1 }
 0x207   : > { %v13524_v58 = vpop.f32.mrb[49].mxu1  ;;  %13722 = vmatmul.mubr.msk.f32.gmra.mrb[102].mxu1 %vm442_vm2, %v17477_v50 }
 0x208   : > { %12072 = vmatmul.mubr.msk.f32.gmra.mrb[86].mxu0 %vm442_vm2, %v17447_v45  ;;  %13734 = vmatprep.mubr.msk.f32.mxu1 %vm15952_vm0, %v21895_v8 }
 0x209   : > { %3149 = vmatprep.mubr.f32.mxu0 %v21895_v8 }
 0x20a   : > { %v17646_v47 = vpop.f32.mrb[50].mxu1 }
 0x20b   : > { %v13527_v19 = vpop.f32.mrb[51].mxu1  ;;  %13735 = vmatmul.mubr.msk.f32.vlgmr.msra.gmra.mrb[78].mxu1 %vm442_vm2, %v16892_v20  ;;  %v17678_v20 = vld [vmem:[%s21820_s1 + $0x160] sm:$0x1f] }
 0x20c   : > { %12073 = vmatmul.mubr.msk.f32.gmra.mrb[88].mxu0 %vm442_vm2, %v17457_v48  ;;  %14758 = vmatpush3.bf16.msra.mxu1 %v16284_v46 }
 0x20d   : > { %13737 = vmatprep.mubr.msk.f32.mxu1 %vm15952_vm0, %v21895_v8  ;;  %3155 = vmatprep.mubr.f32.mxu0 %v21895_v8 }
 0x20e   : > { %14759 = vmatprep.subr.bf16.mxu1 %v21997_v41 }
 0x20f   : > { %13738 = vmatmul.mubr.msk.f32.gmra.mrb[80].mxu1 %vm442_vm2, %v16901_v24 }
 0x210   : > { %12074 = vmatmul.mubr.msk.f32.gmra.mrb[90].mxu0 %vm442_vm2, %v17467_v44  ;;  %13740 = vmatprep.mubr.msk.f32.mxu1 %vm15952_vm0, %v21895_v8 }
 0x211   : > { %3161 = vmatprep.mubr.f32.mxu0 %v21895_v8  ;;  %14761 = vmatpush3.bf16.msra.mxu1 %v16310_v52 }
 0x212   : > { %13781 = vmatprep.subr.mxu1 %v21895_v8 }
 0x213   : > { %13741 = vmatmul.mubr.msk.f32.gmra.mrb[82].mxu1 %vm442_vm2, %v16914_v60 }
 0x214   : > { %12075 = vmatmul.mubr.msk.f32.gmra.mrb[92].mxu0 %vm442_vm2, %v17477_v50  ;;  %13743 = vmatprep.mubr.msk.f32.mxu1 %vm15952_vm0, %v21895_v8 }
 0x215   : > { %3440 = vmatprep.mubr.f32.mxu0 %v21895_v8  ;;  %13782 = vmatpush3.msk.msra.mxu1 %vm482_vm1, %v17678_v20 }
 0x216   : > { %14770 = vmatprep.subr.bf16.mxu1 %v21997_v41 }
 0x217   : > { %13744 = vmatmul.mubr.msk.f32.gmra.mrb[84].mxu1 %vm442_vm2, %v16926_v1 }
 0x218   : > { %12092 = vmatmul.mubr.msk.f32.vlgmr.msra.gmra.mrb[94].mxu0 %vm442_vm2, %v17321_v62  ;;  %13746 = vmatprep.mubr.msk.f32.mxu1 %vm15952_vm0, %v21895_v8 }
 0x219   : > { %3446 = vmatprep.mubr.f32.mxu0 %v21895_v8  ;;  %14737 = vmatpush1.bf16.msra.mxu0 %v16409_v2 }
 0x21a   : > { %14739 = vmatprep.subr.bf16.mxu0 %v16411_v5 }
 0x21b   : > { %v17692_v24 = vpop.f32.mrb[42].mxu0  ;;  %13747 = vmatmul.mubr.msk.f32.gmra.mrb[86].mxu1 %vm442_vm2, %v16939_v11  ;;  %v17711_v11 = vld [vmem:[%s21820_s1 + $0x68] sm:$0x1f] }
 0x21c   : > { %v17698_v1 = vpop.f32.mrb[43].mxu0  ;;  %12093 = vmatmul.mubr.msk.f32.gmra.mrb[96].mxu0 %vm442_vm2, %v17334_v15  ;;  %13749 = vmatprep.mubr.msk.f32.mxu1 %vm15952_vm0, %v21895_v8 }
 0x21d   : > { %3452 = vmatprep.mubr.f32.mxu0 %v21895_v8  ;;  %14741 = vmatpush1.bf16.msra.mxu0 %v16431_v12 }
 0x21e   : > { %12119 = vmatprep.subr.msk.mxu0 %vm482_vm1, %v17711_v11 }
 0x21f   : > { %v17715_v19 = vpop.f32.mrb[44].mxu0  ;;  %13750 = vmatmul.mubr.msk.f32.gmra.mrb[88].mxu1 %vm442_vm2, %v16951_v23  ;;  %v17733_v23 = vld [vmem:[%s21820_s1 + $0x60] sm:$0x1f] }
 0x220   : > { %v17721_v60 = vpop.f32.mrb[45].mxu0  ;;  %12094 = vmatmul.mubr.msk.f32.gmra.mrb[98].mxu0 %vm442_vm2, %v17351_v9  ;;  %13752 = vmatprep.mubr.msk.f32.mxu1 %vm15952_vm0, %v21895_v8  ;;  %22036 = vst [vmem:[#allocation59_spill] sm:$0xff] %v17733_v23 }
 0x221   : > { %22035 = vst [vmem:[#allocation25_spill] sm:$0xff] %v17721_v60  ;;  %3458 = vmatprep.mubr.f32.mxu0 %v21895_v8  ;;  %12120 = vmatpush1.msk.msra.mxu0 %vm482_vm1, %v17733_v23 }
 0x222   : > { %14749 = vmatprep.subr.bf16.mxu0 %v16464_v22 }
 0x223   : > { %v17738_v58 = vpop.f32.mrb[46].mxu0  ;;  %13753 = vmatmul.mubr.msk.f32.gmra.mrb[90].mxu1 %vm442_vm2, %v16964_v27 }
 0x224   : > { %22037 = vst [vmem:[#allocation60_spill] sm:$0xff] %v17738_v58  ;;  %v17744_v7 = vpop.f32.mrb[47].mxu0  ;;  %12095 = vmatmul.mubr.msk.f32.gmra.mrb[100].mxu0 %vm442_vm2, %v17367_v51  ;;  %13755 = vmatprep.mubr.msk.f32.mxu1 %vm15952_vm0, %v21895_v8 }
 0x225   : > { %22038 = vst [vmem:[#allocation61_spill] sm:$0xff] %v17744_v7  ;;  %3464 = vmatprep.mubr.f32.mxu0 %v21895_v8 }
 0x227   : > { %v17753_v22 = vpop.f32.mrb[48].mxu0  ;;  %13756 = vmatmul.mubr.msk.f32.gmra.mrb[92].mxu1 %vm442_vm2, %v16977_v31  ;;  %v22053_v31 = vld [vmem:[#allocation20_spill] sm:$0xff] }
 0x228   : > { %22040 = vst [vmem:[#allocation62_spill] sm:$0xff] %v17753_v22  ;;  %v17759_v58 = vpop.f32.mrb[49].mxu0  ;;  %12096 = vmatmul.mubr.msk.f32.gmra.mrb[102].mxu0 %vm442_vm2, %v17389_v17  ;;  %13758 = vmatprep.mubr.msk.f32.mxu1 %vm15952_vm0, %v21895_v8 }
 0x229   : > { %22042 = vst [vmem:[#allocation63_spill] sm:$0xff] %v17759_v58  ;;  %3470 = vmatprep.mubr.f32.mxu0 %v21895_v8 }
 0x22b   : > { %v17768_v23 = vpop.f32.mrb[50].mxu0  ;;  %13759 = vmatmul.mubr.msk.f32.gmra.mrb[94].mxu1 %vm442_vm2, %v16987_v34 }
 0x22c   : > { %22044 = vst [vmem:[#allocation64_spill] sm:$0xff] %v17768_v23  ;;  %v17774_v22 = vpop.f32.mrb[51].mxu0  ;;  %12097 = vmatmul.mubr.msk.f32.gmra.mrb[104].mxu0 %vm442_vm2, %v17401_v6  ;;  %13761 = vmatprep.mubr.msk.f32.mxu1 %vm15952_vm0, %v21895_v8 }
 0x22d   : > { %22046 = vst [vmem:[#allocation65_spill] sm:$0xff] %v17774_v22  ;;  %3476 = vmatprep.mubr.f32.mxu0 %v21895_v8 }
 0x22f   : > { %v17783_v60 = vpop.f32.mrb[52].mxu0  ;;  %13762 = vmatmul.mubr.msk.f32.gmra.mrb[96].mxu1 %vm442_vm2, %v16997_v39 }
 0x230   : > { %22048 = vst [vmem:[#allocation66_spill] sm:$0xff] %v17783_v60  ;;  %v17789_v23 = vpop.f32.mrb[53].mxu0  ;;  %12098 = vmatmul.mubr.msk.f32.gmra.mrb[106].mxu0 %vm442_vm2, %v17414_v18  ;;  %13764 = vmatprep.mubr.msk.f32.mxu1 %vm15952_vm0, %v21895_v8 }
 0x231   : > { %22050 = vst [vmem:[#allocation67_spill] sm:$0xff] %v17789_v23  ;;  %3482 = vmatprep.mubr.f32.mxu0 %v21895_v8  ;;  %v22086_v23 = vld [vmem:[#allocation19_spill] sm:$0xff] }
 0x233   : > { %v17798_v7 = vpop.f32.mrb[54].mxu0  ;;  %13765 = vmatmul.mubr.msk.f32.gmra.mrb[98].mxu1 %vm442_vm2, %v22053_v31  ;;  %v22058_v31 = vld [vmem:[#allocation21_spill] sm:$0xff] }
 0x234   : > { %22052 = vst [vmem:[#allocation68_spill] sm:$0xff] %v17798_v7  ;;  %v17804_v60 = vpop.f32.mrb[55].mxu0  ;;  %12099 = vmatmul.mubr.msk.f32.gmra.mrb[108].mxu0 %vm442_vm2, %v17427_v0  ;;  %13767 = vmatprep.mubr.msk.f32.mxu1 %vm15952_vm0, %v21895_v8  ;;  %v22070_v7 = vld [vmem:[#allocation11_spill] sm:$0xff] }
 0x235   : > { %22055 = vst [vmem:[#allocation20_spill] sm:$0xff] %v17804_v60  ;;  %3488 = vmatprep.mubr.f32.mxu0 %v21895_v8  ;;  %v17841_v60 = vld [vmem:[%s16145_s29 + $0x208] sm:$0xff] }
 0x237   : > { %v17813_v58 = vpop.f32.mrb[56].mxu0  ;;  %13768 = vmatmul.mubr.msk.f32.gmra.mrb[100].mxu1 %vm442_vm2, %v22058_v31  ;;  %v22063_v31 = vld [vmem:[#allocation22_spill] sm:$0xff] }
 0x238   : > { %22057 = vst [vmem:[#allocation69_spill] sm:$0xff] %v17813_v58  ;;  %v17819_v39 = vpop.f32.mrb[57].mxu0  ;;  %12100 = vmatmul.mubr.msk.f32.gmra.mrb[110].mxu0 %vm442_vm2, %v17437_v16  ;;  %13770 = vmatprep.mubr.msk.f32.mxu1 %vm15952_vm0, %v21895_v8 }
 0x239   : > { %22060 = vst [vmem:[#allocation21_spill] sm:$0xff] %v17819_v39  ;;  %3494 = vmatprep.mubr.f32.mxu0 %v21895_v8  ;;  %v22077_v39 = vld [vmem:[#allocation13_spill] sm:$0xff] }
 0x23b   : > { %v17828_v22 = vpop.f32.mrb[58].mxu0  ;;  %13771 = vmatmul.mubr.msk.f32.gmra.mrb[102].mxu1 %vm442_vm2, %v22063_v31 }
 0x23c   : > { %22062 = vst [vmem:[#allocation70_spill] sm:$0xff] %v17828_v22  ;;  %v17834_v40 = vpop.f32.mrb[59].mxu0  ;;  %12101 = vmatmul.mubr.msk.f32.gmra.mrb[112].mxu0 %vm442_vm2, %v17447_v45  ;;  %13783 = vmatprep.mubr.msk.f32.mxu1 %vm15952_vm0, %v21895_v8  ;;  %v17858_v45 = vld [vmem:[%s16145_s29 + $0x210] sm:$0xff] }
 0x23d   : > { %22065 = vst [vmem:[#allocation22_spill] sm:$0xff] %v17834_v40  ;;  %3500 = vmatprep.mubr.f32.mxu0 %v21895_v8  ;;  %v22072_v40 = vmov 0.0   ;;  %v17879_v8 = vld [vmem:[%s16145_s29 + $0x218] sm:$0xff] }
 0x23f   : > { %v17846_v34 = vpop.f32.mrb[60].mxu0  ;;  %13784 = vmatmul.mubr.msk.f32.vlgmr.msra.gmra.mrb[78].mxu1 %vm442_vm2, %v17841_v60 }
 0x240   : > { %22067 = vst [vmem:[#allocation71_spill] sm:$0xff] %v17846_v34  ;;  %v17852_v22 = vpop.f32.mrb[61].mxu0  ;;  %12102 = vmatmul.mubr.msk.f32.gmra.mrb[114].mxu0 %vm442_vm2, %v17457_v48  ;;  %14772 = vmatpush3.bf16.msra.mxu1 %v22070_v7  ;;  %v22090_v48 = vmax.f32 %v17046_v54, %v17495_v53  ;;  %v22091_v54 = vmax.f32 %v17057_v42, %v17508_v57 }
 0x241   : > { %22069 = vst [vmem:[#allocation72_spill] sm:$0xff] %v17852_v22  ;;  %13786 = vmatprep.mubr.msk.f32.mxu1 %vm15952_vm0, %v22072_v40  ;;  %3506 = vmatprep.mubr.f32.mxu0 %v22072_v40  ;;  %v18010_v22 = vld [vmem:[%s16145_s29 + $0x260] sm:$0xff]  ;;  %v22093_v42 = vmax.f32 %v17069_v28, %v17527_v49  ;;  %v22095_v28 = vld [vmem:[#allocation53_spill] sm:$0xff] }
 0x242   : > { %14773 = vmatprep.subr.bf16.mxu1 %v21997_v41  ;;  %v22096_v49 = vmax.f32 %v17080_v61, %v22095_v28  ;;  %v15860_v61 = vld [vmem:[%s21820_s1 + $0xe0] sm:$0x1f] }
 0x243   : > { %v17866_v58 = vpop.f32.mrb[62].mxu0  ;;  %13787 = vmatmul.mubr.msk.f32.gmra.mrb[80].mxu1 %vm442_vm2, %v17858_v45 }
 0x244   : > { %22073 = vst [vmem:[#allocation11_spill] sm:$0xff] %v17866_v58  ;;  %v17872_v31 = vpop.f32.mrb[63].mxu0  ;;  %12103 = vmatmul.mubr.msk.f32.gmra.mrb[116].mxu0 %vm442_vm2, %v17467_v44  ;;  %13789 = vmatprep.mubr.msk.f32.mxu1 %vm15952_vm0, %v22072_v40 }
 0x245   : > { %22075 = vst [vmem:[#allocation73_spill] sm:$0xff] %v17872_v31  ;;  %3512 = vmatprep.mubr.f32.mxu0 %v22072_v40  ;;  %14775 = vmatpush3.bf16.msra.mxu1 %v22077_v39  ;;  %v17899_v39 = vld [vmem:[%s16145_s29 + $0x220] sm:$0xff]  ;;  %v15845_v31 = vld [vmem:[%s16145_s29 + $0x138] sm:$0xff] }
 0x246   : > { %13830 = vmatprep.subr.mxu1 %v22072_v40 }
 0x247   : > { %v17886_v7 = vpop.f32.mrb[64].mxu0  ;;  %13790 = vmatmul.mubr.msk.f32.gmra.mrb[82].mxu1 %vm442_vm2, %v17879_v8 }
 0x248   : > { %22078 = vst [vmem:[#allocation13_spill] sm:$0xff] %v17886_v7  ;;  %v17892_v44 = vpop.f32.mrb[65].mxu0  ;;  %12104 = vmatmul.mubr.msk.f32.gmra.mrb[118].mxu0 %vm442_vm2, %v17477_v50  ;;  %13792 = vmatprep.mubr.msk.f32.mxu1 %vm15952_vm0, %v22072_v40  ;;  %v22085_v7 = vld [vmem:[#allocation18_spill] sm:$0xff]  ;;  %v18020_v50 = vld [vmem:[%s16145_s29 + $0x268] sm:$0x1] }
 0x249   : > { %22080 = vst [vmem:[#allocation74_spill] sm:$0xff] %v17892_v44  ;;  %3713 = vmatprep.mubr.f32.mxu0 %v22072_v40  ;;  %13831 = vmatpush3.msk.msra.mxu1 %vm482_vm1, %v17373_v4  ;;  %v17920_v4 = vld [vmem:[%s16145_s29 + $0x228] sm:$0xff] }
 0x24a   : > { %14784 = vmatprep.subr.bf16.mxu1 %v21997_v41  ;;  %v15853_v44 = vld [vmem:[%s16145_s29 + $0x168] sm:$0xff] }
 0x24b   : > { %v17907_v34 = vpop.f32.mrb[66].mxu0  ;;  %13793 = vmatmul.mubr.msk.f32.gmra.mrb[84].mxu1 %vm442_vm2, %v17899_v39 }
 0x24c   : > { %22082 = vst [vmem:[#allocation75_spill] sm:$0xff] %v17907_v34  ;;  %v17913_v58 = vpop.f32.mrb[67].mxu0  ;;  %12121 = vmatmul.mubr.msk.f32.vlgmr.msra.gmra.mrb[94].mxu0 %vm442_vm2, %v15845_v31  ;;  %13795 = vmatprep.mubr.msk.f32.mxu1 %vm15952_vm0, %v22072_v40  ;;  %v15846_v31 = vld [vmem:[%s16145_s29 + $0x140] sm:$0xff]  ;;  %v17934_v34 = vld [vmem:[%s16145_s29 + $0x230] sm:$0xff] }
 0x24d   : > { %22083 = vst [vmem:[#allocation76_spill] sm:$0xff] %v17913_v58  ;;  %3719 = vmatprep.mubr.f32.mxu0 %v22072_v40  ;;  %14751 = vmatpush1.bf16.msra.mxu0 %v16552_v63  ;;  %v17958_v63 = vld [vmem:[%s21820_s1 + $0x150] sm:$0x1f]  ;;  %v17970_v58 = vld [vmem:[%s16145_s29 + $0x240] sm:$0xff] }
 0x24e   : > { %14753 = vmatprep.subr.bf16.mxu0 %v22085_v7  ;;  %v17941_v7 = vld [vmem:[%s21820_s1 + $0x158] sm:$0x1f]  ;;  %22088 = vst [vmem:[#allocation78_spill] sm:$0xff] %v17958_v63 }
 0x24f   : > { %13796 = vmatmul.mubr.msk.f32.gmra.mrb[86].mxu1 %vm442_vm2, %v17920_v4  ;;  %22087 = vst [vmem:[#allocation77_spill] sm:$0xff] %v17941_v7 }
 0x250   : > { %12122 = vmatmul.mubr.msk.f32.gmra.mrb[96].mxu0 %vm442_vm2, %v15846_v31  ;;  %13798 = vmatprep.mubr.msk.f32.mxu1 %vm15952_vm0, %v22072_v40  ;;  %v15848_v31 = vld [vmem:[%s16145_s29 + $0x148] sm:$0xff] }
 0x251   : > { %3725 = vmatprep.mubr.f32.mxu0 %v22072_v40  ;;  %14755 = vmatpush1.bf16.msra.mxu0 %v22086_v23  ;;  %v17952_v23 = vld [vmem:[%s16145_s29 + $0x238] sm:$0xff] }
 0x252   : > { %12161 = vmatprep.subr.msk.mxu0 %vm482_vm1, %v17941_v7  ;;  %v22089_v7 = vld [vmem:[#allocation10_spill] sm:$0xff] }
 0x253   : > { %13799 = vmatmul.mubr.msk.f32.gmra.mrb[88].mxu1 %vm442_vm2, %v17934_v34 }
 0x254   : > { %12123 = vmatmul.mubr.msk.f32.gmra.mrb[98].mxu0 %vm442_vm2, %v15848_v31  ;;  %13801 = vmatprep.mubr.msk.f32.mxu1 %vm15952_vm0, %v22072_v40  ;;  %v15850_v31 = vld [vmem:[%s16145_s29 + $0x150] sm:$0xff] }
 0x255   : > { %3731 = vmatprep.mubr.f32.mxu0 %v22072_v40  ;;  %12162 = vmatpush1.msk.msra.mxu0 %vm482_vm1, %v17958_v63  ;;  %v15852_v63 = vld [vmem:[%s16145_s29 + $0x160] sm:$0xff] }
 0x256   : > { %14763 = vmatprep.subr.bf16.mxu0 %v22089_v7  ;;  %v15851_v7 = vld [vmem:[%s16145_s29 + $0x158] sm:$0xff] }
 0x257   : > { %13802 = vmatmul.mubr.msk.f32.gmra.mrb[90].mxu1 %vm442_vm2, %v17952_v23 }
 0x258   : > { %12124 = vmatmul.mubr.msk.f32.gmra.mrb[100].mxu0 %vm442_vm2, %v15850_v31  ;;  %13804 = vmatprep.mubr.msk.f32.mxu1 %vm15952_vm0, %v22072_v40  ;;  %v17980_v31 = vld [vmem:[%s16145_s29 + $0x248] sm:$0xff] }
 0x259   : > { %3737 = vmatprep.mubr.f32.mxu0 %v22072_v40 }
 0x25b   : > { %13805 = vmatmul.mubr.msk.f32.gmra.mrb[92].mxu1 %vm442_vm2, %v17970_v58 }
 0x25c   : > { %12125 = vmatmul.mubr.msk.f32.gmra.mrb[102].mxu0 %vm442_vm2, %v15851_v7  ;;  %13807 = vmatprep.mubr.msk.f32.mxu1 %vm15952_vm0, %v22072_v40  ;;  %v17990_v7 = vld [vmem:[%s16145_s29 + $0x250] sm:$0xff] }
 0x25d   : > { %3743 = vmatprep.mubr.f32.mxu0 %v22072_v40 }
 0x25f   : > { %13808 = vmatmul.mubr.msk.f32.gmra.mrb[94].mxu1 %vm442_vm2, %v17980_v31 }
 0x260   : > { %12126 = vmatmul.mubr.msk.f32.gmra.mrb[104].mxu0 %vm442_vm2, %v15852_v63  ;;  %13810 = vmatprep.mubr.msk.f32.mxu1 %vm15952_vm0, %v22072_v40  ;;  %v18000_v63 = vld [vmem:[%s16145_s29 + $0x258] sm:$0xff] }
 0x261   : > { %3749 = vmatprep.mubr.f32.mxu0 %v22072_v40 }
 0x263   : > { %13811 = vmatmul.mubr.msk.f32.gmra.mrb[96].mxu1 %vm442_vm2, %v17990_v7 }
 0x264   : > { %12127 = vmatmul.mubr.msk.f32.gmra.mrb[106].mxu0 %vm442_vm2, %v15853_v44  ;;  %13813 = vmatprep.mubr.msk.f32.mxu1 %vm15952_vm0, %v22072_v40  ;;  %v15855_v44 = vld [vmem:[%s16145_s29 + $0x178] sm:$0xff] }
 0x265   : > { %3755 = vmatprep.mubr.f32.mxu0 %v22072_v40 }
 0x267   : > { %13814 = vmatmul.mubr.msk.f32.gmra.mrb[98].mxu1 %vm442_vm2, %v18000_v63 }
 0x268   : > { %12128 = vmatmul.mubr.msk.f32.gmra.mrb[108].mxu0 %vm442_vm2, %v15854_v21  ;;  %13816 = vmatprep.mubr.msk.f32.mxu1 %vm15952_vm0, %v22072_v40  ;;  %v15856_v21 = vld [vmem:[%s16145_s29 + $0x180] sm:$0xff] }
 0x269   : > { %3761 = vmatprep.mubr.f32.mxu0 %v22072_v40 }
 0x26b   : > { %13817 = vmatmul.mubr.msk.f32.gmra.mrb[100].mxu1 %vm442_vm2, %v18010_v22 }
 0x26c   : > { %12129 = vmatmul.mubr.msk.f32.gmra.mrb[110].mxu0 %vm442_vm2, %v15855_v44  ;;  %13819 = vmatprep.mubr.msk.f32.mxu1 %vm15952_vm0, %v22072_v40  ;;  %v15857_v44 = vld [vmem:[%s16145_s29 + $0x188] sm:$0xff] }
 0x26d   : > { %3767 = vmatprep.mubr.f32.mxu0 %v22072_v40 }
 0x26f   : > { %13820 = vmatmul.mubr.msk.f32.gmra.mrb[102].mxu1 %vm442_vm2, %v18020_v50 }
 0x270   : > { %12130 = vmatmul.mubr.msk.f32.gmra.mrb[112].mxu0 %vm442_vm2, %v15856_v21  ;;  %13832 = vmatprep.mubr.msk.f32.mxu1 %vm15952_vm0, %v22072_v40 }
 0x271   : > { %3773 = vmatprep.mubr.f32.mxu0 %v22072_v40 }
 0x273   : > { %13833 = vmatmul.mubr.msk.f32.vlgmr.msra.gmra.mrb[104].mxu1 %vm442_vm2, %v17841_v60 }
 0x274   : > { %12131 = vmatmul.mubr.msk.f32.gmra.mrb[114].mxu0 %vm442_vm2, %v15857_v44  ;;  %14786 = vmatpush3.bf16.msra.mxu1 %v16171_v26  ;;  %v15858_v44 = vld [vmem:[%s16145_s29 + $0x190] sm:$0xff] }
 0x275   : > { %13835 = vmatprep.mubr.msk.f32.mxu1 %vm15952_vm0, %v22072_v40  ;;  %3779 = vmatprep.mubr.f32.mxu0 %v22072_v40 }
 0x276   : > { %v3234_v21 = vpop.f32.mrb[52].mxu1  ;;  %14787 = vmatprep.subr.bf16.mxu1 %v21997_v41 }
 0x277   : > { %v18042_v16 = vmax.f32 %v22090_v48, %v3234_v21  ;;  %v13638_v27 = vpop.f32.mrb[53].mxu1  ;;  %13836 = vmatmul.mubr.msk.f32.gmra.mrb[106].mxu1 %vm442_vm2, %v17858_v45 }
 0x278   : > { %12132 = vmatmul.mubr.msk.f32.gmra.mrb[116].mxu0 %vm442_vm2, %v15858_v44  ;;  %13838 = vmatprep.mubr.msk.f32.mxu1 %vm15952_vm0, %v22072_v40  ;;  %v15859_v27 = vld [vmem:[%s16145_s29 + $0x198] sm:$0x1] }
 0x279   : > { %3785 = vmatprep.mubr.f32.mxu0 %v22072_v40  ;;  %14789 = vmatpush3.bf16.msra.mxu1 %v16201_v32  ;;  %v22092_v32 = vld [vmem:[#allocation52_spill] sm:$0xff] }
 0x27a   : > { %v3239_v26 = vpop.f32.mrb[54].mxu1  ;;  %13879 = vmatprep.subr.mxu1 %v22072_v40 }
 0x27b   : > { %v18056_v48 = vmax.f32 %v22091_v54, %v3239_v26  ;;  %v13641_v53 = vpop.f32.mrb[55].mxu1  ;;  %13839 = vmatmul.mubr.msk.f32.gmra.mrb[108].mxu1 %vm442_vm2, %v17879_v8  ;;  %v22094_v26 = vld [vmem:[#allocation12_spill] sm:$0xff] }
 0x27c   : > { %12133 = vmatmul.mubr.msk.f32.gmra.mrb[118].mxu0 %vm442_vm2, %v15859_v27  ;;  %13841 = vmatprep.mubr.msk.f32.mxu1 %vm15952_vm0, %v22072_v40 }
 0x27d   : > { %4039 = vmatprep.mubr.f32.mxu0 %v22072_v40  ;;  %13880 = vmatpush3.msk.msra.mxu1 %vm482_vm1, %v22092_v32  ;;  %v22097_v32 = vld [vmem:[#allocation14_spill] sm:$0xff] }
 0x27e   : > { %v3244_v21 = vpop.f32.mrb[56].mxu1  ;;  %14798 = vmatprep.subr.bf16.mxu1 %v21997_v41 }
 0x27f   : > { %v18071_v57 = vmax.f32 %v22093_v42, %v3244_v21  ;;  %v13644_v44 = vpop.f32.mrb[57].mxu1  ;;  %13842 = vmatmul.mubr.msk.f32.gmra.mrb[110].mxu1 %vm442_vm2, %v17899_v39  ;;  %v22098_v21 = vmax.f32 %v17097_v29, %v17553_v10  ;;  %v22099_v29 = vld [vmem:[#allocation15_spill] sm:$0xff] }
 0x280   : > { %12163 = vmatmul.mubr.msk.f32.vlgmr.msra.gmra.mrb[94].mxu0 %vm442_vm2, %v17841_v60  ;;  %13844 = vmatprep.mubr.msk.f32.mxu1 %vm15952_vm0, %v22072_v40 }
 0x281   : > { %4045 = vmatprep.mubr.f32.mxu0 %v22072_v40  ;;  %14765 = vmatpush1.bf16.msra.mxu0 %v22094_v26  ;;  %v15861_v26 = vld [vmem:[%s21820_s1 + $0xd8] sm:$0x1f] }
 0x282   : > { %v3249_v54 = vpop.f32.mrb[58].mxu1  ;;  %14767 = vmatprep.subr.bf16.mxu0 %v16117_v14 }
 0x283   : > { %v18085_v53 = vmax.f32 %v22096_v49, %v3249_v54  ;;  %v13647_v27 = vpop.f32.mrb[59].mxu1  ;;  %13845 = vmatmul.mubr.msk.f32.gmra.mrb[112].mxu1 %vm442_vm2, %v17920_v4  ;;  %v22100_v54 = vld [vmem:[#allocation23_spill] sm:$0xff] }
 0x284   : > { %12164 = vmatmul.mubr.msk.f32.gmra.mrb[96].mxu0 %vm442_vm2, %v17858_v45  ;;  %13847 = vmatprep.mubr.msk.f32.mxu1 %vm15952_vm0, %v22072_v40  ;;  %v22101_v28 = vmax.f32 %v17114_v38, %v22100_v54 }
 0x285   : > { %4051 = vmatprep.mubr.f32.mxu0 %v22072_v40  ;;  %14769 = vmatpush1.bf16.msra.mxu0 %v22097_v32 }
 0x286   : > { %v3254_v14 = vpop.f32.mrb[60].mxu1  ;;  %12190 = vmatprep.subr.msk.mxu0 %vm482_vm1, %v15860_v61 }
 0x287   : > { %v18102_v42 = vmax.f32 %v22098_v21, %v3254_v14  ;;  %v13650_v44 = vpop.f32.mrb[61].mxu1  ;;  %13848 = vmatmul.mubr.msk.f32.gmra.mrb[114].mxu1 %vm442_vm2, %v17934_v34  ;;  %v22102_v14 = vld [vmem:[#allocation54_spill] sm:$0xff] }
 0x288   : > { %12165 = vmatmul.mubr.msk.f32.gmra.mrb[98].mxu0 %vm442_vm2, %v17879_v8  ;;  %13850 = vmatprep.mubr.msk.f32.mxu1 %vm15952_vm0, %v22072_v40  ;;  %v22103_v61 = vmax.f32 %v17123_v3, %v22102_v14 }
 0x289   : > { %4057 = vmatprep.mubr.f32.mxu0 %v22072_v40  ;;  %12191 = vmatpush1.msk.msra.mxu0 %vm482_vm1, %v15861_v26  ;;  %v22104_v26 = vld [vmem:[#allocation55_spill] sm:$0xff] }
 0x28a   : > { %v3259_v10 = vpop.f32.mrb[62].mxu1  ;;  %14777 = vmatprep.subr.bf16.mxu0 %v22099_v29 }
 0x28b   : > { %v18119_v49 = vmax.f32 %v22101_v28, %v3259_v10  ;;  %v13653_v27 = vpop.f32.mrb[63].mxu1  ;;  %13851 = vmatmul.mubr.msk.f32.gmra.mrb[116].mxu1 %vm442_vm2, %v17952_v23  ;;  %v22105_v10 = vmax.f32 %v17132_v25, %v22104_v26  ;;  %v22106_v28 = vld [vmem:[#allocation24_spill] sm:$0xff] }
 0x28c   : > { %12166 = vmatmul.mubr.msk.f32.gmra.mrb[100].mxu0 %vm442_vm2, %v17899_v39  ;;  %13853 = vmatprep.mubr.msk.f32.mxu1 %vm15952_vm0, %v22072_v40  ;;  %v22107_v27 = vld [vmem:[#allocation56_spill] sm:$0xff] }
 0x28d   : > { %4063 = vmatprep.mubr.f32.mxu0 %v22072_v40 }
 0x28e   : > { %v3264_v32 = vpop.f32.mrb[64].mxu1 }
 0x28f   : > { %v18131_v21 = vmax.f32 %v22103_v61, %v3264_v32  ;;  %v13656_v38 = vpop.f32.mrb[65].mxu1  ;;  %13854 = vmatmul.mubr.msk.f32.gmra.mrb[118].mxu1 %vm442_vm2, %v17970_v58  ;;  %v22108_v32 = vmax.f32 %v22106_v28, %v22107_v27 }
 0x290   : > { %12167 = vmatmul.mubr.msk.f32.gmra.mrb[102].mxu0 %vm442_vm2, %v17920_v4  ;;  %13856 = vmatprep.mubr.msk.f32.mxu1 %vm15952_vm0, %v22072_v40  ;;  %v22109_v38 = vld [vmem:[#allocation57_spill] sm:$0xff] }
 0x291   : > { %4069 = vmatprep.mubr.f32.mxu0 %v22072_v40 }
 0x292   : > { %v3269_v44 = vpop.f32.mrb[66].mxu1 }
 0x293   : > { %v18143_v29 = vmax.f32 %v22105_v10, %v3269_v44  ;;  %v13659_v3 = vpop.f32.mrb[67].mxu1  ;;  %13857 = vmatmul.mubr.msk.f32.gmra.mrb[120].mxu1 %vm442_vm2, %v17980_v31  ;;  %v22110_v44 = vmax.f32 %v17150_v30, %v22109_v38 }
 0x294   : > { %12168 = vmatmul.mubr.msk.f32.gmra.mrb[104].mxu0 %vm442_vm2, %v17934_v34  ;;  %13859 = vmatprep.mubr.msk.f32.mxu1 %vm15952_vm0, %v22072_v40 }
 0x295   : > { %4075 = vmatprep.mubr.f32.mxu0 %v22072_v40 }
 0x296   : > { %v3274_v54 = vpop.f32.mrb[68].mxu1 }
 0x297   : > { %v18155_v14 = vmax.f32 %v22108_v32, %v3274_v54  ;;  %v13662_v25 = vpop.f32.mrb[69].mxu1  ;;  %13860 = vmatmul.mubr.msk.f32.gmra.mrb[122].mxu1 %vm442_vm2, %v17990_v7  ;;  %v22111_v54 = vld [vmem:[#allocation58_spill] sm:$0xff] }
 0x298   : > { %12169 = vmatmul.mubr.msk.f32.gmra.mrb[106].mxu0 %vm442_vm2, %v17952_v23  ;;  %13862 = vmatprep.mubr.msk.f32.mxu1 %vm15952_vm0, %v22072_v40  ;;  %v22112_v28 = vmax.f32 %v22034_v59, %v22111_v54  ;;  %v22113_v25 = vmax.f32 %v17168_v35, %v17635_v56  ;;  %v22130_v54 = vld [vmem:[#allocation28_spill] sm:$0xff] }
 0x299   : > { %4081 = vmatprep.mubr.f32.mxu0 %v22072_v40 }
 0x29a   : > { %v3279_v61 = vpop.f32.mrb[70].mxu1 }
 0x29b   : > { %v18167_v26 = vmax.f32 %v22110_v44, %v3279_v61  ;;  %v13665_v10 = vpop.f32.mrb[71].mxu1  ;;  %13863 = vmatmul.mubr.msk.f32.gmra.mrb[124].mxu1 %vm442_vm2, %v18000_v63  ;;  %v22114_v44 = vmax.f32 %v17177_v33, %v17646_v47  ;;  %v22117_v33 = vmax.f32 %v17230_v37, %v17715_v19  ;;  %v22121_v37 = vld [vmem:[#allocation16_spill] sm:$0xff] }
 0x29c   : > { %12170 = vmatmul.mubr.msk.f32.gmra.mrb[108].mxu0 %vm442_vm2, %v17970_v58  ;;  %13865 = vmatprep.mubr.msk.f32.mxu1 %vm15952_vm0, %v22072_v40 }
 0x29d   : > { %4087 = vmatprep.mubr.f32.mxu0 %v22072_v40 }
 0x29e   : > { %v3284_v3 = vpop.f32.mrb[72].mxu1 }
 0x29f   : > { %v18179_v27 = vmax.f32 %v22112_v28, %v3284_v3  ;;  %v13668_v30 = vpop.f32.mrb[73].mxu1  ;;  %13866 = vmatmul.mubr.msk.f32.gmra.mrb[126].mxu1 %vm442_vm2, %v18010_v22  ;;  %v22131_v28 = vld [vmem:[#allocation63_spill] sm:$0xff] }
 0x2a0   : > { %12171 = vmatmul.mubr.msk.f32.gmra.mrb[110].mxu0 %vm442_vm2, %v17980_v31  ;;  %13868 = vmatprep.mubr.msk.f32.mxu1 %vm15952_vm0, %v22072_v40  ;;  %v22132_v30 = vmax.f32 %v22130_v54, %v22131_v28 }
 0x2a1   : > { %4093 = vmatprep.mubr.f32.mxu0 %v22072_v40 }
 0x2a2   : > { %v3289_v32 = vpop.f32.mrb[74].mxu1 }
 0x2a3   : > { %v18191_v61 = vmax.f32 %v22113_v25, %v3289_v32  ;;  %v13671_v59 = vpop.f32.mrb[75].mxu1  ;;  %13869 = vmatmul.mubr.msk.f32.gmra.mrb[128].mxu1 %vm442_vm2, %v18020_v50  ;;  %v22133_v25 = vld [vmem:[#allocation47_spill] sm:$0xff] }
 0x2a4   : > { %12172 = vmatmul.mubr.msk.f32.gmra.mrb[112].mxu0 %vm442_vm2, %v17990_v7  ;;  %13881 = vmatprep.mubr.msk.f32.mxu1 %vm15952_vm0, %v22072_v40  ;;  %v22134_v59 = vld [vmem:[#allocation29_spill] sm:$0xff] }
 0x2a5   : > { %4099 = vmatprep.mubr.f32.mxu0 %v22072_v40 }
 0x2a6   : > { %v3294_v38 = vpop.f32.mrb[76].mxu1 }
 0x2a7   : > { %v18203_v10 = vmax.f32 %v22114_v44, %v3294_v38  ;;  %v13674_v35 = vpop.f32.mrb[77].mxu1  ;;  %13882 = vmatmul.mubr.msk.f32.vlgmr.msra.gmra.mrb[104].mxu1 %vm442_vm2, %v17321_v62  ;;  %v22135_v38 = vld [vmem:[#allocation64_spill] sm:$0xff] }
 0x2a8   : > { %12173 = vmatmul.mubr.msk.f32.gmra.mrb[114].mxu0 %vm442_vm2, %v18000_v63  ;;  %14800 = vmatpush3.bf16.msra.mxu1 %v16284_v46  ;;  %v22115_v46 = vmax.f32 %v17216_v36, %v17692_v24  ;;  %v22125_v24 = vld [vmem:[#allocation61_spill] sm:$0xff]  ;;  %v22136_v44 = vmax.f32 %v22134_v59, %v22135_v38 }
 0x2a9   : > { %13884 = vmatprep.mubr.msk.f32.mxu1 %vm15952_vm0, %v22072_v40  ;;  %4105 = vmatprep.mubr.f32.mxu0 %v22072_v40 }
 0x2aa   : > { %14801 = vmatprep.subr.bf16.mxu1 %v21997_v41 }
 0x2ab   : > { %13885 = vmatmul.mubr.msk.f32.gmra.mrb[106].mxu1 %vm442_vm2, %v17334_v15 }
 0x2ac   : > { %12174 = vmatmul.mubr.msk.f32.gmra.mrb[116].mxu0 %vm442_vm2, %v18010_v22  ;;  %13887 = vmatprep.mubr.msk.f32.mxu1 %vm15952_vm0, %v22072_v40 }
 0x2ad   : > { %4111 = vmatprep.mubr.f32.mxu0 %v22072_v40  ;;  %14803 = vmatpush3.bf16.msra.mxu1 %v16310_v52 }
 0x2ae   : > { %13928 = vmatprep.subr.mxu1 %v22072_v40 }
 0x2af   : > { %13888 = vmatmul.mubr.msk.f32.gmra.mrb[108].mxu1 %vm442_vm2, %v17351_v9 }
 0x2b0   : > { %12175 = vmatmul.mubr.msk.f32.gmra.mrb[118].mxu0 %vm442_vm2, %v18020_v50  ;;  %13890 = vmatprep.mubr.msk.f32.mxu1 %vm15952_vm0, %v22072_v40 }
 0x2b1   : > { %4390 = vmatprep.mubr.f32.mxu0 %v22072_v40  ;;  %13929 = vmatpush3.msk.msra.mxu1 %vm482_vm1, %v17678_v20 }
 0x2b3   : > { %13891 = vmatmul.mubr.msk.f32.gmra.mrb[110].mxu1 %vm442_vm2, %v17367_v51 }
 0x2b4   : > { %12192 = vmatmul.mubr.msk.f32.vlgmr.msra.gmra.mrb[120].mxu0 %vm442_vm2, %v17841_v60  ;;  %13893 = vmatprep.mubr.msk.f32.mxu1 %vm15952_vm0, %v22072_v40 }
 0x2b5   : > { %4396 = vmatprep.mubr.f32.mxu0 %v22072_v40  ;;  %14779 = vmatpush1.bf16.msra.mxu0 %v16409_v2  ;;  %v22116_v2 = vmax.f32 %v17220_v55, %v17698_v1 }
 0x2b6   : > { %14781 = vmatprep.subr.bf16.mxu0 %v16411_v5 }
 0x2b7   : > { %v3091_v9 = vpop.f32.mrb[68].mxu0  ;;  %13894 = vmatmul.mubr.msk.f32.gmra.mrb[112].mxu1 %vm442_vm2, %v17389_v17 }
 0x2b8   : > { %v18246_v52 = vmax.f32 %v22115_v46, %v3091_v9  ;;  %v3093_v51 = vpop.f32.mrb[69].mxu0  ;;  %12193 = vmatmul.mubr.msk.f32.gmra.mrb[122].mxu0 %vm442_vm2, %v17858_v45  ;;  %13896 = vmatprep.mubr.msk.f32.mxu1 %vm15952_vm0, %v22072_v40  ;;  %v22137_v9 = vld [vmem:[#allocation30_spill] sm:$0xff]  ;;  %v22138_v46 = vld [vmem:[#allocation65_spill] sm:$0xff] }
 0x2b9   : > { %v18255_v5 = vmax.f32 %v22116_v2, %v3093_v51  ;;  %4402 = vmatprep.mubr.f32.mxu0 %v22072_v40  ;;  %14783 = vmatpush1.bf16.msra.mxu0 %v16431_v12  ;;  %v22118_v12 = vld [vmem:[#allocation25_spill] sm:$0xff]  ;;  %v22139_v51 = vmax.f32 %v22137_v9, %v22138_v46 }
 0x2ba   : > { %12219 = vmatprep.subr.msk.mxu0 %vm482_vm1, %v17711_v11  ;;  %v22119_v55 = vmax.f32 %v17234_v43, %v22118_v12  ;;  %v22124_v43 = vld [vmem:[#allocation26_spill] sm:$0xff] }
 0x2bb   : > { %v3097_v17 = vpop.f32.mrb[70].mxu0  ;;  %13897 = vmatmul.mubr.msk.f32.gmra.mrb[114].mxu1 %vm442_vm2, %v17401_v6  ;;  %v22120_v6 = vld [vmem:[#allocation59_spill] sm:$0xff]  ;;  %v22126_v60 = vmax.f32 %v22124_v43, %v22125_v24  ;;  %v22128_v11 = vld [vmem:[#allocation62_spill] sm:$0xff]  ;;  %v22147_v43 = vld [vmem:[#allocation49_spill] sm:$0xff] }
 0x2bc   : > { %v18266_v36 = vmax.f32 %v22117_v33, %v3097_v17  ;;  %v3099_v62 = vpop.f32.mrb[71].mxu0  ;;  %12194 = vmatmul.mubr.msk.f32.gmra.mrb[124].mxu0 %vm442_vm2, %v17879_v8  ;;  %13899 = vmatprep.mubr.msk.f32.mxu1 %vm15952_vm0, %v22072_v40  ;;  %v22122_v8 = vld [vmem:[#allocation60_spill] sm:$0xff]  ;;  %v22142_v12 = vld [vmem:[#allocation66_spill] sm:$0xff]  ;;  %v22148_v24 = vld [vmem:[#allocation33_spill] sm:$0xff] }
 0x2bd   : > { %v18275_v15 = vmax.f32 %v22119_v55, %v3099_v62  ;;  %4408 = vmatprep.mubr.f32.mxu0 %v22072_v40  ;;  %12220 = vmatpush1.msk.msra.mxu0 %vm482_vm1, %v22120_v6  ;;  %v22123_v56 = vmax.f32 %v17244_v13, %v22122_v8  ;;  %v22127_v13 = vld [vmem:[#allocation27_spill] sm:$0xff]  ;;  %v22140_v33 = vld [vmem:[#allocation48_spill] sm:$0xff] }
 0x2be   : > { %14791 = vmatprep.subr.bf16.mxu0 %v22121_v37  ;;  %v22129_v19 = vmax.f32 %v22127_v13, %v22128_v11  ;;  %v22141_v62 = vld [vmem:[#allocation31_spill] sm:$0xff]  ;;  %v22144_v37 = vld [vmem:[#allocation32_spill] sm:$0xff]  ;;  %v22151_v11 = vld [vmem:[#allocation34_spill] sm:$0xff] }
 0x2bf   : > { %v3103_v45 = vpop.f32.mrb[72].mxu0  ;;  %13900 = vmatmul.mubr.msk.f32.gmra.mrb[116].mxu1 %vm442_vm2, %v17414_v18  ;;  %v22143_v55 = vmax.f32 %v22141_v62, %v22142_v12  ;;  %v22163_v62 = vld [vmem:[#allocation70_spill] sm:$0xff] }
 0x2c0   : > { %v18286_v47 = vmax.f32 %v22123_v56, %v3103_v45  ;;  %v3105_v20 = vpop.f32.mrb[73].mxu0  ;;  %12195 = vmatmul.mubr.msk.f32.gmra.mrb[126].mxu0 %vm442_vm2, %v17899_v39  ;;  %13902 = vmatprep.mubr.msk.f32.mxu1 %vm15952_vm0, %v22072_v40  ;;  %v22145_v45 = vld [vmem:[#allocation67_spill] sm:$0xff] }
 0x2c1   : > { %v18295_v1 = vmax.f32 %v22126_v60, %v3105_v20  ;;  %4414 = vmatprep.mubr.f32.mxu0 %v22072_v40  ;;  %v22146_v8 = vmax.f32 %v22144_v37, %v22145_v45  ;;  %v22149_v60 = vld [vmem:[#allocation68_spill] sm:$0xff]  ;;  %v22165_v37 = vld [vmem:[#allocation38_spill] sm:$0xff] }
 0x2c2   : > { %v22166_v45 = vld [vmem:[#allocation22_spill] sm:$0xff] }
 0x2c3   : > { %v3109_v18 = vpop.f32.mrb[74].mxu0  ;;  %13903 = vmatmul.mubr.msk.f32.gmra.mrb[118].mxu1 %vm442_vm2, %v17427_v0 }
 0x2c4   : > { %v18303_v3 = vmax.f32 %v22129_v19, %v3109_v18  ;;  %v3111_v39 = vpop.f32.mrb[75].mxu0  ;;  %12196 = vmatmul.mubr.msk.f32.gmra.mrb[128].mxu0 %vm442_vm2, %v17920_v4  ;;  %13905 = vmatprep.mubr.msk.f32.mxu1 %vm15952_vm0, %v22072_v40  ;;  %v22150_v18 = vmax.f32 %v22148_v24, %v22149_v60  ;;  %v22152_v19 = vld [vmem:[#allocation20_spill] sm:$0xff]  ;;  %v22168_v24 = vld [vmem:[#allocation39_spill] sm:$0xff] }
 0x2c5   : > { %v18312_v32 = vmax.f32 %v22132_v30, %v3111_v39  ;;  %4420 = vmatprep.mubr.f32.mxu0 %v22072_v40  ;;  %v22153_v39 = vmax.f32 %v22151_v11, %v22152_v19  ;;  %v22154_v30 = vld [vmem:[#allocation50_spill] sm:$0xff]  ;;  %v22169_v60 = vld [vmem:[#allocation71_spill] sm:$0xff]  ;;  %v22171_v19 = vld [vmem:[#allocation40_spill] sm:$0xff] }
 0x2c6   : > { %v18415_v11 = vld [vmem:[%s16145_s29 + $0x278] sm:$0xff] }
 0x2c7   : > { %v3115_v0 = vpop.f32.mrb[76].mxu0  ;;  %13906 = vmatmul.mubr.msk.f32.gmra.mrb[120].mxu1 %vm442_vm2, %v22133_v25  ;;  %v22156_v25 = vld [vmem:[#allocation69_spill] sm:$0xff] }
 0x2c8   : > { %v18320_v35 = vmax.f32 %v22136_v44, %v3115_v0  ;;  %v3117_v4 = vpop.f32.mrb[77].mxu0  ;;  %12197 = vmatmul.mubr.msk.f32.gmra.mrb[130].mxu0 %vm442_vm2, %v17934_v34  ;;  %13908 = vmatprep.mubr.msk.f32.mxu1 %vm15952_vm0, %v22072_v40  ;;  %v22155_v0 = vld [vmem:[#allocation35_spill] sm:$0xff]  ;;  %v22158_v44 = vld [vmem:[#allocation36_spill] sm:$0xff] }
 0x2c9   : > { %v18329_v2 = vmax.f32 %v22139_v51, %v3117_v4  ;;  %4426 = vmatprep.mubr.f32.mxu0 %v22072_v40  ;;  %v22157_v59 = vmax.f32 %v22155_v0, %v22156_v25  ;;  %v22159_v4 = vld [vmem:[#allocation21_spill] sm:$0xff] }
 0x2ca   : > { %v22160_v9 = vmax.f32 %v22158_v44, %v22159_v4  ;;  %v22174_v25 = vld [vmem:[#allocation41_spill] sm:$0xff]  ;;  %v18435_v4 = vld [vmem:[%s16145_s29 + $0x280] sm:$0xff] }
 0x2cb   : > { %v3121_v17 = vpop.f32.mrb[78].mxu0  ;;  %13909 = vmatmul.mubr.msk.f32.gmra.mrb[122].mxu1 %vm442_vm2, %v22140_v33  ;;  %v22162_v33 = vld [vmem:[#allocation37_spill] sm:$0xff] }
 0x2cc   : > { %v18337_v6 = vmax.f32 %v22143_v55, %v3121_v17  ;;  %v3123_v34 = vpop.f32.mrb[79].mxu0  ;;  %12198 = vmatmul.mubr.msk.f32.gmra.mrb[132].mxu0 %vm442_vm2, %v17952_v23  ;;  %13911 = vmatprep.mubr.msk.f32.mxu1 %vm15952_vm0, %v22072_v40  ;;  %v22161_v17 = vld [vmem:[#allocation51_spill] sm:$0xff]  ;;  %v22164_v12 = vmax.f32 %v22162_v33, %v22163_v62 }
 0x2cd   : > { %v18346_v56 = vmax.f32 %v22146_v8, %v3123_v34  ;;  %4432 = vmatprep.mubr.f32.mxu0 %v22072_v40  ;;  %v18395_v34 = vld [vmem:[%s16145_s29 + $0x270] sm:$0xff]  ;;  %v22167_v8 = vmax.f32 %v22165_v37, %v22166_v45 }
 0x2cf   : > { %v3127_v20 = vpop.f32.mrb[80].mxu0  ;;  %13912 = vmatmul.mubr.msk.f32.gmra.mrb[124].mxu1 %vm442_vm2, %v22147_v43 }
 0x2d0   : > { %v18354_v13 = vmax.f32 %v22150_v18, %v3127_v20  ;;  %v3129_v23 = vpop.f32.mrb[81].mxu0  ;;  %12199 = vmatmul.mubr.msk.f32.gmra.mrb[134].mxu0 %vm442_vm2, %v17970_v58  ;;  %13914 = vmatprep.mubr.msk.f32.mxu1 %vm15952_vm0, %v22072_v40 }
 0x2d1   : > { %v18363_v54 = vmax.f32 %v22153_v39, %v3129_v23  ;;  %4438 = vmatprep.mubr.f32.mxu0 %v22072_v40  ;;  %v22172_v39 = vld [vmem:[#allocation72_spill] sm:$0xff] }
 0x2d3   : > { %v3133_v28 = vpop.f32.mrb[82].mxu0  ;;  %13915 = vmatmul.mubr.msk.f32.gmra.mrb[126].mxu1 %vm442_vm2, %v22154_v30 }
 0x2d4   : > { %v18371_v38 = vmax.f32 %v22157_v59, %v3133_v28  ;;  %v3135_v58 = vpop.f32.mrb[83].mxu0  ;;  %12200 = vmatmul.mubr.msk.f32.gmra.mrb[136].mxu0 %vm442_vm2, %v17980_v31  ;;  %13917 = vmatprep.mubr.msk.f32.mxu1 %vm15952_vm0, %v22072_v40  ;;  %v22173_v28 = vmax.f32 %v22171_v19, %v22172_v39  ;;  %v22175_v59 = vld [vmem:[#allocation11_spill] sm:$0xff]  ;;  %v22188_v19 = vld [vmem:[#allocation45_spill] sm:$0xff] }
 0x2d5   : > { %v18380_v46 = vmax.f32 %v22160_v9, %v3135_v58  ;;  %4444 = vmatprep.mubr.f32.mxu0 %v22072_v40  ;;  %v22177_v9 = vld [vmem:[#allocation42_spill] sm:$0xff] }
 0x2d7   : > { %v3139_v51 = vpop.f32.mrb[84].mxu0  ;;  %13918 = vmatmul.mubr.msk.f32.gmra.mrb[128].mxu1 %vm442_vm2, %v22161_v17 }
 0x2d8   : > { %v18388_v55 = vmax.f32 %v22164_v12, %v3139_v51  ;;  %v3141_v31 = vpop.f32.mrb[85].mxu0  ;;  %12201 = vmatmul.mubr.msk.f32.gmra.mrb[138].mxu0 %vm442_vm2, %v17990_v7  ;;  %13930 = vmatprep.mubr.msk.f32.mxu1 %vm15952_vm0, %v22072_v40  ;;  %v22170_v7 = vmax.f32 %v22168_v24, %v22169_v60  ;;  %v22178_v51 = vld [vmem:[#allocation73_spill] sm:$0xff]  ;;  %v22180_v12 = vld [vmem:[#allocation43_spill] sm:$0xff]  ;;  %v22185_v24 = vld [vmem:[#allocation74_spill] sm:$0xff] }
 0x2d9   : > { %v18400_v20 = vmax.f32 %v22167_v8, %v3141_v31  ;;  %4450 = vmatprep.mubr.f32.mxu0 %v22072_v40  ;;  %v22179_v17 = vmax.f32 %v22177_v9, %v22178_v51  ;;  %v18455_v8 = vld [vmem:[%s16145_s29 + $0x288] sm:$0xff] }
 0x2db   : > { %v3145_v43 = vpop.f32.mrb[86].mxu0  ;;  %13931 = vmatmul.mubr.msk.f32.vlgmr.msra.gmra.mrb[104].mxu1 %vm442_vm2, %v18395_v34 }
 0x2dc   : > { %v18408_v18 = vmax.f32 %v22170_v7, %v3145_v43  ;;  %v3147_v23 = vpop.f32.mrb[87].mxu0  ;;  %12202 = vmatmul.mubr.msk.f32.gmra.mrb[140].mxu0 %vm442_vm2, %v18000_v63  ;;  %13933 = vmatprep.mubr.msk.f32.mxu1 %vm15952_vm0, %v22072_v40  ;;  %v22176_v63 = vmax.f32 %v22174_v25, %v22175_v59  ;;  %v22184_v43 = vld [vmem:[#allocation44_spill] sm:$0xff]  ;;  %v15862_v25 = vld [vmem:[%s16145_s29 + $0x1a0] sm:$0xff] }
 0x2dd   : > { %v18420_v30 = vmax.f32 %v22173_v28, %v3147_v23  ;;  %4456 = vmatprep.mubr.f32.mxu0 %v22072_v40  ;;  %v22186_v60 = vmax.f32 %v22184_v43, %v22185_v24  ;;  %v18475_v59 = vld [vmem:[%s16145_s29 + $0x290] sm:$0xff]  ;;  %v18505_v24 = vld [vmem:[%s16145_s29 + $0x2a0] sm:$0xff] }
 0x2de   : > { %v15864_v43 = vld [vmem:[%s16145_s29 + $0x1b0] sm:$0xff] }
 0x2df   : > { %v3151_v0 = vpop.f32.mrb[88].mxu0  ;;  %13934 = vmatmul.mubr.msk.f32.gmra.mrb[106].mxu1 %vm442_vm2, %v18415_v11 }
 0x2e0   : > { %v18428_v58 = vmax.f32 %v22176_v63, %v3151_v0  ;;  %v3153_v44 = vpop.f32.mrb[89].mxu0  ;;  %12203 = vmatmul.mubr.msk.f32.gmra.mrb[142].mxu0 %vm442_vm2, %v18010_v22  ;;  %13936 = vmatprep.mubr.msk.f32.mxu1 %vm15952_vm0, %v22072_v40  ;;  %v22181_v22 = vld [vmem:[#allocation13_spill] sm:$0xff]  ;;  %v22192_v63 = vld [vmem:[#allocation46_spill] sm:$0xff] }
 0x2e1   : > { %v18440_v33 = vmax.f32 %v22179_v17, %v3153_v44  ;;  %4462 = vmatprep.mubr.f32.mxu0 %v22072_v40  ;;  %v22182_v31 = vmax.f32 %v22180_v12, %v22181_v22  ;;  %v22193_v44 = vld [vmem:[#allocation76_spill] sm:$0xff]  ;;  %v22196_v17 = vld [vmem:[#allocation17_spill] sm:$0xff] }
 0x2e2   : > { %v22194_v9 = vmax.f32 %v22192_v63, %v22193_v44  ;;  %v15863_v12 = vld [vmem:[%s16145_s29 + $0x1a8] sm:$0xff]  ;;  %v18492_v22 = vld [vmem:[%s16145_s29 + $0x298] sm:$0xff]  ;;  %v15868_v63 = vld [vmem:[%s16145_s29 + $0x1d0] sm:$0xff] }
 0x2e3   : > { %v3157_v62 = vpop.f32.mrb[90].mxu0  ;;  %13937 = vmatmul.mubr.msk.f32.gmra.mrb[108].mxu1 %vm442_vm2, %v18435_v4  ;;  %v18547_v44 = vld [vmem:[%s16145_s29 + $0x2c0] sm:$0xff] }
 0x2e4   : > { %v18448_v37 = vmax.f32 %v22182_v31, %v3157_v62  ;;  %v3159_v45 = vpop.f32.mrb[91].mxu0  ;;  %12204 = vmatmul.mubr.msk.f32.gmra.mrb[144].mxu0 %vm442_vm2, %v18020_v50  ;;  %13939 = vmatprep.mubr.msk.f32.mxu1 %vm15952_vm0, %v22072_v40  ;;  %v22189_v50 = vld [vmem:[#allocation75_spill] sm:$0xff]  ;;  %v22197_v62 = vld [vmem:[#allocation18_spill] sm:$0xff] }
 0x2e5   : > { %v18460_v7 = vmax.f32 %v22186_v60, %v3159_v45  ;;  %4663 = vmatprep.mubr.f32.mxu0 %v22072_v40  ;;  %v22190_v39 = vmax.f32 %v22188_v19, %v22189_v50  ;;  %v22198_v31 = vld [vmem:[#allocation19_spill] sm:$0xff]  ;;  %v22199_v45 = vld [vmem:[#allocation77_spill] sm:$0xff]  ;;  %v22200_v60 = vld [vmem:[#allocation78_spill] sm:$0xff] }
 0x2e6   : > { %22183 = vst [vmem:[#allocation10_spill] sm:$0xff] %v18448_v37  ;;  %v18517_v19 = vld [vmem:[%s16145_s29 + $0x2a8] sm:$0xff]  ;;  %v15866_v50 = vld [vmem:[%s16145_s29 + $0x1c0] sm:$0xff] }
 0x2e7   : > { %22187 = vst [vmem:[#allocation52_spill] sm:$0xff] %v18460_v7  ;;  %v3163_v23 = vpop.f32.mrb[92].mxu0  ;;  %13940 = vmatmul.mubr.msk.f32.gmra.mrb[110].mxu1 %vm442_vm2, %v18455_v8 }
 0x2e8   : > { %v18468_v28 = vmax.f32 %v22190_v39, %v3163_v23  ;;  %v3165_v0 = vpop.f32.mrb[93].mxu0  ;;  %12221 = vmatmul.mubr.msk.f32.vlgmr.msra.gmra.mrb[120].mxu0 %vm442_vm2, %v15862_v25  ;;  %13942 = vmatprep.mubr.msk.f32.mxu1 %vm15952_vm0, %v22072_v40  ;;  %v15865_v23 = vld [vmem:[%s16145_s29 + $0x1b8] sm:$0xff]  ;;  %v18527_v39 = vld [vmem:[%s16145_s29 + $0x2b0] sm:$0xff] }
 0x2e9   : > { %v18480_v51 = vmax.f32 %v22194_v9, %v3165_v0  ;;  %4669 = vmatprep.mubr.f32.mxu0 %v22072_v40  ;;  %14793 = vmatpush1.bf16.msra.mxu0 %v22196_v17  ;;  %v15867_v0 = vld [vmem:[%s16145_s29 + $0x1c8] sm:$0xff]  ;;  %v18537_v25 = vld [vmem:[%s16145_s29 + $0x2b8] sm:$0xff] }
 0x2ea   : > { %22191 = vst [vmem:[#allocation12_spill] sm:$0xff] %v18468_v28  ;;  %14795 = vmatprep.subr.bf16.mxu0 %v22197_v62  ;;  %v15869_v9 = vld [vmem:[%s16145_s29 + $0x1d8] sm:$0xff]  ;;  %v18557_v17 = vld [vmem:[%s16145_s29 + $0x2c8] sm:$0xff]  ;;  %v18563_v62 = vld [vmem:[%s21821_s2] ss:$0 sm:$0xff] }
 0x2eb   : > { %22195 = vst [vmem:[#allocation53_spill] sm:$0xff] %v18480_v51  ;;  %13943 = vmatmul.mubr.msk.f32.gmra.mrb[112].mxu1 %vm442_vm2, %v18475_v59  ;;  %6363 = vrot.lane.b32.xlu1 %v18563_v62, %s15953_s26  ;;  %s21777_s26 = scalar_lea.hbm %s21830_s11, %s12614_s22 }
 0x2ec   : > { %12222 = vmatmul.mubr.msk.f32.gmra.mrb[122].mxu0 %vm442_vm2, %v15863_v12  ;;  %13945 = vmatprep.mubr.msk.f32.mxu1 %vm15952_vm0, %v22072_v40  ;;  %v15870_v12 = vld [vmem:[%s16145_s29 + $0x1e0] sm:$0xff] }
 0x2ed   : > { %4675 = vmatprep.mubr.f32.mxu0 %v22072_v40  ;;  %14797 = vmatpush1.bf16.msra.mxu0 %v22198_v31  ;;  %v18574_v31 = vld [vmem:[%s16145_s29 + $0x2d0] sm:$0x1] }
 0x2ee   : > { %12261 = vmatprep.subr.msk.mxu0 %vm482_vm1, %v22199_v45  ;;  %6248 = vrot.lane.b32.xlu0 %v18563_v62, %s15954_s24  ;;  %v15871_v45 = vld [vmem:[%s16145_s29 + $0x1e8] sm:$0xff]  ;;  %s15963_s24 = smov 56  }
 0x2ef   : > { %13946 = vmatmul.mubr.msk.f32.gmra.mrb[114].mxu1 %vm442_vm2, %v18492_v22 }
 0x2f0   : > { %12223 = vmatmul.mubr.msk.f32.gmra.mrb[124].mxu0 %vm442_vm2, %v15864_v43  ;;  %13948 = vmatprep.mubr.msk.f32.mxu1 %vm15952_vm0, %v22072_v40  ;;  %v15872_v43 = vld [vmem:[%s16145_s29 + $0x1f0] sm:$0xff] }
 0x2f1   : > { %4681 = vmatprep.mubr.f32.mxu0 %v22072_v40  ;;  %12262 = vmatpush1.msk.msra.mxu0 %vm482_vm1, %v22200_v60  ;;  %vm6329_vm1 = vcmask 162896  }
 0x2f2   : > { %6478 = vrot.lane.b32.xlu0 %v18563_v62, %s15956_s25  ;;  %s15965_s25 = smov 8  }
 0x2f3   : > { %13949 = vmatmul.mubr.msk.f32.gmra.mrb[116].mxu1 %vm442_vm2, %v18505_v24 }
 0x2f4   : > { %12224 = vmatmul.mubr.msk.f32.gmra.mrb[126].mxu0 %vm442_vm2, %v15865_v23  ;;  %13951 = vmatprep.mubr.msk.f32.mxu1 %vm15952_vm0, %v22072_v40 }
 0x2f5   : > { %4687 = vmatprep.mubr.f32.mxu0 %v22072_v40 }
 0x2f6   : > { %6721 = vrot.lane.b32.xlu0 %v18563_v62, %s15958_s12  ;;  %s15967_s12 = smov 96  }
 0x2f7   : > { %13952 = vmatmul.mubr.msk.f32.gmra.mrb[118].mxu1 %vm442_vm2, %v18517_v19 }
 0x2f8   : > { %12225 = vmatmul.mubr.msk.f32.gmra.mrb[128].mxu0 %vm442_vm2, %v15866_v50  ;;  %13954 = vmatprep.mubr.msk.f32.mxu1 %vm15952_vm0, %v22072_v40 }
 0x2f9   : > { %4693 = vmatprep.mubr.f32.mxu0 %v22072_v40 }
 0x2fb   : > { %13955 = vmatmul.mubr.msk.f32.gmra.mrb[120].mxu1 %vm442_vm2, %v18527_v39 }
 0x2fc   : > { %12226 = vmatmul.mubr.msk.f32.gmra.mrb[130].mxu0 %vm442_vm2, %v15867_v0  ;;  %13957 = vmatprep.mubr.msk.f32.mxu1 %vm15952_vm0, %v22072_v40  ;;  %v15873_v0 = vld [vmem:[%s16145_s29 + $0x1f8] sm:$0xff] }
 0x2fd   : > { %4699 = vmatprep.mubr.f32.mxu0 %v22072_v40 }
 0x2ff   : > { %13958 = vmatmul.mubr.msk.f32.gmra.mrb[122].mxu1 %vm442_vm2, %v18537_v25 }
 0x300   : > { %12227 = vmatmul.mubr.msk.f32.gmra.mrb[132].mxu0 %vm442_vm2, %v15868_v63  ;;  %13960 = vmatprep.mubr.msk.f32.mxu1 %vm15952_vm0, %v22072_v40 }
 0x301   : > { %4705 = vmatprep.mubr.f32.mxu0 %v22072_v40 }
 0x303   : > { %13961 = vmatmul.mubr.msk.f32.gmra.mrb[124].mxu1 %vm442_vm2, %v18547_v44 }
 0x304   : > { %12228 = vmatmul.mubr.msk.f32.gmra.mrb[134].mxu0 %vm442_vm2, %v15869_v9  ;;  %13963 = vmatprep.mubr.msk.f32.mxu1 %vm15952_vm0, %v22072_v40 }
 0x305   : > { %4711 = vmatprep.mubr.f32.mxu0 %v22072_v40 }
 0x307   : > { %13964 = vmatmul.mubr.msk.f32.gmra.mrb[126].mxu1 %vm442_vm2, %v18557_v17 }
 0x308   : > { %12229 = vmatmul.mubr.msk.f32.gmra.mrb[136].mxu0 %vm442_vm2, %v15870_v12  ;;  %13966 = vmatprep.mubr.msk.f32.mxu1 %vm15952_vm0, %v22072_v40 }
 0x309   : > { %4717 = vmatprep.mubr.f32.mxu0 %v22072_v40 }
 0x30b   : > { %13967 = vmatmul.mubr.msk.f32.gmra.mrb[128].mxu1 %vm442_vm2, %v18574_v31 }
 0x30c   : > { %12230 = vmatmul.mubr.msk.f32.gmra.mrb[138].mxu0 %vm442_vm2, %v15871_v45  ;;  %v15874_v45 = vld [vmem:[%s16145_s29 + $0x200] sm:$0x1]  ;;  %s15955_s29 = smov 72  }
 0x30d   : > { %4723 = vmatprep.mubr.f32.mxu0 %v22072_v40  ;;  %6593 = vrot.lane.b32.xlu1 %v18563_v62, %s15955_s29  ;;  %s15964_s29 = smov 16  }
 0x310   : > { %12231 = vmatmul.mubr.msk.f32.gmra.mrb[140].mxu0 %vm442_vm2, %v15872_v43 }
 0x311   : > { %4729 = vmatprep.mubr.f32.mxu0 %v22072_v40  ;;  %6915 = vrot.lane.b32.xlu1 %v18563_v62, %s15957_s30  ;;  %s15966_s30 = smov 48  }
 0x312   : > { %v18585_v60 = vpop.f32.mrb[78].mxu1 }
 0x313   : > { %v13785_v50 = vpop.f32.mrb[79].mxu1 }
 0x314   : > { %12232 = vmatmul.mubr.msk.f32.gmra.mrb[142].mxu0 %vm442_vm2, %v15873_v0 }
 0x315   : > { %4735 = vmatprep.mubr.f32.mxu0 %v22072_v40 }
 0x316   : > { %v18592_v63 = vpop.f32.mrb[80].mxu1 }
 0x317   : > { %v13788_v12 = vpop.f32.mrb[81].mxu1 }
 0x318   : > { %12233 = vmatmul.mubr.msk.f32.gmra.mrb[144].mxu0 %vm442_vm2, %v15874_v45 }
 0x319   : > { %4989 = vmatprep.mubr.f32.mxu0 %v22072_v40 }
 0x31a   : > { %v18599_v43 = vpop.f32.mrb[82].mxu1 }
 0x31b   : > { %v13791_v23 = vpop.f32.mrb[83].mxu1 }
 0x31c   : > { %12263 = vmatmul.mubr.msk.f32.vlgmr.msra.gmra.mrb[120].mxu0 %vm442_vm2, %v18395_v34 }
 0x31d   : > { %4995 = vmatprep.mubr.f32.mxu0 %v22072_v40 }
 0x31e   : > { %v18606_v0 = vpop.f32.mrb[84].mxu1 }
 0x31f   : > { %v13794_v9 = vpop.f32.mrb[85].mxu1 }
 0x320   : > { %12264 = vmatmul.mubr.msk.f32.gmra.mrb[122].mxu0 %vm442_vm2, %v18415_v11 }
 0x321   : > { %5001 = vmatprep.mubr.f32.mxu0 %v22072_v40 }
 0x322   : > { %v18613_v45 = vpop.f32.mrb[86].mxu1 }
 0x323   : > { %v13797_v50 = vpop.f32.mrb[87].mxu1 }
 0x324   : > { %12265 = vmatmul.mubr.msk.f32.gmra.mrb[124].mxu0 %vm442_vm2, %v18435_v4 }
 0x325   : > { %5007 = vmatprep.mubr.f32.mxu0 %v22072_v40 }
 0x326   : > { %v18620_v34 = vpop.f32.mrb[88].mxu1 }
 0x327   : > { %v13800_v12 = vpop.f32.mrb[89].mxu1 }
 0x328   : > { %12266 = vmatmul.mubr.msk.f32.gmra.mrb[126].mxu0 %vm442_vm2, %v18455_v8 }
 0x329   : > { %5013 = vmatprep.mubr.f32.mxu0 %v22072_v40 }
 0x32a   : > { %v18627_v11 = vpop.f32.mrb[90].mxu1 }
 0x32b   : > { %v13803_v23 = vpop.f32.mrb[91].mxu1 }
 0x32c   : > { %12267 = vmatmul.mubr.msk.f32.gmra.mrb[128].mxu0 %vm442_vm2, %v18475_v59 }
 0x32d   : > { %5019 = vmatprep.mubr.f32.mxu0 %v22072_v40 }
 0x32e   : > { %v18634_v4 = vpop.f32.mrb[92].mxu1 }
 0x32f   : > { %v13806_v9 = vpop.f32.mrb[93].mxu1 }
 0x330   : > { %12268 = vmatmul.mubr.msk.f32.gmra.mrb[130].mxu0 %vm442_vm2, %v18492_v22 }
 0x331   : > { %5025 = vmatprep.mubr.f32.mxu0 %v22072_v40 }
 0x332   : > { %v18642_v8 = vpop.f32.mrb[94].mxu1 }
 0x333   : > { %v13809_v23 = vpop.f32.mrb[95].mxu1 }
 0x334   : > { %12269 = vmatmul.mubr.msk.f32.gmra.mrb[132].mxu0 %vm442_vm2, %v18505_v24 }
 0x335   : > { %5031 = vmatprep.mubr.f32.mxu0 %v22072_v40 }
 0x336   : > { %v18651_v22 = vpop.f32.mrb[96].mxu1 }
 0x337   : > { %v13812_v12 = vpop.f32.mrb[97].mxu1 }
 0x338   : > { %12270 = vmatmul.mubr.msk.f32.gmra.mrb[134].mxu0 %vm442_vm2, %v18517_v19 }
 0x339   : > { %5037 = vmatprep.mubr.f32.mxu0 %v22072_v40 }
 0x33a   : > { %v18659_v24 = vpop.f32.mrb[98].mxu1 }
 0x33b   : > { %v13815_v59 = vpop.f32.mrb[99].mxu1 }
 0x33c   : > { %12271 = vmatmul.mubr.msk.f32.gmra.mrb[136].mxu0 %vm442_vm2, %v18527_v39 }
 0x33d   : > { %5043 = vmatprep.mubr.f32.mxu0 %v22072_v40 }
 0x33e   : > { %v18666_v62 = vpop.f32.mrb[100].mxu1 }
 0x33f   : > { %v13818_v9 = vpop.f32.mrb[101].mxu1 }
 0x340   : > { %12272 = vmatmul.mubr.msk.f32.gmra.mrb[138].mxu0 %vm442_vm2, %v18537_v25 }
 0x341   : > { %5049 = vmatprep.mubr.f32.mxu0 %v22072_v40 }
 0x342   : > { %v18673_v19 = vpop.f32.mrb[102].mxu1 }
 0x343   : > { %v13821_v23 = vpop.f32.mrb[103].mxu1 }
 0x344   : > { %12273 = vmatmul.mubr.msk.f32.gmra.mrb[140].mxu0 %vm442_vm2, %v18547_v44  ;;  %v22226_v44 = vmax.f32 %v18071_v57, %v18599_v43 }
 0x345   : > { %5055 = vmatprep.mubr.f32.mxu0 %v22072_v40 }
 0x348   : > { %12274 = vmatmul.mubr.msk.f32.gmra.mrb[142].mxu0 %vm442_vm2, %v18557_v17  ;;  %v22224_v17 = vmax.f32 %v18042_v16, %v18585_v60 }
 0x349   : > { %5061 = vmatprep.mubr.f32.mxu0 %v22072_v40 }
 0x34c   : > { %12275 = vmatmul.mubr.msk.f32.gmra.mrb[144].mxu0 %vm442_vm2, %v18574_v31  ;;  %vm6444_vm2 = vcmask 244896  }
 0x353   : > { %v18685_v39 = vpop.f32.mrb[94].mxu0 }
 0x354   : > { %v18689_v9 = vpop.f32.mrb[95].mxu0 }
 0x357   : > { %v18693_v23 = vpop.f32.mrb[96].mxu0 }
 0x358   : > { %v18697_v59 = vpop.f32.mrb[97].mxu0 }
 0x359   : > { %22201 = vst [vmem:[#allocation14_spill] sm:$0xff] %v18697_v59 }
 0x35b   : > { %v18701_v12 = vpop.f32.mrb[98].mxu0 }
 0x35c   : > { %22202 = vst [vmem:[#allocation15_spill] sm:$0xff] %v18701_v12  ;;  %v18705_v50 = vpop.f32.mrb[99].mxu0 }
 0x35d   : > { %22203 = vst [vmem:[#allocation23_spill] sm:$0xff] %v18705_v50 }
 0x35f   : > { %v18709_v40 = vpop.f32.mrb[100].mxu0 }
 0x360   : > { %22204 = vst [vmem:[#allocation54_spill] sm:$0xff] %v18709_v40  ;;  %v18713_v41 = vpop.f32.mrb[101].mxu0 }
 0x361   : > { %22205 = vst [vmem:[#allocation55_spill] sm:$0xff] %v18713_v41 }
 0x363   : > { %v18717_v59 = vpop.f32.mrb[102].mxu0 }
 0x364   : > { %22206 = vst [vmem:[#allocation24_spill] sm:$0xff] %v18717_v59  ;;  %v18721_v12 = vpop.f32.mrb[103].mxu0 }
 0x365   : > { %22207 = vst [vmem:[#allocation56_spill] sm:$0xff] %v18721_v12 }
 0x367   : > { %v18725_v50 = vpop.f32.mrb[104].mxu0 }
 0x368   : > { %22208 = vst [vmem:[#allocation57_spill] sm:$0xff] %v18725_v50  ;;  %v18729_v40 = vpop.f32.mrb[105].mxu0 }
 0x369   : > { %22209 = vst [vmem:[#allocation58_spill] sm:$0xff] %v18729_v40 }
 0x36b   : > { %v18733_v41 = vpop.f32.mrb[106].mxu0 }
 0x36c   : > { %22210 = vst [vmem:[#allocation25_spill] sm:$0xff] %v18733_v41  ;;  %v18737_v59 = vpop.f32.mrb[107].mxu0 }
 0x36d   : > { %22211 = vst [vmem:[#allocation59_spill] sm:$0xff] %v18737_v59 }
 0x36f   : > { %v18741_v12 = vpop.f32.mrb[108].mxu0 }
 0x370   : > { %22212 = vst [vmem:[#allocation16_spill] sm:$0xff] %v18741_v12  ;;  %v18745_v50 = vpop.f32.mrb[109].mxu0 }
 0x371   : > { %22213 = vst [vmem:[#allocation60_spill] sm:$0xff] %v18745_v50 }
 0x373   : > { %v18749_v40 = vpop.f32.mrb[110].mxu0 }
 0x374   : > { %22214 = vst [vmem:[#allocation26_spill] sm:$0xff] %v18749_v40  ;;  %v18753_v41 = vpop.f32.mrb[111].mxu0 }
 0x375   : > { %22215 = vst [vmem:[#allocation61_spill] sm:$0xff] %v18753_v41 }
 0x377   : > { %v18757_v59 = vpop.f32.mrb[112].mxu0 }
 0x378   : > { %22216 = vst [vmem:[#allocation27_spill] sm:$0xff] %v18757_v59  ;;  %v18761_v12 = vpop.f32.mrb[113].mxu0 }
 0x379   : > { %22217 = vst [vmem:[#allocation62_spill] sm:$0xff] %v18761_v12 }
 0x37b   : > { %v18765_v50 = vpop.f32.mrb[114].mxu0 }
 0x37c   : > { %22218 = vst [vmem:[#allocation28_spill] sm:$0xff] %v18765_v50  ;;  %v18769_v40 = vpop.f32.mrb[115].mxu0 }
 0x37d   : > { %22219 = vst [vmem:[#allocation63_spill] sm:$0xff] %v18769_v40 }
 0x37f   : > { %v18773_v41 = vpop.f32.mrb[116].mxu0 }
 0x380   : > { %22220 = vst [vmem:[#allocation47_spill] sm:$0xff] %v18773_v41  ;;  %v18777_v59 = vpop.f32.mrb[117].mxu0 }
 0x381   : > { %22221 = vst [vmem:[#allocation29_spill] sm:$0xff] %v18777_v59  ;;  %v22225_v59 = vmax.f32 %v18056_v48, %v18592_v63  ;;  %v22229_v63 = vmax.f32 %v18119_v49, %v18620_v34  ;;  %v22231_v34 = vmax.f32 %v18143_v29, %v18634_v4  ;;  %v22233_v4 = vmax.f32 %v18167_v26, %v18651_v22 }
 0x382   : > { %v22235_v22 = vmax.f32 %v18191_v61, %v18666_v62  ;;  %v22237_v62 = vmax.f32 %v18246_v52, %v18685_v39  ;;  %v22240_v39 = vld [vmem:[#allocation14_spill] sm:$0xff] }
 0x383   : > { %v18781_v12 = vpop.f32.mrb[118].mxu0 }
 0x384   : > { %22222 = vst [vmem:[#allocation64_spill] sm:$0xff] %v18781_v12  ;;  %v18785_v50 = vpop.f32.mrb[119].mxu0 }
 0x385   : > { %22223 = vst [vmem:[#allocation30_spill] sm:$0xff] %v18785_v50 }
 0x3ae   : > { %v5134_v40 = vpop.f32.mrb[104].mxu1 }
 0x3af   : > { %v5239_v41 = vmax.f32 %v22224_v17, %v5134_v40  ;;  %v13932_v37 = vpop.f32.mrb[105].mxu1 }
 0x3b0   : > { %v22228_v37 = vmax.f32 %v18102_v42, %v18613_v45  ;;  %v22230_v45 = vmax.f32 %v18131_v21, %v18627_v11  ;;  %v22232_v11 = vmax.f32 %v18155_v14, %v18642_v8  ;;  %v22234_v8 = vmax.f32 %v18179_v27, %v18659_v24 }
 0x3b1   : > { %5279 = vst.msk [vmem:[#allocation2 + $0x10] sm:$0xff] %vm5278_vm3, %v5239_v41  ;;  %v22227_v41 = vmax.f32 %v18085_v53, %v18606_v0  ;;  %v22236_v24 = vmax.f32 %v18203_v10, %v18673_v19 }
 0x3b2   : > { %v5139_v31 = vpop.f32.mrb[106].mxu1 }
 0x3b3   : > { %v5242_v7 = vmax.f32 %v22225_v59, %v5139_v31  ;;  %v13935_v25 = vpop.f32.mrb[107].mxu1 }
 0x3b5   : > { %5282 = vst.msk [vmem:[#allocation2 + $0x28] sm:$0xff] %vm5278_vm3, %v5242_v7 }
 0x3b6   : > { %v5144_v12 = vpop.f32.mrb[108].mxu1 }
 0x3b7   : > { %v5245_v50 = vmax.f32 %v22226_v44, %v5144_v12  ;;  %v13938_v51 = vpop.f32.mrb[109].mxu1 }
 0x3b8   : > { %v18800_v28 = vld [vmem:[#allocation2 + $0x10] sm:$0xff] }
 0x3b9   : > { %5285 = vst.msk [vmem:[#allocation2 + $0x40] sm:$0xff] %vm5278_vm3, %v5245_v50  ;;  %5582 = vrot.lane.b32.xlu1 %v18800_v28, %s15959_s13  ;;  %5399 = vrot.lane.b32.xlu0 %v18800_v28, %s15960_s14 }
 0x3ba   : > { %v5149_v16 = vpop.f32.mrb[110].mxu1 }
 0x3bb   : > { %v5248_v40 = vmax.f32 %v22227_v41, %v5149_v16  ;;  %v13941_v48 = vpop.f32.mrb[111].mxu1 }
 0x3bc   : > { %v18818_v60 = vld [vmem:[#allocation2 + $0x28] sm:$0xff] }
 0x3bd   : > { %5288 = vst.msk [vmem:[#allocation2 + $0x58] sm:$0xff] %vm5278_vm3, %v5248_v40  ;;  %5765 = vrot.lane.b32.xlu1 %v18800_v28, %s21974_s15  ;;  %5948 = vrot.lane.b32.xlu0 %v18800_v28, %s15962_s16 }
 0x3be   : > { %v5154_v57 = vpop.f32.mrb[112].mxu1 }
 0x3bf   : > { %v5251_v7 = vmax.f32 %v22228_v37, %v5154_v57  ;;  %v13944_v51 = vpop.f32.mrb[113].mxu1 }
 0x3c0   : > { %v18836_v59 = vld [vmem:[#allocation2 + $0x40] sm:$0xff] }
 0x3c1   : > { %5291 = vst.msk [vmem:[#allocation2 + $0x70] sm:$0xff] %vm5278_vm3, %v5251_v7  ;;  %5588 = vrot.lane.b32.xlu0 %v18818_v60, %s15959_s13  ;;  %5405 = vrot.lane.b32.xlu1 %v18818_v60, %s15960_s14 }
 0x3c2   : > { %v5159_v53 = vpop.f32.mrb[114].mxu1 }
 0x3c3   : > { %v5254_v43 = vmax.f32 %v22229_v63, %v5159_v53  ;;  %v13947_v0 = vpop.f32.mrb[115].mxu1 }
 0x3c4   : > { %v18854_v16 = vld [vmem:[#allocation2 + $0x58] sm:$0xff] }
 0x3c5   : > { %5294 = vst.msk [vmem:[#allocation2 + $0x88] sm:$0xff] %vm5278_vm3, %v5254_v43  ;;  %5771 = vrot.lane.b32.xlu0 %v18818_v60, %s21974_s15  ;;  %5954 = vrot.lane.b32.xlu1 %v18818_v60, %s15962_s16 }
 0x3c6   : > { %v5164_v42 = vpop.f32.mrb[116].mxu1 }
 0x3c7   : > { %v5257_v50 = vmax.f32 %v22230_v45, %v5164_v42  ;;  %v13950_v12 = vpop.f32.mrb[117].mxu1  ;;  %v22238_v45 = vmax.f32 %v18255_v5, %v18689_v9  ;;  %v22242_v9 = vld [vmem:[#allocation15_spill] sm:$0xff] }
 0x3c8   : > { %v18864_v48 = vld [vmem:[#allocation2 + $0x70] sm:$0xff] }
 0x3c9   : > { %5297 = vst.msk [vmem:[#allocation2 + $0xa0] sm:$0xff] %vm5278_vm3, %v5257_v50  ;;  %5594 = vrot.lane.b32.xlu1 %v18836_v59, %s15959_s13  ;;  %5411 = vrot.lane.b32.xlu0 %v18836_v59, %s15960_s14 }
 0x3ca   : > { %v5169_v49 = vpop.f32.mrb[118].mxu1 }
 0x3cb   : > { %v5260_v25 = vmax.f32 %v22231_v34, %v5169_v49  ;;  %v13953_v44 = vpop.f32.mrb[119].mxu1  ;;  %v22239_v49 = vmax.f32 %v18266_v36, %v18693_v23 }
 0x3cc   : > { %v18874_v7 = vld [vmem:[#allocation2 + $0x88] sm:$0xff] }
 0x3cd   : > { %5300 = vst.msk [vmem:[#allocation2 + $0xb8] sm:$0xff] %vm5278_vm3, %v5260_v25  ;;  %5960 = vrot.lane.b32.xlu1 %v18836_v59, %s15962_s16  ;;  %5777 = vrot.lane.b32.xlu0 %v18836_v59, %s21974_s15  ;;  %v22241_v25 = vmax.f32 %v18275_v15, %v22240_v39 }
 0x3ce   : > { %v5174_v21 = vpop.f32.mrb[120].mxu1 }
 0x3cf   : > { %v5263_v17 = vmax.f32 %v22232_v11, %v5174_v21  ;;  %v13956_v31 = vpop.f32.mrb[121].mxu1  ;;  %v22243_v21 = vmax.f32 %v18286_v47, %v22242_v9 }
 0x3d0   : > { %v18892_v0 = vld [vmem:[#allocation2 + $0xa0] sm:$0xff] }
 0x3d1   : > { %5303 = vst.msk [vmem:[#allocation2 + $0xd0] sm:$0xff] %vm5278_vm3, %v5263_v17  ;;  %5600 = vrot.lane.b32.xlu1 %v18854_v16, %s15959_s13  ;;  %5417 = vrot.lane.b32.xlu0 %v18854_v16, %s15960_s14  ;;  %v22244_v17 = vld [vmem:[#allocation23_spill] sm:$0xff] }
 0x3d2   : > { %v5179_v29 = vpop.f32.mrb[122].mxu1  ;;  %v22245_v15 = vmax.f32 %v18295_v1, %v22244_v17 }
 0x3d3   : > { %v5266_v41 = vmax.f32 %v22233_v4, %v5179_v29  ;;  %v13959_v40 = vpop.f32.mrb[123].mxu1  ;;  %v22246_v4 = vld [vmem:[#allocation54_spill] sm:$0xff] }
 0x3d4   : > { %v18902_v61 = vld [vmem:[#allocation2 + $0xb8] sm:$0xff]  ;;  %v22247_v47 = vmax.f32 %v18303_v3, %v22246_v4 }
 0x3d5   : > { %5306 = vst.msk [vmem:[#allocation2 + $0xe8] sm:$0xff] %vm5278_vm3, %v5266_v41  ;;  %5783 = vrot.lane.b32.xlu1 %v18854_v16, %s21974_s15  ;;  %5606 = vrot.lane.b32.xlu0 %v18864_v48, %s15959_s13 }
 0x3d6   : > { %v5184_v14 = vpop.f32.mrb[124].mxu1 }
 0x3d7   : > { %v5269_v57 = vmax.f32 %v22234_v8, %v5184_v14  ;;  %v13962_v37 = vpop.f32.mrb[125].mxu1  ;;  %v22248_v8 = vld [vmem:[#allocation55_spill] sm:$0xff] }
 0x3d8   : > { %v18945_v23 = vld [vmem:[#allocation2 + $0xd0] sm:$0xff]  ;;  %v22249_v1 = vmax.f32 %v18312_v32, %v22248_v8 }
 0x3d9   : > { %5309 = vst.msk [vmem:[#allocation2 + $0x100] sm:$0xff] %vm5278_vm3, %v5269_v57  ;;  %5966 = vrot.lane.b32.xlu1 %v18854_v16, %s15962_s16  ;;  %5429 = vrot.lane.b32.xlu0 %v18874_v7, %s15960_s14 }
 0x3da   : > { %v5189_v26 = vpop.f32.mrb[126].mxu1 }
 0x3db   : > { %v5272_v51 = vmax.f32 %v22235_v22, %v5189_v26  ;;  %v13965_v53 = vpop.f32.mrb[127].mxu1  ;;  %v22250_v26 = vld [vmem:[#allocation24_spill] sm:$0xff] }
 0x3dc   : > { %v18961_v14 = vld [vmem:[#allocation2 + $0xe8] sm:$0xff]  ;;  %v22251_v3 = vmax.f32 %v18320_v35, %v22250_v26 }
 0x3dd   : > { %5312 = vst.msk [vmem:[#allocation2 + $0x118] sm:$0xff] %vm5278_vm3, %v5272_v51  ;;  %5423 = vrot.lane.b32.xlu1 %v18864_v48, %s15960_s14  ;;  %5612 = vrot.lane.b32.xlu0 %v18874_v7, %s15959_s13  ;;  %v22252_v53 = vld [vmem:[#allocation56_spill] sm:$0xff]  ;;  %vm6559_vm3 = vcmask 326896  }
 0x3de   : > { %v5194_v27 = vpop.f32.mrb[128].mxu1 }
 0x3df   : > { %v5275_v63 = vmax.f32 %v22236_v24, %v5194_v27  ;;  %v13968_v43 = vpop.f32.mrb[129].mxu1  ;;  %v22253_v27 = vmax.f32 %v18329_v2, %v22252_v53 }
 0x3e1   : > { %5316 = vst.msk [vmem:[#allocation2 + $0x130] sm:$0x1] %vm5315_vm4, %v5275_v63  ;;  %5789 = vrot.lane.b32.xlu1 %v18864_v48, %s21974_s15  ;;  %5435 = vrot.lane.b32.xlu0 %v18892_v0, %s15960_s14  ;;  %v22254_v63 = vld [vmem:[#allocation57_spill] sm:$0xff]  ;;  %vm6674_vm4 = vcmask 408896  }
 0x3e2   : > { %v22255_v43 = vmax.f32 %v18337_v6, %v22254_v63 }
 0x3e5   : > { %5972 = vrot.lane.b32.xlu1 %v18864_v48, %s15962_s16  ;;  %5618 = vrot.lane.b32.xlu0 %v18892_v0, %s15959_s13 }
 0x3e9   : > { %5795 = vrot.lane.b32.xlu1 %v18874_v7, %s21974_s15  ;;  %5441 = vrot.lane.b32.xlu0 %v18902_v61, %s15960_s14 }
 0x3ed   : > { %5978 = vrot.lane.b32.xlu1 %v18874_v7, %s15962_s16  ;;  %5624 = vrot.lane.b32.xlu0 %v18902_v61, %s15959_s13 }
 0x3ef   : > { %v4991_v10 = vpop.f32.mrb[120].mxu0 }
 0x3f0   : > { %v18915_v19 = vmax.f32 %v22237_v62, %v4991_v10  ;;  %v4993_v42 = vpop.f32.mrb[121].mxu0  ;;  %v18991_v62 = vld [vmem:[#allocation2 + $0x100] sm:$0xff] }
 0x3f1   : > { %v18920_v50 = vmax.f32 %v22238_v45, %v4993_v42  ;;  %5801 = vrot.lane.b32.xlu1 %v18892_v0, %s21974_s15  ;;  %5807 = vrot.lane.b32.xlu0 %v18902_v61, %s21974_s15  ;;  %v22256_v42 = vld [vmem:[#allocation58_spill] sm:$0xff] }
 0x3f2   : > { %v22257_v2 = vmax.f32 %v18346_v56, %v22256_v42 }
 0x3f3   : > { %v4997_v12 = vpop.f32.mrb[122].mxu0 }
 0x3f4   : > { %v18929_v34 = vmax.f32 %v22239_v49, %v4997_v12  ;;  %v4999_v52 = vpop.f32.mrb[123].mxu0  ;;  %v22258_v49 = vld [vmem:[#allocation25_spill] sm:$0xff] }
 0x3f5   : > { %v18934_v44 = vmax.f32 %v22241_v25, %v4999_v52  ;;  %5984 = vrot.lane.b32.xlu1 %v18892_v0, %s15962_s16  ;;  %5990 = vrot.lane.b32.xlu0 %v18902_v61, %s15962_s16  ;;  %v22259_v6 = vmax.f32 %v18354_v13, %v22258_v49  ;;  %v22260_v25 = vld [vmem:[#allocation59_spill] sm:$0xff] }
 0x3f6   : > { %v22277_v49 = vld [vmem:[#allocation63_spill] sm:$0xff] }
 0x3f7   : > { %v5003_v5 = vpop.f32.mrb[124].mxu0 }
 0x3f8   : > { %v18943_v11 = vmax.f32 %v22243_v21, %v5003_v5  ;;  %v5005_v36 = vpop.f32.mrb[125].mxu0  ;;  %v22261_v5 = vmax.f32 %v18363_v54, %v22260_v25  ;;  %v22262_v21 = vld [vmem:[#allocation16_spill] sm:$0xff]  ;;  %v19084_v25 = vpop.permute.xlu0 %6248 }
 0x3f9   : > { %v18950_v31 = vmax.f32 %v22245_v15, %v5005_v36  ;;  %5813 = vrot.lane.b32.xlu1 %v18945_v23, %s21974_s15  ;;  %5447 = vrot.lane.b32.xlu0 %v18945_v23, %s15960_s14  ;;  %v22263_v36 = vmax.f32 %v18371_v38, %v22262_v21  ;;  %v19021_v15 = vld [vmem:[#allocation2 + $0x118] sm:$0xff]  ;;  %22279 = vst [vmem:[#allocation48_spill] sm:$0xff] %v19084_v25 }
 0x3fb   : > { %v5009_v29 = vpop.f32.mrb[126].mxu0 }
 0x3fc   : > { %v18959_v41 = vmax.f32 %v22247_v47, %v5009_v29  ;;  %v5011_v40 = vpop.f32.mrb[127].mxu0  ;;  %v22264_v29 = vld [vmem:[#allocation60_spill] sm:$0xff]  ;;  %v22266_v47 = vld [vmem:[#allocation26_spill] sm:$0xff] }
 0x3fd   : > { %v18966_v57 = vmax.f32 %v22249_v1, %v5011_v40  ;;  %5630 = vrot.lane.b32.xlu0 %v18945_v23, %s15959_s13  ;;  %5453 = vrot.lane.b32.xlu1 %v18961_v14, %s15960_s14  ;;  %v22265_v54 = vmax.f32 %v18380_v46, %v22264_v29  ;;  %v22267_v40 = vmax.f32 %v18388_v55, %v22266_v47  ;;  %v22268_v46 = vld [vmem:[#allocation61_spill] sm:$0xff]  ;;  %v22270_v55 = vld [vmem:[#allocation27_spill] sm:$0xff] }
 0x3fe   : > { %v22284_v29 = vld [vmem:[#allocation29_spill] sm:$0xff] }
 0x3ff   : > { %v5015_v37 = vpop.f32.mrb[128].mxu0 }
 0x400   : > { %v18975_v22 = vmax.f32 %v22251_v3, %v5015_v37  ;;  %v5017_v51 = vpop.f32.mrb[129].mxu0  ;;  %v22269_v37 = vmax.f32 %v18400_v20, %v22268_v46  ;;  %v22272_v20 = vld [vmem:[#allocation62_spill] sm:$0xff]  ;;  %v22288_v46 = vld [vmem:[#allocation12_spill] sm:$0xff] }
 0x401   : > { %v18980_v24 = vmax.f32 %v22253_v27, %v5017_v51  ;;  %5996 = vrot.lane.b32.xlu0 %v18945_v23, %s15962_s16  ;;  %5636 = vrot.lane.b32.xlu1 %v18961_v14, %s15959_s13  ;;  %v22271_v51 = vmax.f32 %v18408_v18, %v22270_v55  ;;  %v22274_v18 = vld [vmem:[#allocation28_spill] sm:$0xff] }
 0x403   : > { %v5021_v32 = vpop.f32.mrb[130].mxu0 }
 0x404   : > { %v18989_v10 = vmax.f32 %v22255_v43, %v5021_v32  ;;  %v5023_v35 = vpop.f32.mrb[131].mxu0  ;;  %v22273_v32 = vmax.f32 %v18420_v30, %v22272_v20  ;;  %v19071_v30 = vld [vmem:[#allocation2 + $0x130] sm:$0x1]  ;;  %v22292_v20 = vld [vmem:[#allocation30_spill] sm:$0xff] }
 0x405   : > { %v18996_v45 = vmax.f32 %v22257_v2, %v5023_v35  ;;  %5819 = vrot.lane.b32.xlu0 %v18961_v14, %s21974_s15  ;;  %5642 = vrot.lane.b32.xlu1 %v18991_v62, %s15959_s13  ;;  %v22275_v35 = vmax.f32 %v18428_v58, %v22274_v18 }
 0x407   : > { %v5027_v12 = vpop.f32.mrb[132].mxu0 }
 0x408   : > { %v19005_v52 = vmax.f32 %v22259_v6, %v5027_v12  ;;  %v5029_v39 = vpop.f32.mrb[133].mxu0  ;;  %v19073_v12 = vpop.permute.xlu1 %6363  ;;  %v22278_v6 = vmax.f32 %v18440_v33, %v22277_v49 }
 0x409   : > { %v19010_v9 = vmax.f32 %v22261_v5, %v5029_v39  ;;  %6002 = vrot.lane.b32.xlu0 %v18961_v14, %s15962_s16  ;;  %6008 = vrot.lane.b32.xlu1 %v18991_v62, %s15962_s16  ;;  %22276 = vst [vmem:[#allocation65_spill] sm:$0xff] %v19073_v12  ;;  %v22280_v5 = vld [vmem:[#allocation10_spill] sm:$0xff] }
 0x40b   : > { %v5033_v56 = vpop.f32.mrb[134].mxu0 }
 0x40c   : > { %v19019_v17 = vmax.f32 %v22263_v36, %v5033_v56  ;;  %v5035_v13 = vpop.f32.mrb[135].mxu0  ;;  %v22281_v56 = vld [vmem:[#allocation47_spill] sm:$0xff]  ;;  %v19103_v47 = vpop.permute.xlu1 %6593 }
 0x40d   : > { %v19026_v4 = vmax.f32 %v22265_v54, %v5035_v13  ;;  %5459 = vrot.lane.b32.xlu0 %v18991_v62, %s15960_s14  ;;  %5465 = vrot.lane.b32.xlu1 %v19021_v15, %s15960_s14  ;;  %v22282_v21 = vmax.f32 %v22280_v5, %v22281_v56  ;;  %v22283_v13 = vld [vmem:[#allocation52_spill] sm:$0xff]  ;;  %22286 = vst [vmem:[#allocation31_spill] sm:$0xff] %v19103_v47 }
 0x40e   : > { %5298 = vst [vmem:[#allocation2 + $0xa8] sm:$0xff] %v19019_v17  ;;  %v22285_v54 = vmax.f32 %v22283_v13, %v22284_v29 }
 0x40f   : > { %5299 = vst [vmem:[#allocation2 + $0xb0] sm:$0xff] %v19026_v4  ;;  %v5039_v38 = vpop.f32.mrb[136].mxu0 }
 0x410   : > { %v19037_v8 = vmax.f32 %v22267_v40, %v5039_v38  ;;  %v5041_v1 = vpop.f32.mrb[137].mxu0  ;;  %v19122_v18 = vpop.permute.xlu1 %6915 }
 0x411   : > { %v19042_v26 = vmax.f32 %v22269_v37, %v5041_v1  ;;  %5825 = vrot.lane.b32.xlu0 %v18991_v62, %s21974_s15  ;;  %5648 = vrot.lane.b32.xlu1 %v19021_v15, %s15959_s13  ;;  %v19106_v1 = vpop.permute.xlu0 %6478  ;;  %v22289_v37 = vld [vmem:[#allocation64_spill] sm:$0xff]  ;;  %22294 = vst [vmem:[#allocation32_spill] sm:$0xff] %v19122_v18 }
 0x412   : > { %5301 = vst [vmem:[#allocation2 + $0xc0] sm:$0xff] %v19037_v8  ;;  %22287 = vst [vmem:[#allocation66_spill] sm:$0xff] %v19106_v1 }
 0x413   : > { %5302 = vst [vmem:[#allocation2 + $0xc8] sm:$0xff] %v19042_v26  ;;  %v5045_v3 = vpop.f32.mrb[138].mxu0 }
 0x414   : > { %v19053_v53 = vmax.f32 %v22271_v51, %v5045_v3  ;;  %v5047_v27 = vpop.f32.mrb[139].mxu0  ;;  %v22290_v3 = vmax.f32 %v22288_v46, %v22289_v37 }
 0x415   : > { %v19058_v63 = vmax.f32 %v22273_v32, %v5047_v27  ;;  %5831 = vrot.lane.b32.xlu0 %v19021_v15, %s21974_s15  ;;  %6014 = vrot.lane.b32.xlu1 %v19021_v15, %s15962_s16  ;;  %v22291_v27 = vld [vmem:[#allocation53_spill] sm:$0xff] }
 0x416   : > { %5304 = vst [vmem:[#allocation2 + $0xd8] sm:$0xff] %v19053_v53  ;;  %v22293_v32 = vmax.f32 %v22291_v27, %v22292_v20 }
 0x417   : > { %5305 = vst [vmem:[#allocation2 + $0xe0] sm:$0xff] %v19058_v63  ;;  %v5051_v43 = vpop.f32.mrb[140].mxu0 }
 0x418   : > { %v19069_v42 = vmax.f32 %v22275_v35, %v5051_v43  ;;  %v5053_v2 = vpop.f32.mrb[141].mxu0  ;;  %v19124_v35 = vpop.permute.xlu0 %6721 }
 0x419   : > { %v19078_v39 = vmax.f32 %v22278_v6, %v5053_v2  ;;  %5654 = vrot.lane.b32.xlu1 %v19071_v30, %s15959_s13  ;;  %5471 = vrot.lane.b32.xlu0 %v19071_v30, %s15960_s14  ;;  %22295 = vst [vmem:[#allocation67_spill] sm:$0xff] %v19124_v35 }
 0x41a   : > { %5307 = vst [vmem:[#allocation2 + $0xf0] sm:$0xff] %v19069_v42 }
 0x41b   : > { %5308 = vst [vmem:[#allocation2 + $0xf8] sm:$0xff] %v19078_v39  ;;  %v5057_v58 = vpop.f32.mrb[142].mxu0 }
 0x41c   : > { %v19091_v36 = vmax.f32 %v22282_v21, %v5057_v58  ;;  %v5059_v33 = vpop.f32.mrb[143].mxu0 }
 0x41d   : > { %v19096_v38 = vmax.f32 %v22285_v54, %v5059_v33  ;;  %6020 = vrot.lane.b32.xlu1 %v19071_v30, %s15962_s16  ;;  %5837 = vrot.lane.b32.xlu0 %v19071_v30, %s21974_s15 }
 0x41e   : > { %5310 = vst [vmem:[#allocation2 + $0x108] sm:$0xff] %v19091_v36 }
 0x41f   : > { %5311 = vst [vmem:[#allocation2 + $0x110] sm:$0xff] %v19096_v38  ;;  %v5063_v40 = vpop.f32.mrb[144].mxu0 }
 0x420   : > { %v5273_v55 = vmax.f32 %v22290_v3, %v5063_v40  ;;  %v5065_v51 = vpop.f32.mrb[145].mxu0 }
 0x421   : > { %v5274_v43 = vmax.f32 %v22293_v32, %v5065_v51  ;;  %5761 = vrot.lane.b32.xlu1 %v18915_v19, %s21974_s15  ;;  %5395 = vrot.lane.b32.xlu0 %v18915_v19, %s15960_s14 }
 0x422   : > { %5313 = vst [vmem:[#allocation2 + $0x120] sm:$0x1] %v5273_v55 }
 0x423   : > { %5314 = vst [vmem:[#allocation2 + $0x128] sm:$0x1] %v5274_v43 }
 0x425   : > { %5944 = vrot.lane.b32.xlu1 %v18915_v19, %s15962_s16  ;;  %5578 = vrot.lane.b32.xlu0 %v18915_v19, %s15959_s13 }
 0x429   : > { %5580 = vrot.lane.b32.xlu1 %v18920_v50, %s15959_s13  ;;  %5397 = vrot.lane.b32.xlu0 %v18920_v50, %s15960_s14 }
 0x42b   : > { %v19130_v2 = vpop.permute.xlu1 %5582  ;;  %v19132_v49 = vpop.permute.xlu0 %5399 }
 0x42c   : > { %v5541_v6 = vmax.f32 %v18800_v28, %v19132_v49 }
 0x42d   : > { %5763 = vrot.lane.b32.xlu0 %v18920_v50, %s21974_s15  ;;  %5401 = vrot.lane.b32.xlu1 %v18929_v34, %s15960_s14 }
 0x42e   : > { %v5724_v58 = vmax.f32 %v5541_v6, %v19130_v2 }
 0x42f   : > { %v19141_v5 = vpop.permute.xlu1 %5765  ;;  %v19143_v56 = vpop.permute.xlu0 %5948 }
 0x430   : > { %v5907_v21 = vmax.f32 %v5724_v58, %v19141_v5 }
 0x431   : > { %5946 = vrot.lane.b32.xlu0 %v18920_v50, %s15962_s16  ;;  %5767 = vrot.lane.b32.xlu1 %v18929_v34, %s21974_s15 }
 0x432   : > { %v6090_v28 = vmax.f32 %v5907_v21, %v19143_v56 }
 0x433   : > { %v19151_v33 = vpop.permute.xlu0 %5588  ;;  %v19153_v13 = vpop.permute.xlu1 %5405 }
 0x434   : > { %6130 = vst.msk [vmem:[#allocation3 + $0x10] sm:$0xff] %vm6129_vm5, %v6090_v28  ;;  %v5544_v29 = vmax.f32 %v18818_v60, %v19153_v13 }
 0x435   : > { %5584 = vrot.lane.b32.xlu0 %v18929_v34, %s15959_s13  ;;  %5950 = vrot.lane.b32.xlu1 %v18929_v34, %s15962_s16 }
 0x436   : > { %v5727_v54 = vmax.f32 %v5544_v29, %v19151_v33 }
 0x437   : > { %v19163_v40 = vpop.permute.xlu0 %5771  ;;  %v19165_v46 = vpop.permute.xlu1 %5954 }
 0x438   : > { %v5910_v37 = vmax.f32 %v5727_v54, %v19163_v40 }
 0x439   : > { %5769 = vrot.lane.b32.xlu0 %v18934_v44, %s21974_s15  ;;  %5403 = vrot.lane.b32.xlu1 %v18934_v44, %s15960_s14 }
 0x43a   : > { %v6093_v60 = vmax.f32 %v5910_v37, %v19165_v46 }
 0x43b   : > { %v19173_v3 = vpop.permute.xlu1 %5594  ;;  %v19175_v55 = vpop.permute.xlu0 %5411 }
 0x43c   : > { %6133 = vst.msk [vmem:[#allocation3 + $0x28] sm:$0xff] %vm6129_vm5, %v6093_v60  ;;  %v5547_v51 = vmax.f32 %v18836_v59, %v19175_v55 }
 0x43d   : > { %5952 = vrot.lane.b32.xlu0 %v18934_v44, %s15962_s16  ;;  %5586 = vrot.lane.b32.xlu1 %v18934_v44, %s15959_s13 }
 0x43e   : > { %v5730_v27 = vmax.f32 %v5547_v51, %v19173_v3 }
 0x43f   : > { %v19185_v20 = vpop.permute.xlu1 %5960  ;;  %v19187_v32 = vpop.permute.xlu0 %5777 }
 0x440   : > { %v5913_v43 = vmax.f32 %v5730_v27, %v19187_v32 }
 0x441   : > { %5590 = vrot.lane.b32.xlu1 %v18943_v11, %s15959_s13  ;;  %5407 = vrot.lane.b32.xlu0 %v18943_v11, %s15960_s14 }
 0x442   : > { %v6096_v59 = vmax.f32 %v5913_v43, %v19185_v20 }
 0x443   : > { %v19195_v6 = vpop.permute.xlu1 %5600  ;;  %v19197_v58 = vpop.permute.xlu0 %5417 }
 0x444   : > { %6136 = vst.msk [vmem:[#allocation3 + $0x40] sm:$0xff] %vm6129_vm5, %v6096_v59  ;;  %v5550_v21 = vmax.f32 %v18854_v16, %v19197_v58 }
 0x445   : > { %5956 = vrot.lane.b32.xlu1 %v18943_v11, %s15962_s16  ;;  %5773 = vrot.lane.b32.xlu0 %v18943_v11, %s21974_s15 }
 0x446   : > { %v5733_v28 = vmax.f32 %v5550_v21, %v19195_v6 }
 0x447   : > { %v19207_v29 = vpop.permute.xlu1 %5783  ;;  %v19209_v54 = vpop.permute.xlu0 %5606 }
 0x448   : > { %v5916_v16 = vmax.f32 %v5733_v28, %v19207_v29 }
 0x449   : > { %5592 = vrot.lane.b32.xlu0 %v18950_v31, %s15959_s13  ;;  %5409 = vrot.lane.b32.xlu1 %v18950_v31, %s15960_s14 }
 0x44b   : > { %v19216_v37 = vpop.permute.xlu1 %5966  ;;  %v19218_v60 = vpop.permute.xlu0 %5429 }
 0x44c   : > { %v6099_v51 = vmax.f32 %v5916_v16, %v19216_v37 }
 0x44d   : > { %5958 = vrot.lane.b32.xlu0 %v18950_v31, %s15962_s16  ;;  %5775 = vrot.lane.b32.xlu1 %v18950_v31, %s21974_s15 }
 0x44e   : > { %6139 = vst.msk [vmem:[#allocation3 + $0x58] sm:$0xff] %vm6129_vm5, %v6099_v51 }
 0x44f   : > { %v19226_v27 = vpop.permute.xlu1 %5423  ;;  %v19228_v43 = vpop.permute.xlu0 %5612 }
 0x450   : > { %v5553_v59 = vmax.f32 %v18864_v48, %v19226_v27 }
 0x451   : > { %5779 = vrot.lane.b32.xlu0 %v18959_v41, %s21974_s15  ;;  %5413 = vrot.lane.b32.xlu1 %v18959_v41, %s15960_s14 }
 0x452   : > { %v5736_v21 = vmax.f32 %v5553_v59, %v19209_v54  ;;  %v5556_v59 = vmax.f32 %v18874_v7, %v19218_v60 }
 0x453   : > { %v19237_v28 = vpop.permute.xlu1 %5789  ;;  %v19239_v16 = vpop.permute.xlu0 %5435 }
 0x454   : > { %22296 = vst [vmem:[#allocation49_spill] sm:$0xff] %v19239_v16  ;;  %v5919_v48 = vmax.f32 %v5736_v21, %v19237_v28  ;;  %v5739_v25 = vmax.f32 %v5556_v59, %v19228_v43 }
 0x455   : > { %5962 = vrot.lane.b32.xlu0 %v18959_v41, %s15962_s16  ;;  %5596 = vrot.lane.b32.xlu1 %v18959_v41, %s15959_s13 }
 0x457   : > { %v19246_v51 = vpop.permute.xlu1 %5972  ;;  %v19248_v47 = vpop.permute.xlu0 %5618 }
 0x458   : > { %v6102_v12 = vmax.f32 %v5919_v48, %v19246_v51 }
 0x459   : > { %5781 = vrot.lane.b32.xlu1 %v18966_v57, %s21974_s15  ;;  %5415 = vrot.lane.b32.xlu0 %v18966_v57, %s15960_s14 }
 0x45a   : > { %6142 = vst.msk [vmem:[#allocation3 + $0x70] sm:$0xff] %vm6129_vm5, %v6102_v12  ;;  %v5559_v12 = vmax.f32 %v18892_v0, %v19239_v16 }
 0x45b   : > { %v19258_v1 = vpop.permute.xlu1 %5795  ;;  %v19260_v21 = vpop.permute.xlu0 %5441 }
 0x45c   : > { %22297 = vst [vmem:[#allocation33_spill] sm:$0xff] %v19258_v1  ;;  %22298 = vst [vmem:[#allocation68_spill] sm:$0xff] %v19260_v21  ;;  %v5922_v48 = vmax.f32 %v5739_v25, %v19258_v1  ;;  %v5562_v59 = vmax.f32 %v18902_v61, %v19260_v21 }
 0x45d   : > { %5964 = vrot.lane.b32.xlu1 %v18966_v57, %s15962_s16  ;;  %5598 = vrot.lane.b32.xlu0 %v18966_v57, %s15959_s13 }
 0x45f   : > { %v19268_v18 = vpop.permute.xlu1 %5978  ;;  %v19270_v35 = vpop.permute.xlu0 %5624 }
 0x460   : > { %22299 = vst [vmem:[#allocation34_spill] sm:$0xff] %v19268_v18  ;;  %v6105_v7 = vmax.f32 %v5922_v48, %v19268_v18  ;;  %v5742_v48 = vmax.f32 %v5559_v12, %v19248_v47  ;;  %v5745_v18 = vmax.f32 %v5562_v59, %v19270_v35 }
 0x461   : > { %5602 = vrot.lane.b32.xlu0 %v18975_v22, %s15959_s13  ;;  %5419 = vrot.lane.b32.xlu1 %v18975_v22, %s15960_s14 }
 0x462   : > { %6145 = vst.msk [vmem:[#allocation3 + $0x88] sm:$0xff] %vm6129_vm5, %v6105_v7 }
 0x463   : > { %v19282_v25 = vpop.permute.xlu1 %5801  ;;  %v19284_v1 = vpop.permute.xlu0 %5807 }
 0x464   : > { %22300 = vst [vmem:[#allocation20_spill] sm:$0xff] %v19284_v1  ;;  %v5925_v0 = vmax.f32 %v5742_v48, %v19282_v25  ;;  %v5928_v61 = vmax.f32 %v5745_v18, %v19284_v1 }
 0x465   : > { %5968 = vrot.lane.b32.xlu0 %v18975_v22, %s15962_s16  ;;  %5785 = vrot.lane.b32.xlu1 %v18975_v22, %s21974_s15 }
 0x467   : > { %v19294_v21 = vpop.permute.xlu1 %5984  ;;  %v19296_v7 = vpop.permute.xlu0 %5990 }
 0x468   : > { %22301 = vst [vmem:[#allocation50_spill] sm:$0xff] %v19296_v7  ;;  %v6108_v16 = vmax.f32 %v5925_v0, %v19294_v21  ;;  %v6111_v12 = vmax.f32 %v5928_v61, %v19296_v7 }
 0x469   : > { %5604 = vrot.lane.b32.xlu1 %v18980_v24, %s15959_s13  ;;  %5421 = vrot.lane.b32.xlu0 %v18980_v24, %s15960_s14 }
 0x46a   : > { %6148 = vst.msk [vmem:[#allocation3 + $0xa0] sm:$0xff] %vm6129_vm5, %v6108_v16  ;;  %6151 = vst.msk [vmem:[#allocation3 + $0xb8] sm:$0xff] %vm6129_vm5, %v6111_v12 }
 0x46b   : > { %v19306_v59 = vpop.permute.xlu1 %5813  ;;  %v19308_v18 = vpop.permute.xlu0 %5447 }
 0x46c   : > { %22302 = vst [vmem:[#allocation35_spill] sm:$0xff] %v19306_v59  ;;  %22303 = vst [vmem:[#allocation69_spill] sm:$0xff] %v19308_v18  ;;  %v5565_v48 = vmax.f32 %v18945_v23, %v19308_v18 }
 0x46d   : > { %5970 = vrot.lane.b32.xlu1 %v18980_v24, %s15962_s16  ;;  %5787 = vrot.lane.b32.xlu0 %v18980_v24, %s21974_s15 }
 0x46f   : > { %v19316_v0 = vpop.permute.xlu0 %5630  ;;  %v19318_v61 = vpop.permute.xlu1 %5453 }
 0x470   : > { %22304 = vst [vmem:[#allocation36_spill] sm:$0xff] %v19316_v0  ;;  %v5748_v16 = vmax.f32 %v5565_v48, %v19316_v0  ;;  %v5568_v48 = vmax.f32 %v18961_v14, %v19318_v61 }
 0x471   : > { %5974 = vrot.lane.b32.xlu0 %v18989_v10, %s15962_s16  ;;  %5425 = vrot.lane.b32.xlu1 %v18989_v10, %s15960_s14 }
 0x472   : > { %v5931_v12 = vmax.f32 %v5748_v16, %v19306_v59 }
 0x473   : > { %v19326_v7 = vpop.permute.xlu0 %5996  ;;  %v19328_v1 = vpop.permute.xlu1 %5636 }
 0x474   : > { %22305 = vst [vmem:[#allocation21_spill] sm:$0xff] %v19326_v7  ;;  %22306 = vst [vmem:[#allocation51_spill] sm:$0xff] %v19328_v1  ;;  %v6114_v23 = vmax.f32 %v5931_v12, %v19326_v7  ;;  %v5751_v59 = vmax.f32 %v5568_v48, %v19328_v1 }
 0x475   : > { %5608 = vrot.lane.b32.xlu1 %v18989_v10, %s15959_s13  ;;  %5427 = vrot.lane.b32.xlu0 %v18996_v45, %s15960_s14 }
 0x476   : > { %6154 = vst.msk [vmem:[#allocation3 + $0xd0] sm:$0xff] %vm6129_vm5, %v6114_v23 }
 0x477   : > { %v19338_v0 = vpop.permute.xlu0 %5819  ;;  %v19340_v16 = vpop.permute.xlu1 %5642 }
 0x478   : > { %22307 = vst [vmem:[#allocation37_spill] sm:$0xff] %v19338_v0  ;;  %22308 = vst [vmem:[#allocation70_spill] sm:$0xff] %v19340_v16  ;;  %v5934_v12 = vmax.f32 %v5751_v59, %v19338_v0 }
 0x479   : > { %5791 = vrot.lane.b32.xlu1 %v18989_v10, %s21974_s15  ;;  %5610 = vrot.lane.b32.xlu0 %v18996_v45, %s15959_s13 }
 0x47b   : > { %v19348_v7 = vpop.permute.xlu0 %6002  ;;  %v19350_v18 = vpop.permute.xlu1 %6008 }
 0x47c   : > { %22309 = vst [vmem:[#allocation38_spill] sm:$0xff] %v19348_v7  ;;  %22310 = vst [vmem:[#allocation22_spill] sm:$0xff] %v19350_v18  ;;  %v6117_v14 = vmax.f32 %v5934_v12, %v19348_v7 }
 0x47d   : > { %5976 = vrot.lane.b32.xlu1 %v18996_v45, %s15962_s16  ;;  %5793 = vrot.lane.b32.xlu0 %v18996_v45, %s21974_s15 }
 0x47e   : > { %6157 = vst.msk [vmem:[#allocation3 + $0xe8] sm:$0xff] %vm6129_vm5, %v6117_v14 }
 0x47f   : > { %v19358_v23 = vpop.permute.xlu0 %5459  ;;  %v19360_v48 = vpop.permute.xlu1 %5465 }
 0x480   : > { %22311 = vst [vmem:[#allocation39_spill] sm:$0xff] %v19358_v23  ;;  %22312 = vst [vmem:[#allocation71_spill] sm:$0xff] %v19360_v48  ;;  %v5571_v59 = vmax.f32 %v18991_v62, %v19358_v23  ;;  %v5574_v14 = vmax.f32 %v19021_v15, %v19360_v48 }
 0x481   : > { %5614 = vrot.lane.b32.xlu1 %v19005_v52, %s15959_s13  ;;  %5431 = vrot.lane.b32.xlu0 %v19005_v52, %s15960_s14 }
 0x482   : > { %v5754_v12 = vmax.f32 %v5571_v59, %v19340_v16 }
 0x483   : > { %v19369_v7 = vpop.permute.xlu0 %5825  ;;  %v19371_v0 = vpop.permute.xlu1 %5648 }
 0x484   : > { %22313 = vst [vmem:[#allocation40_spill] sm:$0xff] %v19369_v7  ;;  %22314 = vst [vmem:[#allocation72_spill] sm:$0xff] %v19371_v0  ;;  %v5937_v1 = vmax.f32 %v5754_v12, %v19369_v7  ;;  %v5757_v23 = vmax.f32 %v5574_v14, %v19371_v0 }
 0x485   : > { %5797 = vrot.lane.b32.xlu1 %v19005_v52, %s21974_s15  ;;  %5980 = vrot.lane.b32.xlu0 %v19005_v52, %s15962_s16 }
 0x486   : > { %v6120_v62 = vmax.f32 %v5937_v1, %v19350_v18 }
 0x487   : > { %v19382_v59 = vpop.permute.xlu0 %5831  ;;  %v19384_v16 = vpop.permute.xlu1 %6014 }
 0x488   : > { %22315 = vst [vmem:[#allocation41_spill] sm:$0xff] %v19382_v59  ;;  %22316 = vst [vmem:[#allocation11_spill] sm:$0xff] %v19384_v16  ;;  %v5940_v15 = vmax.f32 %v5757_v23, %v19382_v59 }
 0x489   : > { %6160 = vst.msk [vmem:[#allocation3 + $0x100] sm:$0xff] %vm6129_vm5, %v6120_v62  ;;  %5616 = vrot.lane.b32.xlu0 %v19010_v9, %s15959_s13  ;;  %5433 = vrot.lane.b32.xlu1 %v19010_v9, %s15960_s14 }
 0x48a   : > { %v6123_v12 = vmax.f32 %v5940_v15, %v19384_v16 }
 0x48b   : > { %v19393_v48 = vpop.permute.xlu1 %5654  ;;  %v19395_v1 = vpop.permute.xlu0 %5471 }
 0x48c   : > { %22317 = vst [vmem:[#allocation42_spill] sm:$0xff] %v19393_v48  ;;  %22318 = vst [vmem:[#allocation73_spill] sm:$0xff] %v19395_v1  ;;  %v5577_v14 = vmax.f32 %v19071_v30, %v19395_v1 }
 0x48d   : > { %6163 = vst.msk [vmem:[#allocation3 + $0x118] sm:$0xff] %vm6129_vm5, %v6123_v12  ;;  %5799 = vrot.lane.b32.xlu0 %v19010_v9, %s21974_s15  ;;  %5982 = vrot.lane.b32.xlu1 %v19010_v9, %s15962_s16  ;;  %vm6881_vm5 = vcmask 490896  }
 0x48e   : > { %v5760_v23 = vmax.f32 %v5577_v14, %v19393_v48 }
 0x48f   : > { %v19405_v62 = vpop.permute.xlu1 %6020  ;;  %v19407_v15 = vpop.permute.xlu0 %5837 }
 0x490   : > { %22319 = vst [vmem:[#allocation43_spill] sm:$0xff] %v19405_v62  ;;  %22320 = vst [vmem:[#allocation13_spill] sm:$0xff] %v19407_v15  ;;  %v5943_v16 = vmax.f32 %v5760_v23, %v19407_v15 }
 0x491   : > { %5620 = vrot.lane.b32.xlu1 %v19019_v17, %s15959_s13  ;;  %5437 = vrot.lane.b32.xlu0 %v19019_v17, %s15960_s14 }
 0x492   : > { %v6126_v30 = vmax.f32 %v5943_v16, %v19405_v62 }
 0x493   : > { %v5762_v12 = vpop.permute.xlu1 %5761  ;;  %v5396_v1 = vpop.permute.xlu0 %5395 }
 0x494   : > { %6167 = vst.msk [vmem:[#allocation3 + $0x130] sm:$0x1] %vm6166_vm6, %v6126_v30  ;;  %vm6854_vm6 = vcmask 457728  }
 0x495   : > { %5803 = vrot.lane.b32.xlu1 %v19019_v17, %s21974_s15  ;;  %5622 = vrot.lane.b32.xlu0 %v19026_v4, %s15959_s13 }
 0x497   : > { %v5945_v14 = vpop.permute.xlu1 %5944  ;;  %v5579_v23 = vpop.permute.xlu0 %5578 }
 0x499   : > { %5986 = vrot.lane.b32.xlu1 %v19019_v17, %s15962_s16  ;;  %5805 = vrot.lane.b32.xlu0 %v19026_v4, %s21974_s15 }
 0x49b   : > { %v5581_v16 = vpop.permute.xlu1 %5580  ;;  %v5398_v62 = vpop.permute.xlu0 %5397 }
 0x49c   : > { %v5474_v30 = vsel %vm5473_vm7, %v5396_v1, %v5398_v62  ;;  %v5475_v15 = vsel %vm5473_vm7, %v5398_v62, %v19132_v49  ;;  %v5657_v17 = vsel %vm5656_vm8, %v5579_v23, %v5581_v16  ;;  %v5658_v0 = vsel %vm5656_vm8, %v5581_v16, %v19130_v2 }
 0x49d   : > { %v5539_v48 = vmax.f32 %v18915_v19, %v5474_v30  ;;  %v5540_v59 = vmax.f32 %v18920_v50, %v5475_v15  ;;  %5988 = vrot.lane.b32.xlu0 %v19026_v4, %s15962_s16  ;;  %5439 = vrot.lane.b32.xlu1 %v19026_v4, %s15960_s14 }
 0x49f   : > { %v5722_v1 = vmax.f32 %v5539_v48, %v5657_v17  ;;  %v5723_v18 = vmax.f32 %v5540_v59, %v5658_v0  ;;  %v5764_v7 = vpop.permute.xlu0 %5763  ;;  %v5402_v49 = vpop.permute.xlu1 %5401 }
 0x4a0   : > { %v5840_v19 = vsel %vm5839_vm9, %v5762_v12, %v5764_v7  ;;  %v5841_v50 = vsel %vm5839_vm9, %v5764_v7, %v19141_v5 }
 0x4a1   : > { %5626 = vrot.lane.b32.xlu1 %v19037_v8, %s15959_s13  ;;  %5443 = vrot.lane.b32.xlu0 %v19037_v8, %s15960_s14  ;;  %v5905_v4 = vmax.f32 %v5722_v1, %v5840_v19  ;;  %v5906_v62 = vmax.f32 %v5723_v18, %v5841_v50 }
 0x4a3   : > { %v5947_v15 = vpop.permute.xlu0 %5946  ;;  %v5768_v2 = vpop.permute.xlu1 %5767 }
 0x4a4   : > { %v6023_v0 = vsel %vm6022_vm10, %v5945_v14, %v5947_v15  ;;  %v6024_v48 = vsel %vm6022_vm10, %v5947_v15, %v19143_v56 }
 0x4a5   : > { %v19445_v59 = vmax.f32 %v5905_v4, %v6023_v0  ;;  %v19447_v12 = vmax.f32 %v5906_v62, %v6024_v48  ;;  %5809 = vrot.lane.b32.xlu1 %v19037_v8, %s21974_s15  ;;  %5992 = vrot.lane.b32.xlu0 %v19037_v8, %s15962_s16  ;;  %v19464_v8 = vld [vmem:[%s21821_s2] ss:$0 sm:$0xff] }
 0x4a7   : > { %6127 = vst [vmem:[#allocation3] sm:$0xff] %v19445_v59  ;;  %v5585_v5 = vpop.permute.xlu0 %5584  ;;  %v5951_v7 = vpop.permute.xlu1 %5950 }
 0x4a9   : > { %5628 = vrot.lane.b32.xlu0 %v19042_v26, %s15959_s13  ;;  %5445 = vrot.lane.b32.xlu1 %v19042_v26, %s15960_s14 }
 0x4ab   : > { %v5770_v56 = vpop.permute.xlu0 %5769  ;;  %v5404_v18 = vpop.permute.xlu1 %5403 }
 0x4ac   : > { %v5476_v14 = vsel %vm5473_vm7, %v5402_v49, %v5404_v18  ;;  %v5477_v23 = vsel %vm5473_vm7, %v5404_v18, %v19153_v13 }
 0x4ad   : > { %5811 = vrot.lane.b32.xlu0 %v19042_v26, %s21974_s15  ;;  %5994 = vrot.lane.b32.xlu1 %v19042_v26, %s15962_s16  ;;  %v5542_v30 = vmax.f32 %v18929_v34, %v5476_v14  ;;  %v5543_v17 = vmax.f32 %v18934_v44, %v5477_v23  ;;  %v5842_v44 = vsel %vm5839_vm9, %v5768_v2, %v5770_v56 }
 0x4ae   : > { %v6168_v16 = vld [vmem:[#allocation3] sm:$0xff]  ;;  %v5843_v26 = vsel %vm5839_vm9, %v5770_v56, %v19163_v40 }
 0x4af   : > { %v5953_v1 = vpop.permute.xlu0 %5952  ;;  %v5587_v49 = vpop.permute.xlu1 %5586  ;;  %v6188_v13 = vadd.f32 %v19464_v8, %v6168_v16 }
 0x4b0   : > { %v5659_v19 = vsel %vm5656_vm8, %v5585_v5, %v5587_v49  ;;  %v5660_v50 = vsel %vm5656_vm8, %v5587_v49, %v19151_v33  ;;  %v6025_v33 = vsel %vm6022_vm10, %v5951_v7, %v5953_v1  ;;  %v6026_v18 = vsel %vm6022_vm10, %v5953_v1, %v19165_v46 }
 0x4b1   : > { %v5725_v4 = vmax.f32 %v5542_v30, %v5659_v19  ;;  %v5726_v62 = vmax.f32 %v5543_v17, %v5660_v50  ;;  %5998 = vrot.lane.b32.xlu1 %v19053_v53, %s15962_s16  ;;  %5449 = vrot.lane.b32.xlu0 %v19053_v53, %s15960_s14  ;;  %v6201_v34 = vmax.f32 %v6188_v13, 0.0 }
 0x4b3   : > { %v5908_v15 = vmax.f32 %v5725_v4, %v5842_v44  ;;  %v5909_v0 = vmax.f32 %v5726_v62, %v5843_v26  ;;  %v5591_v48 = vpop.permute.xlu1 %5590  ;;  %v5408_v5 = vpop.permute.xlu0 %5407  ;;  %6215 = vst.msk [vmem:[#allocation4] sm:$0xff] %vm6214_vm11, %v6201_v34 }
 0x4b5   : > { %v19487_v14 = vmax.f32 %v5908_v15, %v6025_v33  ;;  %v19489_v23 = vmax.f32 %v5909_v0, %v6026_v18  ;;  %5632 = vrot.lane.b32.xlu0 %v19053_v53, %s15959_s13  ;;  %5451 = vrot.lane.b32.xlu1 %v19058_v63, %s15960_s14 }
 0x4b7   : > { %6131 = vst [vmem:[#allocation3 + $0x18] sm:$0xff] %v19487_v14  ;;  %v5957_v40 = vpop.permute.xlu1 %5956  ;;  %v5774_v2 = vpop.permute.xlu0 %5773 }
 0x4b9   : > { %5815 = vrot.lane.b32.xlu0 %v19053_v53, %s21974_s15  ;;  %5634 = vrot.lane.b32.xlu1 %v19058_v63, %s15959_s13 }
 0x4bb   : > { %v5593_v46 = vpop.permute.xlu0 %5592  ;;  %v5410_v7 = vpop.permute.xlu1 %5409 }
 0x4bc   : > { %v5478_v56 = vsel %vm5473_vm7, %v5408_v5, %v5410_v7  ;;  %v5479_v16 = vsel %vm5473_vm7, %v5410_v7, %v19175_v55  ;;  %v5661_v53 = vsel %vm5656_vm8, %v5591_v48, %v5593_v46  ;;  %v5662_v1 = vsel %vm5656_vm8, %v5593_v46, %v19173_v3 }
 0x4bd   : > { %v5545_v30 = vmax.f32 %v18943_v11, %v5478_v56  ;;  %v5546_v17 = vmax.f32 %v18950_v31, %v5479_v16  ;;  %6000 = vrot.lane.b32.xlu0 %v19058_v63, %s15962_s16  ;;  %5817 = vrot.lane.b32.xlu1 %v19058_v63, %s21974_s15 }
 0x4be   : > { %v6169_v49 = vld [vmem:[#allocation3 + $0x18] sm:$0xff] }
 0x4bf   : > { %v5959_v13 = vpop.permute.xlu0 %5958  ;;  %v5728_v19 = vmax.f32 %v5545_v30, %v5661_v53  ;;  %v5729_v50 = vmax.f32 %v5546_v17, %v5662_v1  ;;  %v5776_v55 = vpop.permute.xlu1 %5775  ;;  %v6189_v11 = vadd.f32 %v19464_v8, %v6169_v49 }
 0x4c0   : > { %v5844_v31 = vsel %vm5839_vm9, %v5774_v2, %v5776_v55  ;;  %v5845_v4 = vsel %vm5839_vm9, %v5776_v55, %v19187_v32  ;;  %v6027_v3 = vsel %vm6022_vm10, %v5957_v40, %v5959_v13  ;;  %v6028_v44 = vsel %vm6022_vm10, %v5959_v13, %v19185_v20 }
 0x4c1   : > { %v5911_v62 = vmax.f32 %v5728_v19, %v5844_v31  ;;  %v5912_v34 = vmax.f32 %v5729_v50, %v5845_v4  ;;  %5638 = vrot.lane.b32.xlu1 %v19069_v42, %s15959_s13  ;;  %5455 = vrot.lane.b32.xlu0 %v19069_v42, %s15960_s14  ;;  %v6202_v63 = vmax.f32 %v6189_v11, 0.0 }
 0x4c3   : > { %v19523_v26 = vmax.f32 %v5911_v62, %v6027_v3  ;;  %v19525_v15 = vmax.f32 %v5912_v34, %v6028_v44  ;;  %v5780_v0 = vpop.permute.xlu0 %5779  ;;  %v5414_v32 = vpop.permute.xlu1 %5413  ;;  %6216 = vst.msk [vmem:[#allocation4 + $0x8] sm:$0xff] %vm6214_vm11, %v6202_v63 }
 0x4c5   : > { %6134 = vst [vmem:[#allocation3 + $0x30] sm:$0xff] %v19523_v26  ;;  %6004 = vrot.lane.b32.xlu1 %v19069_v42, %s15962_s16  ;;  %5821 = vrot.lane.b32.xlu0 %v19069_v42, %s21974_s15 }
 0x4c7   : > { %v5963_v48 = vpop.permute.xlu0 %5962  ;;  %v5597_v5 = vpop.permute.xlu1 %5596 }
 0x4c9   : > { %5640 = vrot.lane.b32.xlu0 %v19078_v39, %s15959_s13  ;;  %5457 = vrot.lane.b32.xlu1 %v19078_v39, %s15960_s14 }
 0x4cb   : > { %v5782_v20 = vpop.permute.xlu1 %5781  ;;  %v5416_v33 = vpop.permute.xlu0 %5415 }
 0x4cc   : > { %v5480_v18 = vsel %vm5473_vm7, %v5414_v32, %v5416_v33  ;;  %v5481_v40 = vsel %vm5473_vm7, %v5416_v33, %v19197_v58  ;;  %v6170_v2 = vld [vmem:[#allocation3 + $0x30] sm:$0xff]  ;;  %v19590_v33 = vld [vmem:[#allocation2 + $0x120] sm:$0x1] }
 0x4cd   : > { %6006 = vrot.lane.b32.xlu0 %v19078_v39, %s15962_s16  ;;  %5823 = vrot.lane.b32.xlu1 %v19078_v39, %s21974_s15  ;;  %v6190_v42 = vadd.f32 %v19464_v8, %v6170_v2  ;;  %v5548_v46 = vmax.f32 %v18959_v41, %v5480_v18  ;;  %v5549_v7 = vmax.f32 %v18966_v57, %v5481_v40 }
 0x4ce   : > { %v5846_v41 = vsel %vm5839_vm9, %v5780_v0, %v5782_v20  ;;  %v5847_v57 = vsel %vm5839_vm9, %v5782_v20, %v19207_v29 }
 0x4cf   : > { %v5965_v56 = vpop.permute.xlu1 %5964  ;;  %v5599_v16 = vpop.permute.xlu0 %5598  ;;  %v6203_v30 = vmax.f32 %v6190_v42, 0.0 }
 0x4d0   : > { %v5663_v17 = vsel %vm5656_vm8, %v5597_v5, %v5599_v16  ;;  %v5664_v58 = vsel %vm5656_vm8, %v5599_v16, %v19195_v6  ;;  %v6029_v6 = vsel %vm6022_vm10, %v5963_v48, %v5965_v56  ;;  %v6030_v50 = vsel %vm6022_vm10, %v5965_v56, %v19216_v37 }
 0x4d1   : > { %v5731_v53 = vmax.f32 %v5548_v46, %v5663_v17  ;;  %v5732_v1 = vmax.f32 %v5549_v7, %v5664_v58  ;;  %5644 = vrot.lane.b32.xlu0 %v19091_v36, %s15959_s13  ;;  %5461 = vrot.lane.b32.xlu1 %v19091_v36, %s15960_s14  ;;  %6217 = vst.msk [vmem:[#allocation4 + $0x10] sm:$0xff] %vm6214_vm11, %v6203_v30  ;;  %v6690_v30 = vld [vmem:[#allocation3 + $0x10] sm:$0xff] }
 0x4d3   : > { %v5914_v39 = vmax.f32 %v5731_v53, %v5846_v41  ;;  %v5915_v49 = vmax.f32 %v5732_v1, %v5847_v57  ;;  %v5603_v13 = vpop.permute.xlu0 %5602  ;;  %v5420_v19 = vpop.permute.xlu1 %5419  ;;  %v22321_v53 = vld [vmem:[#allocation67_spill] sm:$0xff]  ;;  %v22322_v41 = vld [vmem:[#allocation32_spill] sm:$0xff] }
 0x4d4   : > { %v6725_v1 = vadd.f32 %v22321_v53, %v6690_v30  ;;  %v6918_v57 = vadd.f32 %v22322_v41, %v6690_v30  ;;  %v6698_v30 = vld [vmem:[#allocation3 + $0x70] sm:$0xff] }
 0x4d5   : > { %v19561_v55 = vmax.f32 %v5914_v39, %v6029_v6  ;;  %v19563_v11 = vmax.f32 %v5915_v49, %v6030_v50  ;;  %5827 = vrot.lane.b32.xlu0 %v19091_v36, %s21974_s15  ;;  %6010 = vrot.lane.b32.xlu1 %v19091_v36, %s15962_s16  ;;  %v6898_v50 = vld [vmem:[#allocation3 + $0x40] sm:$0xff] }
 0x4d7   : > { %6137 = vst [vmem:[#allocation3 + $0x48] sm:$0xff] %v19561_v55  ;;  %v5969_v29 = vpop.permute.xlu0 %5968  ;;  %v5786_v31 = vpop.permute.xlu1 %5785 }
 0x4d9   : > { %5646 = vrot.lane.b32.xlu1 %v19096_v38, %s15959_s13  ;;  %5463 = vrot.lane.b32.xlu0 %v19096_v38, %s15960_s14 }
 0x4db   : > { %v5605_v37 = vpop.permute.xlu1 %5604  ;;  %v5422_v4 = vpop.permute.xlu0 %5421 }
 0x4dc   : > { %v5482_v62 = vsel %vm5473_vm7, %v5420_v19, %v5422_v4  ;;  %v5483_v34 = vsel %vm5473_vm7, %v5422_v4, %v19226_v27  ;;  %v5665_v3 = vsel %vm5656_vm8, %v5603_v13, %v5605_v37  ;;  %v5666_v44 = vsel %vm5656_vm8, %v5605_v37, %v19209_v54  ;;  %v6692_v13 = vld [vmem:[#allocation3 + $0x28] sm:$0xff] }
 0x4dd   : > { %v5551_v63 = vmax.f32 %v18975_v22, %v5482_v62  ;;  %v5552_v36 = vmax.f32 %v18980_v24, %v5483_v34  ;;  %5829 = vrot.lane.b32.xlu1 %v19096_v38, %s21974_s15  ;;  %6012 = vrot.lane.b32.xlu0 %v19096_v38, %s15962_s16  ;;  %v6751_v4 = vmax.f32 %v6725_v1, 0.0  ;;  %v6931_v62 = vmax.f32 %v6918_v57, 0.0 }
 0x4de   : > { %v6171_v0 = vld [vmem:[#allocation3 + $0x48] sm:$0xff]  ;;  %v6727_v34 = vadd.f32 %v22321_v53, %v6692_v13  ;;  %v6729_v57 = vadd.f32 %v6898_v50, %v22321_v53 }
 0x4df   : > { %v5971_v32 = vpop.permute.xlu1 %5970  ;;  %v5734_v48 = vmax.f32 %v5551_v63, %v5665_v3  ;;  %v5735_v5 = vmax.f32 %v5552_v36, %v5666_v44  ;;  %v5788_v27 = vpop.permute.xlu0 %5787  ;;  %v6191_v22 = vadd.f32 %v19464_v8, %v6171_v0  ;;  %v22323_v0 = vld [vmem:[#allocation33_spill] sm:$0xff] }
 0x4e0   : > { %v5848_v24 = vsel %vm5839_vm9, %v5786_v31, %v5788_v27  ;;  %v5849_v20 = vsel %vm5839_vm9, %v5788_v27, %v19237_v28  ;;  %v6031_v40 = vsel %vm6022_vm10, %v5969_v29, %v5971_v32  ;;  %v6032_v2 = vsel %vm6022_vm10, %v5971_v32, %v19246_v51  ;;  %v19609_v51 = vld [vmem:[#allocation2 + $0x128] sm:$0x1] }
 0x4e1   : > { %v5917_v38 = vmax.f32 %v5734_v48, %v5848_v24  ;;  %v5918_v18 = vmax.f32 %v5735_v5, %v5849_v20  ;;  %5650 = vrot.lane.b32.xlu1 %v19590_v33, %s15959_s13  ;;  %5467 = vrot.lane.b32.xlu0 %v19590_v33, %s15960_s14  ;;  %v6204_v54 = vmax.f32 %v6191_v22, 0.0  ;;  %v6696_v48 = vld [vmem:[#allocation3 + $0x58] sm:$0xff]  ;;  %v22324_v24 = vld [vmem:[#allocation34_spill] sm:$0xff] }
 0x4e3   : > { %v19599_v42 = vmax.f32 %v5917_v38, %v6031_v40  ;;  %v19601_v46 = vmax.f32 %v5918_v18, %v6032_v2  ;;  %v5975_v28 = vpop.permute.xlu0 %5974  ;;  %v5426_v7 = vpop.permute.xlu1 %5425  ;;  %6218 = vst.msk [vmem:[#allocation4 + $0x18] sm:$0xff] %vm6214_vm11, %v6204_v54  ;;  %v6753_v38 = vmax.f32 %v6727_v34, 0.0  ;;  %v6919_v18 = vadd.f32 %v22322_v41, %v6692_v13 }
 0x4e5   : > { %6140 = vst [vmem:[#allocation3 + $0x60] sm:$0xff] %v19599_v42  ;;  %6016 = vrot.lane.b32.xlu1 %v19590_v33, %s15962_s16  ;;  %5833 = vrot.lane.b32.xlu0 %v19590_v33, %s21974_s15 }
 0x4e7   : > { %v5609_v56 = vpop.permute.xlu1 %5608  ;;  %v5428_v16 = vpop.permute.xlu0 %5427 }
 0x4e8   : > { %v5484_v17 = vsel %vm5473_vm7, %v5426_v7, %v5428_v16  ;;  %v5485_v58 = vsel %vm5473_vm7, %v5428_v16, %v19218_v60  ;;  %v6731_v16 = vadd.f32 %v22321_v53, %v6696_v48 }
 0x4e9   : > { %5652 = vrot.lane.b32.xlu0 %v19609_v51, %s15959_s13  ;;  %5469 = vrot.lane.b32.xlu1 %v19609_v51, %s15960_s14  ;;  %v5554_v31 = vmax.f32 %v18989_v10, %v5484_v17  ;;  %v5555_v37 = vmax.f32 %v18996_v45, %v5485_v58  ;;  %v6920_v10 = vadd.f32 %v22322_v41, %v6898_v50  ;;  %v6932_v58 = vmax.f32 %v6919_v18, 0.0 }
 0x4ea   : > { %v6757_v1 = vmax.f32 %v6731_v16, 0.0 }
 0x4eb   : > { %v5792_v39 = vpop.permute.xlu1 %5791  ;;  %v5611_v49 = vpop.permute.xlu0 %5610 }
 0x4ec   : > { %v5667_v19 = vsel %vm5656_vm8, %v5609_v56, %v5611_v49  ;;  %v5668_v6 = vsel %vm5656_vm8, %v5611_v49, %v19228_v43  ;;  %v6172_v29 = vld [vmem:[#allocation3 + $0x60] sm:$0xff]  ;;  %v6933_v56 = vmax.f32 %v6920_v10, 0.0  ;;  %v6921_v49 = vadd.f32 %v22322_v41, %v6696_v48 }
 0x4ed   : > { %6018 = vrot.lane.b32.xlu0 %v19609_v51, %s15962_s16  ;;  %5835 = vrot.lane.b32.xlu1 %v19609_v51, %s21974_s15  ;;  %v6192_v60 = vadd.f32 %v19464_v8, %v6172_v29  ;;  %v5737_v63 = vmax.f32 %v5554_v31, %v5667_v19  ;;  %v5738_v43 = vmax.f32 %v5555_v37, %v5668_v6  ;;  %v6755_v6 = vmax.f32 %v6729_v57, 0.0  ;;  %v6901_v37 = vld [vmem:[#allocation3 + $0x88] sm:$0xff]  ;;  %v19684_v57 = vld [vmem:[#allocation3 + $0x118] sm:$0xff] }
 0x4ee   : > { %v6922_v31 = vadd.f32 %v22322_v41, %v6698_v30 }
 0x4ef   : > { %v5977_v36 = vpop.permute.xlu1 %5976  ;;  %v5794_v3 = vpop.permute.xlu0 %5793  ;;  %v6205_v44 = vmax.f32 %v6192_v60, 0.0 }
 0x4f0   : > { %v5850_v45 = vsel %vm5839_vm9, %v5792_v39, %v5794_v3  ;;  %v5851_v32 = vsel %vm5839_vm9, %v5794_v3, %v22323_v0  ;;  %v6033_v22 = vsel %vm6022_vm10, %v5975_v28, %v5977_v36  ;;  %v6034_v20 = vsel %vm6022_vm10, %v5977_v36, %v22324_v24  ;;  %v6903_v24 = vld [vmem:[#allocation3 + $0xb8] sm:$0xff] }
 0x4f1   : > { %v5920_v5 = vmax.f32 %v5737_v63, %v5850_v45  ;;  %v5921_v27 = vmax.f32 %v5738_v43, %v5851_v32  ;;  %6804 = vrot.lane.b32.xlu0 %v6751_v4, %s15963_s24  ;;  %6957 = vrot.lane.b32.xlu1 %v6931_v62, %s15964_s29  ;;  %6219 = vst.msk [vmem:[#allocation4 + $0x20] sm:$0xff] %vm6214_vm11, %v6205_v44  ;;  %v22325_v4 = vld [vmem:[#allocation49_spill] sm:$0xff]  ;;  %v6934_v43 = vmax.f32 %v6921_v49, 0.0  ;;  %v6935_v48 = vmax.f32 %v6922_v31, 0.0 }
 0x4f2   : > { %v6733_v39 = vadd.f32 %v22321_v53, %v6698_v30  ;;  %v6923_v44 = vadd.f32 %v22322_v41, %v6901_v37  ;;  %v6735_v45 = vadd.f32 %v6901_v37, %v22321_v53 }
 0x4f3   : > { %v19642_v54 = vmax.f32 %v5920_v5, %v6033_v22  ;;  %v19644_v40 = vmax.f32 %v5921_v27, %v6034_v20  ;;  %v5615_v2 = vpop.permute.xlu1 %5614  ;;  %v5432_v7 = vpop.permute.xlu0 %5431  ;;  %v6702_v20 = vld [vmem:[#allocation3 + $0xa0] sm:$0xff] }
 0x4f4   : > { %v6759_v29 = vmax.f32 %v6733_v39, 0.0 }
 0x4f5   : > { %6143 = vst [vmem:[#allocation3 + $0x78] sm:$0xff] %v19642_v54  ;;  %6808 = vrot.lane.b32.xlu0 %v6753_v38, %s15963_s24  ;;  %6961 = vrot.lane.b32.xlu1 %v6933_v56, %s15964_s29  ;;  %v6761_v56 = vmax.f32 %v6735_v45, 0.0  ;;  %v22326_v45 = vld [vmem:[#allocation48_spill] sm:$0xff] }
 0x4f7   : > { %v5798_v28 = vpop.permute.xlu1 %5797  ;;  %v5981_v17 = vpop.permute.xlu0 %5980 }
 0x4f9   : > { %6959 = vrot.lane.b32.xlu0 %v6932_v58, %s15964_s29  ;;  %6816 = vrot.lane.b32.xlu1 %v6757_v1, %s15963_s24  ;;  %v6925_v58 = vadd.f32 %v22322_v41, %v6903_v24  ;;  %v6737_v1 = vadd.f32 %v22321_v53, %v6702_v20 }
 0x4fb   : > { %v5617_v13 = vpop.permute.xlu0 %5616  ;;  %v5434_v19 = vpop.permute.xlu1 %5433  ;;  %v6938_v39 = vmax.f32 %v6925_v58, 0.0  ;;  %v6763_v49 = vmax.f32 %v6737_v1, 0.0  ;;  %v22328_v1 = vld [vmem:[#allocation66_spill] sm:$0xff] }
 0x4fc   : > { %v5486_v60 = vsel %vm5473_vm7, %v5432_v7, %v5434_v19  ;;  %v5487_v50 = vsel %vm5473_vm7, %v5434_v19, %v22325_v4  ;;  %v6173_v62 = vld [vmem:[#allocation3 + $0x78] sm:$0xff]  ;;  %v5669_v3 = vsel %vm5656_vm8, %v5615_v2, %v5617_v13  ;;  %v5670_v10 = vsel %vm5656_vm8, %v5617_v13, %v19248_v47 }
 0x4fd   : > { %v5557_v34 = vmax.f32 %v19005_v52, %v5486_v60  ;;  %v5558_v63 = vmax.f32 %v19010_v9, %v5487_v50  ;;  %6812 = vrot.lane.b32.xlu0 %v6755_v6, %s15963_s24  ;;  %6820 = vrot.lane.b32.xlu1 %v6759_v29, %s15963_s24  ;;  %v6193_v36 = vadd.f32 %v19464_v8, %v6173_v62  ;;  %v6936_v7 = vmax.f32 %v6923_v44, 0.0  ;;  %v6908_v6 = vld [vmem:[#allocation3 + $0x130] sm:$0x1] }
 0x4fe   : > { %v6747_v13 = vadd.f32 %v22321_v53, %v19684_v57  ;;  %v6924_v19 = vadd.f32 %v22322_v41, %v6702_v20  ;;  %v6930_v4 = vadd.f32 %v22322_v41, %v6908_v6  ;;  %v6739_v50 = vadd.f32 %v6903_v24, %v22321_v53  ;;  %v6706_v62 = vld [vmem:[#allocation3 + $0xd0] sm:$0xff] }
 0x4ff   : > { %v5800_v0 = vpop.permute.xlu0 %5799  ;;  %v5740_v52 = vmax.f32 %v5557_v34, %v5669_v3  ;;  %v5741_v32 = vmax.f32 %v5558_v63, %v5670_v10  ;;  %v5983_v9 = vpop.permute.xlu1 %5982  ;;  %v6206_v5 = vmax.f32 %v6193_v36, 0.0 }
 0x500   : > { %v5852_v27 = vsel %vm5839_vm9, %v5798_v28, %v5800_v0  ;;  %v5853_v22 = vsel %vm5839_vm9, %v5800_v0, %v19282_v25  ;;  %v6035_v47 = vsel %vm6022_vm10, %v5981_v17, %v5983_v9  ;;  %v6036_v2 = vsel %vm6022_vm10, %v5983_v9, %v19294_v21  ;;  %v22327_v9 = vld [vmem:[#allocation68_spill] sm:$0xff] }
 0x501   : > { %v5923_v38 = vmax.f32 %v5740_v52, %v5852_v27  ;;  %v5924_v18 = vmax.f32 %v5741_v32, %v5853_v22  ;;  %6963 = vrot.lane.b32.xlu0 %v6934_v43, %s15964_s29  ;;  %6965 = vrot.lane.b32.xlu1 %v6935_v48, %s15964_s29  ;;  %6220 = vst.msk [vmem:[#allocation4 + $0x28] sm:$0xff] %vm6214_vm11, %v6206_v5  ;;  %v6773_v37 = vmax.f32 %v6747_v13, 0.0  ;;  %v6937_v60 = vmax.f32 %v6924_v19, 0.0  ;;  %v15875_v5 = vld [vmem:[#allocation2 + $0xa8] sm:$0xff]  ;;  %v15876_v22 = vld [vmem:[#allocation2 + $0xb0] sm:$0xff] }
 0x502   : > { %v6741_v43 = vadd.f32 %v22321_v53, %v6706_v62  ;;  %v6943_v10 = vmax.f32 %v6930_v4, 0.0  ;;  %v6765_v44 = vmax.f32 %v6739_v50, 0.0  ;;  %v6251_v0 = vadd.f32 %v22326_v45, %v19445_v59  ;;  %v22329_v19 = vld [vmem:[#allocation20_spill] sm:$0xff] }
 0x503   : > { %v19678_v16 = vmax.f32 %v5923_v38, %v6035_v47  ;;  %v19680_v25 = vmax.f32 %v5924_v18, %v6036_v2  ;;  %v5621_v30 = vpop.permute.xlu1 %5620  ;;  %v5438_v28 = vpop.permute.xlu0 %5437  ;;  %v6926_v47 = vadd.f32 %v22322_v41, %v6706_v62 }
 0x504   : > { %v6767_v18 = vmax.f32 %v6741_v43, 0.0  ;;  %v6264_v58 = vmax.f32 %v6251_v0, 0.0  ;;  %v22331_v43 = vld [vmem:[#allocation65_spill] sm:$0xff] }
 0x505   : > { %6146 = vst [vmem:[#allocation3 + $0x90] sm:$0xff] %v19678_v16  ;;  %6967 = vrot.lane.b32.xlu0 %v6936_v7, %s15964_s29  ;;  %6824 = vrot.lane.b32.xlu1 %v6761_v56, %s15963_s24  ;;  %v6939_v4 = vmax.f32 %v6926_v47, 0.0  ;;  %v22334_v47 = vld [vmem:[#allocation36_spill] sm:$0xff] }
 0x507   : > { %v5804_v21 = vpop.permute.xlu1 %5803  ;;  %v5623_v17 = vpop.permute.xlu0 %5622 }
 0x508   : > { %v5671_v20 = vsel %vm5656_vm8, %v5621_v30, %v5623_v17  ;;  %v5672_v38 = vsel %vm5656_vm8, %v5623_v17, %v19270_v35  ;;  %v22330_v17 = vld [vmem:[#allocation50_spill] sm:$0xff] }
 0x509   : > { %6971 = vrot.lane.b32.xlu0 %v6938_v39, %s15964_s29  ;;  %6828 = vrot.lane.b32.xlu1 %v6763_v49, %s15963_s24  ;;  %v6481_v39 = vadd.f32 %v22328_v1, %v19447_v12  ;;  %v6708_v49 = vld [vmem:[#allocation3 + $0xe8] sm:$0xff] }
 0x50a   : > { %v6743_v50 = vadd.f32 %v22321_v53, %v6708_v49 }
 0x50b   : > { %v5987_v29 = vpop.permute.xlu1 %5986  ;;  %v5806_v31 = vpop.permute.xlu0 %5805 }
 0x50c   : > { %v6174_v34 = vld [vmem:[#allocation3 + $0x90] sm:$0xff]  ;;  %v5854_v13 = vsel %vm5839_vm9, %v5804_v21, %v5806_v31  ;;  %v5855_v30 = vsel %vm5839_vm9, %v5806_v31, %v22329_v19  ;;  %v6769_v0 = vmax.f32 %v6743_v50, 0.0 }
 0x50d   : > { %6848 = vrot.lane.b32.xlu0 %v6773_v37, %s15963_s24  ;;  %6969 = vrot.lane.b32.xlu1 %v6937_v60, %s15964_s29  ;;  %v6194_v63 = vadd.f32 %v19464_v8, %v6174_v34 }
 0x50f   : > { %v5989_v36 = vpop.permute.xlu0 %5988  ;;  %v5440_v3 = vpop.permute.xlu1 %5439  ;;  %v6207_v52 = vmax.f32 %v6194_v63, 0.0  ;;  %v6494_v63 = vmax.f32 %v6481_v39, 0.0 }
 0x510   : > { %v5488_v32 = vsel %vm5473_vm7, %v5438_v28, %v5440_v3  ;;  %v5489_v48 = vsel %vm5473_vm7, %v5440_v3, %v22327_v9  ;;  %v6037_v35 = vsel %vm6022_vm10, %v5987_v29, %v5989_v36  ;;  %v6038_v60 = vsel %vm6022_vm10, %v5989_v36, %v22330_v17  ;;  %v6710_v9 = vld [vmem:[#allocation3 + $0x100] sm:$0xff] }
 0x511   : > { %v5560_v27 = vmax.f32 %v15875_v5, %v5488_v32  ;;  %v5561_v24 = vmax.f32 %v15876_v22, %v5489_v48  ;;  %6981 = vrot.lane.b32.xlu0 %v6943_v10, %s15964_s29  ;;  %6832 = vrot.lane.b32.xlu1 %v6765_v44, %s15963_s24  ;;  %6221 = vst.msk [vmem:[#allocation4 + $0x30] sm:$0xff] %vm6214_vm11, %v6207_v52  ;;  %v22332_v52 = vld [vmem:[#allocation31_spill] sm:$0xff]  ;;  %v22333_v5 = vld [vmem:[#allocation69_spill] sm:$0xff] }
 0x512   : > { %v6367_v3 = vadd.f32 %v22331_v43, %v19487_v14  ;;  %v6927_v29 = vadd.f32 %v22322_v41, %v6708_v49  ;;  %v6597_v32 = vadd.f32 %v22332_v52, %v19489_v23  ;;  %v15877_v22 = vld [vmem:[#allocation2 + $0xc0] sm:$0xff] }
 0x513   : > { %v5743_v2 = vmax.f32 %v5560_v27, %v5671_v20  ;;  %v5744_v7 = vmax.f32 %v5561_v24, %v5672_v38  ;;  %v5627_v56 = vpop.permute.xlu1 %5626  ;;  %v5444_v28 = vpop.permute.xlu0 %5443  ;;  %v15878_v20 = vld [vmem:[#allocation2 + $0xc8] sm:$0xff] }
 0x514   : > { %v6380_v44 = vmax.f32 %v6367_v3, 0.0  ;;  %v6610_v19 = vmax.f32 %v6597_v32, 0.0  ;;  %v22336_v3 = vld [vmem:[#allocation21_spill] sm:$0xff] }
 0x515   : > { %v5926_v6 = vmax.f32 %v5743_v2, %v5854_v13  ;;  %v5927_v37 = vmax.f32 %v5744_v7, %v5855_v30  ;;  %6290 = vrot.lane.b32.xlu0 %v6264_v58, %s15962_s16  ;;  %6836 = vrot.lane.b32.xlu1 %v6767_v18, %s15963_s24  ;;  %v6940_v7 = vmax.f32 %v6927_v29, 0.0  ;;  %v6253_v30 = vadd.f32 %v22326_v45, %v19523_v26 }
 0x517   : > { %v19723_v62 = vmax.f32 %v5926_v6, %v6037_v35  ;;  %v19725_v21 = vmax.f32 %v5927_v37, %v6038_v60  ;;  %v5810_v34 = vpop.permute.xlu1 %5809  ;;  %v5993_v31 = vpop.permute.xlu0 %5992  ;;  %v22335_v37 = vld [vmem:[#allocation35_spill] sm:$0xff] }
 0x519   : > { %6149 = vst [vmem:[#allocation3 + $0xa8] sm:$0xff] %v19723_v62  ;;  %6520 = vrot.lane.b32.xlu0 %v6494_v63, %s15965_s25  ;;  %6973 = vrot.lane.b32.xlu1 %v6939_v4, %s15964_s29 }
 0x51b   : > { %v5629_v36 = vpop.permute.xlu0 %5628  ;;  %v5446_v10 = vpop.permute.xlu1 %5445 }
 0x51c   : > { %v5490_v48 = vsel %vm5473_vm7, %v5444_v28, %v5446_v10  ;;  %v5491_v27 = vsel %vm5473_vm7, %v5446_v10, %v22333_v5  ;;  %v5673_v18 = vsel %vm5656_vm8, %v5627_v56, %v5629_v36  ;;  %v5674_v2 = vsel %vm5656_vm8, %v5629_v36, %v22334_v47 }
 0x51d   : > { %v5563_v24 = vmax.f32 %v15877_v22, %v5490_v48  ;;  %v5564_v38 = vmax.f32 %v15878_v20, %v5491_v27  ;;  %6407 = vrot.lane.b32.xlu0 %v6380_v44, %s15966_s30  ;;  %6840 = vrot.lane.b32.xlu1 %v6769_v0, %s15963_s24  ;;  %v6745_v28 = vadd.f32 %v22321_v53, %v6710_v9 }
 0x51e   : > { %v6928_v56 = vadd.f32 %v22322_v41, %v6710_v9  ;;  %v6483_v36 = vadd.f32 %v22328_v1, %v19525_v15  ;;  %v6266_v9 = vmax.f32 %v6253_v30, 0.0  ;;  %v6929_v20 = vadd.f32 %v22322_v41, %v19684_v57  ;;  %v22337_v57 = vld [vmem:[#allocation51_spill] sm:$0xff]  ;;  %v15879_v30 = vld [vmem:[#allocation2 + $0xd8] sm:$0xff] }
 0x51f   : > { %v5812_v58 = vpop.permute.xlu0 %5811  ;;  %v5746_v39 = vmax.f32 %v5563_v24, %v5673_v18  ;;  %v5747_v49 = vmax.f32 %v5564_v38, %v5674_v2  ;;  %v5995_v13 = vpop.permute.xlu1 %5994  ;;  %v6771_v29 = vmax.f32 %v6745_v28, 0.0  ;;  %v6598_v24 = vadd.f32 %v22332_v52, %v19525_v15  ;;  %v6714_v38 = vld [vmem:[#allocation3 + $0x130] sm:$0x1] }
 0x520   : > { %v5856_v6 = vsel %vm5839_vm9, %v5810_v34, %v5812_v58  ;;  %v5857_v35 = vsel %vm5839_vm9, %v5812_v58, %v22335_v37  ;;  %v6175_v17 = vld [vmem:[#allocation3 + $0xa8] sm:$0xff]  ;;  %v6039_v63 = vsel %vm6022_vm10, %v5993_v31, %v5995_v13  ;;  %v6040_v34 = vsel %vm6022_vm10, %v5995_v13, %v22336_v3 }
 0x521   : > { %v5929_v60 = vmax.f32 %v5746_v39, %v5856_v6  ;;  %v5930_v4 = vmax.f32 %v5747_v49, %v5857_v35  ;;  %6637 = vrot.lane.b32.xlu0 %v6610_v19, %s15967_s12  ;;  %6975 = vrot.lane.b32.xlu1 %v6940_v7, %s15964_s29  ;;  %v6195_v50 = vadd.f32 %v19464_v8, %v6175_v17  ;;  %v6496_v27 = vmax.f32 %v6483_v36, 0.0  ;;  %v15880_v37 = vld [vmem:[#allocation2 + $0xe0] sm:$0xff] }
 0x522   : > { %v6941_v22 = vmax.f32 %v6928_v56, 0.0  ;;  %v6749_v2 = vadd.f32 %v22321_v53, %v6714_v38  ;;  %v6611_v58 = vmax.f32 %v6598_v24, 0.0  ;;  %v6942_v39 = vmax.f32 %v6929_v20, 0.0 }
 0x523   : > { %v19758_v10 = vmax.f32 %v5929_v60, %v6039_v63  ;;  %v19760_v44 = vmax.f32 %v5930_v4, %v6040_v34  ;;  %v5999_v0 = vpop.permute.xlu1 %5998  ;;  %v5450_v32 = vpop.permute.xlu0 %5449  ;;  %v6208_v48 = vmax.f32 %v6195_v50, 0.0  ;;  %v6369_v49 = vadd.f32 %v22331_v43, %v19561_v55 }
 0x524   : > { %v6775_v56 = vmax.f32 %v6749_v2, 0.0  ;;  %v6484_v17 = vadd.f32 %v22328_v1, %v19563_v11  ;;  %v6366_v60 = vadd.f32 %v22331_v43, %v19445_v59  ;;  %v6596_v24 = vadd.f32 %v22332_v52, %v19447_v12 }
 0x525   : > { %6152 = vst [vmem:[#allocation3 + $0xc0] sm:$0xff] %v19758_v10  ;;  %6294 = vrot.lane.b32.xlu0 %v6266_v9, %s15962_s16  ;;  %6844 = vrot.lane.b32.xlu1 %v6771_v29, %s15963_s24  ;;  %6222 = vst.msk [vmem:[#allocation4 + $0x38] sm:$0xff] %vm6214_vm11, %v6208_v48  ;;  %v6382_v34 = vmax.f32 %v6369_v49, 0.0  ;;  %v6485_v49 = vadd.f32 %v22328_v1, %v19601_v46 }
 0x526   : > { %v6497_v2 = vmax.f32 %v6484_v17, 0.0 }
 0x527   : > { %v5633_v31 = vpop.permute.xlu0 %5632  ;;  %v5452_v5 = vpop.permute.xlu1 %5451 }
 0x528   : > { %v5492_v18 = vsel %vm5473_vm7, %v5450_v32, %v5452_v5  ;;  %v5493_v47 = vsel %vm5473_vm7, %v5452_v5, %v19318_v61  ;;  %v22338_v32 = vld [vmem:[#allocation37_spill] sm:$0xff]  ;;  %v22339_v5 = vld [vmem:[#allocation38_spill] sm:$0xff] }
 0x529   : > { %6524 = vrot.lane.b32.xlu0 %v6496_v27, %s15965_s25  ;;  %6977 = vrot.lane.b32.xlu1 %v6941_v22, %s15964_s29  ;;  %v5566_v6 = vmax.f32 %v15879_v30, %v5492_v18  ;;  %v5567_v35 = vmax.f32 %v15880_v37, %v5493_v47  ;;  %v6379_v22 = vmax.f32 %v6366_v60, 0.0  ;;  %v15881_v60 = vld [vmem:[#allocation2 + $0xf0] sm:$0xff] }
 0x52b   : > { %v5816_v7 = vpop.permute.xlu0 %5815  ;;  %v5635_v28 = vpop.permute.xlu1 %5634 }
 0x52c   : > { %v5675_v41 = vsel %vm5656_vm8, %v5633_v31, %v5635_v28  ;;  %v5676_v13 = vsel %vm5656_vm8, %v5635_v28, %v22337_v57  ;;  %v6176_v19 = vld [vmem:[#allocation3 + $0xc0] sm:$0xff]  ;;  %v6732_v57 = vadd.f32 %v22321_v53, %v19601_v46 }
 0x52d   : > { %6639 = vrot.lane.b32.xlu0 %v6611_v58, %s15967_s12  ;;  %6979 = vrot.lane.b32.xlu1 %v6942_v39, %s15964_s29  ;;  %v6196_v61 = vadd.f32 %v19464_v8, %v6176_v19  ;;  %v5749_v4 = vmax.f32 %v5566_v6, %v5675_v41  ;;  %v5750_v50 = vmax.f32 %v5567_v35, %v5676_v13  ;;  %v6609_v39 = vmax.f32 %v6596_v24, 0.0  ;;  %v22342_v24 = vld [vmem:[#allocation40_spill] sm:$0xff]  ;;  %s15890_s29 = sshll.u32 %s15969_s21, 4  ;;  %s15891_s29 = int_to_ptr.vmem [resolvable:$false] %s15890_s29 }
 0x52e   : > { %v6724_v41 = vadd.f32 %v22321_v53, %v19447_v12  ;;  %v6252_v13 = vadd.f32 %v22326_v45, %v19487_v14  ;;  %v6498_v6 = vmax.f32 %v6485_v49, 0.0  ;;  %v6482_v12 = vadd.f32 %v22328_v1, %v19489_v23  ;;  %s15892_s15 = scalar_lea.vmem %s15891_s29, 32 }
 0x52f   : > { %v6001_v63 = vpop.permute.xlu0 %6000  ;;  %v5818_v3 = vpop.permute.xlu1 %5817  ;;  %v6209_v29 = vmax.f32 %v6196_v61, 0.0  ;;  %v22340_v61 = vld [vmem:[#allocation39_spill] sm:$0xff] }
 0x530   : > { %v5858_v36 = vsel %vm5839_vm9, %v5816_v7, %v5818_v3  ;;  %v5859_v9 = vsel %vm5839_vm9, %v5818_v3, %v22338_v32  ;;  %v6041_v59 = vsel %vm6022_vm10, %v5999_v0, %v6001_v63  ;;  %v6042_v27 = vsel %vm6022_vm10, %v6001_v63, %v22339_v5 }
 0x531   : > { %v5932_v48 = vmax.f32 %v5749_v4, %v5858_v36  ;;  %v5933_v31 = vmax.f32 %v5750_v50, %v5859_v9  ;;  %6411 = vrot.lane.b32.xlu0 %v6382_v34, %s15966_s30  ;;  %6852 = vrot.lane.b32.xlu1 %v6775_v56, %s15963_s24  ;;  %6223 = vst.msk [vmem:[#allocation4 + $0x40] sm:$0xff] %vm6214_vm11, %v6209_v29  ;;  %v6750_v37 = vmax.f32 %v6724_v41, 0.0  ;;  %v15882_v50 = vld [vmem:[#allocation2 + $0xf8] sm:$0xff]  ;;  %v6758_v36 = vmax.f32 %v6732_v57, 0.0 }
 0x532   : > { %v6730_v7 = vadd.f32 %v22321_v53, %v19563_v11  ;;  %v22341_v34 = vld [vmem:[#allocation70_spill] sm:$0xff]  ;;  %v6265_v32 = vmax.f32 %v6252_v13, 0.0  ;;  %v6256_v5 = vadd.f32 %v22326_v45, %v19642_v54  ;;  %v6495_v49 = vmax.f32 %v6482_v12, 0.0 }
 0x533   : > { %v19799_v20 = vmax.f32 %v5932_v48, %v6041_v59  ;;  %v19801_v38 = vmax.f32 %v5933_v31, %v6042_v27  ;;  %v5639_v18 = vpop.permute.xlu1 %5638  ;;  %v5456_v47 = vpop.permute.xlu0 %5455 }
 0x534   : > { %v6756_v58 = vmax.f32 %v6730_v7, 0.0 }
 0x535   : > { %6155 = vst [vmem:[#allocation3 + $0xd8] sm:$0xff] %v19799_v20  ;;  %6526 = vrot.lane.b32.xlu0 %v6497_v2, %s15965_s25  ;;  %6405 = vrot.lane.b32.xlu1 %v6379_v22, %s15966_s30 }
 0x537   : > { %v6005_v0 = vpop.permute.xlu1 %6004  ;;  %v5822_v28 = vpop.permute.xlu0 %5821 }
 0x539   : > { %6814 = vrot.lane.b32.xlu0 %v6756_v58, %s15963_s24  ;;  %6635 = vrot.lane.b32.xlu1 %v6609_v39, %s15967_s12  ;;  %v22343_v58 = vld [vmem:[#allocation22_spill] sm:$0xff] }
 0x53b   : > { %v5641_v19 = vpop.permute.xlu0 %5640  ;;  %v5458_v30 = vpop.permute.xlu1 %5457 }
 0x53c   : > { %v5494_v35 = vsel %vm5473_vm7, %v5456_v47, %v5458_v30  ;;  %v5495_v56 = vsel %vm5473_vm7, %v5458_v30, %v22340_v61  ;;  %v6177_v17 = vld [vmem:[#allocation3 + $0xd8] sm:$0xff]  ;;  %v5677_v3 = vsel %vm5656_vm8, %v5639_v18, %v5641_v19  ;;  %v5678_v29 = vsel %vm5656_vm8, %v5641_v19, %v22341_v34 }
 0x53d   : > { %v5569_v4 = vmax.f32 %v15881_v60, %v5494_v35  ;;  %v5570_v63 = vmax.f32 %v15882_v50, %v5495_v56  ;;  %6528 = vrot.lane.b32.xlu0 %v6498_v6, %s15965_s25  ;;  %6802 = vrot.lane.b32.xlu1 %v6750_v37, %s15963_s24  ;;  %v6197_v14 = vadd.f32 %v19464_v8, %v6177_v17  ;;  %v6269_v30 = vmax.f32 %v6256_v5, 0.0  ;;  %v12299_v50 = vld [vmem:[%s21822_s3 + $0x30] sm:$0xff] }
 0x53e   : > { %v6486_v6 = vadd.f32 %v22328_v1, %v19644_v40  ;;  %v6734_v17 = vadd.f32 %v22321_v53, %v19644_v40  ;;  %v6368_v60 = vadd.f32 %v22331_v43, %v19523_v26 }
 0x53f   : > { %v6007_v9 = vpop.permute.xlu0 %6006  ;;  %v5752_v48 = vmax.f32 %v5569_v4, %v5677_v3  ;;  %v5753_v31 = vmax.f32 %v5570_v63, %v5678_v29  ;;  %v5824_v59 = vpop.permute.xlu1 %5823  ;;  %v6210_v27 = vmax.f32 %v6197_v14, 0.0  ;;  %v12300_v63 = vld [vmem:[%s21822_s3 + $0x38] sm:$0x3f] }
 0x540   : > { %v5860_v22 = vsel %vm5839_vm9, %v5822_v28, %v5824_v59  ;;  %v5861_v47 = vsel %vm5839_vm9, %v5824_v59, %v22342_v24  ;;  %v6043_v7 = vsel %vm6022_vm10, %v6005_v0, %v6007_v9  ;;  %v6044_v39 = vsel %vm6022_vm10, %v6007_v9, %v22343_v58  ;;  %v12297_v0 = vld [vmem:[%s21822_s3 + $0x20] sm:$0xff]  ;;  %v15883_v59 = vld [vmem:[#allocation2 + $0x108] sm:$0xff] }
 0x541   : > { %v5935_v2 = vmax.f32 %v5752_v48, %v5860_v22  ;;  %v5936_v18 = vmax.f32 %v5753_v31, %v5861_v47  ;;  %6818 = vrot.lane.b32.xlu0 %v6758_v36, %s15963_s24  ;;  %6292 = vrot.lane.b32.xlu1 %v6265_v32, %s15962_s16  ;;  %6224 = vst.msk [vmem:[#allocation4 + $0x48] sm:$0xff] %vm6214_vm11, %v6210_v27  ;;  %v6499_v12 = vmax.f32 %v6486_v6, 0.0  ;;  %v6760_v29 = vmax.f32 %v6734_v17, 0.0  ;;  %v22346_v48 = vld [vmem:[#allocation71_spill] sm:$0xff]  ;;  %v15884_v27 = vld [vmem:[#allocation2 + $0x110] sm:$0xff] }
 0x542   : > { %v6726_v28 = vadd.f32 %v22321_v53, %v19489_v23  ;;  %v12298_v23 = vld [vmem:[%s21822_s3 + $0x28] sm:$0xff]  ;;  %v19877_v14 = vpack.c.bf16 %v12300_v63, %v12299_v50  ;;  %v6381_v36 = vmax.f32 %v6368_v60, 0.0  ;;  %v6257_v32 = vadd.f32 %v22326_v45, %v19678_v16 }
 0x543   : > { %v19842_v41 = vmax.f32 %v5935_v2, %v6043_v7  ;;  %v19844_v57 = vmax.f32 %v5936_v18, %v6044_v39  ;;  %v5645_v13 = vpop.permute.xlu0 %5644  ;;  %v5462_v19 = vpop.permute.xlu1 %5461  ;;  %v19856_v35 = vpack.c.bf16 %v12298_v23, %v12297_v0  ;;  %v22347_v47 = vld [vmem:[#allocation72_spill] sm:$0xff]  ;;  %v6254_v7 = vadd.f32 %v22326_v45, %v19561_v55 }
 0x544   : > { %v6752_v37 = vmax.f32 %v6726_v28, 0.0 }
 0x545   : > { %6300 = vrot.lane.b32.xlu0 %v6269_v30, %s15962_s16  ;;  %6522 = vrot.lane.b32.xlu1 %v6495_v49, %s15965_s25  ;;  %v6198_v4 = vadd.f32 %v19464_v8, %v19842_v41  ;;  %v6728_v8 = vadd.f32 %v22321_v53, %v19525_v15  ;;  %v22348_v30 = vld [vmem:[#allocation41_spill] sm:$0xff]  ;;  %v6267_v60 = vmax.f32 %v6254_v7, 0.0 }
 0x546   : > { %14805 = vmatprep.subr.bf16.mxu0 %v19856_v35  ;;  %14835 = vmatprep.subr.bf16.mxu1 %v19856_v35 }
 0x547   : > { %v5828_v61 = vpop.permute.xlu0 %5827  ;;  %v6011_v56 = vpop.permute.xlu1 %6010  ;;  %v6211_v26 = vmax.f32 %v6198_v4, 0.0  ;;  %14807 = vmatpush3.bf16.msra.mxu0 %v19856_v35  ;;  %14837 = vmatpush3.bf16.msra.mxu1 %v19856_v35  ;;  %v6754_v18 = vmax.f32 %v6728_v8, 0.0  ;;  %v6599_v4 = vadd.f32 %v22332_v52, %v19563_v11 }
 0x548   : > { %14810 = vmatprep.subr.msk.bf16.mxu0 %vm19882_vm14, %v19877_v14  ;;  %14840 = vmatprep.subr.msk.bf16.mxu1 %vm19882_vm14, %v19877_v14 }
 0x549   : > { %6530 = vrot.lane.b32.xlu0 %v6499_v12, %s15965_s25  ;;  %6806 = vrot.lane.b32.xlu1 %v6752_v37, %s15963_s24  ;;  %6225 = vst.msk [vmem:[#allocation4 + $0x50] sm:$0xff] %vm6214_vm11, %v6211_v26  ;;  %v22349_v12 = vld [vmem:[#allocation11_spill] sm:$0xff] }
 0x54b   : > { %v5647_v3 = vpop.permute.xlu1 %5646  ;;  %v5464_v34 = vpop.permute.xlu0 %5463  ;;  %14813 = vmatpush3.bf16.msk.msra.mxu0 %vm19882_vm14, %v19877_v14  ;;  %14843 = vmatpush3.bf16.msk.msra.mxu1 %vm19882_vm14, %v19877_v14 }
 0x54c   : > { %v5496_v15 = vsel %vm5473_vm7, %v5462_v19, %v5464_v34  ;;  %v5497_v31 = vsel %vm5473_vm7, %v5464_v34, %v22346_v48  ;;  %v5679_v24 = vsel %vm5656_vm8, %v5645_v13, %v5647_v3  ;;  %v5680_v2 = vsel %vm5656_vm8, %v5647_v3, %v22347_v47 }
 0x54d   : > { %v5572_v5 = vmax.f32 %v15883_v59, %v5496_v15  ;;  %v5573_v22 = vmax.f32 %v15884_v27, %v5497_v31  ;;  %6822 = vrot.lane.b32.xlu0 %v6760_v29, %s15963_s24  ;;  %6409 = vrot.lane.b32.xlu1 %v6381_v36, %s15966_s30  ;;  %v6270_v13 = vmax.f32 %v6257_v32, 0.0  ;;  %v6487_v19 = vadd.f32 %v22328_v1, %v19680_v25 }
 0x54e   : > { %v6736_v3 = vadd.f32 %v22321_v53, %v19680_v25  ;;  %v6612_v32 = vmax.f32 %v6599_v4, 0.0  ;;  %v6258_v15 = vadd.f32 %v22326_v45, %v19723_v62  ;;  %v6255_v48 = vadd.f32 %v22326_v45, %v19599_v42  ;;  %v22353_v4 = vld [vmem:[#allocation43_spill] sm:$0xff] }
 0x54f   : > { %v5830_v58 = vpop.permute.xlu1 %5829  ;;  %v5755_v39 = vmax.f32 %v5572_v5, %v5679_v24  ;;  %v5756_v49 = vmax.f32 %v5573_v22, %v5680_v2  ;;  %v6013_v28 = vpop.permute.xlu0 %6012  ;;  %v6500_v8 = vmax.f32 %v6487_v19, 0.0  ;;  %v6370_v59 = vadd.f32 %v22331_v43, %v19599_v42 }
 0x550   : > { %v5862_v55 = vsel %vm5839_vm9, %v5828_v61, %v5830_v58  ;;  %v5863_v6 = vsel %vm5839_vm9, %v5830_v58, %v22348_v30  ;;  %v6045_v37 = vsel %vm6022_vm10, %v6011_v56, %v6013_v28  ;;  %v6046_v17 = vsel %vm6022_vm10, %v6013_v28, %v22349_v12  ;;  %v19932_v56 = vld [vmem:[%s21821_s2] ss:$0 sm:$0xff] }
 0x551   : > { %v5938_v0 = vmax.f32 %v5755_v39, %v5862_v55  ;;  %v5939_v23 = vmax.f32 %v5756_v49, %v5863_v6  ;;  %6302 = vrot.lane.b32.xlu0 %v6270_v13, %s15962_s16  ;;  %6810 = vrot.lane.b32.xlu1 %v6754_v18, %s15963_s24  ;;  %v6762_v36 = vmax.f32 %v6736_v3, 0.0  ;;  %v6271_v22 = vmax.f32 %v6258_v15, 0.0  ;;  %v22350_v18 = vld [vmem:[#allocation73_spill] sm:$0xff]  ;;  %v22351_v49 = vld [vmem:[#allocation42_spill] sm:$0xff] }
 0x552   : > { %v6268_v24 = vmax.f32 %v6255_v48, 0.0  ;;  %v6488_v47 = vadd.f32 %v22328_v1, %v19725_v21  ;;  %v6383_v13 = vmax.f32 %v6370_v59, 0.0  ;;  %v6600_v19 = vadd.f32 %v22332_v52, %v19601_v46 }
 0x553   : > { %v19921_v50 = vmax.f32 %v5938_v0, %v6045_v37  ;;  %v19923_v61 = vmax.f32 %v5939_v23, %v6046_v17  ;;  %v5651_v63 = vpop.permute.xlu1 %5650  ;;  %v5468_v26 = vpop.permute.xlu0 %5467  ;;  %v22352_v37 = vld [vmem:[#allocation13_spill] sm:$0xff]  ;;  %v6259_v15 = vadd.f32 %v22326_v45, %v19758_v10  ;;  %v6489_v59 = vadd.f32 %v22328_v1, %v19760_v44 }
 0x555   : > { %6532 = vrot.lane.b32.xlu0 %v6500_v8, %s15965_s25  ;;  %6296 = vrot.lane.b32.xlu1 %v6267_v60, %s15962_s16  ;;  %v6199_v11 = vadd.f32 %v19932_v56, %v19921_v50  ;;  %v6371_v8 = vadd.f32 %v22331_v43, %v19642_v54  ;;  %v6272_v54 = vmax.f32 %v6259_v15, 0.0 }
 0x557   : > { %v6017_v34 = vpop.permute.xlu1 %6016  ;;  %v5834_v29 = vpop.permute.xlu0 %5833  ;;  %v6212_v31 = vmax.f32 %v6199_v11, 0.0 }
 0x559   : > { %6826 = vrot.lane.b32.xlu0 %v6762_v36, %s15963_s24  ;;  %6641 = vrot.lane.b32.xlu1 %v6612_v32, %s15967_s12  ;;  %6226 = vst.msk [vmem:[#allocation4 + $0x58] sm:$0xff] %vm6214_vm11, %v6212_v31  ;;  %v6384_v31 = vmax.f32 %v6371_v8, 0.0  ;;  %vm6572_vm11 = vcmask 319728  }
 0x55b   : > { %v5653_v5 = vpop.permute.xlu0 %5652  ;;  %v5470_v27 = vpop.permute.xlu1 %5469 }
 0x55c   : > { %v5498_v2 = vsel %vm5473_vm7, %v5468_v26, %v5470_v27  ;;  %v5499_v7 = vsel %vm5473_vm7, %v5470_v27, %v22350_v18  ;;  %v5681_v42 = vsel %vm5656_vm8, %v5651_v63, %v5653_v5  ;;  %v5682_v28 = vsel %vm5656_vm8, %v5653_v5, %v22351_v49 }
 0x55d   : > { %v5575_v58 = vmax.f32 %v19590_v33, %v5498_v2  ;;  %v5576_v39 = vmax.f32 %v19609_v51, %v5499_v7  ;;  %6304 = vrot.lane.b32.xlu0 %v6271_v22, %s15962_s16  ;;  %6298 = vrot.lane.b32.xlu1 %v6268_v24, %s15962_s16  ;;  %v6501_v33 = vmax.f32 %v6488_v47, 0.0  ;;  %v6738_v51 = vadd.f32 %v22321_v53, %v19725_v21 }
 0x55e   : > { %v6613_v26 = vmax.f32 %v6600_v19, 0.0  ;;  %v6601_v5 = vadd.f32 %v22332_v52, %v19644_v40  ;;  %v6502_v24 = vmax.f32 %v6489_v59, 0.0  ;;  %v6740_v2 = vadd.f32 %v22321_v53, %v19760_v44 }
 0x55f   : > { %v6019_v55 = vpop.permute.xlu0 %6018  ;;  %v5758_v30 = vmax.f32 %v5575_v58, %v5681_v42  ;;  %v5759_v6 = vmax.f32 %v5576_v39, %v5682_v28  ;;  %v5836_v0 = vpop.permute.xlu1 %5835  ;;  %v6764_v32 = vmax.f32 %v6738_v51, 0.0  ;;  %v6372_v18 = vadd.f32 %v22331_v43, %v19678_v16 }
 0x560   : > { %v5864_v23 = vsel %vm5839_vm9, %v5834_v29, %v5836_v0  ;;  %v5865_v12 = vsel %vm5839_vm9, %v5836_v0, %v22352_v37  ;;  %v6047_v46 = vsel %vm6022_vm10, %v6017_v34, %v6019_v55  ;;  %v6048_v63 = vsel %vm6022_vm10, %v6019_v55, %v22353_v4 }
 0x561   : > { %v5941_v17 = vmax.f32 %v5758_v30, %v5864_v23  ;;  %v5942_v60 = vmax.f32 %v5759_v6, %v5865_v12  ;;  %6534 = vrot.lane.b32.xlu0 %v6501_v33, %s15965_s25  ;;  %6413 = vrot.lane.b32.xlu1 %v6383_v13, %s15966_s30  ;;  %v6614_v47 = vmax.f32 %v6601_v5, 0.0  ;;  %v6766_v42 = vmax.f32 %v6740_v2, 0.0 }
 0x562   : > { %v6385_v49 = vmax.f32 %v6372_v18, 0.0  ;;  %v6260_v28 = vadd.f32 %v22326_v45, %v19799_v20  ;;  %v6602_v16 = vadd.f32 %v22332_v52, %v19680_v25  ;;  %v6490_v6 = vadd.f32 %v22328_v1, %v19801_v38 }
 0x563   : > { %v6124_v3 = vmax.f32 %v5941_v17, %v6047_v46  ;;  %v6125_v11 = vmax.f32 %v5942_v60, %v6048_v63  ;;  %v19971_v29 = vpop.permute.xlu0 %6804  ;;  %v19973_v36 = vpop.permute.xlu1 %6957  ;;  %v6373_v0 = vadd.f32 %v22331_v43, %v19723_v62  ;;  %v6742_v37 = vadd.f32 %v22321_v53, %v19801_v38 }
 0x564   : > { %v6273_v55 = vmax.f32 %v6260_v28, 0.0  ;;  %v6615_v30 = vmax.f32 %v6602_v16, 0.0  ;;  %v6503_v51 = vmax.f32 %v6490_v6, 0.0  ;;  %v6603_v12 = vadd.f32 %v22332_v52, %v19725_v21 }
 0x565   : > { %6164 = vst [vmem:[#allocation3 + $0x120] sm:$0x1] %v6124_v3  ;;  %6165 = vst [vmem:[#allocation3 + $0x128] sm:$0x1] %v6125_v11  ;;  %6830 = vrot.lane.b32.xlu0 %v6764_v32, %s15963_s24  ;;  %6643 = vrot.lane.b32.xlu1 %v6613_v26, %s15967_s12  ;;  %v6386_v23 = vmax.f32 %v6373_v0, 0.0  ;;  %v6768_v60 = vmax.f32 %v6742_v37, 0.0  ;;  %v6261_v4 = vadd.f32 %v22326_v45, %v19842_v41 }
 0x566   : > { %v6616_v46 = vmax.f32 %v6603_v12, 0.0  ;;  %v6374_v63 = vadd.f32 %v22331_v43, %v19758_v10  ;;  %v6491_v11 = vadd.f32 %v22328_v1, %v19844_v57  ;;  %v6604_v32 = vadd.f32 %v22332_v52, %v19760_v44 }
 0x567   : > { %v19979_v34 = vpop.permute.xlu0 %6808  ;;  %v19981_v48 = vpop.permute.xlu1 %6961  ;;  %v6274_v8 = vmax.f32 %v6261_v4, 0.0  ;;  %v6744_v59 = vadd.f32 %v22321_v53, %v19844_v57  ;;  %v6375_v5 = vadd.f32 %v22331_v43, %v19799_v20  ;;  %v6262_v18 = vadd.f32 %v22326_v45, %v19921_v50 }
 0x568   : > { %v6387_v3 = vmax.f32 %v6374_v63, 0.0  ;;  %v6377_v28 = vadd.f32 %v22331_v43, %v19921_v50  ;;  %v6376_v16 = vadd.f32 %v22331_v43, %v19842_v41  ;;  %v6492_v0 = vadd.f32 %v22328_v1, %v19923_v61  ;;  %v7023_v50 = vld [vmem:[%s21822_s3] sm:$0xff] }
 0x569   : > { %6306 = vrot.lane.b32.xlu0 %v6272_v54, %s15962_s16  ;;  %6415 = vrot.lane.b32.xlu1 %v6384_v31, %s15966_s30  ;;  %v6504_v54 = vmax.f32 %v6491_v11, 0.0  ;;  %v6617_v31 = vmax.f32 %v6604_v32, 0.0  ;;  %v6388_v2 = vmax.f32 %v6375_v5, 0.0  ;;  %v6607_v12 = vadd.f32 %v22332_v52, %v19923_v61 }
 0x56a   : > { %v6389_v6 = vmax.f32 %v6376_v16, 0.0  ;;  %v6505_v37 = vmax.f32 %v6492_v0, 0.0  ;;  %vm6996_vm7 = vcmask 572896   ;;  %vm7044_vm8 = vcmask 244736  }
 0x56b   : > { %v19989_v27 = vpop.permute.xlu0 %6959  ;;  %v19991_v22 = vpop.permute.xlu1 %6816  ;;  %v6620_v11 = vmax.f32 %v6607_v12, 0.0  ;;  %vm6342_vm9 = vcmask 155728   ;;  %vm6457_vm10 = vcmask 237728  }
 0x56c   : > { %v6180_v40 = vld [vmem:[#allocation3 + $0x120] sm:$0x1] }
 0x56d   : > { %6536 = vrot.lane.b32.xlu0 %v6502_v24, %s15965_s25  ;;  %6645 = vrot.lane.b32.xlu1 %v6614_v47, %s15967_s12  ;;  %v6200_v7 = vadd.f32 %v19932_v56, %v6180_v40  ;;  %v6770_v47 = vmax.f32 %v6744_v59, 0.0  ;;  %v6605_v40 = vadd.f32 %v22332_v52, %v19801_v38  ;;  %v6606_v38 = vadd.f32 %v22332_v52, %v19844_v57  ;;  %v7024_v57 = vld [vmem:[%s21822_s3 + $0x8] sm:$0xff]  ;;  %v6356_v4 = vld [vmem:[#allocation3 + $0x120] sm:$0x1]  ;;  %v6471_v59 = vld [vmem:[#allocation3 + $0x128] sm:$0x1] }
 0x56e   : > { %v6241_v63 = vld [vmem:[#allocation3 + $0x120] sm:$0x1] }
 0x56f   : > { %v20000_v58 = vpop.permute.xlu0 %6812  ;;  %v20002_v39 = vpop.permute.xlu1 %6820  ;;  %v6213_v13 = vmax.f32 %v6200_v7, 0.0  ;;  %v6619_v41 = vmax.f32 %v6606_v38, 0.0 }
 0x571   : > { %6834 = vrot.lane.b32.xlu0 %v6766_v42, %s15963_s24  ;;  %6417 = vrot.lane.b32.xlu1 %v6385_v49, %s15966_s30  ;;  %6228 = vst.msk [vmem:[#allocation4 + $0x60] sm:$0x1] %vm6227_vm15, %v6213_v13  ;;  %v6275_v42 = vmax.f32 %v6262_v18, 0.0  ;;  %v6618_v49 = vmax.f32 %v6605_v40, 0.0  ;;  %v6493_v40 = vadd.f32 %v22328_v1, %v6471_v59  ;;  %vm7009_vm15 = vcmask 565728  }
 0x573   : > { %v20010_v19 = vpop.permute.xlu0 %6963  ;;  %v20012_v56 = vpop.permute.xlu1 %6965 }
 0x575   : > { %6308 = vrot.lane.b32.xlu0 %v6273_v55, %s15962_s16  ;;  %6647 = vrot.lane.b32.xlu1 %v6615_v30, %s15967_s12  ;;  %v6390_v30 = vmax.f32 %v6377_v28, 0.0  ;;  %v6506_v28 = vmax.f32 %v6493_v40, 0.0 }
 0x577   : > { %v20020_v25 = vpop.permute.xlu0 %6967  ;;  %v20022_v33 = vpop.permute.xlu1 %6824 }
 0x579   : > { %6538 = vrot.lane.b32.xlu0 %v6503_v51, %s15965_s25  ;;  %6419 = vrot.lane.b32.xlu1 %v6386_v23, %s15966_s30 }
 0x57b   : > { %v20030_v62 = vpop.permute.xlu0 %6971  ;;  %v20032_v17 = vpop.permute.xlu1 %6828 }
 0x57d   : > { %6838 = vrot.lane.b32.xlu0 %v6768_v60, %s15963_s24  ;;  %6649 = vrot.lane.b32.xlu1 %v6616_v46, %s15967_s12  ;;  %v6746_v60 = vadd.f32 %v22321_v53, %v19923_v61  ;;  %v20103_v46 = vpack.c.bf16 %v7024_v57, %v7023_v50  ;;  %v6263_v61 = vadd.f32 %v22326_v45, %v6241_v63 }
 0x57f   : > { %v20040_v21 = vpop.permute.xlu0 %6848  ;;  %v20042_v26 = vpop.permute.xlu1 %6969  ;;  %14815 = vmatprep.subr.bf16.mxu0 %v20103_v46  ;;  %14845 = vmatprep.subr.bf16.mxu1 %v20103_v46  ;;  %v6772_v32 = vmax.f32 %v6746_v60, 0.0 }
 0x581   : > { %6310 = vrot.lane.b32.xlu0 %v6274_v8, %s15962_s16  ;;  %6421 = vrot.lane.b32.xlu1 %v6387_v3, %s15966_s30 }
 0x583   : > { %v20050_v10 = vpop.permute.xlu0 %6981  ;;  %v20052_v15 = vpop.permute.xlu1 %6832 }
 0x585   : > { %6540 = vrot.lane.b32.xlu0 %v6504_v54, %s15965_s25  ;;  %6651 = vrot.lane.b32.xlu1 %v6617_v31, %s15967_s12  ;;  %v6378_v54 = vadd.f32 %v22331_v43, %v6356_v4  ;;  %v6586_v31 = vld [vmem:[#allocation3 + $0x128] sm:$0x1] }
 0x586   : > { %v6608_v18 = vadd.f32 %v22332_v52, %v6586_v31  ;;  %v6713_v43 = vld [vmem:[#allocation3 + $0x128] sm:$0x1] }
 0x587   : > { %v6291_v44 = vpop.permute.xlu0 %6290  ;;  %v20060_v24 = vpop.permute.xlu1 %6836  ;;  %v6748_v16 = vadd.f32 %v22321_v53, %v6713_v43  ;;  %v12328_v43 = vld [vmem:[%s21822_s3 + $0x48] sm:$0xff] }
 0x588   : > { %6330 = vst.msk [vmem:[#allocation4] sm:$0xff] %vm6329_vm1, %v6291_v44 }
 0x589   : > { %6842 = vrot.lane.b32.xlu0 %v6770_v47, %s15963_s24  ;;  %6423 = vrot.lane.b32.xlu1 %v6388_v2, %s15966_s30  ;;  %v6391_v47 = vmax.f32 %v6378_v54, 0.0  ;;  %v6276_v2 = vmax.f32 %v6263_v61, 0.0  ;;  %v6774_v1 = vmax.f32 %v6748_v16, 0.0 }
 0x58b   : > { %v20069_v20 = vpop.permute.xlu0 %6520  ;;  %v20071_v7 = vpop.permute.xlu1 %6973 }
 0x58d   : > { %6312 = vrot.lane.b32.xlu0 %v6275_v42, %s15962_s16  ;;  %6653 = vrot.lane.b32.xlu1 %v6618_v49, %s15967_s12  ;;  %v6621_v49 = vmax.f32 %v6608_v18, 0.0 }
 0x58f   : > { %v20081_v13 = vpop.permute.xlu0 %6407  ;;  %v20083_v55 = vpop.permute.xlu1 %6840 }
 0x591   : > { %6427 = vrot.lane.b32.xlu0 %v6390_v30, %s15966_s30  ;;  %6425 = vrot.lane.b32.xlu1 %v6389_v6, %s15966_s30 }
 0x593   : > { %v20095_v51 = vpop.permute.xlu0 %6637  ;;  %v20097_v23 = vpop.permute.xlu1 %6975 }
 0x595   : > { %6542 = vrot.lane.b32.xlu0 %v6505_v37, %s15965_s25  ;;  %6655 = vrot.lane.b32.xlu1 %v6619_v41, %s15967_s12 }
 0x597   : > { %v6295_v8 = vpop.permute.xlu0 %6294  ;;  %v20109_v3 = vpop.permute.xlu1 %6844 }
 0x598   : > { %6332 = vst.msk [vmem:[#allocation4 + $0x10] sm:$0xff] %vm6329_vm1, %v6295_v8 }
 0x599   : > { %6657 = vrot.lane.b32.xlu0 %v6620_v11, %s15967_s12  ;;  %6846 = vrot.lane.b32.xlu1 %v6772_v32, %s15963_s24 }
 0x59b   : > { %v6525_v5 = vpop.permute.xlu0 %6524  ;;  %v20116_v44 = vpop.permute.xlu1 %6977 }
 0x59d   : > { %6429 = vrot.lane.b32.xlu1 %v6391_v47, %s15966_s30  ;;  %6314 = vrot.lane.b32.xlu0 %v6276_v2, %s15962_s16  ;;  %v12327_v2 = vld [vmem:[%s21822_s3 + $0x40] sm:$0xff] }
 0x59f   : > { %v6640_v45 = vpop.permute.xlu0 %6639  ;;  %v20122_v42 = vpop.permute.xlu1 %6979 }
 0x5a1   : > { %6659 = vrot.lane.b32.xlu1 %v6621_v49, %s15967_s12  ;;  %6544 = vrot.lane.b32.xlu0 %v6506_v28, %s15965_s25 }
 0x5a3   : > { %v6412_v38 = vpop.permute.xlu0 %6411  ;;  %v20127_v52 = vpop.permute.xlu1 %6852 }
 0x5a5   : > { %6850 = vrot.lane.b32.xlu0 %v6774_v1, %s15963_s24  ;;  %s22355_s24 = smov 98  }
 0x5a7   : > { %v6527_v30 = vpop.permute.xlu0 %6526  ;;  %v6406_v6 = vpop.permute.xlu1 %6405 }
 0x5a8   : > { %6445 = vst.msk [vmem:[#allocation4] sm:$0xff] %vm6444_vm2, %v6406_v6 }
 0x5a9   : > { %6560 = vst.msk [vmem:[#allocation4] sm:$0xff] %vm6559_vm3, %v20069_v20 }
 0x5ab   : > { %v6815_v53 = vpop.permute.xlu0 %6814  ;;  %v6636_v0 = vpop.permute.xlu1 %6635 }
 0x5ac   : > { %6675 = vst.msk [vmem:[#allocation4] sm:$0xff] %vm6674_vm4, %v6636_v0 }
 0x5af   : > { %v20134_v41 = vpop.permute.xlu0 %6528  ;;  %v6803_v50 = vpop.permute.xlu1 %6802 }
 0x5b0   : > { %v6855_v57 = vsel %vm6854_vm6, %v6803_v50, %v19971_v29 }
 0x5b1   : > { %6882 = vst.msk [vmem:[#allocation4] sm:$0xff] %vm6881_vm5, %v6855_v57 }
 0x5b2   : > { %6997 = vst.msk [vmem:[#allocation4] sm:$0xff] %vm6996_vm7, %v19973_v36 }
 0x5b3   : > { %v20141_v20 = vpop.permute.xlu0 %6818  ;;  %v6293_v37 = vpop.permute.xlu1 %6292 }
 0x5b4   : > { %6331 = vst.msk [vmem:[#allocation4 + $0x8] sm:$0xff] %vm6329_vm1, %v6293_v37  ;;  %v6859_v6 = vsel %vm6854_vm6, %v20141_v20, %v20002_v39 }
 0x5b5   : > { %6446 = vst.msk [vmem:[#allocation4 + $0x8] sm:$0xff] %vm6444_vm2, %v20081_v13 }
 0x5b7   : > { %v6301_v12 = vpop.permute.xlu0 %6300  ;;  %v6523_v60 = vpop.permute.xlu1 %6522 }
 0x5b8   : > { %6335 = vst.msk [vmem:[#allocation4 + $0x28] sm:$0xff] %vm6329_vm1, %v6301_v12 }
 0x5b9   : > { %6561 = vst.msk [vmem:[#allocation4 + $0x8] sm:$0xff] %vm6559_vm3, %v6523_v60  ;;  %v20150_v29 = vld [vmem:[#allocation4] sm:$0xff] }
 0x5ba   : > { %6676 = vst.msk [vmem:[#allocation4 + $0x8] sm:$0xff] %vm6674_vm4, %v20095_v51  ;;  %7740 = vrot.lane.b32.xlu1 %v20150_v29, %s15960_s14 }
 0x5bb   : > { %v20154_v36 = vpop.permute.xlu0 %6530  ;;  %v6807_v4 = vpop.permute.xlu1 %6806 }
 0x5bc   : > { %v6856_v13 = vsel %vm6854_vm6, %v6807_v4, %v19979_v34 }
 0x5bd   : > { %6883 = vst.msk [vmem:[#allocation4 + $0x8] sm:$0xff] %vm6881_vm5, %v6856_v13 }
 0x5be   : > { %6998 = vst.msk [vmem:[#allocation4 + $0x8] sm:$0xff] %vm6996_vm7, %v19989_v27  ;;  %8283 = vrot.lane.b32.xlu1 %v20150_v29, %s15959_s13 }
 0x5bf   : > { %v20163_v51 = vpop.permute.xlu0 %6822  ;;  %v6410_v63 = vpop.permute.xlu1 %6409 }
 0x5c0   : > { %6447 = vst.msk [vmem:[#allocation4 + $0x10] sm:$0xff] %vm6444_vm2, %v6410_v63  ;;  %v6860_v50 = vsel %vm6854_vm6, %v20163_v51, %v20022_v33 }
 0x5c1   : > { %6562 = vst.msk [vmem:[#allocation4 + $0x10] sm:$0xff] %vm6559_vm3, %v6525_v5  ;;  %v6858_v5 = vsel %vm6854_vm6, %v6815_v53, %v19991_v22 }
 0x5c2   : > { %6677 = vst.msk [vmem:[#allocation4 + $0x10] sm:$0xff] %vm6674_vm4, %v6640_v45 }
 0x5c3   : > { %v6303_v8 = vpop.permute.xlu0 %6302  ;;  %v6811_v11 = vpop.permute.xlu1 %6810 }
 0x5c4   : > { %6336 = vst.msk [vmem:[#allocation4 + $0x30] sm:$0xff] %vm6329_vm1, %v6303_v8  ;;  %v6857_v34 = vsel %vm6854_vm6, %v6811_v11, %v20000_v58  ;;  %v7025_v58 = vld [vmem:[%s21822_s3 + $0x10] sm:$0xff] }
 0x5c5   : > { %6884 = vst.msk [vmem:[#allocation4 + $0x10] sm:$0xff] %vm6881_vm5, %v6857_v34  ;;  %v7027_v27 = vld [vmem:[#allocation4 + $0x1] sm:$0xff] }
 0x5c6   : > { %v20172_v32 = vld [vmem:[#allocation4 + $0x8] sm:$0xff]  ;;  %6999 = vst.msk [vmem:[#allocation4 + $0x10] sm:$0xff] %vm6996_vm7, %v19981_v48  ;;  %7567 = vrot.lane.b32.xlu1 %v7027_v27, %s15960_s14  ;;  %13977 = vmatprep.mubr.msk.f32.mxu0 %vm7044_vm8, %v7027_v27 }
 0x5c7   : > { %7742 = vrot.lane.b32.xlu0 %v20172_v32, %s15960_s14  ;;  %v20180_v54 = vpop.permute.xlu0 %6532  ;;  %v6297_v61 = vpop.permute.xlu1 %6296  ;;  %v7026_v48 = vld [vmem:[%s21822_s3 + $0x18] sm:$0x3f] }
 0x5c8   : > { %6333 = vst.msk [vmem:[#allocation4 + $0x18] sm:$0xff] %vm6329_vm1, %v6297_v61  ;;  %v20199_v47 = vpack.c.bf16 %v7026_v48, %v7025_v58  ;;  %v20205_v18 = vld [vmem:[#allocation4 + $0x2] sm:$0xff] }
 0x5c9   : > { %6448 = vst.msk [vmem:[#allocation4 + $0x18] sm:$0xff] %vm6444_vm2, %v6412_v38 }
 0x5ca   : > { %6563 = vst.msk [vmem:[#allocation4 + $0x18] sm:$0xff] %vm6559_vm3, %v6527_v30  ;;  %8110 = vrot.lane.b32.xlu1 %v7027_v27, %s15959_s13  ;;  %22354 = vst [vmem:[#allocation44_spill] sm:$0xff] %v20199_v47 }
 0x5cb   : > { %8285 = vrot.lane.b32.xlu0 %v20172_v32, %s15959_s13  ;;  %v20194_v31 = vpop.permute.xlu0 %6826  ;;  %v6642_v59 = vpop.permute.xlu1 %6641 }
 0x5cc   : > { %6678 = vst.msk [vmem:[#allocation4 + $0x18] sm:$0xff] %vm6674_vm4, %v6642_v59  ;;  %v6861_v60 = vsel %vm6854_vm6, %v20194_v31, %v20032_v17 }
 0x5cd   : > { %6885 = vst.msk [vmem:[#allocation4 + $0x18] sm:$0xff] %vm6881_vm5, %v6858_v5  ;;  %v7028_v40 = vld [vmem:[#allocation4 + $0x9] sm:$0xff] }
 0x5ce   : > { %7000 = vst.msk [vmem:[#allocation4 + $0x18] sm:$0xff] %vm6996_vm7, %v20010_v19  ;;  %7913 = vrot.lane.b32.xlu1 %v20205_v18, %s15960_s14  ;;  %13978 = vmatmul.mubr.msk.f32.vlgmr.msra.gmra.mrb[146].mxu0 %vm7044_vm8, %v7028_v40  ;;  %v20222_v19 = vpack.c.bf16 %v12328_v43, %v12327_v2  ;;  %v20237_v38 = vld [vmem:[#allocation4 + $0xa] sm:$0xff] }
 0x5cf   : > { %7569 = vrot.lane.b32.xlu0 %v7028_v40, %s15960_s14  ;;  %v6305_v22 = vpop.permute.xlu0 %6304  ;;  %v6299_v45 = vpop.permute.xlu1 %6298  ;;  %14817 = vmatpush3.bf16.msra.mxu0 %v20103_v46  ;;  %v20257_v39 = vld [vmem:[#allocation4 + $0x10] sm:$0xff] }
 0x5d0   : > { %6337 = vst.msk [vmem:[#allocation4 + $0x38] sm:$0xff] %vm6329_vm1, %v6305_v22  ;;  %6334 = vst.msk [vmem:[#allocation4 + $0x20] sm:$0xff] %vm6329_vm1, %v6299_v45  ;;  %14820 = vmatprep.subr.msk.bf16.mxu0 %vm19882_vm14, %v20199_v47 }
 0x5d2   : > { %8456 = vrot.lane.b32.xlu1 %v20205_v18, %s15959_s13 }
 0x5d3   : > { %8112 = vrot.lane.b32.xlu0 %v7028_v40, %s15959_s13  ;;  %v6535_v49 = vpop.permute.xlu0 %6534  ;;  %v6414_v28 = vpop.permute.xlu1 %6413  ;;  %14823 = vmatpush3.bf16.msk.msra.mxu0 %vm19882_vm14, %v20199_v47 }
 0x5d4   : > { %6449 = vst.msk [vmem:[#allocation4 + $0x20] sm:$0xff] %vm6444_vm2, %v6414_v28  ;;  %14825 = vmatprep.subr.bf16.mxu0 %v20222_v19 }
 0x5d5   : > { %6564 = vst.msk [vmem:[#allocation4 + $0x20] sm:$0xff] %vm6559_vm3, %v20134_v41  ;;  %v20234_v16 = vld [vmem:[#allocation4 + $0x11] sm:$0xff] }
 0x5d6   : > { %8653 = vrot.lane.b32.xlu1 %v7027_v27, %s22355_s24  ;;  %13980 = vmatprep.mubr.msk.f32.mxu0 %vm7044_vm8, %v20234_v16  ;;  %v20281_v33 = vld [vmem:[#allocation4 + $0x18] sm:$0xff] }
 0x5d7   : > { %7915 = vrot.lane.b32.xlu0 %v20237_v38, %s15960_s14  ;;  %v6831_v1 = vpop.permute.xlu0 %6830  ;;  %v6644_v30 = vpop.permute.xlu1 %6643  ;;  %v20303_v13 = vld [vmem:[#allocation4 + $0x12] sm:$0xff] }
 0x5d8   : > { %6679 = vst.msk [vmem:[#allocation4 + $0x20] sm:$0xff] %vm6674_vm4, %v6644_v30  ;;  %v6862_v63 = vsel %vm6854_vm6, %v6831_v1, %v20052_v15 }
 0x5d9   : > { %6886 = vst.msk [vmem:[#allocation4 + $0x20] sm:$0xff] %vm6881_vm5, %v6859_v6 }
 0x5da   : > { %7001 = vst.msk [vmem:[#allocation4 + $0x20] sm:$0xff] %vm6996_vm7, %v20012_v56  ;;  %9196 = vrot.lane.b32.xlu1 %v7027_v27, %s15962_s16 }
 0x5db   : > { %8458 = vrot.lane.b32.xlu0 %v20237_v38, %s15959_s13  ;;  %v6307_v53 = vpop.permute.xlu0 %6306  ;;  %v6416_v0 = vpop.permute.xlu1 %6415 }
 0x5dc   : > { %6338 = vst.msk [vmem:[#allocation4 + $0x40] sm:$0xff] %vm6329_vm1, %v6307_v53 }
 0x5dd   : > { %6450 = vst.msk [vmem:[#allocation4 + $0x28] sm:$0xff] %vm6444_vm2, %v6416_v0 }
 0x5de   : > { %6565 = vst.msk [vmem:[#allocation4 + $0x28] sm:$0xff] %vm6559_vm3, %v20154_v36  ;;  %7744 = vrot.lane.b32.xlu1 %v20257_v39, %s15960_s14 }
 0x5df   : > { %8655 = vrot.lane.b32.xlu0 %v7028_v40, %s22355_s24  ;;  %v6537_v56 = vpop.permute.xlu0 %6536  ;;  %v6646_v41 = vpop.permute.xlu1 %6645 }
 0x5e0   : > { %6680 = vst.msk [vmem:[#allocation4 + $0x28] sm:$0xff] %vm6674_vm4, %v6646_v41 }
 0x5e1   : > { %6887 = vst.msk [vmem:[#allocation4 + $0x28] sm:$0xff] %vm6881_vm5, %v6860_v50  ;;  %v20267_v57 = vld [vmem:[#allocation4 + $0x19] sm:$0xff] }
 0x5e2   : > { %7002 = vst.msk [vmem:[#allocation4 + $0x28] sm:$0xff] %vm6996_vm7, %v20020_v25  ;;  %8287 = vrot.lane.b32.xlu1 %v20257_v39, %s15959_s13  ;;  %13981 = vmatmul.mubr.msk.f32.gmra.mrb[148].mxu0 %vm7044_vm8, %v20267_v57  ;;  %v20336_v61 = vld [vmem:[#allocation4 + $0x20] sm:$0xff] }
 0x5e3   : > { %9198 = vrot.lane.b32.xlu0 %v7028_v40, %s15962_s16  ;;  %v6835_v20 = vpop.permute.xlu0 %6834  ;;  %v6418_v37 = vpop.permute.xlu1 %6417  ;;  %v12329_v50 = vld [vmem:[%s21822_s3 + $0x50] sm:$0xff] }
 0x5e4   : > { %6451 = vst.msk [vmem:[#allocation4 + $0x30] sm:$0xff] %vm6444_vm2, %v6418_v37 }
 0x5e5   : > { %6566 = vst.msk [vmem:[#allocation4 + $0x30] sm:$0xff] %vm6559_vm3, %v20180_v54  ;;  %v6863_v54 = vsel %vm6854_vm6, %v6835_v20, %v20060_v24  ;;  %v12330_v20 = vld [vmem:[%s21822_s3 + $0x58] sm:$0x3f] }
 0x5e6   : > { %7571 = vrot.lane.b32.xlu1 %v20234_v16, %s15960_s14 }
 0x5e7   : > { %7746 = vrot.lane.b32.xlu0 %v20281_v33, %s15960_s14  ;;  %v6309_v25 = vpop.permute.xlu0 %6308  ;;  %v6648_v12 = vpop.permute.xlu1 %6647 }
 0x5e8   : > { %6339 = vst.msk [vmem:[#allocation4 + $0x48] sm:$0xff] %vm6329_vm1, %v6309_v25 }
 0x5e9   : > { %6681 = vst.msk [vmem:[#allocation4 + $0x30] sm:$0xff] %vm6674_vm4, %v6648_v12  ;;  %v20291_v36 = vld [vmem:[#allocation4 + $0x21] sm:$0xff]  ;;  %v20439_v12 = vpack.c.bf16 %v12330_v20, %v12329_v50 }
 0x5ea   : > { %6888 = vst.msk [vmem:[#allocation4 + $0x30] sm:$0xff] %vm6881_vm5, %v6861_v60  ;;  %8114 = vrot.lane.b32.xlu1 %v20234_v16, %s15959_s13  ;;  %13983 = vmatprep.mubr.msk.f32.mxu0 %vm7044_vm8, %v20291_v36  ;;  %v20365_v2 = vld [vmem:[#allocation4 + $0x28] sm:$0xff] }
 0x5eb   : > { %7003 = vst.msk [vmem:[#allocation4 + $0x30] sm:$0xff] %vm6996_vm7, %v20042_v26  ;;  %8289 = vrot.lane.b32.xlu0 %v20281_v33, %s15959_s13  ;;  %v6539_v17 = vpop.permute.xlu0 %6538  ;;  %v6420_v4 = vpop.permute.xlu1 %6419  ;;  %v20383_v45 = vld [vmem:[#allocation4 + $0x22] sm:$0xff] }
 0x5ec   : > { %6452 = vst.msk [vmem:[#allocation4 + $0x38] sm:$0xff] %vm6444_vm2, %v6420_v4 }
 0x5ed   : > { %6567 = vst.msk [vmem:[#allocation4 + $0x38] sm:$0xff] %vm6559_vm3, %v6535_v49 }
 0x5ee   : > { %7917 = vrot.lane.b32.xlu1 %v20303_v13, %s15960_s14 }
 0x5ef   : > { %7573 = vrot.lane.b32.xlu0 %v20267_v57, %s15960_s14  ;;  %v6839_v26 = vpop.permute.xlu0 %6838  ;;  %v6650_v51 = vpop.permute.xlu1 %6649 }
 0x5f0   : > { %6682 = vst.msk [vmem:[#allocation4 + $0x38] sm:$0xff] %vm6674_vm4, %v6650_v51  ;;  %v6864_v59 = vsel %vm6854_vm6, %v6839_v26, %v20083_v55 }
 0x5f1   : > { %6889 = vst.msk [vmem:[#allocation4 + $0x38] sm:$0xff] %vm6881_vm5, %v6862_v63 }
 0x5f2   : > { %v20313_v8 = vld [vmem:[#allocation4 + $0x29] sm:$0xff]  ;;  %7004 = vst.msk [vmem:[#allocation4 + $0x38] sm:$0xff] %vm6996_vm7, %v20030_v62  ;;  %8460 = vrot.lane.b32.xlu1 %v20303_v13, %s15959_s13  ;;  %v20328_v62 = vld [vmem:[#allocation4 + $0x1a] sm:$0xff] }
 0x5f3   : > { %13984 = vmatmul.mubr.msk.f32.gmra.mrb[150].mxu0 %vm7044_vm8, %v20313_v8  ;;  %8116 = vrot.lane.b32.xlu0 %v20267_v57, %s15959_s13  ;;  %v6311_v11 = vpop.permute.xlu0 %6310  ;;  %v6422_v15 = vpop.permute.xlu1 %6421  ;;  %v20405_v6 = vld [vmem:[#allocation4 + $0x30] sm:$0xff] }
 0x5f4   : > { %6340 = vst.msk [vmem:[#allocation4 + $0x50] sm:$0xff] %vm6329_vm1, %v6311_v11  ;;  %v20409_v53 = vld [vmem:[#allocation4 + $0x2a] sm:$0xff] }
 0x5f5   : > { %6453 = vst.msk [vmem:[#allocation4 + $0x40] sm:$0xff] %vm6444_vm2, %v6422_v15 }
 0x5f6   : > { %6568 = vst.msk [vmem:[#allocation4 + $0x40] sm:$0xff] %vm6559_vm3, %v6537_v56  ;;  %8657 = vrot.lane.b32.xlu1 %v20234_v16, %s22355_s24 }
 0x5f7   : > { %7919 = vrot.lane.b32.xlu0 %v20328_v62, %s15960_s14  ;;  %v6541_v34 = vpop.permute.xlu0 %6540  ;;  %v6652_v27 = vpop.permute.xlu1 %6651 }
 0x5f8   : > { %6683 = vst.msk [vmem:[#allocation4 + $0x40] sm:$0xff] %vm6674_vm4, %v6652_v27 }
 0x5f9   : > { %6890 = vst.msk [vmem:[#allocation4 + $0x40] sm:$0xff] %vm6881_vm5, %v6863_v54  ;;  %v20338_v58 = vld [vmem:[#allocation4 + $0x31] sm:$0xff] }
 0x5fa   : > { %7005 = vst.msk [vmem:[#allocation4 + $0x40] sm:$0xff] %vm6996_vm7, %v20071_v7  ;;  %7748 = vrot.lane.b32.xlu1 %v20336_v61, %s15960_s14  ;;  %13986 = vmatprep.mubr.msk.f32.mxu0 %vm7044_vm8, %v20338_v58  ;;  %v20444_v60 = vld [vmem:[#allocation4 + $0x38] sm:$0xff] }
 0x5fb   : > { %8462 = vrot.lane.b32.xlu0 %v20328_v62, %s15959_s13  ;;  %v6843_v24 = vpop.permute.xlu0 %6842  ;;  %v6424_v48 = vpop.permute.xlu1 %6423 }
 0x5fc   : > { %6454 = vst.msk [vmem:[#allocation4 + $0x48] sm:$0xff] %vm6444_vm2, %v6424_v48  ;;  %v6865_v22 = vsel %vm6854_vm6, %v6843_v24, %v20109_v3 }
 0x5fd   : > { %6569 = vst.msk [vmem:[#allocation4 + $0x48] sm:$0xff] %vm6559_vm3, %v6539_v17 }
 0x5fe   : > { %8291 = vrot.lane.b32.xlu1 %v20336_v61, %s15959_s13 }
 0x5ff   : > { %8659 = vrot.lane.b32.xlu0 %v20267_v57, %s22355_s24  ;;  %v6313_v7 = vpop.permute.xlu0 %6312  ;;  %v6654_v31 = vpop.permute.xlu1 %6653 }
 0x600   : > { %6341 = vst.msk [vmem:[#allocation4 + $0x58] sm:$0xff] %vm6329_vm1, %v6313_v7  ;;  %vm9754_vm1 = vcmask 241664  }
 0x601   : > { %6684 = vst.msk [vmem:[#allocation4 + $0x48] sm:$0xff] %vm6674_vm4, %v6654_v31  ;;  %v20359_v5 = vld [vmem:[#allocation4 + $0x39] sm:$0xff] }
 0x602   : > { %6891 = vst.msk [vmem:[#allocation4 + $0x48] sm:$0xff] %vm6881_vm5, %v6864_v59  ;;  %7575 = vrot.lane.b32.xlu1 %v20291_v36, %s15960_s14  ;;  %13987 = vmatmul.mubr.msk.f32.gmra.mrb[152].mxu0 %vm7044_vm8, %v20359_v5  ;;  %v20488_v17 = vld [vmem:[#allocation4 + $0x3a] sm:$0xff] }
 0x603   : > { %7006 = vst.msk [vmem:[#allocation4 + $0x48] sm:$0xff] %vm6996_vm7, %v20097_v23  ;;  %7750 = vrot.lane.b32.xlu0 %v20365_v2, %s15960_s14  ;;  %v6428_v55 = vpop.permute.xlu0 %6427  ;;  %v6426_v40 = vpop.permute.xlu1 %6425 }
 0x604   : > { %6456 = vst.msk [vmem:[#allocation4 + $0x58] sm:$0xff] %vm6444_vm2, %v6428_v55  ;;  %6455 = vst.msk [vmem:[#allocation4 + $0x50] sm:$0xff] %vm6444_vm2, %v6426_v40  ;;  %vm9750_vm2 = vcmask 243712  }
 0x605   : > { %6570 = vst.msk [vmem:[#allocation4 + $0x50] sm:$0xff] %vm6559_vm3, %v6541_v34 }
 0x606   : > { %8118 = vrot.lane.b32.xlu1 %v20291_v36, %s15959_s13 }
 0x607   : > { %8293 = vrot.lane.b32.xlu0 %v20365_v2, %s15959_s13  ;;  %v6543_v23 = vpop.permute.xlu0 %6542  ;;  %v6656_v43 = vpop.permute.xlu1 %6655 }
 0x608   : > { %6571 = vst.msk [vmem:[#allocation4 + $0x58] sm:$0xff] %vm6559_vm3, %v6543_v23  ;;  %vm11515_vm3 = vcmask 1041408  }
 0x609   : > { %6685 = vst.msk [vmem:[#allocation4 + $0x50] sm:$0xff] %vm6674_vm4, %v6656_v43 }
 0x60a   : > { %6892 = vst.msk [vmem:[#allocation4 + $0x50] sm:$0xff] %vm6881_vm5, %v6865_v22  ;;  %v20385_v49 = vld [vmem:[#allocation4 + $0x41] sm:$0xff]  ;;  %7921 = vrot.lane.b32.xlu1 %v20383_v45, %s15960_s14 }
 0x60b   : > { %7007 = vst.msk [vmem:[#allocation4 + $0x50] sm:$0xff] %vm6996_vm7, %v20116_v44  ;;  %13989 = vmatprep.mubr.msk.f32.mxu0 %vm7044_vm8, %v20385_v49  ;;  %7577 = vrot.lane.b32.xlu0 %v20313_v8, %s15960_s14  ;;  %v6658_v3 = vpop.permute.xlu0 %6657  ;;  %v6847_v28 = vpop.permute.xlu1 %6846  ;;  %v20492_v4 = vld [vmem:[#allocation4 + $0x48] sm:$0xff] }
 0x60c   : > { %6686 = vst.msk [vmem:[#allocation4 + $0x58] sm:$0xff] %vm6674_vm4, %v6658_v3  ;;  %v6866_v1 = vsel %vm6854_vm6, %v6847_v28, %v20040_v21  ;;  %v20542_v27 = vld [vmem:[#allocation4 + $0x42] sm:$0xff]  ;;  %vm11598_vm4 = vcmask 1043456  }
 0x60d   : > { %6893 = vst.msk [vmem:[#allocation4 + $0x58] sm:$0xff] %vm6881_vm5, %v6866_v1  ;;  %vm11672_vm5 = vcmask 16384  }
 0x60e   : > { %7008 = vst.msk [vmem:[#allocation4 + $0x58] sm:$0xff] %vm6996_vm7, %v20122_v42  ;;  %8464 = vrot.lane.b32.xlu1 %v20383_v45, %s15959_s13 }
 0x60f   : > { %8120 = vrot.lane.b32.xlu0 %v20313_v8, %s15959_s13  ;;  %v6315_v44 = vpop.permute.xlu0 %6314  ;;  %v6430_v30 = vpop.permute.xlu1 %6429 }
 0x610   : > { %6343 = vst.msk [vmem:[#allocation4 + $0x60] sm:$0x1] %vm6342_vm9, %v6315_v44 }
 0x611   : > { %6458 = vst.msk [vmem:[#allocation4 + $0x60] sm:$0x1] %vm6457_vm10, %v6430_v30 }
 0x612   : > { %v20407_v21 = vld [vmem:[#allocation4 + $0x49] sm:$0xff]  ;;  %7752 = vrot.lane.b32.xlu1 %v20405_v6, %s15960_s14 }
 0x613   : > { %13990 = vmatmul.mubr.msk.f32.gmra.mrb[154].mxu0 %vm7044_vm8, %v20407_v21  ;;  %7923 = vrot.lane.b32.xlu0 %v20409_v53, %s15960_s14  ;;  %v6545_v42 = vpop.permute.xlu0 %6544  ;;  %v6660_v0 = vpop.permute.xlu1 %6659  ;;  %v20498_v26 = vld [vmem:[#allocation4 + $0x50] sm:$0xff] }
 0x614   : > { %6573 = vst.msk [vmem:[#allocation4 + $0x60] sm:$0x1] %vm6572_vm11, %v6545_v42  ;;  %v20566_v31 = vld [vmem:[#allocation4 + $0x4a] sm:$0xff] }
 0x615   : > { %6688 = vst.msk [vmem:[#allocation4 + $0x60] sm:$0x1] %vm6687_vm12, %v6660_v0  ;;  %v20417_v56 = vld [vmem:[#allocation4 + $0x51] sm:$0xff]  ;;  %v20419_v41 = vld [vmem:[#allocation4 + $0x59] sm:$0x7f] }
 0x616   : > { %8295 = vrot.lane.b32.xlu1 %v20405_v6, %s15959_s13  ;;  %13992 = vmatprep.mubr.msk.f32.mxu0 %vm7044_vm8, %v20417_v56  ;;  %v20506_v63 = vld [vmem:[#allocation4 + $0x58] sm:$0x7f] }
 0x617   : > { %8466 = vrot.lane.b32.xlu0 %v20409_v53, %s15959_s13  ;;  %v6851_v37 = vpop.permute.xlu0 %6850  ;;  %13993 = vmatmul.mubr.msk.f32.gmra.mrb[156].mxu0 %vm7044_vm8, %v20419_v41  ;;  %v20574_v59 = vld [vmem:[#allocation4 + $0x52] sm:$0xff] }
 0x618   : > { %v6867_v25 = vsel %vm6854_vm6, %v6851_v37, %v20127_v52  ;;  %14003 = vmatprep.mubr.msk.f32.mxu0 %vm7044_vm8, %v20150_v29  ;;  %v20484_v52 = vld [vmem:[#allocation4 + $0x40] sm:$0xff] }
 0x619   : > { %6895 = vst.msk [vmem:[#allocation4 + $0x60] sm:$0x1] %vm6894_vm13, %v6867_v25 }
 0x61a   : > { %7010 = vst.msk [vmem:[#allocation4 + $0x60] sm:$0x1] %vm7009_vm15, %v20050_v10  ;;  %7579 = vrot.lane.b32.xlu1 %v20338_v58, %s15960_s14  ;;  %v20467_v10 = vld [vmem:[#allocation4 + $0x32] sm:$0xff] }
 0x61b   : > { %7754 = vrot.lane.b32.xlu0 %v20444_v60, %s15960_s14  ;;  %14004 = vmatmul.mubr.msk.f32.vlgmr.msra.gmra.mrb[146].mxu0 %vm7044_vm8, %v20172_v32 }
 0x61c   : > { %14006 = vmatprep.mubr.msk.f32.mxu0 %vm7044_vm8, %v20257_v39  ;;  %14827 = vmatpush3.bf16.msra.mxu0 %v20222_v19 }
 0x61d   : > { %14830 = vmatprep.subr.msk.bf16.mxu0 %vm19882_vm14, %v20439_v12 }
 0x61e   : > { %8122 = vrot.lane.b32.xlu1 %v20338_v58, %s15959_s13 }
 0x61f   : > { %8297 = vrot.lane.b32.xlu0 %v20444_v60, %s15959_s13  ;;  %14007 = vmatmul.mubr.msk.f32.gmra.mrb[148].mxu0 %vm7044_vm8, %v20281_v33 }
 0x620   : > { %14009 = vmatprep.mubr.msk.f32.mxu0 %vm7044_vm8, %v20336_v61  ;;  %14833 = vmatpush3.bf16.msk.msra.mxu0 %vm19882_vm14, %v20439_v12 }
 0x621   : > { %14865 = vmatprep.subr.bf16.mxu0 %v19856_v35  ;;  %v20586_v23 = vld [vmem:[#allocation4 + $0x5a] sm:$0x7f] }
 0x622   : > { %7925 = vrot.lane.b32.xlu1 %v20467_v10, %s15960_s14 }
 0x623   : > { %7581 = vrot.lane.b32.xlu0 %v20359_v5, %s15960_s14  ;;  %14010 = vmatmul.mubr.msk.f32.gmra.mrb[150].mxu0 %vm7044_vm8, %v20365_v2 }
 0x624   : > { %14012 = vmatprep.mubr.msk.f32.mxu0 %vm7044_vm8, %v20405_v6 }
 0x626   : > { %8468 = vrot.lane.b32.xlu1 %v20467_v10, %s15959_s13 }
 0x627   : > { %8124 = vrot.lane.b32.xlu0 %v20359_v5, %s15959_s13  ;;  %14013 = vmatmul.mubr.msk.f32.gmra.mrb[152].mxu0 %vm7044_vm8, %v20444_v60 }
 0x628   : > { %14015 = vmatprep.mubr.msk.f32.mxu0 %vm7044_vm8, %v20484_v52 }
 0x62a   : > { %7756 = vrot.lane.b32.xlu1 %v20484_v52, %s15960_s14 }
 0x62b   : > { %7927 = vrot.lane.b32.xlu0 %v20488_v17, %s15960_s14  ;;  %14016 = vmatmul.mubr.msk.f32.gmra.mrb[154].mxu0 %vm7044_vm8, %v20492_v4 }
 0x62c   : > { %14018 = vmatprep.mubr.msk.f32.mxu0 %vm7044_vm8, %v20498_v26  ;;  %v20502_v51 = vpop.permute.xlu1 %7740 }
 0x62e   : > { %8299 = vrot.lane.b32.xlu1 %v20484_v52, %s15959_s13 }
 0x62f   : > { %8470 = vrot.lane.b32.xlu0 %v20488_v17, %s15959_s13  ;;  %14019 = vmatmul.mubr.msk.f32.gmra.mrb[156].mxu0 %vm7044_vm8, %v20506_v63 }
 0x630   : > { %14029 = vmatprep.mubr.msk.f32.mxu0 %vm7044_vm8, %v20205_v18  ;;  %v20520_v11 = vpop.permute.xlu1 %8283 }
 0x632   : > { %7583 = vrot.lane.b32.xlu1 %v20385_v49, %s15960_s14 }
 0x633   : > { %7758 = vrot.lane.b32.xlu0 %v20492_v4, %s15960_s14  ;;  %14030 = vmatmul.mubr.msk.f32.vlgmr.msra.gmra.mrb[146].mxu0 %vm7044_vm8, %v20237_v38 }
 0x634   : > { %14032 = vmatprep.mubr.msk.f32.mxu0 %vm7044_vm8, %v20303_v13  ;;  %14867 = vmatpush3.bf16.msra.mxu0 %v19856_v35 }
 0x635   : > { %14870 = vmatprep.subr.msk.bf16.mxu0 %vm19882_vm14, %v19877_v14 }
 0x636   : > { %8126 = vrot.lane.b32.xlu1 %v20385_v49, %s15959_s13 }
 0x637   : > { %8301 = vrot.lane.b32.xlu0 %v20492_v4, %s15959_s13  ;;  %14033 = vmatmul.mubr.msk.f32.gmra.mrb[148].mxu0 %vm7044_vm8, %v20328_v62 }
 0x638   : > { %14035 = vmatprep.mubr.msk.f32.mxu0 %vm7044_vm8, %v20383_v45  ;;  %v7568_v15 = vpop.permute.xlu1 %7567  ;;  %14873 = vmatpush3.bf16.msk.msra.mxu0 %vm19882_vm14, %v19877_v14 }
 0x639   : > { %v20539_v34 = vpop.permute.xlu0 %7742  ;;  %14055 = vmatprep.mubr.msk.f32.mxu1 %vm7044_vm8, %v7568_v15  ;;  %14875 = vmatprep.subr.bf16.mxu0 %v20103_v46 }
 0x63a   : > { %7929 = vrot.lane.b32.xlu1 %v20542_v27, %s15960_s14 }
 0x63b   : > { %7585 = vrot.lane.b32.xlu0 %v20407_v21, %s15960_s14  ;;  %14036 = vmatmul.mubr.msk.f32.gmra.mrb[150].mxu0 %vm7044_vm8, %v20409_v53 }
 0x63c   : > { %14038 = vmatprep.mubr.msk.f32.mxu0 %vm7044_vm8, %v20467_v10  ;;  %v8111_v54 = vpop.permute.xlu1 %8110 }
 0x63d   : > { %v20553_v24 = vpop.permute.xlu0 %8285 }
 0x63e   : > { %8472 = vrot.lane.b32.xlu1 %v20542_v27, %s15959_s13 }
 0x63f   : > { %8128 = vrot.lane.b32.xlu0 %v20407_v21, %s15959_s13  ;;  %14039 = vmatmul.mubr.msk.f32.gmra.mrb[152].mxu0 %vm7044_vm8, %v20488_v17 }
 0x640   : > { %14041 = vmatprep.mubr.msk.f32.mxu0 %vm7044_vm8, %v20542_v27  ;;  %v20563_v48 = vpop.permute.xlu1 %7913 }
 0x641   : > { %v7570_v7 = vpop.permute.xlu0 %7569 }
 0x642   : > { %14056 = vmatmul.mubr.msk.f32.vlgmr.msra.gmra.mrb[130].mxu1 %vm7044_vm8, %v7570_v7  ;;  %7760 = vrot.lane.b32.xlu1 %v20498_v26, %s15960_s14 }
 0x643   : > { %7931 = vrot.lane.b32.xlu0 %v20566_v31, %s15960_s14  ;;  %14042 = vmatmul.mubr.msk.f32.gmra.mrb[154].mxu0 %vm7044_vm8, %v20566_v31 }
 0x644   : > { %14044 = vmatprep.mubr.msk.f32.mxu0 %vm7044_vm8, %v20574_v59  ;;  %v20578_v55 = vpop.permute.xlu1 %8456  ;;  %14847 = vmatpush3.bf16.msra.mxu1 %v20103_v46 }
 0x645   : > { %v8113_v40 = vpop.permute.xlu0 %8112  ;;  %14850 = vmatprep.subr.msk.bf16.mxu1 %vm19882_vm14, %v20199_v47 }
 0x646   : > { %8303 = vrot.lane.b32.xlu1 %v20498_v26, %s15959_s13 }
 0x647   : > { %8474 = vrot.lane.b32.xlu0 %v20566_v31, %s15959_s13  ;;  %14045 = vmatmul.mubr.msk.f32.gmra.mrb[156].mxu0 %vm7044_vm8, %v20586_v23 }
 0x648   : > { %14133 = vmatprep.mubr.msk.f32.mxu0 %vm7044_vm8, %v8111_v54  ;;  %v20593_v43 = vpop.permute.xlu1 %8653  ;;  %14853 = vmatpush3.bf16.msk.msra.mxu1 %vm19882_vm14, %v20199_v47 }
 0x649   : > { %v20598_v22 = vpop.permute.xlu0 %7915  ;;  %14855 = vmatprep.subr.bf16.mxu1 %v20222_v19 }
 0x64a   : > { %7587 = vrot.lane.b32.xlu1 %v20417_v56, %s15960_s14 }
 0x64b   : > { %7589 = vrot.lane.b32.xlu0 %v20419_v41, %s15960_s14  ;;  %14134 = vmatmul.mubr.msk.f32.vlgmr.msra.gmra.mrb[158].mxu0 %vm7044_vm8, %v8113_v40 }
 0x64c   : > { %v20606_v3 = vpop.permute.xlu1 %9196  ;;  %14877 = vmatpush3.bf16.msra.mxu0 %v20103_v46 }
 0x64d   : > { %22356 = vst [vmem:[#allocation74_spill] sm:$0xff] %v20606_v3  ;;  %v20609_v28 = vpop.permute.xlu0 %8458  ;;  %14880 = vmatprep.subr.msk.bf16.mxu0 %vm19882_vm14, %v20199_v47 }
 0x64e   : > { %8130 = vrot.lane.b32.xlu1 %v20417_v56, %s15959_s13 }
 0x64f   : > { %9202 = vrot.lane.b32.xlu0 %v20267_v57, %s15962_s16 }
 0x650   : > { %v20618_v1 = vpop.permute.xlu1 %7744  ;;  %14883 = vmatpush3.bf16.msk.msra.mxu0 %vm19882_vm14, %v20199_v47 }
 0x651   : > { %v20623_v44 = vpop.permute.xlu0 %8655  ;;  %14885 = vmatprep.subr.bf16.mxu0 %v20222_v19 }
 0x652   : > { %9200 = vrot.lane.b32.xlu1 %v20234_v16, %s15962_s16 }
 0x653   : > { %8663 = vrot.lane.b32.xlu0 %v20313_v8, %s22355_s24 }
 0x654   : > { %v20630_v30 = vpop.permute.xlu1 %8287 }
 0x655   : > { %v20632_v42 = vpop.permute.xlu0 %9198 }
 0x656   : > { %22357 = vst [vmem:[#allocation45_spill] sm:$0xff] %v20632_v42  ;;  %8661 = vrot.lane.b32.xlu1 %v20291_v36, %s22355_s24 }
 0x657   : > { %8132 = vrot.lane.b32.xlu0 %v20419_v41, %s15959_s13 }
 0x658   : > { %v7572_v57 = vpop.permute.xlu1 %7571 }
 0x659   : > { %v20638_v0 = vpop.permute.xlu0 %7746  ;;  %14058 = vmatprep.mubr.msk.f32.mxu1 %vm7044_vm8, %v7572_v57 }
 0x65a   : > { %9204 = vrot.lane.b32.xlu1 %v20291_v36, %s15962_s16 }
 0x65b   : > { %9206 = vrot.lane.b32.xlu0 %v20313_v8, %s15962_s16 }
 0x65c   : > { %v8115_v16 = vpop.permute.xlu1 %8114 }
 0x65d   : > { %v20645_v50 = vpop.permute.xlu0 %8289  ;;  %14136 = vmatprep.mubr.msk.f32.mxu0 %vm7044_vm8, %v8115_v16 }
 0x65e   : > { %8665 = vrot.lane.b32.xlu1 %v20338_v58, %s22355_s24 }
 0x65f   : > { %8667 = vrot.lane.b32.xlu0 %v20359_v5, %s22355_s24 }
 0x660   : > { %v20652_v20 = vpop.permute.xlu1 %7917 }
 0x661   : > { %v7574_v37 = vpop.permute.xlu0 %7573 }
 0x662   : > { %14059 = vmatmul.mubr.msk.f32.gmra.mrb[132].mxu1 %vm7044_vm8, %v7574_v37  ;;  %9208 = vrot.lane.b32.xlu1 %v20338_v58, %s15962_s16 }
 0x663   : > { %9210 = vrot.lane.b32.xlu0 %v20359_v5, %s15962_s16 }
 0x664   : > { %v20659_v36 = vpop.permute.xlu1 %8460 }
 0x665   : > { %v8117_v8 = vpop.permute.xlu0 %8116 }
 0x666   : > { %14137 = vmatmul.mubr.msk.f32.gmra.mrb[160].mxu0 %vm7044_vm8, %v8117_v8  ;;  %8669 = vrot.lane.b32.xlu1 %v20385_v49, %s22355_s24 }
 0x667   : > { %8671 = vrot.lane.b32.xlu0 %v20407_v21, %s22355_s24 }
 0x668   : > { %v20666_v25 = vpop.permute.xlu1 %8657 }
 0x669   : > { %22358 = vst [vmem:[#allocation75_spill] sm:$0xff] %v20666_v25  ;;  %v20668_v15 = vpop.permute.xlu0 %7919 }
 0x66a   : > { %9212 = vrot.lane.b32.xlu1 %v20385_v49, %s15962_s16 }
 0x66b   : > { %7762 = vrot.lane.b32.xlu0 %v20506_v63, %s15960_s14 }
 0x66c   : > { %v20674_v58 = vpop.permute.xlu1 %7748 }
 0x66d   : > { %v20676_v5 = vpop.permute.xlu0 %8462 }
 0x66e   : > { %8826 = vrot.lane.b32.xlu1 %v20150_v29, %s22355_s24 }
 0x66f   : > { %8305 = vrot.lane.b32.xlu0 %v20506_v63, %s15959_s13 }
 0x670   : > { %v20682_v54 = vpop.permute.xlu1 %8291 }
 0x671   : > { %v20684_v7 = vpop.permute.xlu0 %8659 }
 0x672   : > { %22359 = vst [vmem:[#allocation46_spill] sm:$0xff] %v20684_v7  ;;  %9369 = vrot.lane.b32.xlu1 %v20150_v29, %s15962_s16 }
 0x673   : > { %9214 = vrot.lane.b32.xlu0 %v20407_v21, %s15962_s16 }
 0x674   : > { %v7576_v49 = vpop.permute.xlu1 %7575 }
 0x675   : > { %v20690_v40 = vpop.permute.xlu0 %7750  ;;  %14061 = vmatprep.mubr.msk.f32.mxu1 %vm7044_vm8, %v7576_v49 }
 0x676   : > { %7933 = vrot.lane.b32.xlu1 %v20574_v59, %s15960_s14 }
 0x677   : > { %8828 = vrot.lane.b32.xlu0 %v20172_v32, %s22355_s24 }
 0x678   : > { %v8119_v57 = vpop.permute.xlu1 %8118 }
 0x679   : > { %v20697_v16 = vpop.permute.xlu0 %8293  ;;  %14139 = vmatprep.mubr.msk.f32.mxu0 %vm7044_vm8, %v8119_v57 }
 0x67a   : > { %8476 = vrot.lane.b32.xlu1 %v20574_v59, %s15959_s13 }
 0x67b   : > { %8675 = vrot.lane.b32.xlu0 %v20419_v41, %s22355_s24 }
 0x67c   : > { %v20704_v29 = vpop.permute.xlu1 %7921 }
 0x67d   : > { %v7578_v21 = vpop.permute.xlu0 %7577 }
 0x67e   : > { %14062 = vmatmul.mubr.msk.f32.gmra.mrb[134].mxu1 %vm7044_vm8, %v7578_v21  ;;  %8673 = vrot.lane.b32.xlu1 %v20417_v56, %s22355_s24 }
 0x67f   : > { %9218 = vrot.lane.b32.xlu0 %v20419_v41, %s15962_s16 }
 0x680   : > { %v20711_v37 = vpop.permute.xlu1 %8464 }
 0x681   : > { %v8121_v8 = vpop.permute.xlu0 %8120 }
 0x682   : > { %14140 = vmatmul.mubr.msk.f32.gmra.mrb[162].mxu0 %vm7044_vm8, %v8121_v8  ;;  %9216 = vrot.lane.b32.xlu1 %v20417_v56, %s15962_s16 }
 0x683   : > { %7935 = vrot.lane.b32.xlu0 %v20586_v23, %s15960_s14 }
 0x684   : > { %v20718_v49 = vpop.permute.xlu1 %7752 }
 0x685   : > { %v20720_v57 = vpop.permute.xlu0 %7923 }
 0x686   : > { %8830 = vrot.lane.b32.xlu1 %v20257_v39, %s22355_s24 }
 0x687   : > { %8478 = vrot.lane.b32.xlu0 %v20586_v23, %s15959_s13 }
 0x688   : > { %v20726_v41 = vpop.permute.xlu1 %8295 }
 0x689   : > { %v20728_v21 = vpop.permute.xlu0 %8466 }
 0x68a   : > { %9373 = vrot.lane.b32.xlu1 %v20257_v39, %s15962_s16 }
 0x68b   : > { %9371 = vrot.lane.b32.xlu0 %v20172_v32, %s15962_s16 }
 0x68c   : > { %v7580_v56 = vpop.permute.xlu1 %7579 }
 0x68d   : > { %v20734_v8 = vpop.permute.xlu0 %7754  ;;  %14064 = vmatprep.mubr.msk.f32.mxu1 %vm7044_vm8, %v7580_v56 }
 0x68e   : > { %8834 = vrot.lane.b32.xlu1 %v20336_v61, %s22355_s24 }
 0x68f   : > { %8832 = vrot.lane.b32.xlu0 %v20281_v33, %s22355_s24 }
 0x690   : > { %v8123_v42 = vpop.permute.xlu1 %8122 }
 0x691   : > { %v20741_v7 = vpop.permute.xlu0 %8297  ;;  %14142 = vmatprep.mubr.msk.f32.mxu0 %vm7044_vm8, %v8123_v42 }
 0x692   : > { %9377 = vrot.lane.b32.xlu1 %v20336_v61, %s15962_s16 }
 0x693   : > { %9375 = vrot.lane.b32.xlu0 %v20281_v33, %s15962_s16 }
 0x694   : > { %v20748_v32 = vpop.permute.xlu1 %7925 }
 0x695   : > { %v7582_v39 = vpop.permute.xlu0 %7581 }
 0x696   : > { %14065 = vmatmul.mubr.msk.f32.gmra.mrb[136].mxu1 %vm7044_vm8, %v7582_v39  ;;  %8838 = vrot.lane.b32.xlu1 %v20405_v6, %s22355_s24 }
 0x697   : > { %8836 = vrot.lane.b32.xlu0 %v20365_v2, %s22355_s24 }
 0x698   : > { %v20755_v56 = vpop.permute.xlu1 %8468 }
 0x699   : > { %v8125_v42 = vpop.permute.xlu0 %8124 }
 0x69a   : > { %14143 = vmatmul.mubr.msk.f32.gmra.mrb[164].mxu0 %vm7044_vm8, %v8125_v42  ;;  %9381 = vrot.lane.b32.xlu1 %v20405_v6, %s15962_s16 }
 0x69b   : > { %9379 = vrot.lane.b32.xlu0 %v20365_v2, %s15962_s16 }
 0x69c   : > { %v20762_v33 = vpop.permute.xlu1 %7756 }
 0x69d   : > { %v20764_v61 = vpop.permute.xlu0 %7927 }
 0x69e   : > { %8842 = vrot.lane.b32.xlu1 %v20484_v52, %s22355_s24 }
 0x69f   : > { %8840 = vrot.lane.b32.xlu0 %v20444_v60, %s22355_s24 }
 0x6a0   : > { %v20770_v39 = vpop.permute.xlu1 %8299 }
 0x6a1   : > { %v20772_v47 = vpop.permute.xlu0 %8470 }
 0x6a2   : > { %9385 = vrot.lane.b32.xlu1 %v20484_v52, %s15962_s16 }
 0x6a3   : > { %9383 = vrot.lane.b32.xlu0 %v20444_v60, %s15962_s16 }
 0x6a4   : > { %v7584_v2 = vpop.permute.xlu1 %7583 }
 0x6a5   : > { %v20778_v6 = vpop.permute.xlu0 %7758  ;;  %14067 = vmatprep.mubr.msk.f32.mxu1 %vm7044_vm8, %v7584_v2 }
 0x6a6   : > { %8846 = vrot.lane.b32.xlu1 %v20498_v26, %s22355_s24 }
 0x6a7   : > { %8844 = vrot.lane.b32.xlu0 %v20492_v4, %s22355_s24 }
 0x6a8   : > { %v8127_v42 = vpop.permute.xlu1 %8126 }
 0x6a9   : > { %v20785_v3 = vpop.permute.xlu0 %8301  ;;  %14145 = vmatprep.mubr.msk.f32.mxu0 %vm7044_vm8, %v8127_v42 }
 0x6aa   : > { %9389 = vrot.lane.b32.xlu1 %v20498_v26, %s15962_s16 }
 0x6ab   : > { %9387 = vrot.lane.b32.xlu0 %v20492_v4, %s15962_s16 }
 0x6ac   : > { %v20792_v60 = vpop.permute.xlu1 %7929 }
 0x6ad   : > { %v7586_v52 = vpop.permute.xlu0 %7585 }
 0x6ae   : > { %14068 = vmatmul.mubr.msk.f32.gmra.mrb[138].mxu1 %vm7044_vm8, %v7586_v52  ;;  %8999 = vrot.lane.b32.xlu1 %v20205_v18, %s22355_s24 }
 0x6af   : > { %8848 = vrot.lane.b32.xlu0 %v20506_v63, %s22355_s24 }
 0x6b0   : > { %v20799_v2 = vpop.permute.xlu1 %8472 }
 0x6b1   : > { %v8129_v42 = vpop.permute.xlu0 %8128 }
 0x6b2   : > { %14146 = vmatmul.mubr.msk.f32.gmra.mrb[166].mxu0 %vm7044_vm8, %v8129_v42  ;;  %9542 = vrot.lane.b32.xlu1 %v20205_v18, %s15962_s16 }
 0x6b3   : > { %9391 = vrot.lane.b32.xlu0 %v20506_v63, %s15962_s16 }
 0x6b4   : > { %v7761_v4 = vpop.permute.xlu1 %7760 }
 0x6b5   : > { %v20806_v26 = vpop.permute.xlu0 %7931 }
 0x6b6   : > { %9003 = vrot.lane.b32.xlu1 %v20303_v13, %s22355_s24 }
 0x6b7   : > { %9001 = vrot.lane.b32.xlu0 %v20237_v38, %s22355_s24 }
 0x6b8   : > { %v20812_v52 = vpop.permute.xlu1 %8303 }
 0x6b9   : > { %v20814_v25 = vpop.permute.xlu0 %8474 }
 0x6ba   : > { %9546 = vrot.lane.b32.xlu1 %v20303_v13, %s15962_s16 }
 0x6bb   : > { %9544 = vrot.lane.b32.xlu0 %v20237_v38, %s15962_s16 }
 0x6bc   : > { %v7588_v18 = vpop.permute.xlu1 %7587 }
 0x6bd   : > { %v7590_v63 = vpop.permute.xlu0 %7589  ;;  %14070 = vmatprep.mubr.msk.f32.mxu1 %vm7044_vm8, %v7588_v18 }
 0x6be   : > { %9007 = vrot.lane.b32.xlu1 %v20383_v45, %s22355_s24  ;;  %14071 = vmatmul.mubr.msk.f32.gmra.mrb[140].mxu1 %vm7044_vm8, %v7590_v63 }
 0x6bf   : > { %9005 = vrot.lane.b32.xlu0 %v20328_v62, %s22355_s24  ;;  %14081 = vmatprep.mubr.msk.f32.mxu1 %vm7044_vm8, %v20502_v51 }
 0x6c0   : > { %v8131_v42 = vpop.permute.xlu1 %8130 }
 0x6c1   : > { %v20828_v13 = vpop.permute.xlu0 %9202  ;;  %14148 = vmatprep.mubr.msk.f32.mxu0 %vm7044_vm8, %v8131_v42  ;;  %v22365_v42 = vmov 0.0|0.0  }
 0x6c2   : > { %9550 = vrot.lane.b32.xlu1 %v20383_v45, %s15962_s16  ;;  %14082 = vmatmul.mubr.msk.f32.vlgmr.msra.gmra.mrb[130].mxu1 %vm7044_vm8, %v20539_v34 }
 0x6c3   : > { %9548 = vrot.lane.b32.xlu0 %v20328_v62, %s15962_s16  ;;  %14084 = vmatprep.mubr.msk.f32.mxu1 %vm7044_vm8, %v20618_v1 }
 0x6c4   : > { %v20839_v38 = vpop.permute.xlu1 %9200  ;;  %14857 = vmatpush3.bf16.msra.mxu1 %v20222_v19 }
 0x6c5   : > { %v20842_v51 = vpop.permute.xlu0 %8663  ;;  %14860 = vmatprep.subr.msk.bf16.mxu1 %vm19882_vm14, %v20439_v12 }
 0x6c6   : > { %9011 = vrot.lane.b32.xlu1 %v20467_v10, %s22355_s24  ;;  %14085 = vmatmul.mubr.msk.f32.gmra.mrb[132].mxu1 %vm7044_vm8, %v20638_v0 }
 0x6c7   : > { %9009 = vrot.lane.b32.xlu0 %v20409_v53, %s22355_s24  ;;  %14087 = vmatprep.mubr.msk.f32.mxu1 %vm7044_vm8, %v20674_v58  ;;  %v22361_v58 = vld [vmem:[#allocation74_spill] sm:$0xff] }
 0x6c8   : > { %v20855_v62 = vpop.permute.xlu1 %8661  ;;  %14863 = vmatpush3.bf16.msk.msra.mxu1 %vm19882_vm14, %v20439_v12 }
 0x6c9   : > { %v8133_v45 = vpop.permute.xlu0 %8132  ;;  %14895 = vmatprep.subr.bf16.mxu1 %v19856_v35 }
 0x6ca   : > { %14149 = vmatmul.mubr.msk.f32.gmra.mrb[168].mxu0 %vm7044_vm8, %v8133_v45  ;;  %9554 = vrot.lane.b32.xlu1 %v20467_v10, %s15962_s16 }
 0x6cb   : > { %9552 = vrot.lane.b32.xlu0 %v20409_v53, %s15962_s16  ;;  %14088 = vmatmul.mubr.msk.f32.gmra.mrb[134].mxu1 %vm7044_vm8, %v20690_v40 }
 0x6cc   : > { %14159 = vmatprep.mubr.msk.f32.mxu0 %vm7044_vm8, %v20520_v11  ;;  %14090 = vmatprep.mubr.msk.f32.mxu1 %vm7044_vm8, %v20718_v49  ;;  %v20872_v34 = vpop.permute.xlu1 %9204 }
 0x6cd   : > { %v20874_v1 = vpop.permute.xlu0 %9206 }
 0x6ce   : > { %14160 = vmatmul.mubr.msk.f32.vlgmr.msra.gmra.mrb[158].mxu0 %vm7044_vm8, %v20553_v24  ;;  %9015 = vrot.lane.b32.xlu1 %v20542_v27, %s22355_s24 }
 0x6cf   : > { %9013 = vrot.lane.b32.xlu0 %v20488_v17, %s22355_s24  ;;  %14091 = vmatmul.mubr.msk.f32.gmra.mrb[136].mxu1 %vm7044_vm8, %v20734_v8 }
 0x6d0   : > { %14162 = vmatprep.mubr.msk.f32.mxu0 %vm7044_vm8, %v20630_v30  ;;  %14887 = vmatpush3.bf16.msra.mxu0 %v20222_v19  ;;  %v20887_v53 = vpop.permute.xlu1 %8665 }
 0x6d1   : > { %14093 = vmatprep.mubr.msk.f32.mxu1 %vm7044_vm8, %v20762_v33  ;;  %v20891_v10 = vpop.permute.xlu0 %8667  ;;  %14890 = vmatprep.subr.msk.bf16.mxu0 %vm19882_vm14, %v20439_v12 }
 0x6d2   : > { %14163 = vmatmul.mubr.msk.f32.gmra.mrb[160].mxu0 %vm7044_vm8, %v20645_v50  ;;  %9558 = vrot.lane.b32.xlu1 %v20542_v27, %s15962_s16 }
 0x6d3   : > { %9556 = vrot.lane.b32.xlu0 %v20488_v17, %s15962_s16  ;;  %14094 = vmatmul.mubr.msk.f32.gmra.mrb[138].mxu1 %vm7044_vm8, %v20778_v6 }
 0x6d4   : > { %14165 = vmatprep.mubr.msk.f32.mxu0 %vm7044_vm8, %v20682_v54  ;;  %14096 = vmatprep.mubr.msk.f32.mxu1 %vm7044_vm8, %v7761_v4  ;;  %v20907_v11 = vpop.permute.xlu1 %9208  ;;  %v22362_v54 = vld [vmem:[#allocation44_spill] sm:$0xff] }
 0x6d5   : > { %v20909_v24 = vpop.permute.xlu0 %9210  ;;  %14893 = vmatpush3.bf16.msk.msra.mxu0 %vm19882_vm14, %v20439_v12 }
 0x6d6   : > { %14166 = vmatmul.mubr.msk.f32.gmra.mrb[162].mxu0 %vm7044_vm8, %v20697_v16  ;;  %9019 = vrot.lane.b32.xlu1 %v20574_v59, %s22355_s24 }
 0x6d7   : > { %9017 = vrot.lane.b32.xlu0 %v20566_v31, %s22355_s24  ;;  %14168 = vmatprep.mubr.msk.f32.mxu0 %vm7044_vm8, %v20726_v41 }
 0x6d8   : > { %v20922_v17 = vpop.permute.xlu1 %8669  ;;  %14925 = vmatprep.subr.bf16.mxu0 %v19856_v35 }
 0x6d9   : > { %v20925_v27 = vpop.permute.xlu0 %8671 }
 0x6da   : > { %14169 = vmatmul.mubr.msk.f32.gmra.mrb[164].mxu0 %vm7044_vm8, %v20741_v7  ;;  %9562 = vrot.lane.b32.xlu1 %v20574_v59, %s15962_s16  ;;  %v22364_v7 = vld [vmem:[#allocation45_spill] sm:$0xff] }
 0x6db   : > { %9560 = vrot.lane.b32.xlu0 %v20566_v31, %s15962_s16  ;;  %14171 = vmatprep.mubr.msk.f32.mxu0 %vm7044_vm8, %v20770_v39 }
 0x6dc   : > { %v20935_v30 = vpop.permute.xlu1 %9212 }
 0x6dd   : > { %v7763_v0 = vpop.permute.xlu0 %7762 }
 0x6de   : > { %14097 = vmatmul.mubr.msk.f32.gmra.mrb[140].mxu1 %vm7044_vm8, %v7763_v0  ;;  %14172 = vmatmul.mubr.msk.f32.gmra.mrb[166].mxu0 %vm7044_vm8, %v20785_v3 }
 0x6df   : > { %9021 = vrot.lane.b32.xlu0 %v20586_v23, %s22355_s24  ;;  %14107 = vmatprep.mubr.msk.f32.mxu1 %vm7044_vm8, %v20563_v48 }
 0x6e0   : > { %14174 = vmatprep.mubr.msk.f32.mxu0 %vm7044_vm8, %v20812_v52  ;;  %v20946_v31 = vpop.permute.xlu1 %8826 }
 0x6e1   : > { %v8306_v59 = vpop.permute.xlu0 %8305 }
 0x6e2   : > { %14108 = vmatmul.mubr.msk.f32.vlgmr.msra.gmra.mrb[130].mxu1 %vm7044_vm8, %v20598_v22  ;;  %14175 = vmatmul.mubr.msk.f32.gmra.mrb[168].mxu0 %vm7044_vm8, %v8306_v59 }
 0x6e3   : > { %9564 = vrot.lane.b32.xlu0 %v20586_v23, %s15962_s16  ;;  %14110 = vmatprep.mubr.msk.f32.mxu1 %vm7044_vm8, %v20652_v20  ;;  %s377_s16 = sand.u32 1, %s15940_s18  }
 0x6e4   : > { %14185 = vmatprep.mubr.msk.f32.mxu0 %vm7044_vm8, %v20578_v55  ;;  %14897 = vmatpush3.bf16.msra.mxu1 %v19856_v35  ;;  %v20958_v48 = vpop.permute.xlu1 %9369  ;;  %s378_s24 = scalar_lea.vmem [#allocation6], %s377_s16  ;;  %s11675_s13 = scalar_lea.sflag [#allocation7], %s377_s16 }
 0x6e5   : > { %v20960_v3 = vpop.permute.xlu0 %9214  ;;  %14900 = vmatprep.subr.msk.bf16.mxu1 %vm19882_vm14, %v19877_v14  ;;  %s11687_s25 = sshll.u32 %s378_s24, 4  ;;  %s21779_s25 = int_to_ptr.vmem [resolvable:$true] %s11687_s25 }
 0x6e6   : > { %14111 = vmatmul.mubr.msk.f32.gmra.mrb[132].mxu1 %vm7044_vm8, %v20668_v15  ;;  %14186 = vmatmul.mubr.msk.f32.vlgmr.msra.gmra.mrb[158].mxu0 %vm7044_vm8, %v20609_v28  ;;  %s15886_s14 = scalar_lea.vmem %s21779_s25, 16  ;;  %p15893_p0 = scmp.lt.s32.totalorder %s21779_s25, %s15891_s29 }
 0x6e7   : > { %14113 = vmatprep.mubr.msk.f32.mxu1 %vm7044_vm8, %v20704_v29  ;;  %14188 = vmatprep.mubr.msk.f32.mxu0 %vm7044_vm8, %v20659_v36  ;;  %p15887_p11 = scmp.ne.s32.totalorder %s21779_s25, %s15886_s14  ;;  %p15894_p1 = scmp.lt.s32.totalorder %s15892_s15, %s15886_s14 }
 0x6e8   : > { %14927 = vmatpush3.bf16.msra.mxu0 %v19856_v35  ;;  %v7934_v55 = vpop.permute.xlu1 %7933  ;;  %14903 = vmatpush3.bf16.msk.msra.mxu1 %vm19882_vm14, %v19877_v14 }
 0x6e9   : > { %v20977_v23 = vpop.permute.xlu0 %8828  ;;  %14930 = vmatprep.subr.msk.bf16.mxu0 %vm19882_vm14, %v19877_v14  ;;  %14905 = vmatprep.subr.bf16.mxu1 %v20103_v46  ;;  %p15888_p12 = pnand %p15887_p11, %p16068_p5  ;;  %p15895_p2 = por %p15894_p1, %p15893_p0 }
 0x6ea   : > { %14114 = vmatmul.mubr.msk.f32.gmra.mrb[134].mxu1 %vm7044_vm8, %v20720_v57  ;;  %14189 = vmatmul.mubr.msk.f32.gmra.mrb[160].mxu0 %vm7044_vm8, %v20676_v5 }
 0x6eb   : > { %14116 = vmatprep.mubr.msk.f32.mxu1 %vm7044_vm8, %v20748_v32  ;;  %14191 = vmatprep.mubr.msk.f32.mxu0 %vm7044_vm8, %v20711_v37  ;;  %p15889_p13 = pneg %p15888_p12 }
 0x6ec   : > { %v8477_v35 = vpop.permute.xlu1 %8476  ;;  %14933 = vmatpush3.bf16.msk.msra.mxu0 %vm19882_vm14, %v19877_v14 }
 0x6ed   : > { %v8676_v22 = vpop.permute.xlu0 %8675  ;;  %14935 = vmatprep.subr.bf16.mxu0 %v20103_v46  ;;  %p15896_p3 = pnand %p15895_p2, %p15889_p13 }
 0x6ee   : > { %14117 = vmatmul.mubr.msk.f32.gmra.mrb[136].mxu1 %vm7044_vm8, %v20764_v61  ;;  %14192 = vmatmul.mubr.msk.f32.gmra.mrb[162].mxu0 %vm7044_vm8, %v20728_v21 }
 0x6ef   : > { %14119 = vmatprep.mubr.msk.f32.mxu1 %vm7044_vm8, %v20792_v60  ;;  %14194 = vmatprep.mubr.msk.f32.mxu0 %vm7044_vm8, %v20755_v56 }
 0x6f0   : > { %v8674_v28 = vpop.permute.xlu1 %8673 }
 0x6f1   : > { %v21003_v50 = vpop.permute.xlu0 %9218 }
 0x6f2   : > { %14120 = vmatmul.mubr.msk.f32.gmra.mrb[138].mxu1 %vm7044_vm8, %v20806_v26  ;;  %14195 = vmatmul.mubr.msk.f32.gmra.mrb[164].mxu0 %vm7044_vm8, %v20772_v47  ;;  %v22360_v47 = vld [vmem:[#allocation75_spill] sm:$0xff] }
 0x6f3   : > { %14122 = vmatprep.mubr.msk.f32.mxu1 %vm7044_vm8, %v7934_v55  ;;  %14197 = vmatprep.mubr.msk.f32.mxu0 %vm7044_vm8, %v20799_v2 }
 0x6f4   : > { %v9217_v14 = vpop.permute.xlu1 %9216 }
 0x6f5   : > { %v7936_v20 = vpop.permute.xlu0 %7935 }
 0x6f6   : > { %14123 = vmatmul.mubr.msk.f32.gmra.mrb[140].mxu1 %vm7044_vm8, %v7936_v20  ;;  %14198 = vmatmul.mubr.msk.f32.gmra.mrb[166].mxu0 %vm7044_vm8, %v20814_v25 }
 0x6f7   : > { %14200 = vmatprep.mubr.msk.f32.mxu0 %vm7044_vm8, %v8477_v35  ;;  %14211 = vmatprep.mubr.msk.f32.mxu1 %vm7044_vm8, %v20593_v43  ;;  %v22363_v43 = vld [vmem:[#allocation46_spill] sm:$0xff] }
 0x6f8   : > { %v8831_v36 = vpop.permute.xlu1 %8830 }
 0x6f9   : > { %v8479_v15 = vpop.permute.xlu0 %8478 }
 0x6fa   : > { %14201 = vmatmul.mubr.msk.f32.gmra.mrb[168].mxu0 %vm7044_vm8, %v8479_v15  ;;  %14212 = vmatmul.mubr.msk.f32.vlgmr.msra.gmra.mrb[142].mxu1 %vm7044_vm8, %v20623_v44 }
 0x6fb   : > { %14214 = vmatprep.mubr.msk.f32.mxu1 %vm7044_vm8, %v22360_v47  ;;  %14289 = vmatprep.mubr.msk.f32.mxu0 %vm7044_vm8, %v22361_v58  ;;  %v9765_v47 = vld [vmem:[%s21824_s5] sm:$0xff]  ;;  %v9766_v58 = vld [vmem:[%s21824_s5 + $0x8] sm:$0xff] }
 0x6fc   : > { %14907 = vmatpush3.bf16.msra.mxu1 %v20103_v46  ;;  %v9374_v25 = vpop.permute.xlu1 %9373 }
 0x6fd   : > { %v9372_v5 = vpop.permute.xlu0 %9371  ;;  %14910 = vmatprep.subr.msk.bf16.mxu1 %vm19882_vm14, %v22362_v54 }
 0x6fe   : > { %14215 = vmatmul.mubr.msk.f32.gmra.mrb[144].mxu1 %vm7044_vm8, %v22363_v43  ;;  %14290 = vmatmul.mubr.msk.f32.vlgmr.msra.gmra.mrb[170].mxu0 %vm7044_vm8, %v22364_v7 }
 0x6ff   : > { %14217 = vmatprep.mubr.msk.f32.mxu1 %vm7044_vm8, %v20855_v62  ;;  %14292 = vmatprep.mubr.msk.f32.mxu0 %vm7044_vm8, %v20839_v38 }
 0x700   : > { %14937 = vmatpush3.bf16.msra.mxu0 %v20103_v46  ;;  %v8835_v44 = vpop.permute.xlu1 %8834  ;;  %14913 = vmatpush3.bf16.msk.msra.mxu1 %vm19882_vm14, %v22362_v54 }
 0x701   : > { %v8833_v40 = vpop.permute.xlu0 %8832  ;;  %14940 = vmatprep.subr.msk.bf16.mxu0 %vm19882_vm14, %v22362_v54  ;;  %14915 = vmatprep.subr.bf16.mxu1 %v20222_v19 }
 0x702   : > { %14218 = vmatmul.mubr.msk.f32.gmra.mrb[146].mxu1 %vm7044_vm8, %v20842_v51  ;;  %14293 = vmatmul.mubr.msk.f32.gmra.mrb[172].mxu0 %vm7044_vm8, %v20828_v13 }
 0x703   : > { %14220 = vmatprep.mubr.msk.f32.mxu1 %vm7044_vm8, %v20887_v53  ;;  %14295 = vmatprep.mubr.msk.f32.mxu0 %vm7044_vm8, %v20872_v34 }
 0x704   : > { %v9378_v46 = vpop.permute.xlu1 %9377  ;;  %14943 = vmatpush3.bf16.msk.msra.mxu0 %vm19882_vm14, %v22362_v54  ;;  %v9768_v54 = vld [vmem:[%s21824_s5 + $0x18] sm:$0x3f] }
 0x705   : > { %v9376_v16 = vpop.permute.xlu0 %9375  ;;  %14945 = vmatprep.subr.bf16.mxu0 %v20222_v19 }
 0x706   : > { %14221 = vmatmul.mubr.msk.f32.gmra.mrb[148].mxu1 %vm7044_vm8, %v20891_v10  ;;  %14296 = vmatmul.mubr.msk.f32.gmra.mrb[174].mxu0 %vm7044_vm8, %v20874_v1  ;;  %v21061_v29 = vpop.f32.mrb[146].mxu0 }
 0x707   : > { %14223 = vmatprep.mubr.msk.f32.mxu1 %vm7044_vm8, %v20922_v17  ;;  %14298 = vmatprep.mubr.msk.f32.mxu0 %vm7044_vm8, %v20907_v11  ;;  %v21067_v37 = vpop.f32.mrb[147].mxu0 }
 0x708   : > { %v8839_v49 = vpop.permute.xlu1 %8838 }
 0x709   : > { %v8837_v57 = vpop.permute.xlu0 %8836 }
 0x70a   : > { %14224 = vmatmul.mubr.msk.f32.gmra.mrb[150].mxu1 %vm7044_vm8, %v20925_v27  ;;  %14299 = vmatmul.mubr.msk.f32.gmra.mrb[176].mxu0 %vm7044_vm8, %v20909_v24  ;;  %v21073_v41 = vpop.f32.mrb[148].mxu0 }
 0x70b   : > { %14226 = vmatprep.mubr.msk.f32.mxu1 %vm7044_vm8, %v8674_v28  ;;  %14301 = vmatprep.mubr.msk.f32.mxu0 %vm7044_vm8, %v20935_v30  ;;  %v21078_v21 = vpop.f32.mrb[149].mxu0 }
 0x70c   : > { %v9382_v8 = vpop.permute.xlu1 %9381 }
 0x70d   : > { %v9380_v32 = vpop.permute.xlu0 %9379 }
 0x70e   : > { %14227 = vmatmul.mubr.msk.f32.gmra.mrb[152].mxu1 %vm7044_vm8, %v8676_v22  ;;  %14302 = vmatmul.mubr.msk.f32.gmra.mrb[178].mxu0 %vm7044_vm8, %v20960_v3  ;;  %v21083_v56 = vpop.f32.mrb[150].mxu0 }
 0x70f   : > { %14237 = vmatprep.mubr.msk.f32.mxu1 %vm7044_vm8, %v20946_v31  ;;  %14304 = vmatprep.mubr.msk.f32.mxu0 %vm7044_vm8, %v9217_v14  ;;  %v21088_v33 = vpop.f32.mrb[151].mxu0 }
 0x710   : > { %v8843_v61 = vpop.permute.xlu1 %8842 }
 0x711   : > { %v8841_v39 = vpop.permute.xlu0 %8840 }
 0x712   : > { %14238 = vmatmul.mubr.msk.f32.vlgmr.msra.gmra.mrb[142].mxu1 %vm7044_vm8, %v20977_v23  ;;  %14305 = vmatmul.mubr.msk.f32.gmra.mrb[180].mxu0 %vm7044_vm8, %v21003_v50  ;;  %v21094_v6 = vpop.f32.mrb[152].mxu0 }
 0x713   : > { %14240 = vmatprep.mubr.msk.f32.mxu1 %vm7044_vm8, %v8831_v36  ;;  %14315 = vmatprep.mubr.msk.f32.mxu0 %vm7044_vm8, %v20958_v48  ;;  %v21099_v60 = vpop.f32.mrb[153].mxu0  ;;  %v22366_v36 = vmov 0.0  }
 0x714   : > { %14917 = vmatpush3.bf16.msra.mxu1 %v20222_v19  ;;  %v9386_v2 = vpop.permute.xlu1 %9385 }
 0x715   : > { %v9384_v4 = vpop.permute.xlu0 %9383  ;;  %14920 = vmatprep.subr.msk.bf16.mxu1 %vm19882_vm14, %v20439_v12 }
 0x716   : > { %14241 = vmatmul.mubr.msk.f32.gmra.mrb[144].mxu1 %vm7044_vm8, %v8833_v40  ;;  %14316 = vmatmul.mubr.msk.f32.vlgmr.msra.gmra.mrb[170].mxu0 %vm7044_vm8, %v9372_v5  ;;  %v21107_v26 = vpop.f32.mrb[154].mxu0  ;;  %v9767_v5 = vld [vmem:[%s21824_s5 + $0x10] sm:$0xff] }
 0x717   : > { %14243 = vmatprep.mubr.msk.f32.mxu1 %vm7044_vm8, %v8835_v44  ;;  %14318 = vmatprep.mubr.msk.f32.mxu0 %vm7044_vm8, %v9374_v25  ;;  %v21111_v52 = vpop.f32.mrb[155].mxu0  ;;  %v14955_v25 = vpack.c.bf16 %v9766_v58, %v9765_v47  ;;  %v14958_v43 = vpack.c.bf16 %v9768_v54, %v9767_v5 }
 0x718   : > { %14947 = vmatpush3.bf16.msra.mxu0 %v20222_v19  ;;  %v8847_v18 = vpop.permute.xlu1 %8846  ;;  %14923 = vmatpush3.bf16.msk.msra.mxu1 %vm19882_vm14, %v20439_v12 }
 0x719   : > { %v8845_v63 = vpop.permute.xlu0 %8844  ;;  %14950 = vmatprep.subr.msk.bf16.mxu0 %vm19882_vm14, %v20439_v12  ;;  %14954 = vmatprep.subr.bf16.mxu1 %v22365_v42 }
 0x71a   : > { %14244 = vmatmul.mubr.msk.f32.gmra.mrb[146].mxu1 %vm7044_vm8, %v8837_v57  ;;  %14319 = vmatmul.mubr.msk.f32.gmra.mrb[172].mxu0 %vm7044_vm8, %v9376_v16  ;;  %v21123_v13 = vpop.f32.mrb[156].mxu0 }
 0x71b   : > { %14246 = vmatprep.mubr.msk.f32.mxu1 %vm7044_vm8, %v8839_v49  ;;  %14321 = vmatprep.mubr.msk.f32.mxu0 %vm7044_vm8, %v9378_v46  ;;  %v21127_v19 = vpop.f32.mrb[157].mxu0 }
 0x71c   : > { %v9390_v38 = vpop.permute.xlu1 %9389  ;;  %14953 = vmatpush3.bf16.msk.msra.mxu0 %vm19882_vm14, %v20439_v12 }
 0x71d   : > { %v9388_v51 = vpop.permute.xlu0 %9387  ;;  %15087 = vmatprep.subr.bf16.mxu0 %v22365_v42 }
 0x71e   : > { %14247 = vmatmul.mubr.msk.f32.gmra.mrb[148].mxu1 %vm7044_vm8, %v8841_v39  ;;  %14322 = vmatmul.mubr.msk.f32.gmra.mrb[174].mxu0 %vm7044_vm8, %v9380_v32 }
 0x71f   : > { %14249 = vmatprep.mubr.msk.f32.mxu1 %vm7044_vm8, %v8843_v61  ;;  %14324 = vmatprep.mubr.msk.f32.mxu0 %vm7044_vm8, %v9382_v8 }
 0x720   : > { %v9000_v62 = vpop.permute.xlu1 %8999 }
 0x721   : > { %v8849_v45 = vpop.permute.xlu0 %8848 }
 0x722   : > { %14250 = vmatmul.mubr.msk.f32.gmra.mrb[150].mxu1 %vm7044_vm8, %v8845_v63  ;;  %14325 = vmatmul.mubr.msk.f32.gmra.mrb[176].mxu0 %vm7044_vm8, %v9384_v4 }
 0x723   : > { %14252 = vmatprep.mubr.msk.f32.mxu1 %vm7044_vm8, %v8847_v18  ;;  %14327 = vmatprep.mubr.msk.f32.mxu0 %vm7044_vm8, %v9386_v2 }
 0x724   : > { %v9543_v12 = vpop.permute.xlu1 %9542 }
 0x725   : > { %v9392_v34 = vpop.permute.xlu0 %9391 }
 0x726   : > { %14253 = vmatmul.mubr.msk.f32.gmra.mrb[152].mxu1 %vm7044_vm8, %v8849_v45  ;;  %14328 = vmatmul.mubr.msk.f32.gmra.mrb[178].mxu0 %vm7044_vm8, %v9388_v51 }
 0x727   : > { %14263 = vmatprep.mubr.msk.f32.mxu1 %vm7044_vm8, %v9000_v62  ;;  %14330 = vmatprep.mubr.msk.f32.mxu0 %vm7044_vm8, %v9390_v38 }
 0x728   : > { %v9004_v1 = vpop.permute.xlu1 %9003 }
 0x729   : > { %v9002_v53 = vpop.permute.xlu0 %9001 }
 0x72a   : > { %14264 = vmatmul.mubr.msk.f32.vlgmr.msra.gmra.mrb[142].mxu1 %vm7044_vm8, %v9002_v53  ;;  %14331 = vmatmul.mubr.msk.f32.gmra.mrb[180].mxu0 %vm7044_vm8, %v9392_v34 }
 0x72b   : > { %14266 = vmatprep.mubr.msk.f32.mxu1 %vm7044_vm8, %v9004_v1  ;;  %14341 = vmatprep.mubr.msk.f32.mxu0 %vm7044_vm8, %v9543_v12 }
 0x72c   : > { %v9547_v10 = vpop.permute.xlu1 %9546  ;;  %14956 = vmatpush3.bf16.msra.mxu1 %v14955_v25 }
 0x72d   : > { %v9545_v11 = vpop.permute.xlu0 %9544  ;;  %14957 = vmatprep.subr.bf16.mxu1 %v22365_v42 }
 0x72e   : > { %14342 = vmatmul.mubr.msk.f32.vlgmr.msra.gmra.mrb[170].mxu0 %vm7044_vm8, %v9545_v11 }
 0x72f   : > { %14344 = vmatprep.mubr.msk.f32.mxu0 %vm7044_vm8, %v9547_v10 }
 0x730   : > { %v9008_v24 = vpop.permute.xlu1 %9007  ;;  %14960 = vmatpush3.bf16.msk.msra.mxu1 %vm19882_vm14, %v14958_v43 }
 0x731   : > { %v9006_v17 = vpop.permute.xlu0 %9005  ;;  %14961 = vmatprep.subr.bf16.mxu1 %v22365_v42 }
 0x732   : > { %14267 = vmatmul.mubr.msk.f32.gmra.mrb[144].mxu1 %vm7044_vm8, %v9006_v17 }
 0x733   : > { %14269 = vmatprep.mubr.msk.f32.mxu1 %vm7044_vm8, %v9008_v24 }
 0x734   : > { %v9551_v27 = vpop.permute.xlu1 %9550 }
 0x735   : > { %v9549_v30 = vpop.permute.xlu0 %9548 }
 0x736   : > { %14345 = vmatmul.mubr.msk.f32.gmra.mrb[172].mxu0 %vm7044_vm8, %v9549_v30 }
 0x737   : > { %14347 = vmatprep.mubr.msk.f32.mxu0 %vm7044_vm8, %v9551_v27 }
 0x738   : > { %v9012_v0 = vpop.permute.xlu1 %9011 }
 0x739   : > { %v9010_v31 = vpop.permute.xlu0 %9009 }
 0x73a   : > { %14270 = vmatmul.mubr.msk.f32.gmra.mrb[146].mxu1 %vm7044_vm8, %v9010_v31 }
 0x73b   : > { %14272 = vmatprep.mubr.msk.f32.mxu1 %vm7044_vm8, %v9012_v0 }
 0x73c   : > { %v9555_v59 = vpop.permute.xlu1 %9554 }
 0x73d   : > { %v9553_v48 = vpop.permute.xlu0 %9552 }
 0x73e   : > { %14348 = vmatmul.mubr.msk.f32.gmra.mrb[174].mxu0 %vm7044_vm8, %v9553_v48 }
 0x73f   : > { %14350 = vmatprep.mubr.msk.f32.mxu0 %vm7044_vm8, %v9555_v59 }
 0x740   : > { %v9016_v3 = vpop.permute.xlu1 %9015 }
 0x741   : > { %v9014_v55 = vpop.permute.xlu0 %9013 }
 0x742   : > { %14273 = vmatmul.mubr.msk.f32.gmra.mrb[148].mxu1 %vm7044_vm8, %v9014_v55 }
 0x743   : > { %14275 = vmatprep.mubr.msk.f32.mxu1 %vm7044_vm8, %v9016_v3 }
 0x744   : > { %v9559_v23 = vpop.permute.xlu1 %9558 }
 0x745   : > { %v9557_v35 = vpop.permute.xlu0 %9556 }
 0x746   : > { %14351 = vmatmul.mubr.msk.f32.gmra.mrb[176].mxu0 %vm7044_vm8, %v9557_v35 }
 0x747   : > { %14353 = vmatprep.mubr.msk.f32.mxu0 %vm7044_vm8, %v9559_v23 }
 0x748   : > { %v9020_v22 = vpop.permute.xlu1 %9019 }
 0x749   : > { %v9018_v28 = vpop.permute.xlu0 %9017 }
 0x74a   : > { %14276 = vmatmul.mubr.msk.f32.gmra.mrb[150].mxu1 %vm7044_vm8, %v9018_v28 }
 0x74b   : > { %14278 = vmatprep.mubr.msk.f32.mxu1 %vm7044_vm8, %v9020_v22 }
 0x74c   : > { %v9563_v50 = vpop.permute.xlu1 %9562 }
 0x74d   : > { %v9561_v14 = vpop.permute.xlu0 %9560 }
 0x74e   : > { %14354 = vmatmul.mubr.msk.f32.gmra.mrb[178].mxu0 %vm7044_vm8, %v9561_v14 }
 0x74f   : > { %14356 = vmatprep.mubr.msk.f32.mxu0 %vm7044_vm8, %v9563_v50 }
 0x751   : > { %v9022_v20 = vpop.permute.xlu0 %9021 }
 0x752   : > { %14279 = vmatmul.mubr.msk.f32.gmra.mrb[152].mxu1 %vm7044_vm8, %v9022_v20 }
 0x753   : > { %14367 = vmatprep.mubr.msk.f32.mxu1 %vm15952_vm0, %v22366_v36 }
 0x755   : > { %v9565_v15 = vpop.permute.xlu0 %9564 }
 0x756   : > { %14357 = vmatmul.mubr.msk.f32.gmra.mrb[180].mxu0 %vm7044_vm8, %v9565_v15 }
 0x757   : > { %14582 = vmatprep.mubr.msk.f32.mxu0 %vm15952_vm0, %v22366_v36 }
 0x7b5   : > { %v14109_v7 = vpop.f32.mrb[130].mxu1 }
 0x7b6   : > { %v8099_v44 = vmax.f32 %v21061_v29, %v14109_v7  ;;  %v8027_v40 = vpop.f32.mrb[131].mxu1 }
 0x7b7   : > { %v8098_v46 = vmax.f32 %v21067_v37, %v8027_v40 }
 0x7b9   : > { %v14112_v16 = vpop.f32.mrb[132].mxu1  ;;  %v14187_v49 = vpop.f32.mrb[158].mxu0 }
 0x7ba   : > { %v8101_v57 = vmax.f32 %v21073_v41, %v14112_v16  ;;  %v8642_v8 = vmax.f32 %v8099_v44, %v14187_v49  ;;  %v8037_v32 = vpop.f32.mrb[133].mxu1  ;;  %v8570_v61 = vpop.f32.mrb[159].mxu0 }
 0x7bb   : > { %v8100_v39 = vmax.f32 %v21078_v21, %v8037_v32  ;;  %v8641_v2 = vmax.f32 %v8098_v46, %v8570_v61 }
 0x7bd   : > { %v14115_v4 = vpop.f32.mrb[134].mxu1  ;;  %v14190_v18 = vpop.f32.mrb[160].mxu0 }
 0x7be   : > { %v8103_v63 = vmax.f32 %v21083_v56, %v14115_v4  ;;  %v8644_v38 = vmax.f32 %v8101_v57, %v14190_v18  ;;  %v8047_v51 = vpop.f32.mrb[135].mxu1  ;;  %v8580_v29 = vpop.f32.mrb[161].mxu0 }
 0x7bf   : > { %v8102_v62 = vmax.f32 %v21088_v33, %v8047_v51  ;;  %v8643_v37 = vmax.f32 %v8100_v39, %v8580_v29 }
 0x7c1   : > { %v14118_v45 = vpop.f32.mrb[136].mxu1  ;;  %v14193_v12 = vpop.f32.mrb[162].mxu0 }
 0x7c2   : > { %v8105_v41 = vmax.f32 %v21094_v6, %v14118_v45  ;;  %v21196_v34 = vmax.f32 %v8103_v63, %v14193_v12  ;;  %v8057_v1 = vpop.f32.mrb[137].mxu1  ;;  %v8590_v53 = vpop.f32.mrb[163].mxu0 }
 0x7c3   : > { %v8104_v21 = vmax.f32 %v21099_v60, %v8057_v1  ;;  %v21199_v10 = vmax.f32 %v8102_v62, %v8590_v53 }
 0x7c5   : > { %v14121_v11 = vpop.f32.mrb[138].mxu1  ;;  %v14196_v56 = vpop.f32.mrb[164].mxu0 }
 0x7c6   : > { %v8107_v24 = vmax.f32 %v21107_v26, %v14121_v11  ;;  %v21202_v17 = vmax.f32 %v8105_v41, %v14196_v56  ;;  %v8067_v33 = vpop.f32.mrb[139].mxu1  ;;  %v8600_v27 = vpop.f32.mrb[165].mxu0 }
 0x7c7   : > { %v8106_v30 = vmax.f32 %v21111_v52, %v8067_v33  ;;  %v21205_v0 = vmax.f32 %v8104_v21, %v8600_v27 }
 0x7c9   : > { %v14124_v6 = vpop.f32.mrb[140].mxu1  ;;  %v14199_v31 = vpop.f32.mrb[166].mxu0 }
 0x7ca   : > { %v8109_v59 = vmax.f32 %v21123_v13, %v14124_v6  ;;  %v21208_v48 = vmax.f32 %v8107_v24, %v14199_v31  ;;  %v8077_v60 = vpop.f32.mrb[141].mxu1  ;;  %v8610_v3 = vpop.f32.mrb[167].mxu0 }
 0x7cb   : > { %v8108_v55 = vmax.f32 %v21127_v19, %v8077_v60  ;;  %v21211_v23 = vmax.f32 %v8106_v30, %v8610_v3 }
 0x7cd   : > { %v14202_v26 = vpop.f32.mrb[168].mxu0 }
 0x7ce   : > { %v21213_v35 = vmax.f32 %v8109_v59, %v14202_v26  ;;  %v8620_v22 = vpop.f32.mrb[169].mxu0 }
 0x7cf   : > { %v21215_v28 = vmax.f32 %v8108_v55, %v8620_v22  ;;  %v21236_v22 = vld [vmem:[%s21823_s4] sm:$0x1] }
 0x7fd   : > { %v14265_v52 = vpop.f32.mrb[142].mxu1 }
 0x7fe   : > { %v9185_v50 = vmax.f32 %v8642_v8, %v14265_v52  ;;  %v9113_v14 = vpop.f32.mrb[143].mxu1 }
 0x7ff   : > { %v9184_v20 = vmax.f32 %v8641_v2, %v9113_v14  ;;  %v12502_v14 = vld [vmem:[%s21824_s5 + $0x20] sm:$0xff] }
 0x801   : > { %v14343_v15 = vpop.f32.mrb[170].mxu0 }
 0x802   : > { %v9728_v13 = vmax.f32 %v9185_v50, %v14343_v15  ;;  %v9656_v47 = vpop.f32.mrb[171].mxu0 }
 0x803   : > { %v9727_v58 = vmax.f32 %v9184_v20, %v9656_v47 }
 0x804   : > { %9740 = vst.msk [vmem:[#allocation5 + $0x8] sm:$0xff] %vm7044_vm8, %v9728_v13 }
 0x805   : > { %9739 = vst.msk [vmem:[#allocation5] sm:$0xff] %vm7044_vm8, %v9727_v58  ;;  %v14268_v19 = vpop.f32.mrb[144].mxu1 }
 0x806   : > { %v9187_v25 = vmax.f32 %v8644_v38, %v14268_v19  ;;  %v9123_v5 = vpop.f32.mrb[145].mxu1 }
 0x807   : > { %v9186_v54 = vmax.f32 %v8643_v37, %v9123_v5 }
 0x809   : > { %v14346_v43 = vpop.f32.mrb[172].mxu0 }
 0x80a   : > { %v9730_v7 = vmax.f32 %v9187_v25, %v14346_v43  ;;  %v9666_v44 = vpop.f32.mrb[173].mxu0  ;;  %v12504_v43 = vld [vmem:[%s21824_s5 + $0x30] sm:$0xff] }
 0x80b   : > { %v9729_v40 = vmax.f32 %v9186_v54, %v9666_v44  ;;  %v9938_v46 = vld [vmem:[#allocation5 + $0xa] sm:$0x1f] }
 0x80c   : > { %9742 = vst.msk [vmem:[#allocation5 + $0x18] sm:$0xff] %vm7044_vm8, %v9730_v7  ;;  %v9753_v16 = vld [vmem:[#allocation5] sm:$0x1f]  ;;  %v9846_v49 = vld [vmem:[#allocation5 + $0x5] sm:$0x1f]  ;;  %v9939_v57 = vsel %vm9754_vm1, %v9938_v46, -inf }
 0x80d   : > { %9741 = vst.msk [vmem:[#allocation5 + $0x10] sm:$0xff] %vm7044_vm8, %v9729_v40  ;;  %v14271_v8 = vpop.f32.mrb[146].mxu1  ;;  %v9755_v32 = vsel %vm9754_vm1, %v9753_v16, -inf  ;;  %v9847_v61 = vsel %vm9754_vm1, %v9846_v49, -inf  ;;  %v9940_v39 = vrot.slane %v9939_v57, 4  ;;  %v21255_v16 = vld [vmem:[%s21824_s5 + $0x40] sm:$0xff] }
 0x80e   : > { %v9189_v2 = vmax.f32 %v21196_v34, %v14271_v8  ;;  %v9133_v4 = vpop.f32.mrb[147].mxu1  ;;  %v9756_v18 = vrot.slane %v9755_v32, 4  ;;  %v9848_v63 = vrot.slane %v9847_v61, 4  ;;  %v12505_v7 = vld [vmem:[%s21824_s5 + $0x38] sm:$0x3f]  ;;  %v21260_v49 = vld [vmem:[%s21824_s5 + $0x48] sm:$0xff] }
 0x80f   : > { %v9188_v38 = vmax.f32 %v21199_v10, %v9133_v4  ;;  %v9941_v51 = vmax.f32 %v9939_v57, %v9940_v39  ;;  %v21266_v39 = vld [vmem:[%s21824_s5 + $0x50] sm:$0xff]  ;;  %v21276_v4 = vld [vmem:[%s21824_s5 + $0x60] sm:$0xff] }
 0x810   : > { %v9757_v29 = vmax.f32 %v9755_v32, %v9756_v18  ;;  %v9849_v62 = vmax.f32 %v9847_v61, %v9848_v63 }
 0x811   : > { %v14349_v37 = vpop.f32.mrb[174].mxu0  ;;  %v9942_v21 = vrot.slane %v9941_v51, 2 }
 0x812   : > { %v9732_v45 = vmax.f32 %v9189_v2, %v14349_v37  ;;  %v9676_v12 = vpop.f32.mrb[175].mxu0  ;;  %v9758_v41 = vrot.slane %v9757_v29, 2  ;;  %v9850_v1 = vrot.slane %v9849_v62, 2  ;;  %v21271_v2 = vld [vmem:[%s21824_s5 + $0x58] sm:$0x3f]  ;;  %v14965_v37 = vpack.c.bf16 %v12505_v7, %v12504_v43 }
 0x813   : > { %v9731_v53 = vmax.f32 %v9188_v38, %v9676_v12  ;;  %v10214_v11 = vld [vmem:[#allocation5 + $0x19] sm:$0x1f]  ;;  %v9943_v52 = vmax.f32 %v9941_v51, %v9942_v21  ;;  %v21283_v38 = vld [vmem:[%s21824_s5 + $0x68] sm:$0xff]  ;;  %v21301_v12 = vld [vmem:[%s21824_s5 + $0x80] sm:$0xff] }
 0x814   : > { %9744 = vst.msk [vmem:[#allocation5 + $0x28] sm:$0xff] %vm7044_vm8, %v9732_v45  ;;  %v9759_v56 = vmax.f32 %v9757_v29, %v9758_v41  ;;  %v9851_v34 = vmax.f32 %v9849_v62, %v9850_v1  ;;  %v10030_v24 = vld [vmem:[#allocation5 + $0xf] sm:$0x1f]  ;;  %v10122_v33 = vld [vmem:[#allocation5 + $0x14] sm:$0x1f]  ;;  %v10215_v27 = vsel %vm9754_vm1, %v10214_v11, -inf }
 0x815   : > { %9743 = vst.msk [vmem:[#allocation5 + $0x20] sm:$0xff] %vm7044_vm8, %v9731_v53  ;;  %v14274_v10 = vpop.f32.mrb[148].mxu1  ;;  %v10031_v30 = vsel %vm9754_vm1, %v10030_v24, -inf  ;;  %v10123_v6 = vsel %vm9754_vm1, %v10122_v33, -inf  ;;  %v10216_v31 = vrot.slane %v10215_v27, 4  ;;  %v9944_v44 = vrot.slane %v9943_v52, 1 }
 0x816   : > { %v9191_v59 = vmax.f32 %v21202_v17, %v14274_v10  ;;  %v9143_v60 = vpop.f32.mrb[149].mxu1  ;;  %v9760_v3 = vrot.slane %v9759_v56, 1  ;;  %v10032_v55 = vrot.slane %v10031_v30, 4  ;;  %v12503_v17 = vld [vmem:[%s21824_s5 + $0x28] sm:$0xff]  ;;  %v9852_v20 = vrot.slane %v9851_v34, 1  ;;  %v21288_v51 = vld [vmem:[%s21824_s5 + $0x70] sm:$0xff] }
 0x817   : > { %v9190_v26 = vmax.f32 %v21205_v0, %v9143_v60  ;;  %v10124_v15 = vrot.slane %v10123_v6, 4  ;;  %v10217_v13 = vmax.f32 %v10215_v27, %v10216_v31  ;;  %v14962_v54 = vpack.c.bf16 %v12503_v17, %v12502_v14  ;;  %v21293_v29 = vld [vmem:[%s21824_s5 + $0x78] sm:$0x3f]  ;;  %v21306_v41 = vld [vmem:[%s21824_s5 + $0x88] sm:$0xff] }
 0x818   : > { %v9761_v50 = vmax.f32 %v9759_v56, %v9760_v3  ;;  %v10033_v25 = vmax.f32 %v10031_v30, %v10032_v55  ;;  %v9853_v46 = vmax.f32 %v9851_v34, %v9852_v20  ;;  %v9945_v45 = vmax.f32 %v9943_v52, %v9944_v44  ;;  %v21319_v21 = vld [vmem:[%s21824_s5 + $0x98] sm:$0x3f] }
 0x819   : > { %v14352_v47 = vpop.f32.mrb[176].mxu0  ;;  %v10125_v57 = vmax.f32 %v10123_v6, %v10124_v15  ;;  %v10218_v8 = vrot.slane %v10217_v13, 2  ;;  %v14969_v27 = vpack.c.bf16 %v21260_v49, %v21255_v16  ;;  %v14972_v10 = vpack.c.bf16 %v21271_v2, %v21266_v39 }
 0x81a   : > { %v9734_v0 = vmax.f32 %v9191_v59, %v14352_v47  ;;  %v9686_v58 = vpop.f32.mrb[177].mxu0  ;;  %v9763_v19 = vadd.f32 %v21236_v22, %v9761_v50  ;;  %v10034_v62 = vrot.slane %v10033_v25, 2  ;;  %v9854_v53 = vadd.f32 %v9853_v46, %v21236_v22 }
 0x81b   : > { %v9733_v5 = vmax.f32 %v9190_v26, %v9686_v58  ;;  %v10490_v32 = vld [vmem:[#allocation5 + $0x28] sm:$0x1f]  ;;  %v10126_v11 = vrot.slane %v10125_v57, 2  ;;  %v10219_v56 = vmax.f32 %v10217_v13, %v10218_v8  ;;  %v14976_v30 = vpack.c.bf16 %v21283_v38, %v21276_v4 }
 0x81c   : > { %9746 = vst.msk [vmem:[#allocation5 + $0x38] sm:$0xff] %vm7044_vm8, %v9734_v0  ;;  %v9764_v40 = vmax.f32 %v9763_v19, 0.0  ;;  %v10491_v1 = vsel %vm9754_vm1, %v10490_v32, -inf  ;;  %v10306_v34 = vld [vmem:[#allocation5 + $0x1e] sm:$0x1f]  ;;  %v14979_v59 = vpack.c.bf16 %v21293_v29, %v21288_v51  ;;  %v10035_v60 = vmax.f32 %v10033_v25, %v10034_v62  ;;  %v21342_v13 = vld [vmem:[%s21824_s5 + $0xa0] sm:$0xff] }
 0x81d   : > { %9745 = vst.msk [vmem:[#allocation5 + $0x30] sm:$0xff] %vm7044_vm8, %v9733_v5  ;;  %v14277_v61 = vpop.f32.mrb[150].mxu1  ;;  %v10492_v24 = vrot.slane %v10491_v1, 4  ;;  %v14983_v3 = vpack.c.bf16 %v21306_v41, %v21301_v12  ;;  %v10398_v55 = vld [vmem:[#allocation5 + $0x23] sm:$0x1f]  ;;  %v10307_v50 = vsel %vm9754_vm1, %v10306_v34, -inf  ;;  %v9946_v20 = vadd.f32 %v9945_v45, %v21236_v22 }
 0x81e   : > { %v9193_v18 = vmax.f32 %v21208_v48, %v14277_v61  ;;  %v9153_v63 = vpop.f32.mrb[151].mxu1  ;;  %14368 = vmatmul.mubr.msk.f32.vlgmr.msra.gmra.mrb[154].mxu1 %vm7044_vm8, %v9764_v40  ;;  %v9855_v17 = vmax.f32 %v9854_v53, 0.0  ;;  %v10127_v15 = vmax.f32 %v10125_v57, %v10126_v11  ;;  %v10220_v47 = vrot.slane %v10219_v56, 1  ;;  %v21348_v25 = vld [vmem:[%s21824_s5 + $0xa8] sm:$0xff] }
 0x81f   : > { %v9192_v48 = vmax.f32 %v21211_v23, %v9153_v63  ;;  %14963 = vmatpush3.bf16.msra.mxu1 %v14962_v54  ;;  %14378 = vmatprep.mubr.msk.f32.mxu1 %vm15952_vm0, %v22366_v36  ;;  %v21311_v23 = vld [vmem:[%s21824_s5 + $0x90] sm:$0xff]  ;;  %v10493_v14 = vmax.f32 %v10491_v1, %v10492_v24  ;;  %v10399_v5 = vsel %vm9754_vm1, %v10398_v55, -inf  ;;  %v10036_v46 = vrot.slane %v10035_v60, 1 }
 0x820   : > { %14964 = vmatprep.subr.bf16.mxu1 %v22365_v42  ;;  %v14986_v52 = vpack.c.bf16 %v21319_v21, %v21311_v23  ;;  %v10308_v16 = vrot.slane %v10307_v50, 4  ;;  %v10400_v2 = vrot.slane %v10399_v5, 4  ;;  %v21362_v34 = vmax.f32 %v10219_v56, %v10220_v47  ;;  %v12529_v23 = vld [vmem:[%s21824_s5 + $0xb8] sm:$0x3f] }
 0x821   : > { %v14355_v33 = vpop.f32.mrb[178].mxu0  ;;  %v10494_v54 = vrot.slane %v10493_v14, 2  ;;  %v10037_v11 = vmax.f32 %v10035_v60, %v10036_v46  ;;  %v11503_v46 = vld [vmem:[%s21826_s7] sm:$0xff] }
 0x822   : > { %v9736_v6 = vmax.f32 %v9193_v18, %v14355_v33  ;;  %v9696_v31 = vpop.f32.mrb[179].mxu0 }
 0x823   : > { %v9735_v26 = vmax.f32 %v9192_v48, %v9696_v31  ;;  %14967 = vmatpush3.bf16.msk.msra.mxu1 %vm19882_vm14, %v14965_v37  ;;  %v10495_v32 = vmax.f32 %v10493_v14, %v10494_v54  ;;  %v9947_v48 = vmax.f32 %v9946_v20, 0.0  ;;  %v14990_v37 = vpack.c.bf16 %v21348_v25, %v21342_v13  ;;  %v12533_v13 = vld [vmem:[%s21824_s5 + $0xc8] sm:$0xff] }
 0x824   : > { %9748 = vst.msk [vmem:[#allocation5 + $0x48] sm:$0xff] %vm7044_vm8, %v9736_v6  ;;  %14968 = vmatprep.subr.bf16.mxu1 %v22365_v42  ;;  %v10582_v0 = vld [vmem:[#allocation5 + $0x2d] sm:$0x1f]  ;;  %v10674_v58 = vld [vmem:[#allocation5 + $0x32] sm:$0x1f]  ;;  %v21372_v14 = vmax.f32 %v10399_v5, %v10400_v2 }
 0x825   : > { %9747 = vst.msk [vmem:[#allocation5 + $0x40] sm:$0xff] %vm7044_vm8, %v9735_v26  ;;  %v14280_v19 = vpop.f32.mrb[152].mxu1  ;;  %v10583_v43 = vsel %vm9754_vm1, %v10582_v0, -inf  ;;  %v10675_v7 = vsel %vm9754_vm1, %v10674_v58, -inf  ;;  %v10766_v57 = vld [vmem:[#allocation5 + $0x37] sm:$0x1f]  ;;  %v21370_v26 = vmax.f32 %v10307_v50, %v10308_v16 }
 0x826   : > { %v9195_v44 = vmax.f32 %v21213_v35, %v14280_v19  ;;  %v9163_v40 = vpop.f32.mrb[153].mxu1  ;;  %14379 = vmatmul.mubr.msk.f32.vlgmr.msra.gmra.mrb[154].mxu1 %vm7044_vm8, %v9855_v17  ;;  %v10584_v49 = vrot.slane %v10583_v43, 4  ;;  %v10676_v61 = vrot.slane %v10675_v7, 4  ;;  %v10767_v39 = vsel %vm9754_vm1, %v10766_v57, -inf  ;;  %v11504_v16 = vld [vmem:[%s21826_s7 + $0x8] sm:$0xff] }
 0x827   : > { %v9194_v8 = vmax.f32 %v21215_v28, %v9163_v40  ;;  %14970 = vmatpush3.bf16.msra.mxu1 %v14969_v27  ;;  %14389 = vmatprep.mubr.msk.f32.mxu1 %vm15952_vm0, %v22366_v36  ;;  %v10128_v35 = vrot.slane %v10127_v15, 1  ;;  %v10768_v63 = vrot.slane %v10767_v39, 4  ;;  %v10496_v28 = vrot.slane %v10495_v32, 1 }
 0x828   : > { %14971 = vmatprep.subr.bf16.mxu1 %v22365_v42  ;;  %v10585_v18 = vmax.f32 %v10583_v43, %v10584_v49  ;;  %v10677_v45 = vmax.f32 %v10675_v7, %v10676_v61  ;;  %v10038_v43 = vadd.f32 %v10037_v11, %v21236_v22  ;;  %v10310_v51 = vrot.slane %v21370_v26, 2 }
 0x829   : > { %v14358_v62 = vpop.f32.mrb[180].mxu0  ;;  %v10497_v27 = vmax.f32 %v10495_v32, %v10496_v28  ;;  %v10769_v31 = vmax.f32 %v10767_v39, %v10768_v63  ;;  %v21368_v55 = vmax.f32 %v10127_v15, %v10128_v35  ;;  %v11505_v39 = vld [vmem:[%s21826_s7 + $0x10] sm:$0xff]  ;;  %v11506_v35 = vld [vmem:[%s21826_s7 + $0x18] sm:$0xff] }
 0x82a   : > { %v9738_v1 = vmax.f32 %v9195_v44, %v14358_v62  ;;  %v9706_v53 = vpop.f32.mrb[181].mxu0  ;;  %v10586_v24 = vrot.slane %v10585_v18, 2  ;;  %v10678_v6 = vrot.slane %v10677_v45, 2  ;;  %v15088_v62 = vpack.c.bf16 %v11504_v16, %v11503_v46 }
 0x82b   : > { %v9737_v33 = vmax.f32 %v9194_v8, %v9706_v53  ;;  %14974 = vmatpush3.bf16.msk.msra.mxu1 %vm19882_vm14, %v14972_v10  ;;  %v21376_v10 = vadd.f32 %v10497_v27, %v21236_v22  ;;  %v10770_v47 = vrot.slane %v10769_v31, 2  ;;  %v11134_v19 = vld [vmem:[#allocation5 + $0x4b] sm:$0x1f]  ;;  %v10039_v53 = vmax.f32 %v10038_v43, 0.0 }
 0x82c   : > { %9751 = vst.msk [vmem:[#allocation5 + $0x58] sm:$0x7f] %vm9750_vm2, %v9738_v1  ;;  %14975 = vmatprep.subr.bf16.mxu1 %v22365_v42  ;;  %v10587_v56 = vmax.f32 %v10585_v18, %v10586_v24  ;;  %v10858_v60 = vld [vmem:[#allocation5 + $0x3c] sm:$0x1f]  ;;  %v10950_v17 = vld [vmem:[#allocation5 + $0x41] sm:$0x1f]  ;;  %v10679_v20 = vmax.f32 %v10677_v45, %v10678_v6  ;;  %15089 = vmatpush3.bf16.msra.mxu0 %v15088_v62 }
 0x82d   : > { %9749 = vst.msk [vmem:[#allocation5 + $0x50] sm:$0xff] %vm7044_vm8, %v9737_v33  ;;  %v10859_v0 = vsel %vm9754_vm1, %v10858_v60, -inf  ;;  %v11042_v58 = vld [vmem:[#allocation5 + $0x46] sm:$0x1f]  ;;  %v10951_v5 = vsel %vm9754_vm1, %v10950_v17, -inf  ;;  %v10771_v44 = vmax.f32 %v10769_v31, %v10770_v47  ;;  %v11135_v49 = vsel %vm9754_vm1, %v11134_v19, -inf  ;;  %15090 = vmatprep.subr.bf16.mxu0 %v22365_v42 }
 0x82e   : > { %14390 = vmatmul.mubr.msk.f32.vlgmr.msra.gmra.mrb[154].mxu1 %vm7044_vm8, %v9947_v48  ;;  %v10588_v50 = vrot.slane %v10587_v56, 1  ;;  %v10860_v15 = vrot.slane %v10859_v0, 4  ;;  %v11043_v54 = vsel %vm9754_vm1, %v11042_v58, -inf  ;;  %v10680_v7 = vrot.slane %v10679_v20, 1 }
 0x82f   : > { %14977 = vmatpush3.bf16.msra.mxu1 %v14976_v30  ;;  %14400 = vmatprep.mubr.msk.f32.mxu1 %vm15952_vm0, %v22366_v36  ;;  %v10952_v40 = vrot.slane %v10951_v5, 4  ;;  %v11044_v30 = vrot.slane %v11043_v54, 4  ;;  %v10772_v8 = vrot.slane %v10771_v44, 1  ;;  %v11136_v61 = vrot.slane %v11135_v49, 4 }
 0x830   : > { %14978 = vmatprep.subr.bf16.mxu1 %v22365_v42  ;;  %v10589_v4 = vmax.f32 %v10587_v56, %v10588_v50  ;;  %v10861_v38 = vmax.f32 %v10859_v0, %v10860_v15  ;;  %v10681_v57 = vmax.f32 %v10679_v20, %v10680_v7  ;;  %v15091_v6 = vpack.c.bf16 %v11506_v35, %v11505_v39  ;;  %v11507_v15 = vld [vmem:[%s21826_s7 + $0x20] sm:$0xff] }
 0x831   : > { %v10953_v32 = vmax.f32 %v10951_v5, %v10952_v40  ;;  %v11045_v63 = vmax.f32 %v11043_v54, %v11044_v30  ;;  %v10773_v28 = vmax.f32 %v10771_v44, %v10772_v8  ;;  %v11137_v1 = vmax.f32 %v11135_v49, %v11136_v61  ;;  %v11508_v5 = vld [vmem:[%s21826_s7 + $0x28] sm:$0xff] }
 0x832   : > { %v21403_v2 = vadd.f32 %v10589_v4, %v21236_v22  ;;  %v10862_v18 = vrot.slane %v10861_v38, 2  ;;  %v21411_v48 = vadd.f32 %v10681_v57, %v21236_v22  ;;  %v10130_v0 = vadd.f32 %v21368_v55, %v21236_v22  ;;  %15092 = vmatpush3.bf16.msra.mxu0 %v15091_v6 }
 0x833   : > { %14981 = vmatpush3.bf16.msk.msra.mxu1 %vm19882_vm14, %v14979_v59  ;;  %v10954_v45 = vrot.slane %v10953_v32, 2  ;;  %v11046_v24 = vrot.slane %v11045_v63, 2  ;;  %v21416_v29 = vadd.f32 %v10773_v28, %v21236_v22  ;;  %v11138_v31 = vrot.slane %v11137_v1, 2  ;;  %v11410_v56 = vld [vmem:[#allocation5 + $0x5a] sm:$0x1f]  ;;  %15093 = vmatprep.subr.bf16.mxu0 %v22365_v42 }
 0x834   : > { %14982 = vmatprep.subr.bf16.mxu1 %v22365_v42  ;;  %v10863_v11 = vmax.f32 %v10861_v38, %v10862_v18  ;;  %v11226_v33 = vld [vmem:[#allocation5 + $0x50] sm:$0x1f]  ;;  %v11318_v27 = vld [vmem:[#allocation5 + $0x55] sm:$0x1f]  ;;  %v11411_v54 = vsel %vm9754_vm1, %v11410_v56, -inf  ;;  %v15094_v4 = vpack.c.bf16 %v11508_v5, %v11507_v15  ;;  %v10131_v8 = vmax.f32 %v10130_v0, 0.0 }
 0x835   : > { %v10955_v59 = vmax.f32 %v10953_v32, %v10954_v45  ;;  %v11047_v17 = vmax.f32 %v11045_v63, %v11046_v24  ;;  %v11227_v20 = vsel %vm9754_vm1, %v11226_v33, -inf  ;;  %v11319_v47 = vsel %vm9754_vm1, %v11318_v27, -inf  ;;  %v12528_v32 = vld [vmem:[%s21824_s5 + $0xb0] sm:$0xff] }
 0x836   : > { %14401 = vmatmul.mubr.msk.f32.vlgmr.msra.gmra.mrb[154].mxu1 %vm7044_vm8, %v10039_v53  ;;  %v10864_v60 = vrot.slane %v10863_v11, 1  ;;  %v11139_v19 = vmax.f32 %v11137_v1, %v11138_v31  ;;  %v11228_v50 = vrot.slane %v11227_v20, 4  ;;  %v11412_v44 = vrot.slane %v11411_v54, 4  ;;  %15095 = vmatpush3.bf16.msra.mxu0 %v15094_v4  ;;  %v12532_v1 = vld [vmem:[%s21824_s5 + $0xc0] sm:$0xff]  ;;  %v12535_v31 = vld [vmem:[%s21824_s5 + $0xd8] sm:$0x3f] }
 0x837   : > { %14984 = vmatpush3.bf16.msra.mxu1 %v14983_v3  ;;  %14411 = vmatprep.mubr.msk.f32.mxu1 %vm15952_vm0, %v22366_v36  ;;  %v10956_v58 = vrot.slane %v10955_v59, 1  ;;  %v11048_v41 = vrot.slane %v11047_v17, 1  ;;  %v11320_v3 = vrot.slane %v11319_v47, 4  ;;  %v10311_v21 = vmax.f32 %v21370_v26, %v10310_v51  ;;  %v12540_v5 = vld [vmem:[%s21824_s5 + $0xf0] sm:$0xff]  ;;  %v12550_v4 = vld [vmem:[%s21824_s5 + $0x120] sm:$0xff] }
 0x838   : > { %14985 = vmatprep.subr.bf16.mxu1 %v22365_v42  ;;  %v10865_v12 = vmax.f32 %v10863_v11, %v10864_v60  ;;  %v11140_v43 = vrot.slane %v11139_v19, 1  ;;  %v11229_v7 = vmax.f32 %v11227_v20, %v11228_v50  ;;  %v11413_v57 = vmax.f32 %v11411_v54, %v11412_v44  ;;  %14580 = vmatprep.subr.mxu0 %v22366_v36 }
 0x839   : > { %v10957_v55 = vmax.f32 %v10955_v59, %v10956_v58  ;;  %v11049_v46 = vmax.f32 %v11047_v17, %v11048_v41  ;;  %v11321_v16 = vmax.f32 %v11319_v47, %v11320_v3  ;;  %v14993_v26 = vpack.c.bf16 %v12529_v23, %v12528_v32  ;;  %v12534_v59 = vld [vmem:[%s21824_s5 + $0xd0] sm:$0xff]  ;;  %v12539_v58 = vld [vmem:[%s21824_s5 + $0xe8] sm:$0xff]  ;;  %v12553_v32 = vld [vmem:[%s21824_s5 + $0x138] sm:$0x3f] }
 0x83a   : > { %v21439_v40 = vadd.f32 %v10865_v12, %v21236_v22  ;;  %v11141_v30 = vmax.f32 %v11139_v19, %v11140_v43  ;;  %v11230_v49 = vrot.slane %v11229_v7, 2  ;;  %v11414_v18 = vrot.slane %v11413_v57, 2  ;;  %v12541_v12 = vld [vmem:[%s21824_s5 + $0xf8] sm:$0x3f]  ;;  %v12545_v43 = vld [vmem:[%s21824_s5 + $0x108] sm:$0xff] }
 0x83b   : > { %14988 = vmatpush3.bf16.msk.msra.mxu1 %vm19882_vm14, %v14986_v52  ;;  %v21447_v38 = vadd.f32 %v10957_v55, %v21236_v22  ;;  %v21458_v52 = vadd.f32 %v11049_v46, %v21236_v22  ;;  %v11322_v61 = vrot.slane %v11321_v16, 2  ;;  %v10222_v45 = vadd.f32 %v21362_v34, %v21236_v22  ;;  %v12544_v55 = vld [vmem:[%s21824_s5 + $0x100] sm:$0xff]  ;;  %v12546_v46 = vld [vmem:[%s21824_s5 + $0x110] sm:$0xff] }
 0x83c   : > { %14989 = vmatprep.subr.bf16.mxu1 %v22365_v42  ;;  %v21461_v39 = vadd.f32 %v11141_v30, %v21236_v22  ;;  %v11231_v35 = vmax.f32 %v11229_v7, %v11230_v49  ;;  %v11415_v28 = vmax.f32 %v11413_v57, %v11414_v18  ;;  %v10312_v25 = vrot.slane %v10311_v21, 1  ;;  %v12551_v30 = vld [vmem:[%s21824_s5 + $0x128] sm:$0xff]  ;;  %v12558_v18 = vld [vmem:[%s21824_s5 + $0x150] sm:$0xff] }
 0x83d   : > { %v11323_v63 = vmax.f32 %v11321_v16, %v11322_v61  ;;  %v14997_v27 = vpack.c.bf16 %v12533_v13, %v12532_v1  ;;  %v10223_v51 = vmax.f32 %v10222_v45, 0.0  ;;  %v15000_v47 = vpack.c.bf16 %v12535_v31, %v12534_v59  ;;  %v12564_v1 = vld [vmem:[%s21824_s5 + $0x170] sm:$0xff]  ;;  %v12565_v13 = vld [vmem:[%s21824_s5 + $0x178] sm:$0x3f] }
 0x83e   : > { %14412 = vmatmul.mubr.msk.f32.vlgmr.msra.gmra.mrb[154].mxu1 %vm7044_vm8, %v10131_v8  ;;  %v11232_v62 = vrot.slane %v11231_v35, 1  ;;  %v11416_v24 = vrot.slane %v11415_v28, 1  ;;  %v10313_v56 = vmax.f32 %v10311_v21, %v10312_v25  ;;  %v15007_v3 = vpack.c.bf16 %v12541_v12, %v12540_v5  ;;  %v12552_v8 = vld [vmem:[%s21824_s5 + $0x130] sm:$0xff]  ;;  %v12557_v21 = vld [vmem:[%s21824_s5 + $0x148] sm:$0xff] }
 0x83f   : > { %14991 = vmatpush3.bf16.msra.mxu1 %v14990_v37  ;;  %14422 = vmatprep.mubr.msk.f32.mxu1 %vm15952_vm0, %v22366_v36  ;;  %v10402_v37 = vrot.slane %v21372_v14, 2  ;;  %v11324_v53 = vrot.slane %v11323_v63, 1  ;;  %v15011_v7 = vpack.c.bf16 %v12545_v43, %v12544_v55  ;;  %v15018_v49 = vpack.c.bf16 %v12551_v30, %v12550_v4  ;;  %v12576_v31 = vld [vmem:[%s21824_s5 + $0x1b0] sm:$0xff]  ;;  %v12593_v55 = vld [vmem:[%s21824_s5 + $0x208] sm:$0xff] }
 0x840   : > { %14992 = vmatprep.subr.bf16.mxu1 %v22365_v42  ;;  %v11233_v11 = vmax.f32 %v11231_v35, %v11232_v62  ;;  %v11417_v6 = vmax.f32 %v11415_v28, %v11416_v24  ;;  %v10314_v0 = vadd.f32 %v10313_v56, %v21236_v22  ;;  %v10499_v57 = vmax.f32 %v21376_v10, 0.0  ;;  %v12556_v10 = vld [vmem:[%s21824_s5 + $0x140] sm:$0xff]  ;;  %v12563_v62 = vld [vmem:[%s21824_s5 + $0x168] sm:$0xff]  ;;  %v12570_v24 = vld [vmem:[%s21824_s5 + $0x190] sm:$0xff] }
 0x841   : > { %v11325_v33 = vmax.f32 %v11323_v63, %v11324_v53  ;;  %v10403_v60 = vmax.f32 %v21372_v14, %v10402_v37  ;;  %v12538_v14 = vld [vmem:[%s21824_s5 + $0xe0] sm:$0xff]  ;;  %v15021_v23 = vpack.c.bf16 %v12553_v32, %v12552_v8  ;;  %v15025_v61 = vpack.c.bf16 %v12557_v21, %v12556_v10  ;;  %v12559_v63 = vld [vmem:[%s21824_s5 + $0x158] sm:$0x3f]  ;;  %v12569_v37 = vld [vmem:[%s21824_s5 + $0x188] sm:$0xff] }
 0x842   : > { %v21483_v34 = vadd.f32 %v11233_v11, %v21236_v22  ;;  %v21497_v20 = vadd.f32 %v11417_v6, %v21236_v22  ;;  %v15004_v50 = vpack.c.bf16 %v12539_v58, %v12538_v14  ;;  %v10315_v15 = vmax.f32 %v10314_v0, 0.0  ;;  %v12575_v6 = vld [vmem:[%s21824_s5 + $0x1a8] sm:$0xff]  ;;  %v12577_v56 = vld [vmem:[%s21824_s5 + $0x1b8] sm:$0x3f]  ;;  %v12582_v58 = vld [vmem:[%s21824_s5 + $0x1d0] sm:$0xff] }
 0x843   : > { %14995 = vmatpush3.bf16.msk.msra.mxu1 %vm19882_vm14, %v14993_v26  ;;  %v21494_v17 = vadd.f32 %v11325_v33, %v21236_v22  ;;  %v10404_v19 = vrot.slane %v10403_v60, 1  ;;  %v10591_v35 = vmax.f32 %v21403_v2, 0.0  ;;  %v15028_v26 = vpack.c.bf16 %v12559_v63, %v12558_v18  ;;  %v12562_v2 = vld [vmem:[%s21824_s5 + $0x160] sm:$0xff]  ;;  %v12571_v33 = vld [vmem:[%s21824_s5 + $0x198] sm:$0x3f]  ;;  %v12605_v32 = vld [vmem:[%s21824_s5 + $0x248] sm:$0xff] }
 0x844   : > { %14996 = vmatprep.subr.bf16.mxu1 %v22365_v42  ;;  %v15032_v28 = vpack.c.bf16 %v12563_v62, %v12562_v2  ;;  %v10683_v45 = vmax.f32 %v21411_v48, 0.0  ;;  %v15035_v25 = vpack.c.bf16 %v12565_v13, %v12564_v1  ;;  %v12568_v48 = vld [vmem:[%s21824_s5 + $0x180] sm:$0xff]  ;;  %v10775_v11 = vmax.f32 %v21416_v29, 0.0  ;;  %v12606_v21 = vld [vmem:[%s21824_s5 + $0x250] sm:$0xff] }
 0x845   : > { %v10405_v41 = vmax.f32 %v10403_v60, %v10404_v19  ;;  %v15039_v53 = vpack.c.bf16 %v12569_v37, %v12568_v48  ;;  %v12574_v29 = vld [vmem:[%s21824_s5 + $0x1a0] sm:$0xff]  ;;  %v10867_v59 = vmax.f32 %v21439_v40, 0.0  ;;  %v15049_v60 = vpack.c.bf16 %v12577_v56, %v12576_v31  ;;  %v12583_v19 = vld [vmem:[%s21824_s5 + $0x1d8] sm:$0x3f]  ;;  %v11509_v18 = vld [vmem:[%s21826_s7 + $0x30] sm:$0x3] }
 0x846   : > { %14423 = vmatmul.mubr.msk.f32.vlgmr.msra.gmra.mrb[154].mxu1 %vm7044_vm8, %v10223_v51  ;;  %v15046_v51 = vpack.c.bf16 %v12575_v6, %v12574_v29  ;;  %v12580_v40 = vld [vmem:[%s21824_s5 + $0x1c0] sm:$0xff]  ;;  %v10959_v14 = vmax.f32 %v21447_v38, 0.0  ;;  %v11051_v12 = vmax.f32 %v21458_v52, 0.0  ;;  %v11235_v30 = vmax.f32 %v21483_v34, 0.0  ;;  %14581 = vmatpush3.msk.msra.mxu0 %vm11515_vm3, %v11509_v18 }
 0x847   : > { %14998 = vmatpush3.bf16.msra.mxu1 %v14997_v27  ;;  %14433 = vmatprep.mubr.msk.f32.mxu1 %vm15952_vm0, %v22366_v36  ;;  %v10406_v54 = vadd.f32 %v10405_v41, %v21236_v22  ;;  %v12547_v22 = vld [vmem:[%s21824_s5 + $0x118] sm:$0x3f]  ;;  %v15042_v27 = vpack.c.bf16 %v12571_v33, %v12570_v24  ;;  %v12586_v38 = vld [vmem:[%s21824_s5 + $0x1e0] sm:$0xff]  ;;  %v12588_v41 = vld [vmem:[%s21824_s5 + $0x1f0] sm:$0xff]  ;;  %v11327_v10 = vmax.f32 %v21494_v17, 0.0  ;;  %v11419_v17 = vmax.f32 %v21497_v20, 0.0 }
 0x848   : > { %14999 = vmatprep.subr.bf16.mxu1 %v22365_v42  ;;  %v15014_v16 = vpack.c.bf16 %v12547_v22, %v12546_v46  ;;  %v12592_v52 = vld [vmem:[%s21824_s5 + $0x200] sm:$0xff]  ;;  %v12595_v46 = vld [vmem:[%s21824_s5 + $0x218] sm:$0x3f]  ;;  %15096 = vmatprep.subr.bf16.mxu0 %v22365_v42 }
 0x849   : > { %v10407_v44 = vmax.f32 %v10406_v54, 0.0  ;;  %v15067_v43 = vpack.c.bf16 %v12593_v55, %v12592_v52  ;;  %v12604_v34 = vld [vmem:[%s21824_s5 + $0x240] sm:$0xff] }
 0x84a   : > { %v9752_v63 = vld [vmem:[%s21825_s6] sm:$0x1] }
 0x84b   : > { %15002 = vmatpush3.bf16.msk.msra.mxu1 %vm19882_vm14, %v15000_v47  ;;  %v12581_v47 = vld [vmem:[%s21824_s5 + $0x1c8] sm:$0xff]  ;;  %v11590_v20 = vld [vmem:[%s21828_s9] sm:$0xff] }
 0x84c   : > { %15003 = vmatprep.subr.bf16.mxu1 %v22365_v42  ;;  %v15053_v0 = vpack.c.bf16 %v12581_v47, %v12580_v40  ;;  %v11510_v1 = vld [vmem:[%s21827_s8] sm:$0x1] }
 0x84e   : > { %14434 = vmatmul.mubr.msk.f32.vlgmr.msra.gmra.mrb[154].mxu1 %vm7044_vm8, %v10315_v15  ;;  %v12587_v15 = vld [vmem:[%s21824_s5 + $0x1e8] sm:$0xff] }
 0x84f   : > { %15005 = vmatpush3.bf16.msra.mxu1 %v15004_v50  ;;  %14444 = vmatprep.mubr.msk.f32.mxu1 %vm15952_vm0, %v22366_v36  ;;  %v15056_v50 = vpack.c.bf16 %v12583_v19, %v12582_v58  ;;  %v15060_v5 = vpack.c.bf16 %v12587_v15, %v12586_v38 }
 0x850   : > { %15006 = vmatprep.subr.bf16.mxu1 %v22365_v42 }
 0x853   : > { %15009 = vmatpush3.bf16.msk.msra.mxu1 %vm19882_vm14, %v15007_v3  ;;  %v12589_v3 = vld [vmem:[%s21824_s5 + $0x1f8] sm:$0x3f] }
 0x854   : > { %15010 = vmatprep.subr.bf16.mxu1 %v22365_v42  ;;  %v15063_v54 = vpack.c.bf16 %v12589_v3, %v12588_v41 }
 0x856   : > { %14445 = vmatmul.mubr.msk.f32.vlgmr.msra.gmra.mrb[154].mxu1 %vm7044_vm8, %v10407_v44  ;;  %v12594_v44 = vld [vmem:[%s21824_s5 + $0x210] sm:$0xff] }
 0x857   : > { %15012 = vmatpush3.bf16.msra.mxu1 %v15011_v7  ;;  %14455 = vmatprep.mubr.msk.f32.mxu1 %vm15952_vm0, %v22366_v36  ;;  %v11143_v7 = vmax.f32 %v21461_v39, 0.0  ;;  %v15070_v22 = vpack.c.bf16 %v12595_v46, %v12594_v44  ;;  %v12598_v39 = vld [vmem:[%s21824_s5 + $0x220] sm:$0xff] }
 0x858   : > { %15013 = vmatprep.subr.bf16.mxu1 %v22365_v42 }
 0x85b   : > { %15016 = vmatpush3.bf16.msk.msra.mxu1 %vm19882_vm14, %v15014_v16  ;;  %v12599_v16 = vld [vmem:[%s21824_s5 + $0x228] sm:$0xff] }
 0x85c   : > { %15017 = vmatprep.subr.bf16.mxu1 %v22365_v42  ;;  %v15074_v4 = vpack.c.bf16 %v12599_v16, %v12598_v39 }
 0x85e   : > { %14456 = vmatmul.mubr.msk.f32.vlgmr.msra.gmra.mrb[154].mxu1 %vm7044_vm8, %v10499_v57  ;;  %v12601_v57 = vld [vmem:[%s21824_s5 + $0x238] sm:$0x3f] }
 0x85f   : > { %15019 = vmatpush3.bf16.msra.mxu1 %v15018_v49  ;;  %14466 = vmatprep.mubr.msk.f32.mxu1 %vm15952_vm0, %v22366_v36  ;;  %v12600_v49 = vld [vmem:[%s21824_s5 + $0x230] sm:$0xff] }
 0x860   : > { %15020 = vmatprep.subr.bf16.mxu1 %v22365_v42  ;;  %v15077_v8 = vpack.c.bf16 %v12601_v57, %v12600_v49 }
 0x863   : > { %15023 = vmatpush3.bf16.msk.msra.mxu1 %vm19882_vm14, %v15021_v23  ;;  %v15081_v23 = vpack.c.bf16 %v12605_v32, %v12604_v34 }
 0x864   : > { %15024 = vmatprep.subr.bf16.mxu1 %v22365_v42 }
 0x866   : > { %14467 = vmatmul.mubr.msk.f32.vlgmr.msra.gmra.mrb[154].mxu1 %vm7044_vm8, %v10591_v35 }
 0x867   : > { %15026 = vmatpush3.bf16.msra.mxu1 %v15025_v61  ;;  %14477 = vmatprep.mubr.msk.f32.mxu1 %vm15952_vm0, %v22366_v36  ;;  %v12607_v61 = vld [vmem:[%s21824_s5 + $0x258] sm:$0x3f] }
 0x868   : > { %15027 = vmatprep.subr.bf16.mxu1 %v22365_v42  ;;  %v15084_v35 = vpack.c.bf16 %v12607_v61, %v12606_v21 }
 0x86b   : > { %15030 = vmatpush3.bf16.msk.msra.mxu1 %vm19882_vm14, %v15028_v26 }
 0x86c   : > { %15031 = vmatprep.subr.bf16.mxu1 %v22365_v42 }
 0x86e   : > { %14478 = vmatmul.mubr.msk.f32.vlgmr.msra.gmra.mrb[154].mxu1 %vm7044_vm8, %v10683_v45  ;;  %v11592_v45 = vld [vmem:[%s21828_s9 + $0x10] sm:$0xf] }
 0x86f   : > { %15033 = vmatpush3.bf16.msra.mxu1 %v15032_v28  ;;  %14488 = vmatprep.mubr.msk.f32.mxu1 %vm15952_vm0, %v22366_v36 }
 0x870   : > { %15034 = vmatprep.subr.bf16.mxu1 %v22365_v42 }
 0x873   : > { %15037 = vmatpush3.bf16.msk.msra.mxu1 %vm19882_vm14, %v15035_v25 }
 0x874   : > { %15038 = vmatprep.subr.bf16.mxu1 %v22365_v42 }
 0x876   : > { %14489 = vmatmul.mubr.msk.f32.vlgmr.msra.gmra.mrb[154].mxu1 %vm7044_vm8, %v10775_v11 }
 0x877   : > { %15040 = vmatpush3.bf16.msra.mxu1 %v15039_v53  ;;  %14499 = vmatprep.mubr.msk.f32.mxu1 %vm15952_vm0, %v22366_v36 }
 0x878   : > { %15041 = vmatprep.subr.bf16.mxu1 %v22365_v42 }
 0x87b   : > { %15044 = vmatpush3.bf16.msk.msra.mxu1 %vm19882_vm14, %v15042_v27 }
 0x87c   : > { %15045 = vmatprep.subr.bf16.mxu1 %v22365_v42 }
 0x87e   : > { %14500 = vmatmul.mubr.msk.f32.vlgmr.msra.gmra.mrb[154].mxu1 %vm7044_vm8, %v10867_v59 }
 0x87f   : > { %15047 = vmatpush3.bf16.msra.mxu1 %v15046_v51  ;;  %14510 = vmatprep.mubr.msk.f32.mxu1 %vm15952_vm0, %v22366_v36 }
 0x880   : > { %15048 = vmatprep.subr.bf16.mxu1 %v22365_v42 }
 0x883   : > { %15051 = vmatpush3.bf16.msk.msra.mxu1 %vm19882_vm14, %v15049_v60 }
 0x884   : > { %15052 = vmatprep.subr.bf16.mxu1 %v22365_v42 }
 0x886   : > { %14511 = vmatmul.mubr.msk.f32.vlgmr.msra.gmra.mrb[154].mxu1 %vm7044_vm8, %v10959_v14 }
 0x887   : > { %15054 = vmatpush3.bf16.msra.mxu1 %v15053_v0  ;;  %14521 = vmatprep.mubr.msk.f32.mxu1 %vm15952_vm0, %v22366_v36 }
 0x888   : > { %15055 = vmatprep.subr.bf16.mxu1 %v22365_v42 }
 0x88b   : > { %15058 = vmatpush3.bf16.msk.msra.mxu1 %vm19882_vm14, %v15056_v50 }
 0x88c   : > { %15059 = vmatprep.subr.bf16.mxu1 %v22365_v42 }
 0x88e   : > { %14522 = vmatmul.mubr.msk.f32.vlgmr.msra.gmra.mrb[154].mxu1 %vm7044_vm8, %v11051_v12 }
 0x88f   : > { %15061 = vmatpush3.bf16.msra.mxu1 %v15060_v5  ;;  %14532 = vmatprep.mubr.msk.f32.mxu1 %vm15952_vm0, %v22366_v36 }
 0x890   : > { %15062 = vmatprep.subr.bf16.mxu1 %v22365_v42 }
 0x893   : > { %15065 = vmatpush3.bf16.msk.msra.mxu1 %vm19882_vm14, %v15063_v54 }
 0x894   : > { %15066 = vmatprep.subr.bf16.mxu1 %v22365_v42 }
 0x896   : > { %14533 = vmatmul.mubr.msk.f32.vlgmr.msra.gmra.mrb[154].mxu1 %vm7044_vm8, %v11143_v7 }
 0x897   : > { %15068 = vmatpush3.bf16.msra.mxu1 %v15067_v43  ;;  %14543 = vmatprep.mubr.msk.f32.mxu1 %vm15952_vm0, %v22366_v36 }
 0x898   : > { %15069 = vmatprep.subr.bf16.mxu1 %v22365_v42 }
 0x89b   : > { %15072 = vmatpush3.bf16.msk.msra.mxu1 %vm19882_vm14, %v15070_v22 }
 0x89c   : > { %15073 = vmatprep.subr.bf16.mxu1 %v22365_v42 }
 0x89e   : > { %14544 = vmatmul.mubr.msk.f32.vlgmr.msra.gmra.mrb[154].mxu1 %vm7044_vm8, %v11235_v30 }
 0x89f   : > { %15075 = vmatpush3.bf16.msra.mxu1 %v15074_v4  ;;  %14554 = vmatprep.mubr.msk.f32.mxu1 %vm15952_vm0, %v22366_v36 }
 0x8a0   : > { %15076 = vmatprep.subr.bf16.mxu1 %v22365_v42 }
 0x8a3   : > { %15079 = vmatpush3.bf16.msk.msra.mxu1 %vm19882_vm14, %v15077_v8 }
 0x8a4   : > { %15080 = vmatprep.subr.bf16.mxu1 %v22365_v42 }
 0x8a6   : > { %14555 = vmatmul.mubr.msk.f32.vlgmr.msra.gmra.mrb[154].mxu1 %vm7044_vm8, %v11327_v10 }
 0x8a7   : > { %15082 = vmatpush3.bf16.msra.mxu1 %v15081_v23  ;;  %14565 = vmatprep.mubr.msk.f32.mxu1 %vm15952_vm0, %v22366_v36 }
 0x8a8   : > { %15083 = vmatprep.subr.bf16.mxu1 %v22365_v42  ;;  %v11591_v42 = vld [vmem:[%s21828_s9 + $0x8] sm:$0xff] }
 0x8a9   : > { %v15097_v28 = vpack.c.bf16 %v11591_v42, %v11590_v20 }
 0x8ab   : > { %15086 = vmatpush3.bf16.msk.msra.mxu1 %vm19882_vm14, %v15084_v35  ;;  %vm11511_vm14 = vcmask 408576  }
 0x8ae   : > { %14566 = vmatmul.mubr.msk.f32.vlgmr.msra.gmra.mrb[154].mxu1 %vm7044_vm8, %v11419_v17 }
 0x981   : > { %v11497_v26 = vpop.f32.mrb[154].mxu1 }
 0x982   : > { %v15113_v2 = vadd.f32 %v11497_v26, %v9752_v63  ;;  %v14567_v9 = vpop.f32.mrb[155].mxu1 }
 0x984   : > { %v11502_v62 = vmax.f32 %v15113_v2, 0.0 }
 0x986   : > { %14583 = vmatmul.mubr.msk.f32.vlgmr.msra.gmra.mrb[182].mxu0 %vm11511_vm14, %v11502_v62 }
 0x987   : > { %14591 = vmatprep.mubr.msk.f32.mxu0 %vm15952_vm0, %v22366_v36  ;;  %15098 = vmatpush3.bf16.msra.mxu0 %v15097_v28  ;;  %vm11594_vm0 = vcmask 162816  }
 0x988   : > { %14589 = vmatprep.subr.mxu0 %v22366_v36  ;;  %v11593_v36 = vld [vmem:[%s21829_s10] sm:$0x1] }
 0x98b   : > { %14590 = vmatpush3.msk.msra.mxu0 %vm11598_vm4, %v11592_v45 }
 0xa59   : > { %v11585_v13 = vpop.f32.mrb[182].mxu0 }
 0xa5a   : > { %v11586_v25 = vadd.f32 %v11585_v13, %v11510_v1  ;;  %v14584_v48 = vpop.f32.mrb[183].mxu0 }
 0xa5c   : > { %v11589_v37 = vmax.f32 %v11586_v25, 0.0 }
 0xa5e   : > { %14592 = vmatmul.mubr.msk.f32.vlgmr.msra.gmra.mrb[184].mxu0 %vm11594_vm0, %v11589_v37 }
 0xb31   : > { %v11668_v53 = vpop.f32.mrb[184].mxu0 }
 0xb32   : > { %v11669_v11 = vadd.f32 %v11668_v53, %v11593_v36  ;;  %v14593_v24 = vpop.f32.mrb[185].mxu0 }
 0xb34   : > { %11673 = vst.msk [vmem:[%s378_s24] sm:$0x1] %vm11672_vm5, %v11669_v11 }
 0xb35   : > { %15899 = shalt.err (!%p15896_p3)
}
 0xb36   : > { %s15900_s16 = scalar_lea.hbm %s21777_s26, 16  ;;  %s15904_s30 = scalar_lea.hbm %s21830_s11, 32 }
 0xb37   : > { %p15901_p4 = scmp.ne.s32.totalorder %s21777_s26, %s15900_s16  ;;  %p15905_p9 = scmp.lt.u32.totalorder %s21777_s26, %s21830_s11 }
 0xb38   : > { %p15906_p10 = scmp.lt.u32.totalorder %s15904_s30, %s15900_s16  ;;  %p15908_p12 = scmp.lt.u32.totalorder %s15900_s16, %s21777_s26 }
 0xb39   : > { %p15902_p7 = pnand %p15901_p4, %p16068_p5 }
 0xb3a   : > { %p15907_p11 = por %p15906_p10, %p15905_p9 }
 0xb3b   : > { %p15903_p8 = pneg %p15902_p7 }
 0xb3c   : > { %p15909_p13 = por %p15908_p12, %p15907_p11 }
 0xb3e   : > { %p15910_p0 = pnand %p15909_p13, %p15903_p8 }
 0xb40   : > { %15913 = shalt.err (!%p15910_p0)
}
 0xb41   : > { %15775 = dma.vmem_to_hbm [thread:$0]  (%p16068_p5), %s21779_s25, 16, %s21777_s26, %s11675_s13  }
 0xb42 PF: > { %p15781_p1 = scmp.ge.s32.totalorder %s15948_s20, 2  ;;  %s11699_s14 = sand.u32 1, %s15936_s17  }
 0xb43   : > { %s11700_s29 = scalar_lea.sflag [#allocation7], %s11699_s14 }
 0xb44   : > { %p15778_p2 = pnand %p15781_p1, %p16072_p6 }
 0xb46   : > { %15931 = dma.done.wait (!%p15778_p2), %s11700_s29, 16  }
 0xb47   : > { %15933 = vsyncadd (!%p15778_p2), %s11700_s29, 4294967280  ;;  %s22367_s15 = sld [smem:[#allocation9_spill]]  ;;  %p21_p3 = scmp.ge.s32.totalorder %s16055_s23, 4  }
 0xb48   : > { %s22368_s17 = smov %s15940_s18  ;;  %s22369_s18 = smov %s15944_s19 }
 0xb49   : > { %s22371_s20 = smov %s16055_s23  ;;  %23 = sbr.rel (!%p21_p3) target bundleno = 3 (0x3), region = 127 }
 0xb4d   : > { %s22370_s19 = smov %s22367_s15 }
 0xb50   :  { %11704 = vsyncpa [#allocation7], 1 }
 0xb51   :  { %11706 = vsyncpa [#allocation7 + $0x1], 1 }

</bundles_post_ra>
